<compile_context>
chip_gen: v6e
topology: v6e:2x2x1
jax: 0.10.0
libtpu: 0.0.40
codegen_flags: <defaults>
</compile_context>

<pallas_src>
import functools

import jax
import jax.numpy as jnp
from jax.experimental import pallas as pl
from jax.experimental.pallas import tpu as pltpu


def _round_up(x, m):
    return (x + m - 1) // m * m


def _tile_bytes(shape, dtype):
    """VMEM footprint of a block including (sublane, 128-lane) tile padding."""
    item = jnp.dtype(dtype).itemsize
    sub = 8 * (4 // item)                       # 8 rows f32, 16 rows bf16
    lead = 1
    for d in shape[:-2]:
        lead *= int(d)
    rows = _round_up(int(shape[-2]), sub) if len(shape) >= 2 else 1
    lanes = _round_up(int(shape[-1]), 128)
    return lead * rows * lanes * item


def conv_block_kernel(x_ref, w_ref, b_ref, o_ref, act_a, act_b, *,
                      n_stages, D, H, W, C, P, TD):
    """Fused n_stages x [Conv3d(3, pad=1) + ReLU] on one batch element.

    x_ref : (1, D*H, W*C)       f32 input, channels zero-padded to C
    w_ref : (S, 9*W*C, W*C)     bf16 banded tap weights, tap order kd-major
    b_ref : (S, 1, W*C)         f32 biases tiled over w
    o_ref : (1, D*H, W*C)       f32 output of the last stage (lane-dense)
    act_a, act_b : (2P+D*H, W*C) bf16 ping-pong activation slabs; the P rows
                   on each side stay zero so depth-boundary taps read zeros.
    """
    DH = D * H
    WC = W * C

    # Zero only the depth-halo pad rows; data rows are fully overwritten by
    # the input copy / every stage's writeback (saves a full-slab store).
    pad_zeros = jnp.zeros((P, WC), jnp.bfloat16)
    act_a[0:P, :] = pad_zeros
    act_a[P + DH:2 * P + DH, :] = pad_zeros
    act_b[0:P, :] = pad_zeros
    act_b[P + DH:2 * P + DH, :] = pad_zeros

    # Stage-0 activation, cast once to bf16 (MXU operand precision).
    act_a[P:P + DH, :] = x_ref[0].astype(jnp.bfloat16)

    slabs = (act_a, act_b)
    for s in range(n_stages):
        src = slabs[s % 2]
        dst = slabs[(s + 1) % 2]
        d0 = 0
        while d0 < D:                      # static chunk loop over depth slices
            td = min(TD, D - d0)
            T = td * H
            row0 = P + d0 * H

            # In-kernel H-boundary masks from iota (chunks start on depth-slice
            # boundaries, so h == local_row % H).  Only kh=0 / kh=2 need them.
            h_loc = jax.lax.broadcasted_iota(jnp.int32, (T, 1), 0) % H
            valid_lo = h_loc >= 1          # kh == 0 taps read row h-1
            valid_hi = h_loc <= H - 2      # kh == 2 taps read row h+1

            # im2col: 9 sublane-shifted (T, WC) bf16 patches packed along lanes
            # -> one (T, 9*WC) x (9*WC, WC) MXU contraction (K = 9*WC).
            patches = []
            for kd in range(3):
                for kh in range(3):
                    off = (kd - 1) * H + (kh - 1)
                    p = src[row0 + off:row0 + off + T, :]
                    if kh == 0:
                        p = jnp.where(valid_lo, p, 0.0)   # select, no bf16 math
                    elif kh == 2:
                        p = jnp.where(valid_hi, p, 0.0)
                    patches.append(p)
            im2col = jnp.concatenate(patches, axis=-1)            # (T, 9*WC)

            acc = jnp.dot(im2col, w_ref[s],
                          preferred_element_type=jnp.float32)     # (T, WC) f32
            out = jnp.maximum(acc + b_ref[s], 0.0)                # bias + ReLU

            if s + 1 < n_stages:
                dst[row0:row0 + T, :] = out.astype(jnp.bfloat16)  # stays in VMEM
            else:
                o_ref[0, d0 * H:d0 * H + T, :] = out.astype(o_ref.dtype)
            d0 += td


def _pack_stage_weight(w, C, W):
    """(Cout, Cin, 3,3,3) -> (9*W*C, W*C) banded tap matrix, kd-major taps.

    Block (wi, wo) of tap (kd, kh) holds weight[:, :, kd, kh, kw].T for
    kw = wi - wo + 1 when 0 <= kw <= 2, else zero -> kw taps and the W
    boundary are handled by the matmul itself (no masks, no lane rolls).
    """
    co, ci = w.shape[0], w.shape[1]
    wt = jnp.transpose(w, (2, 3, 4, 1, 0))                 # (3,3,3,ci,co)
    wt = jnp.pad(wt, ((0, 0), (0, 0), (0, 0), (0, C - ci), (0, C - co)))
    taps = []
    for kd in range(3):
        for kh in range(3):
            g = jnp.zeros((W * C, W * C), jnp.float32)
            for kw in range(3):
                band = jnp.eye(W, k=1 - kw, dtype=jnp.float32)  # wi = wo + kw-1
                g = g + jnp.kron(band, wt[kd, kh, kw])
            taps.append(g)
    return jnp.concatenate(taps, axis=0)                   # (9*W*C, W*C)


def conv_block_forward(x_ncdhw, params):
    """ConvBlock.forward (normalization='none'): fused conv+ReLU stages."""
    N, Cin, D, H, W = x_ncdhw.shape
    Cout = params[0][0].shape[0]
    n_stages = len(params)
    C = max(Cin, Cout)                 # common padded channel width
    WC = W * C
    DH = D * H
    P = _round_up(H + 1, 16)           # bf16-sublane-aligned depth halo
    TD = max(1, 128 // H)              # depth slices per chunk (~128 rows)

    # NCDHW -> (N, D*H, W*C), channels zero-padded once (stay zero: ReLU(0)=0).
    x = jnp.transpose(x_ncdhw, (0, 2, 3, 4, 1))
    if Cin < C:
        x = jnp.pad(x, ((0, 0),) * 4 + ((0, C - Cin),))
    x = x.reshape(N, DH, WC).astype(jnp.float32)

    w_all = jnp.stack([_pack_stage_weight(w, C, W) for (w, _) in params]
                      ).astype(jnp.bfloat16)                     # (S, 9*WC, WC)
    b_all = jnp.stack([jnp.tile(jnp.pad(b, (0, C - b.shape[0])), W)
                       for (_, b) in params]
                      ).astype(jnp.float32).reshape(n_stages, 1, WC)

    kernel = functools.partial(conv_block_kernel, n_stages=n_stages,
                               D=D, H=H, W=W, C=C, P=P, TD=TD)

    # VMEM budget from tile-padded block sizes (double-buffered pipelined
    # blocks + persistent scratch + im2col temporary), capped for v7x.
    est = (2 * _tile_bytes((1, DH, WC), jnp.float32)             # x blocks
           + 2 * _tile_bytes((1, DH, WC), jnp.float32)           # out blocks
           + 2 * _tile_bytes((n_stages, 9 * WC, WC), jnp.bfloat16)
           + 2 * _tile_bytes((n_stages, 1, WC), jnp.float32)
           + 2 * _tile_bytes((2 * P + DH, WC), jnp.bfloat16)     # ping-pong
           + _tile_bytes((TD * H, 9 * WC), jnp.bfloat16))        # im2col temp
    vmem_bytes = int(min(max(est + (8 << 20), 16 << 20), 48 << 20))

    out = pl.pallas_call(
        kernel,
        out_shape=jax.ShapeDtypeStruct((N, DH, WC), jnp.float32),
        grid=(N,),
        in_specs=[
            pl.BlockSpec((1, DH, WC), lambda n: (n, 0, 0)),
            pl.BlockSpec((n_stages, 9 * WC, WC), lambda n: (0, 0, 0)),
            pl.BlockSpec((n_stages, 1, WC), lambda n: (0, 0, 0)),
        ],
        out_specs=pl.BlockSpec((1, DH, WC), lambda n: (n, 0, 0)),
        scratch_shapes=[pltpu.VMEM((2 * P + DH, WC), jnp.bfloat16),
                        pltpu.VMEM((2 * P + DH, WC), jnp.bfloat16)],
        compiler_params=pltpu.CompilerParams(
            dimension_semantics=("parallel",),
            vmem_limit_bytes=vmem_bytes),
    )(x, w_all, b_all)

    out = out.reshape(N, D, H, W, C)[..., :Cout]
    return jnp.transpose(out, (0, 4, 1, 2, 3))          # NDHWC -> NCDHW


def init_conv_block_params(key, n_stages, n_filters_in, n_filters_out):
    params = []
    for i in range(n_stages):
        cin = n_filters_in if i == 0 else n_filters_out
        key, kw, kb = jax.random.split(key, 3)
        w = 0.1 * jax.random.normal(kw, (n_filters_out, cin, 3, 3, 3), jnp.float32)
        b = 0.1 * jax.random.normal(kb, (n_filters_out,), jnp.float32)
        params.append((w, b))
    return params


def reference_forward(x_ncdhw, params):
    y = x_ncdhw
    for (w, b) in params:
        y = jax.lax.conv_general_dilated(
            y, w, window_strides=(1, 1, 1),
            padding=((1, 1), (1, 1), (1, 1)),
            dimension_numbers=("NCDHW", "OIDHW", "NCDHW"),
            precision=jax.lax.Precision.HIGHEST)
        y = y + b[None, :, None, None, None]
        y = jnp.maximum(y, 0.0)
    return y


if __name__ == "__main__":
    # ConvBlock(n_stages=2, n_filters_in=4, n_filters_out=8, normalization='none')
    key = jax.random.PRNGKey(0)
    key, kx = jax.random.split(key)
    N, Cin, D, H, W = 2, 4, 16, 16, 16
    Cout = 8
    n_stages = 2

    x = jax.random.normal(kx, (N, Cin, D, H, W), jnp.float32)
    params = init_conv_block_params(key, n_stages, Cin, Cout)

    out = jax.block_until_ready(jax.jit(conv_block_forward)(x, params))
    ref = jax.block_until_ready(reference_forward(x, params))

    assert out.shape == (N, Cout, D, H, W), out.shape
    # Tolerance sized for bf16 MXU operands (f32 accumulation) across 2 fused
    # stages vs. the f32 Precision.HIGHEST reference.
    max_err = float(jnp.max(jnp.abs(out - ref)))
    assert max_err < 5e-2, f"mismatch vs reference, max abs err = {max_err}"

    print("KERNEL_OK")
</pallas_src>

<mosaic_0001>
module attributes {stable_mosaic.version = 11 : i64} {
  func.func @conv_block_kernel(%arg0: i32, %arg1: memref<1x256x128xf32, #tpu.memory_space<vmem>>, %arg2: memref<2x1152x128xbf16, #tpu.memory_space<vmem>>, %arg3: memref<2x1x128xf32, #tpu.memory_space<vmem>>, %arg4: memref<1x256x128xf32, #tpu.memory_space<vmem>>, %arg5: memref<320x128xbf16, #tpu.memory_space<vmem>>, %arg6: memref<320x128xbf16, #tpu.memory_space<vmem>>) attributes {dimension_semantics = [#tpu.dimension_semantics<parallel>], iteration_bounds = array<i64: 2>, scalar_prefetch = 0 : i64, scratch_operands = 2 : i64, tpu.core_type = #tpu.core_type<tc>, window_params = [{transform_indices = @transform_0, window_bounds = array<i64: 1, 256, 128>}, {pipeline_mode = #tpu.pipeline_mode<synchronous>, transform_indices = @transform_1, window_bounds = array<i64: 2, 1152, 128>}, {pipeline_mode = #tpu.pipeline_mode<synchronous>, transform_indices = @transform_2, window_bounds = array<i64: 2, 1, 128>}, {transform_indices = @transform_3, window_bounds = array<i64: 1, 256, 128>}]} {
    %cst = arith.constant 0.000000e+00 : bf16
    %0 = vector.broadcast %cst : bf16 to vector<32x128xbf16>
    %c0 = arith.constant 0 : index
    %c0_0 = arith.constant 0 : index
    %1 = vector.load %arg5[%c0, %c0_0] : memref<320x128xbf16, #tpu.memory_space<vmem>>, vector<32x128xbf16>
    tpu.vector_store %arg5[%c0, %c0_0], %0 {strides = array<i32>} : memref<320x128xbf16, #tpu.memory_space<vmem>>, vector<32x128xbf16>,
    %c288 = arith.constant 288 : index
    %c0_1 = arith.constant 0 : index
    %2 = vector.load %arg5[%c288, %c0_1] : memref<320x128xbf16, #tpu.memory_space<vmem>>, vector<32x128xbf16>
    tpu.vector_store %arg5[%c288, %c0_1], %0 {strides = array<i32>} : memref<320x128xbf16, #tpu.memory_space<vmem>>, vector<32x128xbf16>,
    %c0_2 = arith.constant 0 : index
    %c0_3 = arith.constant 0 : index
    %3 = vector.load %arg6[%c0_2, %c0_3] : memref<320x128xbf16, #tpu.memory_space<vmem>>, vector<32x128xbf16>
    tpu.vector_store %arg6[%c0_2, %c0_3], %0 {strides = array<i32>} : memref<320x128xbf16, #tpu.memory_space<vmem>>, vector<32x128xbf16>,
    %c288_4 = arith.constant 288 : index
    %c0_5 = arith.constant 0 : index
    %4 = vector.load %arg6[%c288_4, %c0_5] : memref<320x128xbf16, #tpu.memory_space<vmem>>, vector<32x128xbf16>
    tpu.vector_store %arg6[%c288_4, %c0_5], %0 {strides = array<i32>} : memref<320x128xbf16, #tpu.memory_space<vmem>>, vector<32x128xbf16>,
    %c0_6 = arith.constant 0 : index
    %c0_7 = arith.constant 0 : index
    %c0_8 = arith.constant 0 : index
    %5 = vector.load %arg1[%c0_6, %c0_7, %c0_8] : memref<1x256x128xf32, #tpu.memory_space<vmem>>, vector<1x256x128xf32>
    %6 = vector.shape_cast %5 : vector<1x256x128xf32> to vector<256x128xf32>
    %7 = arith.truncf %6 : vector<256x128xf32> to vector<256x128xbf16>
    %c32 = arith.constant 32 : index
    %c0_9 = arith.constant 0 : index
    %8 = vector.load %arg5[%c32, %c0_9] : memref<320x128xbf16, #tpu.memory_space<vmem>>, vector<256x128xbf16>
    tpu.vector_store %arg5[%c32, %c0_9], %7 {strides = array<i32>} : memref<320x128xbf16, #tpu.memory_space<vmem>>, vector<256x128xbf16>,
    %9 = tpu.iota {dimensions = array<i32: 0>} : vector<128x1xi32>
    %c16_i32 = arith.constant 16 : i32
    %c0_i32 = arith.constant 0 : i32
    %10 = arith.cmpi eq, %c16_i32, %c0_i32 : i32
    %c1_i32 = arith.constant 1 : i32
    %11 = arith.select %10, %c1_i32, %c16_i32 : i32
    %12 = vector.broadcast %11 : i32 to vector<128x1xi32>
    %13 = arith.remsi %9, %12 : vector<128x1xi32>
    %c0_i32_10 = arith.constant 0 : i32
    %14 = vector.broadcast %c0_i32_10 : i32 to vector<128x1xi32>
    %15 = arith.cmpi ne, %13, %14 : vector<128x1xi32>
    %c0_i32_11 = arith.constant 0 : i32
    %16 = vector.broadcast %c0_i32_11 : i32 to vector<128x1xi32>
    %17 = arith.cmpi slt, %13, %16 : vector<128x1xi32>
    %c0_i32_12 = arith.constant 0 : i32
    %18 = arith.cmpi slt, %11, %c0_i32_12 : i32
    %19 = vector.broadcast %18 : i1 to vector<128x1xi1>
    %20 = vector.broadcast %19 : vector<128x1xi1> to vector<128x1xi1>
    %21 = arith.xori %17, %20 : vector<128x1xi1>
    %22 = arith.andi %21, %15 : vector<128x1xi1>
    %23 = vector.broadcast %11 : i32 to vector<128x1xi32>
    %24 = arith.addi %13, %23 : vector<128x1xi32>
    %25 = arith.select %22, %24, %13 : vector<128x1xi1>, vector<128x1xi32>
    %c1_i32_13 = arith.constant 1 : i32
    %26 = vector.broadcast %c1_i32_13 : i32 to vector<128x1xi32>
    %27 = arith.cmpi sge, %25, %26 : vector<128x1xi32>
    %c14_i32 = arith.constant 14 : i32
    %28 = vector.broadcast %c14_i32 : i32 to vector<128x1xi32>
    %29 = arith.cmpi sle, %25, %28 : vector<128x1xi32>
    %c15 = arith.constant 15 : index
    %c0_14 = arith.constant 0 : index
    %30 = vector.load %arg5[%c15, %c0_14] : memref<320x128xbf16, #tpu.memory_space<vmem>>, vector<128x128xbf16>
    %cst_15 = arith.constant 0.000000e+00 : f32
    %31 = arith.truncf %cst_15 : f32 to bf16
    %32 = vector.shape_cast %27 : vector<128x1xi1> to vector<128x1xi1>
    %33 = vector.broadcast %32 : vector<128x1xi1> to vector<128x128xi1>
    %34 = vector.broadcast %31 : bf16 to vector<128x128xbf16>
    %35 = arith.select %33, %30, %34 : vector<128x128xi1>, vector<128x128xbf16>
    %c16 = arith.constant 16 : index
    %c0_16 = arith.constant 0 : index
    %36 = vector.load %arg5[%c16, %c0_16] : memref<320x128xbf16, #tpu.memory_space<vmem>>, vector<128x128xbf16>
    %c17 = arith.constant 17 : index
    %c0_17 = arith.constant 0 : index
    %37 = vector.load %arg5[%c17, %c0_17] : memref<320x128xbf16, #tpu.memory_space<vmem>>, vector<128x128xbf16>
    %cst_18 = arith.constant 0.000000e+00 : f32
    %38 = arith.truncf %cst_18 : f32 to bf16
    %39 = vector.shape_cast %29 : vector<128x1xi1> to vector<128x1xi1>
    %40 = vector.broadcast %39 : vector<128x1xi1> to vector<128x128xi1>
    %41 = vector.broadcast %38 : bf16 to vector<128x128xbf16>
    %42 = arith.select %40, %37, %41 : vector<128x128xi1>, vector<128x128xbf16>
    %c31 = arith.constant 31 : index
    %c0_19 = arith.constant 0 : index
    %43 = vector.load %arg5[%c31, %c0_19] : memref<320x128xbf16, #tpu.memory_space<vmem>>, vector<128x128xbf16>
    %cst_20 = arith.constant 0.000000e+00 : f32
    %44 = arith.truncf %cst_20 : f32 to bf16
    %45 = vector.shape_cast %27 : vector<128x1xi1> to vector<128x1xi1>
    %46 = vector.broadcast %45 : vector<128x1xi1> to vector<128x128xi1>
    %47 = vector.broadcast %44 : bf16 to vector<128x128xbf16>
    %48 = arith.select %46, %43, %47 : vector<128x128xi1>, vector<128x128xbf16>
    %c32_21 = arith.constant 32 : index
    %c0_22 = arith.constant 0 : index
    %49 = vector.load %arg5[%c32_21, %c0_22] : memref<320x128xbf16, #tpu.memory_space<vmem>>, vector<128x128xbf16>
    %c33 = arith.constant 33 : index
    %c0_23 = arith.constant 0 : index
    %50 = vector.load %arg5[%c33, %c0_23] : memref<320x128xbf16, #tpu.memory_space<vmem>>, vector<128x128xbf16>
    %cst_24 = arith.constant 0.000000e+00 : f32
    %51 = arith.truncf %cst_24 : f32 to bf16
    %52 = vector.shape_cast %29 : vector<128x1xi1> to vector<128x1xi1>
    %53 = vector.broadcast %52 : vector<128x1xi1> to vector<128x128xi1>
    %54 = vector.broadcast %51 : bf16 to vector<128x128xbf16>
    %55 = arith.select %53, %50, %54 : vector<128x128xi1>, vector<128x128xbf16>
    %c47 = arith.constant 47 : index
    %c0_25 = arith.constant 0 : index
    %56 = vector.load %arg5[%c47, %c0_25] : memref<320x128xbf16, #tpu.memory_space<vmem>>, vector<128x128xbf16>
    %cst_26 = arith.constant 0.000000e+00 : f32
    %57 = arith.truncf %cst_26 : f32 to bf16
    %58 = vector.shape_cast %27 : vector<128x1xi1> to vector<128x1xi1>
    %59 = vector.broadcast %58 : vector<128x1xi1> to vector<128x128xi1>
    %60 = vector.broadcast %57 : bf16 to vector<128x128xbf16>
    %61 = arith.select %59, %56, %60 : vector<128x128xi1>, vector<128x128xbf16>
    %c48 = arith.constant 48 : index
    %c0_27 = arith.constant 0 : index
    %62 = vector.load %arg5[%c48, %c0_27] : memref<320x128xbf16, #tpu.memory_space<vmem>>, vector<128x128xbf16>
    %c49 = arith.constant 49 : index
    %c0_28 = arith.constant 0 : index
    %63 = vector.load %arg5[%c49, %c0_28] : memref<320x128xbf16, #tpu.memory_space<vmem>>, vector<128x128xbf16>
    %cst_29 = arith.constant 0.000000e+00 : f32
    %64 = arith.truncf %cst_29 : f32 to bf16
    %65 = vector.shape_cast %29 : vector<128x1xi1> to vector<128x1xi1>
    %66 = vector.broadcast %65 : vector<128x1xi1> to vector<128x128xi1>
    %67 = vector.broadcast %64 : bf16 to vector<128x128xbf16>
    %68 = arith.select %66, %63, %67 : vector<128x128xi1>, vector<128x128xbf16>
    %69 = tpu.concatenate %35, %36, %42, %48, %49, %55, %61, %62, %68 in 1 : vector<128x128xbf16>, vector<128x128xbf16>, vector<128x128xbf16>, vector<128x128xbf16>, vector<128x128xbf16>, vector<128x128xbf16>, vector<128x128xbf16>, vector<128x128xbf16>, vector<128x128xbf16> -> vector<128x1152xbf16>
    %c0_30 = arith.constant 0 : index
    %c0_31 = arith.constant 0 : index
    %c0_32 = arith.constant 0 : index
    %70 = vector.load %arg2[%c0_30, %c0_31, %c0_32] : memref<2x1152x128xbf16, #tpu.memory_space<vmem>>, vector<1x1152x128xbf16>
    %71 = vector.shape_cast %70 : vector<1x1152x128xbf16> to vector<1152x128xbf16>
    %cst_33 = arith.constant dense<0.000000e+00> : vector<128x128xf32>
    %72 = tpu.matmul %69, %71, %cst_33 {dimension_numbers = #tpu.dot_dimension_numbers<[1], [0], [0], [1], [0, 0, 1, 1], [], []>} : vector<128x1152xbf16>, vector<1152x128xbf16>, vector<128x128xf32> -> vector<128x128xf32>
    %c0_34 = arith.constant 0 : index
    %c0_35 = arith.constant 0 : index
    %c0_36 = arith.constant 0 : index
    %73 = vector.load %arg3[%c0_34, %c0_35, %c0_36] : memref<2x1x128xf32, #tpu.memory_space<vmem>>, vector<1x1x128xf32>
    %74 = vector.shape_cast %73 : vector<1x1x128xf32> to vector<1x128xf32>
    %75 = vector.broadcast %74 : vector<1x128xf32> to vector<128x128xf32>
    %76 = arith.addf %72, %75 : vector<128x128xf32>
    %cst_37 = arith.constant 0.000000e+00 : f32
    %77 = vector.broadcast %cst_37 : f32 to vector<128x128xf32>
    %78 = arith.maximumf %76, %77 : vector<128x128xf32>
    %79 = arith.truncf %78 : vector<128x128xf32> to vector<128x128xbf16>
    %c32_38 = arith.constant 32 : index
    %c0_39 = arith.constant 0 : index
    %80 = vector.load %arg6[%c32_38, %c0_39] : memref<320x128xbf16, #tpu.memory_space<vmem>>, vector<128x128xbf16>
    tpu.vector_store %arg6[%c32_38, %c0_39], %79 {strides = array<i32>} : memref<320x128xbf16, #tpu.memory_space<vmem>>, vector<128x128xbf16>,
    %81 = tpu.iota {dimensions = array<i32: 0>} : vector<128x1xi32>
    %c16_i32_40 = arith.constant 16 : i32
    %c0_i32_41 = arith.constant 0 : i32
    %82 = arith.cmpi eq, %c16_i32_40, %c0_i32_41 : i32
    %c1_i32_42 = arith.constant 1 : i32
    %83 = arith.select %82, %c1_i32_42, %c16_i32_40 : i32
    %84 = vector.broadcast %83 : i32 to vector<128x1xi32>
    %85 = arith.remsi %81, %84 : vector<128x1xi32>
    %c0_i32_43 = arith.constant 0 : i32
    %86 = vector.broadcast %c0_i32_43 : i32 to vector<128x1xi32>
    %87 = arith.cmpi ne, %85, %86 : vector<128x1xi32>
    %c0_i32_44 = arith.constant 0 : i32
    %88 = vector.broadcast %c0_i32_44 : i32 to vector<128x1xi32>
    %89 = arith.cmpi slt, %85, %88 : vector<128x1xi32>
    %c0_i32_45 = arith.constant 0 : i32
    %90 = arith.cmpi slt, %83, %c0_i32_45 : i32
    %91 = vector.broadcast %90 : i1 to vector<128x1xi1>
    %92 = vector.broadcast %91 : vector<128x1xi1> to vector<128x1xi1>
    %93 = arith.xori %89, %92 : vector<128x1xi1>
    %94 = arith.andi %93, %87 : vector<128x1xi1>
    %95 = vector.broadcast %83 : i32 to vector<128x1xi32>
    %96 = arith.addi %85, %95 : vector<128x1xi32>
    %97 = arith.select %94, %96, %85 : vector<128x1xi1>, vector<128x1xi32>
    %c1_i32_46 = arith.constant 1 : i32
    %98 = vector.broadcast %c1_i32_46 : i32 to vector<128x1xi32>
    %99 = arith.cmpi sge, %97, %98 : vector<128x1xi32>
    %c14_i32_47 = arith.constant 14 : i32
    %100 = vector.broadcast %c14_i32_47 : i32 to vector<128x1xi32>
    %101 = arith.cmpi sle, %97, %100 : vector<128x1xi32>
    %c143 = arith.constant 143 : index
    %c0_48 = arith.constant 0 : index
    %102 = vector.load %arg5[%c143, %c0_48] : memref<320x128xbf16, #tpu.memory_space<vmem>>, vector<128x128xbf16>
    %cst_49 = arith.constant 0.000000e+00 : f32
    %103 = arith.truncf %cst_49 : f32 to bf16
    %104 = vector.shape_cast %99 : vector<128x1xi1> to vector<128x1xi1>
    %105 = vector.broadcast %104 : vector<128x1xi1> to vector<128x128xi1>
    %106 = vector.broadcast %103 : bf16 to vector<128x128xbf16>
    %107 = arith.select %105, %102, %106 : vector<128x128xi1>, vector<128x128xbf16>
    %c144 = arith.constant 144 : index
    %c0_50 = arith.constant 0 : index
    %108 = vector.load %arg5[%c144, %c0_50] : memref<320x128xbf16, #tpu.memory_space<vmem>>, vector<128x128xbf16>
    %c145 = arith.constant 145 : index
    %c0_51 = arith.constant 0 : index
    %109 = vector.load %arg5[%c145, %c0_51] : memref<320x128xbf16, #tpu.memory_space<vmem>>, vector<128x128xbf16>
    %cst_52 = arith.constant 0.000000e+00 : f32
    %110 = arith.truncf %cst_52 : f32 to bf16
    %111 = vector.shape_cast %101 : vector<128x1xi1> to vector<128x1xi1>
    %112 = vector.broadcast %111 : vector<128x1xi1> to vector<128x128xi1>
    %113 = vector.broadcast %110 : bf16 to vector<128x128xbf16>
    %114 = arith.select %112, %109, %113 : vector<128x128xi1>, vector<128x128xbf16>
    %c159 = arith.constant 159 : index
    %c0_53 = arith.constant 0 : index
    %115 = vector.load %arg5[%c159, %c0_53] : memref<320x128xbf16, #tpu.memory_space<vmem>>, vector<128x128xbf16>
    %cst_54 = arith.constant 0.000000e+00 : f32
    %116 = arith.truncf %cst_54 : f32 to bf16
    %117 = vector.shape_cast %99 : vector<128x1xi1> to vector<128x1xi1>
    %118 = vector.broadcast %117 : vector<128x1xi1> to vector<128x128xi1>
    %119 = vector.broadcast %116 : bf16 to vector<128x128xbf16>
    %120 = arith.select %118, %115, %119 : vector<128x128xi1>, vector<128x128xbf16>
    %c160 = arith.constant 160 : index
    %c0_55 = arith.constant 0 : index
    %121 = vector.load %arg5[%c160, %c0_55] : memref<320x128xbf16, #tpu.memory_space<vmem>>, vector<128x128xbf16>
    %c161 = arith.constant 161 : index
    %c0_56 = arith.constant 0 : index
    %122 = vector.load %arg5[%c161, %c0_56] : memref<320x128xbf16, #tpu.memory_space<vmem>>, vector<128x128xbf16>
    %cst_57 = arith.constant 0.000000e+00 : f32
    %123 = arith.truncf %cst_57 : f32 to bf16
    %124 = vector.shape_cast %101 : vector<128x1xi1> to vector<128x1xi1>
    %125 = vector.broadcast %124 : vector<128x1xi1> to vector<128x128xi1>
    %126 = vector.broadcast %123 : bf16 to vector<128x128xbf16>
    %127 = arith.select %125, %122, %126 : vector<128x128xi1>, vector<128x128xbf16>
    %c175 = arith.constant 175 : index
    %c0_58 = arith.constant 0 : index
    %128 = vector.load %arg5[%c175, %c0_58] : memref<320x128xbf16, #tpu.memory_space<vmem>>, vector<128x128xbf16>
    %cst_59 = arith.constant 0.000000e+00 : f32
    %129 = arith.truncf %cst_59 : f32 to bf16
    %130 = vector.shape_cast %99 : vector<128x1xi1> to vector<128x1xi1>
    %131 = vector.broadcast %130 : vector<128x1xi1> to vector<128x128xi1>
    %132 = vector.broadcast %129 : bf16 to vector<128x128xbf16>
    %133 = arith.select %131, %128, %132 : vector<128x128xi1>, vector<128x128xbf16>
    %c176 = arith.constant 176 : index
    %c0_60 = arith.constant 0 : index
    %134 = vector.load %arg5[%c176, %c0_60] : memref<320x128xbf16, #tpu.memory_space<vmem>>, vector<128x128xbf16>
    %c177 = arith.constant 177 : index
    %c0_61 = arith.constant 0 : index
    %135 = vector.load %arg5[%c177, %c0_61] : memref<320x128xbf16, #tpu.memory_space<vmem>>, vector<128x128xbf16>
    %cst_62 = arith.constant 0.000000e+00 : f32
    %136 = arith.truncf %cst_62 : f32 to bf16
    %137 = vector.shape_cast %101 : vector<128x1xi1> to vector<128x1xi1>
    %138 = vector.broadcast %137 : vector<128x1xi1> to vector<128x128xi1>
    %139 = vector.broadcast %136 : bf16 to vector<128x128xbf16>
    %140 = arith.select %138, %135, %139 : vector<128x128xi1>, vector<128x128xbf16>
    %141 = tpu.concatenate %107, %108, %114, %120, %121, %127, %133, %134, %140 in 1 : vector<128x128xbf16>, vector<128x128xbf16>, vector<128x128xbf16>, vector<128x128xbf16>, vector<128x128xbf16>, vector<128x128xbf16>, vector<128x128xbf16>, vector<128x128xbf16>, vector<128x128xbf16> -> vector<128x1152xbf16>
    %c0_63 = arith.constant 0 : index
    %c0_64 = arith.constant 0 : index
    %c0_65 = arith.constant 0 : index
    %142 = vector.load %arg2[%c0_63, %c0_64, %c0_65] : memref<2x1152x128xbf16, #tpu.memory_space<vmem>>, vector<1x1152x128xbf16>
    %143 = vector.shape_cast %142 : vector<1x1152x128xbf16> to vector<1152x128xbf16>
    %cst_66 = arith.constant dense<0.000000e+00> : vector<128x128xf32>
    %144 = tpu.matmul %141, %143, %cst_66 {dimension_numbers = #tpu.dot_dimension_numbers<[1], [0], [0], [1], [0, 0, 1, 1], [], []>} : vector<128x1152xbf16>, vector<1152x128xbf16>, vector<128x128xf32> -> vector<128x128xf32>
    %c0_67 = arith.constant 0 : index
    %c0_68 = arith.constant 0 : index
    %c0_69 = arith.constant 0 : index
    %145 = vector.load %arg3[%c0_67, %c0_68, %c0_69] : memref<2x1x128xf32, #tpu.memory_space<vmem>>, vector<1x1x128xf32>
    %146 = vector.shape_cast %145 : vector<1x1x128xf32> to vector<1x128xf32>
    %147 = vector.broadcast %146 : vector<1x128xf32> to vector<128x128xf32>
    %148 = arith.addf %144, %147 : vector<128x128xf32>
    %cst_70 = arith.constant 0.000000e+00 : f32
    %149 = vector.broadcast %cst_70 : f32 to vector<128x128xf32>
    %150 = arith.maximumf %148, %149 : vector<128x128xf32>
    %151 = arith.truncf %150 : vector<128x128xf32> to vector<128x128xbf16>
    %c160_71 = arith.constant 160 : index
    %c0_72 = arith.constant 0 : index
    %152 = vector.load %arg6[%c160_71, %c0_72] : memref<320x128xbf16, #tpu.memory_space<vmem>>, vector<128x128xbf16>
    tpu.vector_store %arg6[%c160_71, %c0_72], %151 {strides = array<i32>} : memref<320x128xbf16, #tpu.memory_space<vmem>>, vector<128x128xbf16>,
    %153 = tpu.iota {dimensions = array<i32: 0>} : vector<128x1xi32>
    %c16_i32_73 = arith.constant 16 : i32
    %c0_i32_74 = arith.constant 0 : i32
    %154 = arith.cmpi eq, %c16_i32_73, %c0_i32_74 : i32
    %c1_i32_75 = arith.constant 1 : i32
    %155 = arith.select %154, %c1_i32_75, %c16_i32_73 : i32
    %156 = vector.broadcast %155 : i32 to vector<128x1xi32>
    %157 = arith.remsi %153, %156 : vector<128x1xi32>
    %c0_i32_76 = arith.constant 0 : i32
    %158 = vector.broadcast %c0_i32_76 : i32 to vector<128x1xi32>
    %159 = arith.cmpi ne, %157, %158 : vector<128x1xi32>
    %c0_i32_77 = arith.constant 0 : i32
    %160 = vector.broadcast %c0_i32_77 : i32 to vector<128x1xi32>
    %161 = arith.cmpi slt, %157, %160 : vector<128x1xi32>
    %c0_i32_78 = arith.constant 0 : i32
    %162 = arith.cmpi slt, %155, %c0_i32_78 : i32
    %163 = vector.broadcast %162 : i1 to vector<128x1xi1>
    %164 = vector.broadcast %163 : vector<128x1xi1> to vector<128x1xi1>
    %165 = arith.xori %161, %164 : vector<128x1xi1>
    %166 = arith.andi %165, %159 : vector<128x1xi1>
    %167 = vector.broadcast %155 : i32 to vector<128x1xi32>
    %168 = arith.addi %157, %167 : vector<128x1xi32>
    %169 = arith.select %166, %168, %157 : vector<128x1xi1>, vector<128x1xi32>
    %c1_i32_79 = arith.constant 1 : i32
    %170 = vector.broadcast %c1_i32_79 : i32 to vector<128x1xi32>
    %171 = arith.cmpi sge, %169, %170 : vector<128x1xi32>
    %c14_i32_80 = arith.constant 14 : i32
    %172 = vector.broadcast %c14_i32_80 : i32 to vector<128x1xi32>
    %173 = arith.cmpi sle, %169, %172 : vector<128x1xi32>
    %c15_81 = arith.constant 15 : index
    %c0_82 = arith.constant 0 : index
    %174 = vector.load %arg6[%c15_81, %c0_82] : memref<320x128xbf16, #tpu.memory_space<vmem>>, vector<128x128xbf16>
    %cst_83 = arith.constant 0.000000e+00 : f32
    %175 = arith.truncf %cst_83 : f32 to bf16
    %176 = vector.shape_cast %171 : vector<128x1xi1> to vector<128x1xi1>
    %177 = vector.broadcast %176 : vector<128x1xi1> to vector<128x128xi1>
    %178 = vector.broadcast %175 : bf16 to vector<128x128xbf16>
    %179 = arith.select %177, %174, %178 : vector<128x128xi1>, vector<128x128xbf16>
    %c16_84 = arith.constant 16 : index
    %c0_85 = arith.constant 0 : index
    %180 = vector.load %arg6[%c16_84, %c0_85] : memref<320x128xbf16, #tpu.memory_space<vmem>>, vector<128x128xbf16>
    %c17_86 = arith.constant 17 : index
    %c0_87 = arith.constant 0 : index
    %181 = vector.load %arg6[%c17_86, %c0_87] : memref<320x128xbf16, #tpu.memory_space<vmem>>, vector<128x128xbf16>
    %cst_88 = arith.constant 0.000000e+00 : f32
    %182 = arith.truncf %cst_88 : f32 to bf16
    %183 = vector.shape_cast %173 : vector<128x1xi1> to vector<128x1xi1>
    %184 = vector.broadcast %183 : vector<128x1xi1> to vector<128x128xi1>
    %185 = vector.broadcast %182 : bf16 to vector<128x128xbf16>
    %186 = arith.select %184, %181, %185 : vector<128x128xi1>, vector<128x128xbf16>
    %c31_89 = arith.constant 31 : index
    %c0_90 = arith.constant 0 : index
    %187 = vector.load %arg6[%c31_89, %c0_90] : memref<320x128xbf16, #tpu.memory_space<vmem>>, vector<128x128xbf16>
    %cst_91 = arith.constant 0.000000e+00 : f32
    %188 = arith.truncf %cst_91 : f32 to bf16
    %189 = vector.shape_cast %171 : vector<128x1xi1> to vector<128x1xi1>
    %190 = vector.broadcast %189 : vector<128x1xi1> to vector<128x128xi1>
    %191 = vector.broadcast %188 : bf16 to vector<128x128xbf16>
    %192 = arith.select %190, %187, %191 : vector<128x128xi1>, vector<128x128xbf16>
    %c32_92 = arith.constant 32 : index
    %c0_93 = arith.constant 0 : index
    %193 = vector.load %arg6[%c32_92, %c0_93] : memref<320x128xbf16, #tpu.memory_space<vmem>>, vector<128x128xbf16>
    %c33_94 = arith.constant 33 : index
    %c0_95 = arith.constant 0 : index
    %194 = vector.load %arg6[%c33_94, %c0_95] : memref<320x128xbf16, #tpu.memory_space<vmem>>, vector<128x128xbf16>
    %cst_96 = arith.constant 0.000000e+00 : f32
    %195 = arith.truncf %cst_96 : f32 to bf16
    %196 = vector.shape_cast %173 : vector<128x1xi1> to vector<128x1xi1>
    %197 = vector.broadcast %196 : vector<128x1xi1> to vector<128x128xi1>
    %198 = vector.broadcast %195 : bf16 to vector<128x128xbf16>
    %199 = arith.select %197, %194, %198 : vector<128x128xi1>, vector<128x128xbf16>
    %c47_97 = arith.constant 47 : index
    %c0_98 = arith.constant 0 : index
    %200 = vector.load %arg6[%c47_97, %c0_98] : memref<320x128xbf16, #tpu.memory_space<vmem>>, vector<128x128xbf16>
    %cst_99 = arith.constant 0.000000e+00 : f32
    %201 = arith.truncf %cst_99 : f32 to bf16
    %202 = vector.shape_cast %171 : vector<128x1xi1> to vector<128x1xi1>
    %203 = vector.broadcast %202 : vector<128x1xi1> to vector<128x128xi1>
    %204 = vector.broadcast %201 : bf16 to vector<128x128xbf16>
    %205 = arith.select %203, %200, %204 : vector<128x128xi1>, vector<128x128xbf16>
    %c48_100 = arith.constant 48 : index
    %c0_101 = arith.constant 0 : index
    %206 = vector.load %arg6[%c48_100, %c0_101] : memref<320x128xbf16, #tpu.memory_space<vmem>>, vector<128x128xbf16>
    %c49_102 = arith.constant 49 : index
    %c0_103 = arith.constant 0 : index
    %207 = vector.load %arg6[%c49_102, %c0_103] : memref<320x128xbf16, #tpu.memory_space<vmem>>, vector<128x128xbf16>
    %cst_104 = arith.constant 0.000000e+00 : f32
    %208 = arith.truncf %cst_104 : f32 to bf16
    %209 = vector.shape_cast %173 : vector<128x1xi1> to vector<128x1xi1>
    %210 = vector.broadcast %209 : vector<128x1xi1> to vector<128x128xi1>
    %211 = vector.broadcast %208 : bf16 to vector<128x128xbf16>
    %212 = arith.select %210, %207, %211 : vector<128x128xi1>, vector<128x128xbf16>
    %213 = tpu.concatenate %179, %180, %186, %192, %193, %199, %205, %206, %212 in 1 : vector<128x128xbf16>, vector<128x128xbf16>, vector<128x128xbf16>, vector<128x128xbf16>, vector<128x128xbf16>, vector<128x128xbf16>, vector<128x128xbf16>, vector<128x128xbf16>, vector<128x128xbf16> -> vector<128x1152xbf16>
    %c1 = arith.constant 1 : index
    %c0_105 = arith.constant 0 : index
    %c0_106 = arith.constant 0 : index
    %214 = vector.load %arg2[%c1, %c0_105, %c0_106] : memref<2x1152x128xbf16, #tpu.memory_space<vmem>>, vector<1x1152x128xbf16>
    %215 = vector.shape_cast %214 : vector<1x1152x128xbf16> to vector<1152x128xbf16>
    %cst_107 = arith.constant dense<0.000000e+00> : vector<128x128xf32>
    %216 = tpu.matmul %213, %215, %cst_107 {dimension_numbers = #tpu.dot_dimension_numbers<[1], [0], [0], [1], [0, 0, 1, 1], [], []>} : vector<128x1152xbf16>, vector<1152x128xbf16>, vector<128x128xf32> -> vector<128x128xf32>
    %c1_108 = arith.constant 1 : index
    %c0_109 = arith.constant 0 : index
    %c0_110 = arith.constant 0 : index
    %217 = vector.load %arg3[%c1_108, %c0_109, %c0_110] : memref<2x1x128xf32, #tpu.memory_space<vmem>>, vector<1x1x128xf32>
    %218 = vector.shape_cast %217 : vector<1x1x128xf32> to vector<1x128xf32>
    %219 = vector.broadcast %218 : vector<1x128xf32> to vector<128x128xf32>
    %220 = arith.addf %216, %219 : vector<128x128xf32>
    %cst_111 = arith.constant 0.000000e+00 : f32
    %221 = vector.broadcast %cst_111 : f32 to vector<128x128xf32>
    %222 = arith.maximumf %220, %221 : vector<128x128xf32>
    %c0_112 = arith.constant 0 : index
    %c0_113 = arith.constant 0 : index
    %c0_114 = arith.constant 0 : index
    %223 = vector.load %arg4[%c0_112, %c0_113, %c0_114] : memref<1x256x128xf32, #tpu.memory_space<vmem>>, vector<1x128x128xf32>
    %224 = vector.shape_cast %223 : vector<1x128x128xf32> to vector<128x128xf32>
    %225 = vector.shape_cast %222 : vector<128x128xf32> to vector<1x128x128xf32>
    tpu.vector_store %arg4[%c0_112, %c0_113, %c0_114], %225 {strides = array<i32>} : memref<1x256x128xf32, #tpu.memory_space<vmem>>, vector<1x128x128xf32>,
    %226 = tpu.iota {dimensions = array<i32: 0>} : vector<128x1xi32>
    %c16_i32_115 = arith.constant 16 : i32
    %c0_i32_116 = arith.constant 0 : i32
    %227 = arith.cmpi eq, %c16_i32_115, %c0_i32_116 : i32
    %c1_i32_117 = arith.constant 1 : i32
    %228 = arith.select %227, %c1_i32_117, %c16_i32_115 : i32
    %229 = vector.broadcast %228 : i32 to vector<128x1xi32>
    %230 = arith.remsi %226, %229 : vector<128x1xi32>
    %c0_i32_118 = arith.constant 0 : i32
    %231 = vector.broadcast %c0_i32_118 : i32 to vector<128x1xi32>
    %232 = arith.cmpi ne, %230, %231 : vector<128x1xi32>
    %c0_i32_119 = arith.constant 0 : i32
    %233 = vector.broadcast %c0_i32_119 : i32 to vector<128x1xi32>
    %234 = arith.cmpi slt, %230, %233 : vector<128x1xi32>
    %c0_i32_120 = arith.constant 0 : i32
    %235 = arith.cmpi slt, %228, %c0_i32_120 : i32
    %236 = vector.broadcast %235 : i1 to vector<128x1xi1>
    %237 = vector.broadcast %236 : vector<128x1xi1> to vector<128x1xi1>
    %238 = arith.xori %234, %237 : vector<128x1xi1>
    %239 = arith.andi %238, %232 : vector<128x1xi1>
    %240 = vector.broadcast %228 : i32 to vector<128x1xi32>
    %241 = arith.addi %230, %240 : vector<128x1xi32>
    %242 = arith.select %239, %241, %230 : vector<128x1xi1>, vector<128x1xi32>
    %c1_i32_121 = arith.constant 1 : i32
    %243 = vector.broadcast %c1_i32_121 : i32 to vector<128x1xi32>
    %244 = arith.cmpi sge, %242, %243 : vector<128x1xi32>
    %c14_i32_122 = arith.constant 14 : i32
    %245 = vector.broadcast %c14_i32_122 : i32 to vector<128x1xi32>
    %246 = arith.cmpi sle, %242, %245 : vector<128x1xi32>
    %c143_123 = arith.constant 143 : index
    %c0_124 = arith.constant 0 : index
    %247 = vector.load %arg6[%c143_123, %c0_124] : memref<320x128xbf16, #tpu.memory_space<vmem>>, vector<128x128xbf16>
    %cst_125 = arith.constant 0.000000e+00 : f32
    %248 = arith.truncf %cst_125 : f32 to bf16
    %249 = vector.shape_cast %244 : vector<128x1xi1> to vector<128x1xi1>
    %250 = vector.broadcast %249 : vector<128x1xi1> to vector<128x128xi1>
    %251 = vector.broadcast %248 : bf16 to vector<128x128xbf16>
    %252 = arith.select %250, %247, %251 : vector<128x128xi1>, vector<128x128xbf16>
    %c144_126 = arith.constant 144 : index
    %c0_127 = arith.constant 0 : index
    %253 = vector.load %arg6[%c144_126, %c0_127] : memref<320x128xbf16, #tpu.memory_space<vmem>>, vector<128x128xbf16>
    %c145_128 = arith.constant 145 : index
    %c0_129 = arith.constant 0 : index
    %254 = vector.load %arg6[%c145_128, %c0_129] : memref<320x128xbf16, #tpu.memory_space<vmem>>, vector<128x128xbf16>
    %cst_130 = arith.constant 0.000000e+00 : f32
    %255 = arith.truncf %cst_130 : f32 to bf16
    %256 = vector.shape_cast %246 : vector<128x1xi1> to vector<128x1xi1>
    %257 = vector.broadcast %256 : vector<128x1xi1> to vector<128x128xi1>
    %258 = vector.broadcast %255 : bf16 to vector<128x128xbf16>
    %259 = arith.select %257, %254, %258 : vector<128x128xi1>, vector<128x128xbf16>
    %c159_131 = arith.constant 159 : index
    %c0_132 = arith.constant 0 : index
    %260 = vector.load %arg6[%c159_131, %c0_132] : memref<320x128xbf16, #tpu.memory_space<vmem>>, vector<128x128xbf16>
    %cst_133 = arith.constant 0.000000e+00 : f32
    %261 = arith.truncf %cst_133 : f32 to bf16
    %262 = vector.shape_cast %244 : vector<128x1xi1> to vector<128x1xi1>
    %263 = vector.broadcast %262 : vector<128x1xi1> to vector<128x128xi1>
    %264 = vector.broadcast %261 : bf16 to vector<128x128xbf16>
    %265 = arith.select %263, %260, %264 : vector<128x128xi1>, vector<128x128xbf16>
    %c160_134 = arith.constant 160 : index
    %c0_135 = arith.constant 0 : index
    %266 = vector.load %arg6[%c160_134, %c0_135] : memref<320x128xbf16, #tpu.memory_space<vmem>>, vector<128x128xbf16>
    %c161_136 = arith.constant 161 : index
    %c0_137 = arith.constant 0 : index
    %267 = vector.load %arg6[%c161_136, %c0_137] : memref<320x128xbf16, #tpu.memory_space<vmem>>, vector<128x128xbf16>
    %cst_138 = arith.constant 0.000000e+00 : f32
    %268 = arith.truncf %cst_138 : f32 to bf16
    %269 = vector.shape_cast %246 : vector<128x1xi1> to vector<128x1xi1>
    %270 = vector.broadcast %269 : vector<128x1xi1> to vector<128x128xi1>
    %271 = vector.broadcast %268 : bf16 to vector<128x128xbf16>
    %272 = arith.select %270, %267, %271 : vector<128x128xi1>, vector<128x128xbf16>
    %c175_139 = arith.constant 175 : index
    %c0_140 = arith.constant 0 : index
    %273 = vector.load %arg6[%c175_139, %c0_140] : memref<320x128xbf16, #tpu.memory_space<vmem>>, vector<128x128xbf16>
    %cst_141 = arith.constant 0.000000e+00 : f32
    %274 = arith.truncf %cst_141 : f32 to bf16
    %275 = vector.shape_cast %244 : vector<128x1xi1> to vector<128x1xi1>
    %276 = vector.broadcast %275 : vector<128x1xi1> to vector<128x128xi1>
    %277 = vector.broadcast %274 : bf16 to vector<128x128xbf16>
    %278 = arith.select %276, %273, %277 : vector<128x128xi1>, vector<128x128xbf16>
    %c176_142 = arith.constant 176 : index
    %c0_143 = arith.constant 0 : index
    %279 = vector.load %arg6[%c176_142, %c0_143] : memref<320x128xbf16, #tpu.memory_space<vmem>>, vector<128x128xbf16>
    %c177_144 = arith.constant 177 : index
    %c0_145 = arith.constant 0 : index
    %280 = vector.load %arg6[%c177_144, %c0_145] : memref<320x128xbf16, #tpu.memory_space<vmem>>, vector<128x128xbf16>
    %cst_146 = arith.constant 0.000000e+00 : f32
    %281 = arith.truncf %cst_146 : f32 to bf16
    %282 = vector.shape_cast %246 : vector<128x1xi1> to vector<128x1xi1>
    %283 = vector.broadcast %282 : vector<128x1xi1> to vector<128x128xi1>
    %284 = vector.broadcast %281 : bf16 to vector<128x128xbf16>
    %285 = arith.select %283, %280, %284 : vector<128x128xi1>, vector<128x128xbf16>
    %286 = tpu.concatenate %252, %253, %259, %265, %266, %272, %278, %279, %285 in 1 : vector<128x128xbf16>, vector<128x128xbf16>, vector<128x128xbf16>, vector<128x128xbf16>, vector<128x128xbf16>, vector<128x128xbf16>, vector<128x128xbf16>, vector<128x128xbf16>, vector<128x128xbf16> -> vector<128x1152xbf16>
    %c1_147 = arith.constant 1 : index
    %c0_148 = arith.constant 0 : index
    %c0_149 = arith.constant 0 : index
    %287 = vector.load %arg2[%c1_147, %c0_148, %c0_149] : memref<2x1152x128xbf16, #tpu.memory_space<vmem>>, vector<1x1152x128xbf16>
    %288 = vector.shape_cast %287 : vector<1x1152x128xbf16> to vector<1152x128xbf16>
    %cst_150 = arith.constant dense<0.000000e+00> : vector<128x128xf32>
    %289 = tpu.matmul %286, %288, %cst_150 {dimension_numbers = #tpu.dot_dimension_numbers<[1], [0], [0], [1], [0, 0, 1, 1], [], []>} : vector<128x1152xbf16>, vector<1152x128xbf16>, vector<128x128xf32> -> vector<128x128xf32>
    %c1_151 = arith.constant 1 : index
    %c0_152 = arith.constant 0 : index
    %c0_153 = arith.constant 0 : index
    %290 = vector.load %arg3[%c1_151, %c0_152, %c0_153] : memref<2x1x128xf32, #tpu.memory_space<vmem>>, vector<1x1x128xf32>
    %291 = vector.shape_cast %290 : vector<1x1x128xf32> to vector<1x128xf32>
    %292 = vector.broadcast %291 : vector<1x128xf32> to vector<128x128xf32>
    %293 = arith.addf %289, %292 : vector<128x128xf32>
    %cst_154 = arith.constant 0.000000e+00 : f32
    %294 = vector.broadcast %cst_154 : f32 to vector<128x128xf32>
    %295 = arith.maximumf %293, %294 : vector<128x128xf32>
    %c0_155 = arith.constant 0 : index
    %c128 = arith.constant 128 : index
    %c0_156 = arith.constant 0 : index
    %296 = vector.load %arg4[%c0_155, %c128, %c0_156] : memref<1x256x128xf32, #tpu.memory_space<vmem>>, vector<1x128x128xf32>
    %297 = vector.shape_cast %296 : vector<1x128x128xf32> to vector<128x128xf32>
    %298 = vector.shape_cast %295 : vector<128x128xf32> to vector<1x128x128xf32>
    tpu.vector_store %arg4[%c0_155, %c128, %c0_156], %298 {strides = array<i32>} : memref<1x256x128xf32, #tpu.memory_space<vmem>>, vector<1x128x128xf32>,
    return
  }
  func.func @transform_0(%arg0: i32) -> (i32, i32, i32) {
    %c0_i32 = arith.constant 0 : i32
    %c0_i32_0 = arith.constant 0 : i32
    %c0_i32_1 = arith.constant 0 : i32
    return %arg0, %c0_i32, %c0_i32_0 : i32, i32, i32
  }
  func.func @transform_1(%arg0: i32) -> (i32, i32, i32) {
    %c0_i32 = arith.constant 0 : i32
    %c0_i32_0 = arith.constant 0 : i32
    %c0_i32_1 = arith.constant 0 : i32
    %c0_i32_2 = arith.constant 0 : i32
    return %c0_i32, %c0_i32_0, %c0_i32_1 : i32, i32, i32
  }
  func.func @transform_2(%arg0: i32) -> (i32, i32, i32) {
    %c0_i32 = arith.constant 0 : i32
    %c0_i32_0 = arith.constant 0 : i32
    %c0_i32_1 = arith.constant 0 : i32
    %c0_i32_2 = arith.constant 0 : i32
    return %c0_i32, %c0_i32_0, %c0_i32_1 : i32, i32, i32
  }
  func.func @transform_3(%arg0: i32) -> (i32, i32, i32) {
    %c0_i32 = arith.constant 0 : i32
    %c0_i32_0 = arith.constant 0 : i32
    %c0_i32_1 = arith.constant 0 : i32
    return %arg0, %c0_i32, %c0_i32_0 : i32, i32, i32
  }
}

</mosaic_0001>

<bundles_post_ra>
// kernel: tile.13
= control target key start
LH: loop header
LB: loop body
LE: loop exit
PB: predicated region body
PF: predicated region fallthrough
CT: control target
= control target key end

     0   :  { %2 = vsyncpa [#allocation1], 0  ;;  %s45_s6 = smov [#allocation0]   ;;  %s65_s0 = inlined_call_operand.hbm [shape: f32[8], index: 0, kind: input, shape index: {}]   ;;  %s66_s1 = inlined_call_operand.vmem [shape: f32[16,8], index: 1, kind: output, shape index: {}]  }
   0x1   :  { %s9_s7 = sshll.u32 %s45_s6, 4  ;;  %s10_s7 = int_to_ptr.vmem [resolvable:$true] %s9_s7 }
   0x2   :  { %s31_s8 = scalar_lea.vmem %s10_s7, 16  ;;  %s35_s9 = scalar_lea.vmem %s10_s7, 32 }
   0x3   :  { %p32_p0 = scmp.ne.s32.totalorder %s10_s7, %s31_s8  ;;  %p36_p1 = scmp.lt.s32.totalorder %s10_s7, %s10_s7 }
   0x4   :  { %p37_p2 = scmp.lt.s32.totalorder %s35_s9, %s31_s8 }
   0x6   :  { %p38_p3 = por %p37_p2, %p36_p1 }
   0x8   :  { %p39_p4 = pnand %p38_p3, %p32_p0 }
   0xa   :  { %42 = shalt.err (!%p39_p4)
}
   0xb   :  { %12 = dma.hbm_to_vmem [thread:$0]  %s65_s0, 16, %s10_s7, [#allocation1]  }
   0xc   :  { %43 = dma.done.wait [#allocation1], 16  }
   0xd   :  { %44 = vsyncadd [#allocation1], 4294967280  ;;  %v16_v0 = vld [vmem:[#allocation0] ss:$0 sm:$0xff] }
   0xe   :  { %17 = vst [vmem:[%s66_s1] sm:$0xff] %v16_v0  ;;  %21 = vst [vmem:[%s66_s1 + $0x8] sm:$0xff] %v16_v0 }
   0xf   :  { %20 = vsyncpa [#allocation1], 1 }

// kernel: tile.18
= control target key start
LH: loop header
LB: loop body
LE: loop exit
PB: predicated region body
PF: predicated region fallthrough
CT: control target
= control target key end

     0   :  { %s133_s10 = smov 120   ;;  %s134_s11 = smov 104   ;;  %vm3_vm0 = vcmask 64512   ;;  %vm9_vm1 = vcmask 1048512   ;;  %vm15_vm2 = vcmask 982912   ;;  %vm21_vm3 = vcmask 917312   ;;  %s209_s0 = inlined_call_operand.vmem [shape: f32[16,8], index: 0, kind: input, shape index: {}]   ;;  %s210_s1 = inlined_call_operand.vmem [shape: f32[1,128], index: 1, kind: output, shape index: {}]  }
   0x1   :  { %v103_v0 = vld [vmem:[%s209_s0 + $0xf] sm:$0x1]   ;;  %v105_v1 = vld [vmem:[%s209_s0 + $0xd] sm:$0x1]   ;;  %v104_v2 = vld [vmem:[%s209_s0 + $0xe] sm:$0x1]  }
   0x2   :  { %7 = vrot.lane.b32.xlu0 %v103_v0, %s133_s10  ;;  %19 = vrot.lane.b32.xlu1 %v105_v1, %s134_s11  ;;  %v106_v3 = vld [vmem:[%s209_s0 + $0xc] sm:$0x1]   ;;  %s135_s16 = smov 112   ;;  %s136_s17 = smov 96   ;;  %v107_v4 = vld [vmem:[%s209_s0 + $0xb] sm:$0x1]  }
   0x3   :  { %v108_v5 = vld [vmem:[%s209_s0 + $0xa] sm:$0x1]   ;;  %v2_v6 = vld [vmem:[%s209_s0] sm:$0x1]   ;;  %s137_s24 = smov 88   ;;  %s138_s25 = smov 80  }
   0x4   :  { %4 = vst.msk [vmem:[#allocation0] sm:$0x1] %vm3_vm0, %v2_v6   ;;  %v109_v7 = vld [vmem:[%s209_s0 + $0x9] sm:$0x1]   ;;  %v110_v8 = vld [vmem:[%s209_s0 + $0x8] sm:$0x1]  }
   0x5   :  { %s139_s30 = smov 72   ;;  %s140_s2 = smov 64   ;;  %v111_v9 = vld [vmem:[%s209_s0 + $0x7] sm:$0x1]   ;;  %v112_v10 = vld [vmem:[%s209_s0 + $0x6] sm:$0x1]  }
   0x6   :  { %13 = vrot.lane.b32.xlu0 %v104_v2, %s135_s16  ;;  %25 = vrot.lane.b32.xlu1 %v106_v3, %s136_s17  ;;  %s141_s7 = smov 56   ;;  %s142_s8 = smov 48   ;;  %v113_v11 = vld [vmem:[%s209_s0 + $0x5] sm:$0x1]   ;;  %v114_v12 = vld [vmem:[%s209_s0 + $0x4] sm:$0x1]  }
   0x7   :  { %s143_s13 = smov 40   ;;  %s144_s14 = smov 32   ;;  %v115_v13 = vld [vmem:[%s209_s0 + $0x3] sm:$0x1]   ;;  %v116_v14 = vld [vmem:[%s209_s0 + $0x2] sm:$0x1]  }
   0x8   :  { %s145_s19 = smov 24   ;;  %s146_s20 = smov 16   ;;  %v117_v15 = vld [vmem:[%s209_s0 + $0x1] sm:$0x1]   ;;  %vm27_vm4 = vcmask 851712   ;;  %vm33_vm5 = vcmask 786112  }
   0x9   :  { %s147_s0 = smov 8   ;;  %vm39_vm6 = vcmask 720512   ;;  %vm45_vm7 = vcmask 654912   ;;  %vm51_vm8 = vcmask 589312   ;;  %vm57_vm9 = vcmask 523712  }
   0xa   :  { %31 = vrot.lane.b32.xlu0 %v107_v4, %s137_s24  ;;  %37 = vrot.lane.b32.xlu1 %v108_v5, %s138_s25  ;;  %vm63_vm10 = vcmask 458112   ;;  %vm69_vm11 = vcmask 392512   ;;  %vm75_vm12 = vcmask 326912   ;;  %vm81_vm13 = vcmask 261312  }
   0xb   :  { %vm87_vm14 = vcmask 195712   ;;  %vm93_vm15 = vcmask 130112  }
   0xe   :  { %43 = vrot.lane.b32.xlu0 %v109_v7, %s139_s30  ;;  %49 = vrot.lane.b32.xlu1 %v110_v8, %s140_s2 }
  0x12   :  { %55 = vrot.lane.b32.xlu0 %v111_v9, %s141_s7  ;;  %61 = vrot.lane.b32.xlu1 %v112_v10, %s142_s8 }
  0x16   :  { %67 = vrot.lane.b32.xlu0 %v113_v11, %s143_s13  ;;  %73 = vrot.lane.b32.xlu1 %v114_v12, %s144_s14 }
  0x1a   :  { %79 = vrot.lane.b32.xlu0 %v115_v13, %s145_s19  ;;  %85 = vrot.lane.b32.xlu1 %v116_v14, %s146_s20 }
  0x1e   :  { %91 = vrot.lane.b32.xlu0 %v117_v15, %s147_s0 }
  0x74   :  { %v8_v16 = vpop.permute.xlu0 %7   ;;  %v20_v17 = vpop.permute.xlu1 %19  }
  0x75   :  { %10 = vst.msk [vmem:[#allocation0] sm:$0x1] %vm9_vm1, %v8_v16  }
  0x78   :  { %v14_v18 = vpop.permute.xlu0 %13   ;;  %v26_v19 = vpop.permute.xlu1 %25  }
  0x79   :  { %16 = vst.msk [vmem:[#allocation0] sm:$0x1] %vm15_vm2, %v14_v18  }
  0x7a   :  { %22 = vst.msk [vmem:[#allocation0] sm:$0x1] %vm21_vm3, %v20_v17  }
  0x7b   :  { %28 = vst.msk [vmem:[#allocation0] sm:$0x1] %vm27_vm4, %v26_v19  }
  0x7c   :  { %v32_v20 = vpop.permute.xlu0 %31   ;;  %v38_v21 = vpop.permute.xlu1 %37  }
  0x7d   :  { %34 = vst.msk [vmem:[#allocation0] sm:$0x1] %vm33_vm5, %v32_v20  }
  0x7e   :  { %40 = vst.msk [vmem:[#allocation0] sm:$0x1] %vm39_vm6, %v38_v21  }
  0x80   :  { %v44_v22 = vpop.permute.xlu0 %43   ;;  %v50_v23 = vpop.permute.xlu1 %49  }
  0x81   :  { %46 = vst.msk [vmem:[#allocation0] sm:$0x1] %vm45_vm7, %v44_v22  }
  0x82   :  { %52 = vst.msk [vmem:[#allocation0] sm:$0x1] %vm51_vm8, %v50_v23  }
  0x84   :  { %v56_v24 = vpop.permute.xlu0 %55   ;;  %v62_v25 = vpop.permute.xlu1 %61  }
  0x85   :  { %58 = vst.msk [vmem:[#allocation0] sm:$0x1] %vm57_vm9, %v56_v24  }
  0x86   :  { %64 = vst.msk [vmem:[#allocation0] sm:$0x1] %vm63_vm10, %v62_v25  }
  0x88   :  { %v68_v26 = vpop.permute.xlu0 %67   ;;  %v74_v27 = vpop.permute.xlu1 %73  }
  0x89   :  { %70 = vst.msk [vmem:[#allocation0] sm:$0x1] %vm69_vm11, %v68_v26  }
  0x8a   :  { %76 = vst.msk [vmem:[#allocation0] sm:$0x1] %vm75_vm12, %v74_v27  }
  0x8c   :  { %v80_v28 = vpop.permute.xlu0 %79   ;;  %v86_v29 = vpop.permute.xlu1 %85  }
  0x8d   :  { %82 = vst.msk [vmem:[#allocation0] sm:$0x1] %vm81_vm13, %v80_v28  }
  0x8e   :  { %88 = vst.msk [vmem:[#allocation0] sm:$0x1] %vm87_vm14, %v86_v29  }
  0x90   :  { %v92_v30 = vpop.permute.xlu0 %91  }
  0x91   :  { %94 = vst.msk [vmem:[#allocation0] sm:$0x1] %vm93_vm15, %v92_v30  }
  0x98   :  { %v99_v31 = vld [vmem:[#allocation0] sm:$0x1] }
  0x99   :  { %102 = vst [vmem:[%s210_s1] sm:$0x1] %v99_v31 }

// kernel: conv_block_forward.1
= control target key start
LH: loop header
LB: loop body
LE: loop exit
PB: predicated region body
PF: predicated region fallthrough
CT: control target
= control target key end

     0   :  { %s13509_s12 = smov 0   ;;  %s19591_s0 = inlined_call_operand.vmem [shape: f32[2,256,128], index: 0, kind: input, shape index: {}]   ;;  %s19592_s1 = inlined_call_operand.vmem [shape: bf16[2,1152,128], index: 1, kind: input, shape index: {}]   ;;  %s19593_s2 = inlined_call_operand.vmem [shape: f32[2,1,128], index: 2, kind: input, shape index: {}]   ;;  %s19594_s3 = inlined_call_operand.vmem [shape: f32[2,256,128], index: 3, kind: output, shape index: {}]  }
   0x1 LB: > { %s10688_s13 = sadd.s32 4294967295, %s13485_s12   ;;  %p10692_p0 = scmp.ge.s32.totalorder %s13485_s12, 1  ;;  %s13485_s12 = sphi %s13509_s12, %s13_s12  }
   0x2   : > { %p137_p1 = scmp.lt.s32.totalorder %s13485_s12, 3 }
   0x4   : > { %p138_p2 = pnand %p10692_p0, %p137_p1 }
   0x6   : > { %141 = sbr.rel (%p138_p2) target bundleno = 1192 (0x4a8), region = 32 }
   0xb   : > { %v13085_v0 = vld [vmem:[%s19592_s1 + $0x78] sm:$0xff]   ;;  %v19608_v3 = vmov 0   ;;  %v13089_v5 = vld [vmem:[%s19592_s1 + $0x70] sm:$0xff]   ;;  %v13093_v9 = vld [vmem:[%s19592_s1 + $0x68] sm:$0xff]   ;;  %v382_v10 = vlaneseq  ;;  %p161_p3 = scmp.lt.s32.totalorder %s10688_s13, 1  ;;  %vm13488_vm5 = vmmov 1  }
   0xc   : > { %v13086_v1 = vld [vmem:[%s19592_s1 + $0xf8] sm:$0xff]   ;;  %11859 = vmatprep.subr.bf16.mxu0 %v13085_v0  ;;  %176 = vst [vmem:[#allocation2 + $0x8] sm:$0xf] %v19608_v3  ;;  %177 = vst [vmem:[#allocation2 + $0xc] sm:$0xf] %v19608_v3  ;;  %v13090_v6 = vld [vmem:[%s19592_s1 + $0xf0] sm:$0xff]  }
   0xd   : > { %v13087_v2 = vld [vmem:[%s19592_s1 + $0x38] sm:$0xff]   ;;  %175 = vst [vmem:[#allocation2 + $0x4] sm:$0xf] %v19608_v3  ;;  %178 = vst [vmem:[#allocation2 + $0x90] sm:$0xf] %v19608_v3  ;;  %11923 = vmatprep.subr.bf16.mxu1 %v13086_v1  ;;  %v13091_v7 = vld [vmem:[%s19592_s1 + $0x30] sm:$0xff]  }
   0xe   : > { %179 = vst [vmem:[#allocation2 + $0x94] sm:$0xf] %v19608_v3  ;;  %180 = vst [vmem:[#allocation2 + $0x98] sm:$0xf] %v19608_v3  ;;  %v13088_v4 = vld [vmem:[%s19592_s1 + $0xb8] sm:$0xff]   ;;  %11860 = vmatpush3.bf16.msra.mxu0 %v13087_v2  ;;  %v13092_v8 = vld [vmem:[%s19592_s1 + $0xb0] sm:$0xff]  }
   0xf   : > { %183 = vst [vmem:[#allocation3 + $0x4] sm:$0xf] %v19608_v3  ;;  %184 = vst [vmem:[#allocation3 + $0x8] sm:$0xf] %v19608_v3  ;;  %11924 = vmatpush3.bf16.msra.mxu1 %v13088_v4  ;;  %11861 = vmatprep.subr.bf16.mxu0 %v13089_v5  ;;  %v13094_v11 = vld [vmem:[%s19592_s1 + $0xe8] sm:$0xff]   ;;  %v13097_v14 = vld [vmem:[%s19592_s1 + $0x60] sm:$0xff]  }
  0x10   : > { %185 = vst [vmem:[#allocation3 + $0xc] sm:$0xf] %v19608_v3  ;;  %186 = vst [vmem:[#allocation3 + $0x90] sm:$0xf] %v19608_v3  ;;  %11925 = vmatprep.subr.bf16.mxu1 %v13090_v6  ;;  %v13095_v12 = vld [vmem:[%s19592_s1 + $0x28] sm:$0xff]   ;;  %v13568_v15 = vshrl.u32 %v382_v10, 7 }
  0x11   : > { %187 = vst [vmem:[#allocation3 + $0x94] sm:$0xf] %v19608_v3  ;;  %188 = vst [vmem:[#allocation3 + $0x98] sm:$0xf] %v19608_v3  ;;  %v13096_v13 = vld [vmem:[%s19592_s1 + $0xa8] sm:$0xff]   ;;  %v13098_v16 = vld [vmem:[%s19592_s1 + $0xe0] sm:$0xff]  }
  0x12   : > { %11862 = vmatpush3.bf16.msra.mxu0 %v13091_v7  ;;  %v13099_v17 = vld [vmem:[%s19592_s1 + $0x20] sm:$0xff]   ;;  %v13101_v19 = vld [vmem:[%s19592_s1 + $0x58] sm:$0xff]   ;;  %v385_v20 = vadd.s32 16, %v13568_v15  ;;  %s21174_s13 = smov (!%p161_p3, %s10688_s13), 1  ;;  %v403_v24 = vand.u32 15, %v13568_v15  ;;  %v13105_v25 = vld [vmem:[%s19592_s1 + $0x50] sm:$0xff]  }
  0x13   : > { %11926 = vmatpush3.bf16.msra.mxu1 %v13092_v8  ;;  %11863 = vmatprep.subr.bf16.mxu0 %v13093_v9  ;;  %v13100_v18 = vld [vmem:[%s19592_s1 + $0xa0] sm:$0xff]   ;;  %v13102_v21 = vld [vmem:[%s19592_s1 + $0xd8] sm:$0xff]   ;;  %v13106_v27 = vld [vmem:[%s19592_s1 + $0xd0] sm:$0xff]   ;;  %v384_v28 = vadd.s32 8, %v13568_v15  ;;  %s11601_s8 = sshll.u32 %s21174_s13, 8  ;;  %v386_v33 = vadd.s32 24, %v13568_v15 }
  0x14   : > { %11927 = vmatprep.subr.bf16.mxu1 %v13094_v11  ;;  %v13103_v22 = vld [vmem:[%s19592_s1 + $0x18] sm:$0xff]   ;;  %v417_v26 = vand.u32 15, %v385_v20  ;;  %v13107_v29 = vld [vmem:[%s19592_s1 + $0x10] sm:$0xff]   ;;  %vm13613_vm0 = vcmp.ge.s32.totalorder %v403_v24, 1  ;;  %v13109_v32 = vld [vmem:[%s19592_s1 + $0x48] sm:$0xff]   ;;  %v13632_v38 = vadd.s32 32, %v13568_v15  ;;  %s13654_s27 = scalar_lea.vmem %s19591_s0, %s11601_s8  ;;  %s19289_s11 = scalar_lea.vmem %s19594_s3, %s11601_s8 }
  0x15   : > { %v13104_v23 = vld [vmem:[%s19592_s1 + $0x98] sm:$0xff]   ;;  %v13108_v30 = vld [vmem:[%s19592_s1 + $0x90] sm:$0xff]   ;;  %v13110_v34 = vld [vmem:[%s19592_s1 + $0xc8] sm:$0xff]   ;;  %v410_v36 = vand.u32 15, %v384_v28  ;;  %v13638_v40 = vadd.s32 40, %v13568_v15  ;;  %v13644_v42 = vadd.s32 48, %v13568_v15 }
  0x16   : > { %11864 = vmatpush3.bf16.msra.mxu0 %v13095_v12  ;;  %vm13624_vm1 = vcmp.ge.s32.totalorder %v417_v26, 1  ;;  %v13111_v37 = vld [vmem:[%s19592_s1 + $0x8] sm:$0xff]   ;;  %v13113_v41 = vld [vmem:[%s19592_s1 + $0x40] sm:$0xff]   ;;  %v13657_v44 = vadd.s32 56, %v13568_v15  ;;  %v424_v46 = vand.u32 15, %v386_v33  ;;  %v431_v52 = vand.u32 15, %v13632_v38  ;;  %vm672_vm3 = vmpackc.low %vm13613_vm0, %vm13613_vm0 }
  0x17   : > { %11928 = vmatpush3.bf16.msra.mxu1 %v13096_v13  ;;  %11865 = vmatprep.subr.bf16.mxu0 %v13097_v14  ;;  %v13112_v39 = vld [vmem:[%s19592_s1 + $0x88] sm:$0xff]   ;;  %v13114_v43 = vld [vmem:[%s19592_s1 + $0xc0] sm:$0xff]   ;;  %vm13665_vm2 = vcmp.le.s32.totalorder %v410_v36, 14  ;;  %v438_v53 = vand.u32 15, %v13638_v40  ;;  %v192_v56 = vld [vmem:[%s13654_s27 + $0x10] sm:$0xff]  ;;  %v445_v58 = vand.u32 15, %v13644_v42 }
  0x18   : > { %11929 = vmatprep.subr.bf16.mxu1 %v13098_v16  ;;  %v13115_v45 = vld [vmem:[%s19592_s1] sm:$0xff]   ;;  %v191_v50 = vld [vmem:[%s13654_s27 + $0x8] sm:$0xff]  ;;  %v193_v57 = vld [vmem:[%s13654_s27 + $0x18] sm:$0xff]  ;;  %v452_v59 = vand.u32 15, %v13657_v44  ;;  %v13687_v62 = vadd.s32 64, %v13568_v15  ;;  %v13690_v63 = vadd.s32 72, %v13568_v15 }
  0x19   : > { %v13116_v47 = vld [vmem:[%s19592_s1 + $0x80] sm:$0xff]   ;;  %v13671_v51 = vld [vmem:[#allocation2 + $0x8] sm:$0xf]  ;;  %v13675_v55 = vld [vmem:[#allocation2 + $0xc] sm:$0xf]  ;;  %v11675_v61 = vpack.c.bf16 %v193_v57, %v192_v56  ;;  %v688_v0 = vsel %vm672_vm3, 65537, %v19608_v3 }
  0x1a   : > { %11866 = vmatpush3.bf16.msra.mxu0 %v13099_v17  ;;  %v190_v49 = vld [vmem:[%s13654_s27] sm:$0xff]  ;;  %v10738_v60 = vcombine.low %v13671_v51, %v13675_v55  ;;  %vm19602_vm4 = vsmask.f32 3328  ;;  %vm673_vm6 = vmpackc.low %vm13488_vm5, %vm13488_vm5  ;;  %vm705_vm7 = vsmask.f32 7440  ;;  %vm13693_vm8 = vcmp.le.s32.totalorder %v424_v46, 14 }
  0x1b   : > { %11930 = vmatpush3.bf16.msra.mxu1 %v13100_v18  ;;  %11867 = vmatprep.subr.bf16.mxu0 %v13101_v19  ;;  %v11670_v54 = vpack.c.bf16 %v191_v50, %v190_v49  ;;  %v13119_v2 = vld [vmem:[%s19592_s1 + $0x1f8] sm:$0xff]   ;;  %11828 = vst [vmem:[#allocation2 + $0x18] sm:$0xff] %v11675_v61   ;;  %vm674_vm9 = vmpackc.low %vm13624_vm1, %vm13624_vm1  ;;  %v689_v6 = vsel %vm673_vm6, 65537, %v19608_v3  ;;  %v708_v7 = vshll.u32 %v688_v0, 16  ;;  %v1145_v8 = vld [vmem:[#allocation2 + $0xc] sm:$0x8] }
  0x1c   : > { %11931 = vmatprep.subr.bf16.mxu1 %v13102_v21  ;;  %v1305_v4 = vshrl.u32 %v10738_v60, 16  ;;  %v1308_v5 = vshll.u32 %v10738_v60, 16  ;;  %v690_v9 = vsel %vm674_vm9, 65537, %v19608_v3  ;;  %v711_v10 = vshrl.u32 %v688_v0, 16  ;;  %v194_v26 = vld [vmem:[%s13654_s27 + $0x20] sm:$0xff]  ;;  %vm934_vm11 = vmpackc.low %vm13665_vm2, %vm13665_vm2  ;;  %v195_v31 = vld [vmem:[%s13654_s27 + $0x28] sm:$0xff] }
  0x1d   : > { %11827 = vst [vmem:[#allocation2 + $0x10] sm:$0xff] %v11670_v54   ;;  %v717_v11 = vshll.u32 %v689_v6, 16  ;;  %v721_v12 = vshrl.u32 %v689_v6, 16  ;;  %v13705_v16 = vrot.slane %v708_v7, 5  ;;  %v727_v17 = vshll.u32 %v690_v9, 16  ;;  %vm13727_vm12 = vmor %vm19602_vm4, %vm705_vm7  ;;  %v13124_v6 = vld [vmem:[%s19592_s1 + $0x178] sm:$0xff]  }
  0x1e   : > { %11868 = vmatpush3.bf16.msra.mxu0 %v13103_v22  ;;  %v1307_v13 = vrot.slane %v1305_v4, 4  ;;  %v1310_v14 = vrot.slane %v1308_v5, 5  ;;  %v713_v18 = vrot.slane %v711_v10, 4  ;;  %v731_v21 = vshrl.u32 %v690_v9, 16  ;;  %vm936_vm15 = vmpackc.low %vm13693_vm8, %vm13693_vm8  ;;  %v13134_v44 = vld [vmem:[%s19592_s1 + $0x168] sm:$0xff]  }
  0x1f   : > { %11932 = vmatpush3.bf16.msra.mxu1 %v13104_v23  ;;  %11869 = vmatprep.subr.bf16.mxu0 %v13105_v25  ;;  %19936 = vst [vmem:[#allocation4_spill] sm:$0xff] %v13705_v16  ;;  %v13707_v19 = vrot.slane %v717_v11, 5  ;;  %v723_v20 = vrot.slane %v721_v12, 4  ;;  %v729_v23 = vrot.slane %v727_v17, 5  ;;  %vm19595_vm10 = vcmp.ne.s16.totalorder %v13705_v16, 0 }
  0x20   : > { %11933 = vmatprep.subr.bf16.mxu1 %v13106_v27  ;;  %v1311_v22 = vor.u32 %v1310_v14, %v1307_v13  ;;  %v13710_v24 = vrot.slane %v721_v12, 7  ;;  %v623_v25 = vld [vmem:[#allocation2 + $0x4] sm:$0x8]  ;;  %v714_v27 = vor.u32 %v713_v18, %v13705_v16  ;;  %v13750_v54 = vsel %vm934_vm11, 65537, %v19608_v3 }
  0x21   : > { %v724_v28 = vor.u32 %v723_v20, %v13707_v19  ;;  %v883_v50 = vsel %vm19595_vm10, %v623_v25, 0  ;;  %v19941_v4 = vmov 0  ;;  %v19944_v5 = vmov 0 }
  0x22   : > { %11870 = vmatpush3.bf16.msra.mxu0 %v13107_v29  ;;  %v733_v29 = vrot.slane %v731_v21, 4  ;;  %v1843_v35 = vshll.u32 %v1311_v22, 16  ;;  %v13752_v60 = vld [vmem:[#allocation2 + $0x18] sm:$0xf]  ;;  %vm965_vm0 = vsmask.f32 256 }
  0x23   : > { %11934 = vmatpush3.bf16.msra.mxu1 %v13108_v30  ;;  %11871 = vmatprep.subr.bf16.mxu0 %v13109_v32  ;;  %v1148_v30 = vsel %vm19595_vm10, %v1145_v8, 0  ;;  %vm966_vm1 = vsmask.f32 4368  ;;  %vm19601_vm2 = vsmask.f32 4352  ;;  %vm13784_vm3 = vcmp.ge.s32.totalorder %v431_v52, 1 }
  0x24   : > { %11935 = vmatprep.subr.bf16.mxu1 %v13110_v34  ;;  %v13721_v32 = vld [vmem:[#allocation2 + $0x10] sm:$0xf]  ;;  %v13723_v33 = vld [vmem:[#allocation2 + $0x14] sm:$0xf]  ;;  %v1840_v34 = vshrl.u32 %v1311_v22, 16  ;;  %v734_v46 = vor.u32 %v733_v29, %v729_v23  ;;  %v13740_v49 = vrot.slane %v1843_v35, 4  ;;  %vm13835_vm7 = vmor %vm965_vm0, %vm966_vm1 }
  0x25   : > { %v19949_v38 = vmov 0  ;;  %v952_v20 = vsel %vm936_vm15, 65537, %v19608_v3  ;;  %vm13819_vm6 = vcmp.le.s32.totalorder %v438_v53, 14  ;;  %v13828_v53 = vrot.slane %v13710_v24, 4  ;;  %vm676_vm8 = vmpackc.low %vm13784_vm3, %vm13784_vm3 }
  0x26   : > { %11872 = vmatpush3.bf16.msra.mxu0 %v13111_v37  ;;  %v13732_v37 = vor.u32 %v13710_v24, %v717_v11  ;;  %v735_v48 = vrot.slane %v734_v46, 4  ;;  %v995_v24 = vshrl.u32 %v952_v20, 16  ;;  %vm19598_vm11 = vcmask 1042432   ;;  %v13130_v11 = vld [vmem:[%s19592_s1 + $0x130] sm:$0xff]   ;;  %vm938_vm3 = vmpackc.low %vm13819_vm6, %vm13819_vm6 }
  0x27   : > { %11936 = vmatpush3.bf16.msra.mxu1 %v13112_v39  ;;  %11873 = vmatprep.subr.bf16.mxu0 %v13113_v41  ;;  %v11680_v39 = vpack.c.bf16 %v195_v31, %v194_v26  ;;  %v10739_v41 = vcombine.low %v13721_v32, %v13723_v33  ;;  %vm13879_vm15 = vcmp.ge.s32.totalorder %v445_v58, 1 }
  0x28   : > { %11937 = vmatprep.subr.bf16.mxu1 %v13114_v43  ;;  %19939 = vst [vmem:[#allocation5_spill] sm:$0xff] %v13732_v37  ;;  %v715_v43 = vrot.slane %v714_v27, 4  ;;  %v740_v12 = vsel %vm13727_vm12, %v735_v48, %v13707_v19  ;;  %vm19597_vm9 = vcmp.ne.s16.totalorder %v13732_v37, 0 }
  0x29   : > { %11829 = vst [vmem:[#allocation2 + $0x20] sm:$0xff] %v11680_v39   ;;  %v1313_v56 = vshrl.u32 %v10739_v41, 16  ;;  %v1316_v57 = vshll.u32 %v10739_v41, 16  ;;  %vm13799_vm5 = vcmp.ne.s16.totalorder %v740_v12, 0 }
  0x2a   : > { %11874 = vmatpush3.bf16.msra.mxu0 %v13115_v45  ;;  %v13736_v45 = vrot.slane %v724_v28, 4  ;;  %v720_v61 = vsel %vm13727_vm12, %v715_v43, %v13707_v19  ;;  %v19950_v38 = vsel %vm13799_vm5, 4294967295, %v19949_v38  ;;  %v1151_v21 = vsel %vm13799_vm5, %v13752_v60, 0 }
  0x2b   : > { %11938 = vmatpush3.bf16.msra.mxu1 %v13116_v47  ;;  %v13738_v47 = vrot.slane %v1840_v34, 3  ;;  %vm13762_vm13 = vcmp.ne.s16.totalorder %v720_v61, 0  ;;  %v1315_v7 = vrot.slane %v1313_v56, 4  ;;  %v1318_v8 = vrot.slane %v1316_v57, 5  ;;  %11987 = vmatprep.subr.bf16.mxu0 %v13124_v6  ;;  %19951 = vst [vmem:[#allocation9_spill] sm:$0xff] %v19950_v38 }
  0x2c   : > { %12051 = vmatprep.subr.bf16.mxu1 %v13119_v2  ;;  %19940 = vst [vmem:[#allocation6_spill] sm:$0xff] %v13736_v45  ;;  %v730_v0 = vsel %vm13727_vm12, %v13736_v45, %v729_v23  ;;  %v19942_v4 = vsel %vm13762_vm13, 4294967295, %v19941_v4  ;;  %v1149_v9 = vsel %vm13762_vm13, %v13721_v32, 0  ;;  %v884_v14 = vsel %vm13762_vm13, %v13671_v51, 0  ;;  %v13823_v57 = vld [vmem:[#allocation2 + $0x1c] sm:$0xf] }
  0x2d   : > { %v1846_v2 = vor.u32 %v13740_v49, %v13738_v47  ;;  %19943 = vst [vmem:[#allocation7_spill] sm:$0xff] %v19942_v4  ;;  %vm13766_vm14 = vcmp.ne.s16.totalorder %v730_v0, 0  ;;  %v10755_v13 = vcombine.low %v1148_v30, %v1149_v9  ;;  %v13797_v18 = vor.u32 %v1318_v8, %v1315_v7 }
  0x2e   : > { %v19945_v5 = vsel %vm13766_vm14, 4294967295, %v19944_v5  ;;  %v1150_v10 = vsel %vm13766_vm14, %v13723_v33, 0  ;;  %v885_v17 = vsel %vm13766_vm14, %v13675_v55, 0  ;;  %v10729_v52 = vcombine.low %v883_v50, %v884_v14 }
  0x2f   : > { %19946 = vst [vmem:[#allocation8_spill] sm:$0xff] %v19945_v5  ;;  %v1874_v23 = vshrl.u32 %v10755_v13, 16  ;;  %v1877_v25 = vshll.u32 %v10755_v13, 16  ;;  %v886_v26 = vsel %vm13799_vm5, %v13721_v32, 0  ;;  %v1320_v27 = vsel %vm19602_vm4, %v1311_v22, %v13797_v18 }
  0x30   : > { %v10756_v28 = vcombine.low %v1150_v10, %v1151_v21  ;;  %v10730_v29 = vcombine.low %v885_v17, %v886_v26  ;;  %v1823_v30 = vshrl.u32 %v10729_v52, 16  ;;  %v1848_v31 = vshrl.u32 %v1320_v27, 16 }
  0x31   : > { %v1851_v1 = vshll.u32 %v1320_v27, 16  ;;  %v1876_v34 = vrot.slane %v1874_v23, 3  ;;  %v1879_v35 = vrot.slane %v1877_v25, 4  ;;  %v1826_v47 = vshll.u32 %v10729_v52, 16 }
  0x32   : > { %v1882_v41 = vshrl.u32 %v10756_v28, 16  ;;  %v1885_v43 = vshll.u32 %v10756_v28, 16  ;;  %v1825_v46 = vrot.slane %v1823_v30, 3  ;;  %v1850_v49 = vrot.slane %v1848_v31, 3 }
  0x33   : > { %v1853_v50 = vrot.slane %v1851_v1, 4  ;;  %v1880_v22 = vor.u32 %v1879_v35, %v1876_v34  ;;  %v1831_v56 = vshrl.u32 %v10730_v29, 16  ;;  %v1828_v48 = vrot.slane %v1826_v47, 4 }
  0x34   : > { %v1884_v61 = vrot.slane %v1882_v41, 3  ;;  %v1887_v0 = vrot.slane %v1885_v43, 4  ;;  %v1834_v6 = vshll.u32 %v10730_v29, 16  ;;  %v977_v8 = vshrl.u32 %v13750_v54, 16  ;;  %v13129_v29 = vld [vmem:[%s19592_s1 + $0x170] sm:$0xff]  }
  0x35   : > { %v13825_v7 = vor.u32 %v1853_v50, %v1850_v49  ;;  %v1833_v40 = vrot.slane %v1831_v56, 3  ;;  %v1829_v10 = vor.u32 %v1828_v48, %v1825_v46  ;;  %v980_v14 = vshll.u32 %v13750_v54, 16  ;;  %v13123_v46 = vld [vmem:[%s19592_s1 + $0x1b0] sm:$0xff]  }
  0x36   : > { %v13831_v9 = vor.u32 %v1887_v0, %v1884_v61  ;;  %v1836_v12 = vrot.slane %v1834_v6, 4  ;;  %v979_v52 = vrot.slane %v977_v8, 7  ;;  %v998_v21 = vshll.u32 %v952_v20, 16  ;;  %v13135_v8 = vld [vmem:[%s19592_s1 + $0x128] sm:$0xff]  }
  0x37   : > { %v1855_v17 = vsel %vm19601_vm2, %v1846_v2, %v13825_v7  ;;  %v10740_v54 = vcombine.low %v13752_v60, %v13823_v57  ;;  %v13125_v2 = vld [vmem:[%s19592_s1 + $0x138] sm:$0xff]   ;;  %v997_v27 = vrot.slane %v995_v24, 7  ;;  %v1128_v28 = vsel %vm19597_vm9, %v13671_v51, 0 }
  0x38   : > { %2962 = vmatprep.mubr.bf16.mxu0 %v1855_v17  ;;  %v1889_v23 = vsel %vm19601_vm2, %v1880_v22, %v13831_v9  ;;  %v13847_v25 = vor.u32 %v1836_v12, %v1833_v40  ;;  %v982_v20 = vor.u32 %v980_v14, %v979_v52  ;;  %v984_v26 = vrot.slane %v979_v52, 4 }
  0x39   : > { %3059 = vmatprep.mubr.bf16.mxu1 %v1889_v23  ;;  %v1322_v31 = vshrl.u32 %v10740_v54, 16  ;;  %v1325_v1 = vshll.u32 %v10740_v54, 16  ;;  %v692_v34 = vsel %vm676_vm8, 65537, %v19608_v3  ;;  %v1000_v41 = vor.u32 %v998_v21, %v997_v27 }
  0x3a   : > { %v1838_v30 = vsel %vm19601_vm2, %v1829_v10, %v13847_v25  ;;  %v983_v51 = vsel %vm13835_vm7, %v13828_v53, %v982_v20  ;;  %v13875_v35 = vsel %vm13835_vm7, %v984_v26, %v13732_v37  ;;  %v747_v43 = vshll.u32 %v692_v34, 16 }
  0x3b   : > { %2963 = vmatmul.mubr.bf16.vlgmr.msra.gmra.mxu0 %v1838_v30  ;;  %19956 = vst [vmem:[#allocation10_spill] sm:$0xff] %v13875_v35  ;;  %vm13886_vm0 = vcmp.ne.s16.totalorder %v983_v51, 0  ;;  %v19959_v47 = vmov 0  ;;  %vm19596_vm1 = vcmp.ne.s16.totalorder %v13875_v35, 0  ;;  %v1324_v49 = vrot.slane %v1322_v31, 4 }
  0x3c   : > { %v19960_v47 = vsel %vm13886_vm0, 4294967295, %v19959_v47  ;;  %v1327_v50 = vrot.slane %v1325_v1, 5  ;;  %11988 = vmatpush3.bf16.msra.mxu0 %v13125_v2  ;;  %vm13896_vm8 = vcmp.le.s32.totalorder %v452_v59, 14  ;;  %v1001_v58 = vsel %vm13835_vm7, %v13828_v53, %v1000_v41  ;;  %v13946_v30 = vld [vmem:[#allocation2 + $0x20] sm:$0xf] }
  0x3d   : > { %19961 = vst [vmem:[#allocation11_spill] sm:$0xff] %v19960_v47  ;;  %v1129_v22 = vsel %vm13886_vm0, %v13675_v55, 0  ;;  %v1130_v39 = vsel %vm19596_vm1, %v13721_v32, 0  ;;  %v749_v56 = vrot.slane %v747_v43, 5  ;;  %11989 = vmatprep.subr.bf16.mxu0 %v13129_v29  ;;  %vm13912_vm6 = vcmp.ne.s16.totalorder %v1001_v58, 0  ;;  %vm678_vm1 = vmpackc.low %vm13879_vm15, %vm13879_vm15 }
  0x3e   : > { %v19964_v59 = vmov 0  ;;  %v10746_v61 = vcombine.low %v1128_v28, %v1129_v22  ;;  %v13916_v0 = vor.u32 %v1327_v50, %v1324_v49  ;;  %v751_v48 = vshrl.u32 %v692_v34, 16 }
  0x3f   : > { %v19965_v59 = vsel %vm13912_vm6, 4294967295, %v19964_v59  ;;  %v1131_v55 = vsel %vm13912_vm6, %v13723_v33, 0  ;;  %v750_v32 = vsel %vm13727_vm12, %v13736_v45, %v749_v56  ;;  %v954_v6 = vsel %vm938_vm3, 65537, %v19608_v3 }
  0x40   : > { %19966 = vst [vmem:[#allocation12_spill] sm:$0xff] %v19965_v59  ;;  %v1002_v40 = vrot.slane %v997_v27, 4  ;;  %v13928_v10 = vcombine.low %v1130_v39, %v1131_v55  ;;  %v1419_v12 = vrot.slane %v10746_v61, 5  ;;  %v1329_v14 = vsel %vm19602_vm4, %v13797_v18, %v13916_v0  ;;  %11990 = vmatpush3.bf16.msra.mxu0 %v13130_v11  ;;  %v13139_v27 = vld [vmem:[%s19592_s1 + $0x160] sm:$0xff]  }
  0x41   : > { %v753_v17 = vrot.slane %v751_v48, 4  ;;  %v1899_v52 = vshrl.u32 %v1329_v14, 16  ;;  %v1902_v24 = vshll.u32 %v1329_v14, 16  ;;  %vm13933_vm10 = vcmp.ne.s16.totalorder %v750_v32, 0  ;;  %11991 = vmatprep.subr.bf16.mxu0 %v13134_v44  ;;  %v13140_v11 = vld [vmem:[%s19592_s1 + $0x120] sm:$0xff]   ;;  %v13120_v32 = vld [vmem:[%s19592_s1 + $0x1b8] sm:$0xff]  }
  0x42   : > { %v19967_v21 = vmov 0  ;;  %v13940_v23 = vsel %vm13835_vm7, %v1002_v40, %v13732_v37  ;;  %v1420_v54 = vrot.slane %v13928_v10, 5  ;;  %v1857_v2 = vshrl.u32 %v1419_v12, 16  ;;  %v13962_v39 = vld [vmem:[#allocation2 + $0x24] sm:$0xf] }
  0x43   : > { %v19968_v21 = vsel %vm13933_vm10, 4294967295, %v19967_v21  ;;  %19970 = vst [vmem:[#allocation14_spill] sm:$0xff] %v13940_v23  ;;  %v1860_v20 = vshll.u32 %v1419_v12, 16  ;;  %v754_v26 = vor.u32 %v753_v17, %v749_v56  ;;  %v1901_v28 = vrot.slane %v1899_v52, 3  ;;  %v13122_v52 = vld [vmem:[%s19592_s1 + $0x1f0] sm:$0xff]  }
  0x44   : > { %19969 = vst [vmem:[#allocation13_spill] sm:$0xff] %v19968_v21  ;;  %v1904_v29 = vrot.slane %v1902_v24, 4  ;;  %v1152_v31 = vsel %vm13933_vm10, %v13823_v57, 0  ;;  %v887_v1 = vsel %vm13933_vm10, %v13723_v33, 0  ;;  %v1421_v34 = vsel %vm19598_vm11, %v1419_v12, %v1420_v54  ;;  %11992 = vmatpush3.bf16.msra.mxu0 %v13135_v8  ;;  %v196_v33 = vld [vmem:[%s13654_s27 + $0x30] sm:$0xff]  ;;  %vm940_vm11 = vmpackc.low %vm13896_vm8, %vm13896_vm8 }
  0x45   : > { %v1859_v51 = vrot.slane %v1857_v2, 3  ;;  %v1862_v41 = vrot.slane %v1860_v20, 4  ;;  %v755_v43 = vrot.slane %v754_v26, 4  ;;  %v1865_v49 = vshrl.u32 %v1421_v34, 16  ;;  %11993 = vmatprep.subr.bf16.mxu0 %v13139_v27  ;;  %v13144_v27 = vld [vmem:[%s19592_s1 + $0x158] sm:$0xff]  }
  0x46   : > { %v1868_v50 = vshll.u32 %v1421_v34, 16  ;;  %v13960_v58 = vor.u32 %v1904_v29, %v1901_v28  ;;  %v1013_v22 = vshrl.u32 %v954_v6, 16  ;;  %v1016_v61 = vshll.u32 %v954_v6, 16  ;;  %v197_v6 = vld [vmem:[%s13654_s27 + $0x38] sm:$0xff] }
  0x47   : > { %v1863_v56 = vor.u32 %v1862_v41, %v1859_v51  ;;  %v760_v44 = vsel %vm13727_vm12, %v755_v43, %v13707_v19  ;;  %vm19600_vm3 = vcmp.ne.s16.totalorder %v13940_v23, 0  ;;  %v1867_v48 = vrot.slane %v1865_v49, 3  ;;  %v13145_v43 = vld [vmem:[%s19592_s1 + $0x118] sm:$0xff]  }
  0x48   : > { %v1870_v55 = vrot.slane %v1868_v50, 4  ;;  %v1984_v40 = vsel %vm19601_vm2, %v13825_v7, %v13960_v58  ;;  %vm13978_vm9 = vcmp.ne.s16.totalorder %v760_v44, 0  ;;  %v19971_v8 = vmov 0  ;;  %11994 = vmatpush3.bf16.msra.mxu0 %v13140_v11 }
  0x49   : > { %v19972_v8 = vsel %vm13978_vm9, 4294967295, %v19971_v8  ;;  %2970 = vmatprep.mubr.bf16.mxu0 %v1984_v40  ;;  %v1153_v12 = vsel %vm13978_vm9, %v13946_v30, 0  ;;  %v888_v14 = vsel %vm13978_vm9, %v13752_v60, 0  ;;  %v1015_v17 = vrot.slane %v1013_v22, 7  ;;  %11995 = vmatprep.subr.bf16.mxu0 %v13144_v27  ;;  %v13127_v22 = vld [vmem:[%s19592_s1 + $0x1e8] sm:$0xff]  }
  0x4a   : > { %19973 = vst [vmem:[#allocation15_spill] sm:$0xff] %v19972_v8  ;;  %v1132_v7 = vsel %vm19600_vm3, %v13752_v60, 0  ;;  %v13998_v24 = vor.u32 %v1870_v55, %v1867_v48  ;;  %v10757_v2 = vcombine.low %v1152_v31, %v1153_v12  ;;  %v10731_v20 = vcombine.low %v887_v1, %v888_v14 }
  0x4b   : > { %v10741_v26 = vcombine.low %v13946_v30, %v13962_v39  ;;  %v1018_v28 = vor.u32 %v1016_v61, %v1015_v17  ;;  %v11685_v29 = vpack.c.bf16 %v197_v6, %v196_v33  ;;  %v694_v60 = vsel %vm678_vm1, 65537, %v19608_v3 }
  0x4c   : > { %v14017_v31 = vsel %vm940_vm11, 65537, %v19608_v3  ;;  %v1872_v1 = vsel %vm19601_vm2, %v1863_v56, %v13998_v24  ;;  %v1995_v34 = vshrl.u32 %v10757_v2, 16  ;;  %v1998_v51 = vshll.u32 %v10757_v2, 16  ;;  %11996 = vmatpush3.bf16.msra.mxu0 %v13145_v43 }
  0x4d   : > { %v1976_v41 = vshrl.u32 %v10731_v20, 16  ;;  %3060 = vmatmul.mubr.bf16.vlgmr.msra.gmra.mxu1 %v1872_v1  ;;  %v1979_v42 = vshll.u32 %v10731_v20, 16  ;;  %v1019_v11 = vsel %vm13835_vm7, %v13828_v53, %v1018_v28  ;;  %v1331_v49 = vshrl.u32 %v10741_v26, 16  ;;  %11830 = vst [vmem:[#allocation2 + $0x28] sm:$0xff] %v11685_v29   ;;  %v13128_v20 = vld [vmem:[%s19592_s1 + $0x1a8] sm:$0xff]  }
  0x4e   : > { %v1334_v50 = vshll.u32 %v10741_v26, 16  ;;  %12052 = vmatpush3.bf16.msra.mxu1 %v13120_v32  ;;  %v1997_v33 = vrot.slane %v1995_v34, 3  ;;  %v2000_v56 = vrot.slane %v1998_v51, 4  ;;  %vm14033_vm11 = vcmp.ne.s16.totalorder %v1019_v11, 0  ;;  %v13149_v26 = vld [vmem:[%s19592_s1 + $0x150] sm:$0xff]   ;;  %v13151_v11 = vld [vmem:[%s19592_s1 + $0x148] sm:$0xff]  }
  0x4f   : > { %v1978_v44 = vrot.slane %v1976_v41, 3  ;;  %v19974_v61 = vmov 0  ;;  %v1981_v48 = vrot.slane %v1979_v42, 4  ;;  %v1133_v55 = vsel %vm14033_vm11, %v13823_v57, 0  ;;  %12053 = vmatprep.subr.bf16.mxu1 %v13122_v52  ;;  %11997 = vmatprep.subr.bf16.mxu0 %v13149_v26  ;;  %v198_v42 = vld [vmem:[%s13654_s27 + $0x40] sm:$0xff] }
  0x50   : > { %v19975_v61 = vsel %vm14033_vm11, 4294967295, %v19974_v61  ;;  %v1333_v40 = vrot.slane %v1331_v49, 4  ;;  %v1336_v6 = vrot.slane %v1334_v50, 5  ;;  %v14040_v12 = vor.u32 %v2000_v56, %v1997_v33 }
  0x51   : > { %19976 = vst [vmem:[#allocation16_spill] sm:$0xff] %v19975_v61  ;;  %v14042_v14 = vcombine.low %v1132_v7, %v1133_v55  ;;  %v767_v32 = vshll.u32 %v694_v60, 16  ;;  %v771_v2 = vshrl.u32 %v694_v60, 16  ;;  %v14050_v27 = vor.u32 %v1981_v48, %v1978_v44  ;;  %v13132_v7 = vld [vmem:[%s19592_s1 + $0x1e0] sm:$0xff]  }
  0x52   : > { %v14052_v28 = vor.u32 %v1336_v6, %v1333_v40  ;;  %v1020_v52 = vrot.slane %v1015_v17, 4  ;;  %v1031_v29 = vshrl.u32 %v14017_v31, 16  ;;  %v2002_v60 = vsel %vm19601_vm2, %v13831_v9, %v14040_v12  ;;  %12054 = vmatpush3.bf16.msra.mxu1 %v13123_v46  ;;  %v13150_v17 = vld [vmem:[%s19592_s1 + $0x110] sm:$0xff]   ;;  %v13133_v44 = vld [vmem:[%s19592_s1 + $0x1a0] sm:$0xff]   ;;  %v13137_v6 = vld [vmem:[%s19592_s1 + $0x1d8] sm:$0xff]  }
  0x53   : > { %v1422_v1 = vrot.slane %v14042_v14, 5  ;;  %v769_v34 = vrot.slane %v767_v32, 5  ;;  %v773_v51 = vrot.slane %v771_v2, 4  ;;  %3067 = vmatprep.mubr.bf16.mxu1 %v2002_v60  ;;  %v1983_v41 = vsel %vm19601_vm2, %v13847_v25, %v14050_v27  ;;  %12055 = vmatprep.subr.bf16.mxu1 %v13127_v22  ;;  %v199_v22 = vld [vmem:[%s13654_s27 + $0x48] sm:$0xff] }
  0x54   : > { %v1338_v9 = vsel %vm19602_vm4, %v13916_v0, %v14052_v28  ;;  %v14074_v46 = vsel %vm13835_vm7, %v1020_v52, %v13732_v37  ;;  %v14076_v43 = vrot.slane %v1031_v29, 7  ;;  %2971 = vmatmul.mubr.bf16.gmra.mxu0 %v1983_v41  ;;  %vm19978_vm15 = vcmask 1042432   ;;  %v14090_v56 = vld [vmem:[#allocation2 + $0x2c] sm:$0xf]  ;;  %v14096_v40 = vld [vmem:[#allocation2 + $0x28] sm:$0xf] }
  0x55   : > { %19977 = vst [vmem:[#allocation17_spill] sm:$0xff] %v14074_v46  ;;  %v1423_v25 = vsel %vm19978_vm15, %v1420_v54, %v1422_v1  ;;  %v1950_v49 = vshrl.u32 %v1338_v9, 16  ;;  %v1953_v50 = vshll.u32 %v1338_v9, 16  ;;  %v770_v33 = vsel %vm13727_vm12, %v13736_v45, %v769_v34  ;;  %11998 = vmatpush3.bf16.msra.mxu0 %v13150_v17 }
  0x56   : > { %v1986_v48 = vshrl.u32 %v1423_v25, 16  ;;  %v1989_v55 = vshll.u32 %v1423_v25, 16  ;;  %v774_v10 = vor.u32 %v773_v51, %v769_v34  ;;  %vm14098_vm1 = vcmp.ne.s16.totalorder %v770_v33, 0  ;;  %12056 = vmatpush3.bf16.msra.mxu1 %v13128_v20  ;;  %11999 = vmatprep.subr.bf16.mxu0 %v13151_v11  ;;  %v13153_v20 = vld [vmem:[%s19592_s1 + $0x108] sm:$0xff]   ;;  %v13142_v25 = vld [vmem:[%s19592_s1 + $0x1d0] sm:$0xff]  }
  0x57   : > { %v19979_v54 = vmov 0  ;;  %v1952_v32 = vrot.slane %v1950_v49, 3  ;;  %v1955_v2 = vrot.slane %v1953_v50, 4  ;;  %v1154_v26 = vsel %vm14098_vm1, %v13962_v39, 0  ;;  %12057 = vmatprep.subr.bf16.mxu1 %v13132_v7 }
  0x58   : > { %v19980_v54 = vsel %vm14098_vm1, 4294967295, %v19979_v54  ;;  %v889_v52 = vsel %vm14098_vm1, %v13823_v57, 0  ;;  %v1988_v29 = vrot.slane %v1986_v48, 3  ;;  %v1991_v60 = vrot.slane %v1989_v55, 4  ;;  %v13138_v57 = vld [vmem:[%s19592_s1 + $0x198] sm:$0xff]   ;;  %v13155_v48 = vld [vmem:[%s19592_s1 + $0x140] sm:$0xff]  }
  0x59   : > { %19981 = vst [vmem:[#allocation18_spill] sm:$0xff] %v19980_v54  ;;  %v775_v34 = vrot.slane %v774_v10, 4  ;;  %v1034_v51 = vshll.u32 %v14017_v31, 16  ;;  %v14112_v41 = vor.u32 %v1955_v2, %v1952_v32  ;;  %vm19599_vm8 = vcmp.ne.s16.totalorder %v14074_v46, 0  ;;  %12000 = vmatpush3.bf16.msra.mxu0 %v13153_v20 }
  0x5a   : > { %v10742_v17 = vcombine.low %v14096_v40, %v14090_v56  ;;  %v11690_v9 = vpack.c.bf16 %v199_v22, %v198_v42  ;;  %v14123_v11 = vor.u32 %v1991_v60, %v1988_v29  ;;  %v1134_v42 = vsel %vm19599_vm8, %v13946_v30, 0  ;;  %12058 = vmatpush3.bf16.msra.mxu1 %v13133_v44  ;;  %12001 = vmatprep.subr.bf16.mxu0 %v13155_v48 }
  0x5b   : > { %v780_v31 = vsel %vm13727_vm12, %v775_v34, %v13707_v19  ;;  %v1036_v7 = vor.u32 %v1034_v51, %v14076_v43  ;;  %v14138_v49 = vsel %vm19601_vm2, %v13960_v58, %v14112_v41  ;;  %v19983_v50 = vmov 0  ;;  %12059 = vmatprep.subr.bf16.mxu1 %v13137_v6  ;;  %v13156_v34 = vld [vmem:[%s19592_s1 + $0x100] sm:$0xff]  }
  0x5c   : > { %19982 = vst [vmem:[#allocation19_spill] sm:$0xff] %v14138_v49  ;;  %vm14140_vm15 = vcmp.ne.s16.totalorder %v780_v31, 0  ;;  %v1340_v33 = vshrl.u32 %v10742_v17, 16  ;;  %v1343_v22 = vshll.u32 %v10742_v17, 16  ;;  %11831 = vst [vmem:[#allocation2 + $0x30] sm:$0xff] %v11690_v9   ;;  %v1993_v55 = vsel %vm19601_vm2, %v13998_v24, %v14123_v11  ;;  %2978 = vmatprep.mubr.bf16.mxu0 %v14138_v49  ;;  %v13147_v17 = vld [vmem:[%s19592_s1 + $0x1c8] sm:$0xff]  }
  0x5d   : > { %v19984_v50 = vsel %vm14140_vm15, 4294967295, %v19983_v50  ;;  %v1155_v10 = vsel %vm14140_vm15, %v14096_v40, 0  ;;  %v890_v32 = vsel %vm14140_vm15, %v13946_v30, 0  ;;  %v1037_v44 = vsel %vm13835_vm7, %v13828_v53, %v1036_v7  ;;  %3068 = vmatmul.mubr.bf16.gmra.mxu1 %v1993_v55  ;;  %12002 = vmatpush3.bf16.msra.mxu0 %v13156_v34  ;;  %v13148_v34 = vld [vmem:[%s19592_s1 + $0x188] sm:$0xff]  }
  0x5e   : > { %19985 = vst [vmem:[#allocation20_spill] sm:$0xff] %v19984_v50  ;;  %v10758_v2 = vcombine.low %v1154_v26, %v1155_v10  ;;  %v10732_v29 = vcombine.low %v889_v52, %v890_v32  ;;  %vm14160_vm8 = vcmp.ne.s16.totalorder %v1037_v44, 0  ;;  %v19986_v24 = vmov 0  ;;  %v13143_v52 = vld [vmem:[%s19592_s1 + $0x190] sm:$0xff]   ;;  %12060 = vmatpush3.bf16.msra.mxu1 %v13138_v57 }
  0x5f   : > { %v19987_v24 = vsel %vm14160_vm8, 4294967295, %v19986_v24  ;;  %v1342_v60 = vrot.slane %v1340_v33, 4  ;;  %v1135_v30 = vsel %vm14160_vm8, %v13962_v39, 0  ;;  %v1345_v51 = vrot.slane %v1343_v22, 5  ;;  %12061 = vmatprep.subr.bf16.mxu1 %v13142_v25 }
  0x60   : > { %19988 = vst [vmem:[#allocation21_spill] sm:$0xff] %v19987_v24  ;;  %v459_v6 = vand.u32 15, %v13687_v62  ;;  %v466_v26 = vand.u32 15, %v13690_v63  ;;  %v2059_v9 = vshrl.u32 %v10758_v2, 16  ;;  %v2062_v20 = vshll.u32 %v10758_v2, 16  ;;  %v13161_v62 = vld [vmem:[%s19592_s1 + $0x238] sm:$0xff]  }
  0x61   : > { %v2041_v31 = vshrl.u32 %v10732_v29, 16  ;;  %v2044_v7 = vshll.u32 %v10732_v29, 16  ;;  %v14178_v33 = vcombine.low %v1134_v42, %v1135_v30  ;;  %v14180_v22 = vor.u32 %v1345_v51, %v1342_v60  ;;  %12947 = vmatprep.subr.bf16.mxu0 %v13161_v62 }
  0x62   : > { %vm599_vm3 = vcmp.ge.s32.totalorder %v459_v6, 1  ;;  %vm14182_vm2 = vcmp.le.s32.totalorder %v466_v26, 14  ;;  %v2061_v63 = vrot.slane %v2059_v9, 3  ;;  %v2064_v48 = vrot.slane %v2062_v20, 4  ;;  %12062 = vmatpush3.bf16.msra.mxu1 %v13143_v52  ;;  %v13152_v6 = vld [vmem:[%s19592_s1 + $0x1c0] sm:$0xff]  }
  0x63   : > { %v2043_v55 = vrot.slane %v2041_v31, 3  ;;  %v2046_v10 = vrot.slane %v2044_v7, 4  ;;  %vm680_vm4 = vmpackc.low %vm599_vm3, %vm599_vm3  ;;  %v19607_v32 = vrot.slane %v14178_v33, 5  ;;  %vm19991_vm15 = vsmask.f32 3328  ;;  %12063 = vmatprep.subr.bf16.mxu1 %v13147_v17 }
  0x64   : > { %v1347_v57 = vsel %vm19991_vm15, %v14052_v28, %v14180_v22  ;;  %v696_v42 = vsel %vm680_vm4, 65537, %v19608_v3  ;;  %vm942_vm1 = vmpackc.low %vm14182_vm2, %vm14182_vm2  ;;  %v1038_v44 = vrot.slane %v14076_v43, 4  ;;  %v14195_v25 = vor.u32 %v2064_v48, %v2061_v63  ;;  %v14217_v7 = vld [vmem:[#allocation2 + $0x34] sm:$0xf] }
  0x65   : > { %v14197_v2 = vor.u32 %v2046_v10, %v2043_v55  ;;  %v2023_v29 = vshrl.u32 %v1347_v57, 16  ;;  %v2026_v60 = vshll.u32 %v1347_v57, 16  ;;  %vm19992_vm4 = vcmask 1042432   ;;  %v200_v55 = vld [vmem:[%s13654_s27 + $0x50] sm:$0xff]  ;;  %v13154_v10 = vld [vmem:[%s19592_s1 + $0x180] sm:$0xff]  }
  0x66   : > { %v1425_v28 = vsel %vm19992_vm4, %v1422_v1, %v19607_v32  ;;  %v787_v30 = vshll.u32 %v696_v42, 16  ;;  %v791_v51 = vshrl.u32 %v696_v42, 16  ;;  %v958_v43 = vsel %vm942_vm1, 65537, %v19608_v3  ;;  %12064 = vmatpush3.bf16.msra.mxu1 %v13148_v34  ;;  %v14233_v42 = vld [vmem:[#allocation2 + $0x30] sm:$0xf] }
  0x67   : > { %vm19993_vm2 = vsmask.f32 4352  ;;  %v2050_v52 = vshrl.u32 %v1425_v28, 16  ;;  %v2053_v1 = vshll.u32 %v1425_v28, 16  ;;  %v2025_v9 = vrot.slane %v2023_v29, 3  ;;  %12065 = vmatprep.subr.bf16.mxu1 %v13152_v6 }
  0x68   : > { %v2066_v26 = vsel %vm19993_vm2, %v14040_v12, %v14195_v25  ;;  %vm19994_vm3 = vmmov %vm19993_vm2  ;;  %v2028_v20 = vrot.slane %v2026_v60, 4  ;;  %v789_v17 = vrot.slane %v787_v30, 5  ;;  %v793_v31 = vrot.slane %v791_v51, 4 }
  0x69   : > { %v2048_v14 = vsel %vm19994_vm3, %v14050_v27, %v14197_v2  ;;  %3075 = vmatprep.mubr.bf16.mxu1 %v2066_v26  ;;  %v2052_v12 = vrot.slane %v2050_v52, 3  ;;  %v2055_v63 = vrot.slane %v2053_v1, 4  ;;  %v14225_v27 = vsel %vm13835_vm7, %v1038_v44, %v13732_v37  ;;  %v13157_v44 = vld [vmem:[%s19592_s1 + $0x78] sm:$0xff]   ;;  %vm19999_vm4 = vmmov %vm19993_vm2 }
  0x6a   : > { %2979 = vmatmul.mubr.bf16.gmra.mxu0 %v2048_v14  ;;  %19995 = vst [vmem:[#allocation22_spill] sm:$0xff] %v14225_v27  ;;  %v1049_v48 = vshrl.u32 %v958_v43, 16  ;;  %v14231_v57 = vor.u32 %v2028_v20, %v2025_v9  ;;  %v790_v29 = vsel %vm13727_vm12, %v13736_v45, %v789_v17  ;;  %v794_v60 = vor.u32 %v793_v31, %v789_v17  ;;  %v201_v26 = vld [vmem:[%s13654_s27 + $0x58] sm:$0xff] }
  0x6b   : > { %v1052_v28 = vshll.u32 %v958_v43, 16  ;;  %v14241_v34 = vor.u32 %v2055_v63, %v2052_v12  ;;  %vm14243_vm1 = vcmp.ne.s16.totalorder %v790_v29, 0  ;;  %v19996_v30 = vmov 0  ;;  %12066 = vmatpush3.bf16.msra.mxu1 %v13154_v10 }
  0x6c   : > { %v19997_v30 = vsel %vm14243_vm1, 4294967295, %v19996_v30  ;;  %v14247_v51 = vrot.slane %v1049_v48, 7  ;;  %vm19610_vm15 = vcmp.ne.s16.totalorder %v14225_v27, 0  ;;  %v14254_v43 = vsel %vm19999_vm4, %v14112_v41, %v14231_v57  ;;  %12131 = vmatprep.subr.bf16.mxu1 %v13157_v44 }
  0x6d   : > { %19998 = vst [vmem:[#allocation23_spill] sm:$0xff] %v19997_v30  ;;  %v795_v6 = vrot.slane %v794_v60, 4  ;;  %v1156_v14 = vsel %vm14243_vm1, %v14090_v56, 0  ;;  %v891_v52 = vsel %vm14243_vm1, %v13962_v39, 0  ;;  %v2057_v1 = vsel %vm19993_vm2, %v14123_v11, %v14241_v34  ;;  %2986 = vmatprep.mubr.bf16.mxu0 %v14254_v43 }
  0x6e   : > { %v1054_v9 = vor.u32 %v1052_v28, %v14247_v51  ;;  %v1136_v20 = vsel %vm19610_vm15, %v14096_v40, 0  ;;  %v10743_v17 = vcombine.low %v14233_v42, %v14217_v7  ;;  %3076 = vmatmul.mubr.bf16.gmra.mxu1 %v2057_v1  ;;  %v11695_v31 = vpack.c.bf16 %v201_v26, %v200_v55 }
  0x6f   : > { %v800_v39 = vsel %vm13727_vm12, %v795_v6, %v13707_v19  ;;  %v393_v11 = vadd.s32 80, %v13568_v15  ;;  %v394_v62 = vadd.s32 88, %v13568_v15  ;;  %v20000_v12 = vmov 0 }
  0x70   : > { %vm14277_vm3 = vcmp.ne.s16.totalorder %v800_v39, 0  ;;  %v1055_v63 = vsel %vm13835_vm7, %v13828_v53, %v1054_v9  ;;  %v1349_v48 = vshrl.u32 %v10743_v17, 16  ;;  %v1352_v10 = vshll.u32 %v10743_v17, 16  ;;  %11832 = vst [vmem:[#allocation2 + $0x38] sm:$0xff] %v11695_v31  }
  0x71   : > { %v20001_v12 = vsel %vm14277_vm3, 4294967295, %v20000_v12  ;;  %v1157_v29 = vsel %vm14277_vm3, %v14233_v42, 0  ;;  %v892_v55 = vsel %vm14277_vm3, %v14096_v40, 0  ;;  %vm14290_vm4 = vcmp.ne.s16.totalorder %v1055_v63, 0 }
  0x72   : > { %20002 = vst [vmem:[#allocation24_spill] sm:$0xff] %v20001_v12  ;;  %v20003_v60 = vmov 0  ;;  %v473_v28 = vand.u32 15, %v393_v11  ;;  %v10759_v44 = vcombine.low %v1156_v14, %v1157_v29  ;;  %v10733_v26 = vcombine.low %v891_v52, %v892_v55 }
  0x73   : > { %v20004_v60 = vsel %vm14290_vm4, 4294967295, %v20003_v60  ;;  %v1137_v6 = vsel %vm14290_vm4, %v14090_v56, 0  ;;  %v1351_v1 = vrot.slane %v1349_v48, 4  ;;  %v1354_v17 = vrot.slane %v1352_v10, 5 }
  0x74   : > { %20005 = vst [vmem:[#allocation25_spill] sm:$0xff] %v20004_v60  ;;  %v14297_v9 = vcombine.low %v1136_v20, %v1137_v6  ;;  %vm601_vm2 = vcmp.ge.s32.totalorder %v473_v28, 1  ;;  %v480_v39 = vand.u32 15, %v394_v62  ;;  %v2122_v32 = vshrl.u32 %v10759_v44, 16 }
  0x75   : > { %v2125_v40 = vshll.u32 %v10759_v44, 16  ;;  %v2104_v63 = vshrl.u32 %v10733_v26, 16  ;;  %v2107_v3 = vshll.u32 %v10733_v26, 16  ;;  %vm682_vm15 = vmpackc.low %vm601_vm2, %vm601_vm2  ;;  %v14300_v11 = vor.u32 %v1354_v17, %v1351_v1 }
  0x76   : > { %v19616_v31 = vrot.slane %v14297_v9, 5  ;;  %v20006_v14 = vmov 0   ;;  %vm14303_vm3 = vcmp.le.s32.totalorder %v480_v39, 14  ;;  %v2124_v20 = vrot.slane %v2122_v32, 3 }
  0x77   : > { %v698_v52 = vsel %vm682_vm15, 65537, %v20006_v14  ;;  %v2127_v48 = vrot.slane %v2125_v40, 4  ;;  %v2106_v10 = vrot.slane %v2104_v63, 3  ;;  %v2109_v55 = vrot.slane %v2107_v3, 4 }
  0x78   : > { %v20009_v62 = vrot.slane %v14178_v33, 5  ;;  %vm20010_vm1 = vcmask 1042432   ;;  %vm20011_vm2 = vsmask.f32 3328  ;;  %v807_v26 = vshll.u32 %v698_v52, 16 }
  0x79   : > { %v1356_v44 = vsel %vm20011_vm2, %v14180_v22, %v14300_v11  ;;  %v811_v6 = vshrl.u32 %v698_v52, 16  ;;  %v14315_v1 = vor.u32 %v2127_v48, %v2124_v20  ;;  %v14317_v17 = vor.u32 %v2109_v55, %v2106_v10  ;;  %v14328_v48 = vld [vmem:[#allocation2 + $0x3c] sm:$0xf] }
  0x7a   : > { %v1427_v28 = vsel %vm20010_vm1, %v20009_v62, %v19616_v31  ;;  %v2086_v40 = vshrl.u32 %v1356_v44, 16  ;;  %v2089_v3 = vshll.u32 %v1356_v44, 16  ;;  %v809_v63 = vrot.slane %v807_v26, 5  ;;  %vm944_vm1 = vmpackc.low %vm14303_vm3, %vm14303_vm3  ;;  %v202_v26 = vld [vmem:[%s13654_s27 + $0x60] sm:$0xff] }
  0x7b   : > { %v2113_v32 = vshrl.u32 %v1427_v28, 16  ;;  %v2116_v39 = vshll.u32 %v1427_v28, 16  ;;  %v813_v49 = vrot.slane %v811_v6, 4  ;;  %vm20012_vm15 = vsmask.f32 4352 }
  0x7c   : > { %v2129_v33 = vsel %vm20012_vm15, %v14195_v25, %v14315_v1  ;;  %vm20013_vm2 = vmmov %vm20012_vm15  ;;  %v2088_v10 = vrot.slane %v2086_v40, 3  ;;  %v2091_v29 = vrot.slane %v2089_v3, 4  ;;  %v810_v55 = vsel %vm13727_vm12, %v13736_v45, %v809_v63  ;;  %v203_v40 = vld [vmem:[%s13654_s27 + $0x68] sm:$0xff] }
  0x7d   : > { %v2111_v22 = vsel %vm20013_vm2, %v14197_v2, %v14317_v17  ;;  %v2115_v52 = vrot.slane %v2113_v32, 3  ;;  %v2118_v20 = vrot.slane %v2116_v39, 4  ;;  %3083 = vmatprep.mubr.bf16.mxu1 %v2129_v33  ;;  %v814_v62 = vor.u32 %v813_v49, %v809_v63  ;;  %vm20017_vm15 = vmmov %vm20013_vm2  ;;  %v14354_v63 = vld [vmem:[#allocation2 + $0x38] sm:$0xf] }
  0x7e   : > { %2987 = vmatmul.mubr.bf16.gmra.mxu0 %v2111_v22  ;;  %vm14335_vm3 = vcmp.ne.s16.totalorder %v810_v55, 0  ;;  %v20014_v25 = vmov 0  ;;  %v960_v2 = vsel %vm944_vm1, 65537, %v20006_v14  ;;  %v1056_v44 = vrot.slane %v14247_v51, 4  ;;  %20018 = vst [vmem:[#allocation27_spill] sm:$0xff] %v14354_v63  ;;  %vm20020_vm1 = vmmov %vm20013_vm2 }
  0x7f   : > { %v14333_v28 = vor.u32 %v2118_v20, %v2115_v52  ;;  %v20015_v25 = vsel %vm14335_vm3, 4294967295, %v20014_v25  ;;  %v14342_v6 = vor.u32 %v2091_v29, %v2088_v10  ;;  %v815_v32 = vrot.slane %v814_v62, 4 }
  0x80   : > { %20016 = vst [vmem:[#allocation26_spill] sm:$0xff] %v20015_v25  ;;  %v1158_v39 = vsel %vm14335_vm3, %v14217_v7, 0  ;;  %v893_v49 = vsel %vm14335_vm3, %v14090_v56, 0  ;;  %v14359_v51 = vsel %vm13835_vm7, %v1056_v44, %v13732_v37  ;;  %v1067_v33 = vshrl.u32 %v960_v2, 16 }
  0x81   : > { %v2120_v3 = vsel %vm20017_vm15, %v14241_v34, %v14333_v28  ;;  %20019 = vst [vmem:[#allocation28_spill] sm:$0xff] %v14359_v51  ;;  %v1070_v22 = vshll.u32 %v960_v2, 16  ;;  %v14364_v52 = vsel %vm20020_vm1, %v14231_v57, %v14342_v6  ;;  %v820_v56 = vsel %vm13727_vm12, %v815_v32, %v13707_v19 }
  0x82   : > { %3084 = vmatmul.mubr.bf16.gmra.mxu1 %v2120_v3  ;;  %20021 = vst [vmem:[#allocation29_spill] sm:$0xff] %v14364_v52  ;;  %vm19627_vm2 = vcmp.ne.s16.totalorder %v14359_v51, 0  ;;  %v10744_v34 = vcombine.low %v14354_v63, %v14328_v48  ;;  %2994 = vmatprep.mubr.bf16.mxu0 %v14364_v52  ;;  %vm14373_vm15 = vcmp.ne.s16.totalorder %v820_v56, 0  ;;  %v20022_v20 = vmov 0 }
  0x83   : > { %v20023_v20 = vsel %vm14373_vm15, 4294967295, %v20022_v20  ;;  %v1069_v10 = vrot.slane %v1067_v33, 7  ;;  %v1138_v57 = vsel %vm19627_vm2, %v14233_v42, 0  ;;  %v11700_v29 = vpack.c.bf16 %v203_v40, %v202_v26 }
  0x84   : > { %20024 = vst [vmem:[#allocation30_spill] sm:$0xff] %v20023_v20  ;;  %v1159_v55 = vsel %vm14373_vm15, %v14354_v63, 0  ;;  %v894_v62 = vsel %vm14373_vm15, %v14233_v42, 0  ;;  %v1358_v2 = vshrl.u32 %v10744_v34, 16  ;;  %v1361_v44 = vshll.u32 %v10744_v34, 16 }
  0x85   : > { %v10760_v32 = vcombine.low %v1158_v39, %v1159_v55  ;;  %v10734_v3 = vcombine.low %v893_v49, %v894_v62  ;;  %v1072_v56 = vor.u32 %v1070_v22, %v1069_v10  ;;  %11833 = vst [vmem:[#allocation2 + $0x40] sm:$0xff] %v11700_v29   ;;  %v395_v33 = vadd.s32 96, %v13568_v15 }
  0x86   : > { %v1360_v31 = vrot.slane %v1358_v2, 4  ;;  %v1363_v52 = vrot.slane %v1361_v44, 5  ;;  %v396_v26 = vadd.s32 104, %v13568_v15  ;;  %v1074_v40 = vrot.slane %v1069_v10, 4 }
  0x87   : > { %v2185_v25 = vshrl.u32 %v10760_v32, 16  ;;  %v2188_v51 = vshll.u32 %v10760_v32, 16  ;;  %v2167_v12 = vshrl.u32 %v10734_v3, 16  ;;  %v2170_v30 = vshll.u32 %v10734_v3, 16 }
  0x88   : > { %v1073_v42 = vsel %vm13835_vm7, %v13828_v53, %v1072_v56  ;;  %v14391_v34 = vor.u32 %v1363_v52, %v1360_v31  ;;  %v487_v39 = vand.u32 15, %v395_v33  ;;  %v494_v49 = vand.u32 15, %v396_v26 }
  0x89   : > { %v2187_v22 = vrot.slane %v2185_v25, 3  ;;  %v2190_v29 = vrot.slane %v2188_v51, 4  ;;  %v2169_v55 = vrot.slane %v2167_v12, 3  ;;  %v2172_v62 = vrot.slane %v2170_v30, 4 }
  0x8a   : > { %vm14393_vm1 = vcmp.ne.s16.totalorder %v1073_v42, 0  ;;  %v20025_v2 = vmov 0  ;;  %vm20028_vm2 = vsmask.f32 3328  ;;  %vm603_vm15 = vcmp.ge.s32.totalorder %v487_v39, 1 }
  0x8b   : > { %v20026_v2 = vsel %vm14393_vm1, 4294967295, %v20025_v2  ;;  %v1365_v10 = vsel %vm20028_vm2, %v14300_v11, %v14391_v34  ;;  %vm14400_vm3 = vcmp.le.s32.totalorder %v494_v49, 14  ;;  %v14404_v31 = vor.u32 %v2190_v29, %v2187_v22  ;;  %vm684_vm4 = vmpackc.low %vm603_vm15, %vm603_vm15 }
  0x8c   : > { %20027 = vst [vmem:[#allocation31_spill] sm:$0xff] %v20026_v2  ;;  %v14406_v52 = vor.u32 %v2172_v62, %v2169_v55  ;;  %v1139_v30 = vsel %vm14393_vm1, %v14217_v7, 0  ;;  %v2149_v12 = vshrl.u32 %v1365_v10, 16  ;;  %v2152_v51 = vshll.u32 %v1365_v10, 16  ;;  %vm946_vm2 = vmpackc.low %vm14400_vm3, %vm14400_vm3  ;;  %v14430_v49 = vld [vmem:[#allocation2 + $0x44] sm:$0xf] }
  0x8d   : > { %v14411_v25 = vcombine.low %v1138_v57, %v1139_v30  ;;  %v700_v11 = vsel %vm684_vm4, 65537, %v20006_v14  ;;  %v14420_v32 = vsel %vm13835_vm7, %v1074_v40, %v13732_v37  ;;  %vm20032_vm8 = vsmask.f32 4352  ;;  %v14432_v22 = vld [vmem:[#allocation2 + $0x40] sm:$0xf] }
  0x8e   : > { %20031 = vst [vmem:[#allocation32_spill] sm:$0xff] %v14420_v32  ;;  %v2192_v3 = vsel %vm20032_vm8, %v14315_v1, %v14404_v31  ;;  %vm20033_vm15 = vmmov %vm20032_vm8  ;;  %v2151_v56 = vrot.slane %v2149_v12, 3  ;;  %v827_v33 = vshll.u32 %v700_v11, 16  ;;  %v2154_v42 = vrot.slane %v2152_v51, 4 }
  0x8f   : > { %v2174_v57 = vsel %vm20033_vm15, %v14317_v17, %v14406_v52  ;;  %3091 = vmatprep.mubr.bf16.mxu1 %v2192_v3  ;;  %v19636_v26 = vrot.slane %v14411_v25, 5  ;;  %v831_v39 = vshrl.u32 %v700_v11, 16  ;;  %v962_v40 = vsel %vm946_vm2, 65537, %v20006_v14  ;;  %vm20036_vm3 = vmmov %vm20033_vm15 }
  0x90   : > { %2995 = vmatmul.mubr.bf16.gmra.mxu0 %v2174_v57  ;;  %v829_v1 = vrot.slane %v827_v33, 5  ;;  %v1085_v29 = vshrl.u32 %v962_v40, 16  ;;  %v1088_v55 = vshll.u32 %v962_v40, 16  ;;  %vm19643_vm8 = vcmp.ne.s16.totalorder %v14420_v32, 0  ;;  %v204_v57 = vld [vmem:[%s13654_s27 + $0x70] sm:$0xff]  ;;  %vm20041_vm15 = vmmov %vm20036_vm3 }
  0x91   : > { %v20034_v17 = vrot.slane %v14297_v9, 5  ;;  %vm20035_vm4 = vcmask 1042432   ;;  %v14440_v10 = vor.u32 %v2154_v42, %v2151_v56  ;;  %v833_v44 = vrot.slane %v831_v39, 4  ;;  %v205_v39 = vld [vmem:[%s13654_s27 + $0x78] sm:$0xff] }
  0x92   : > { %v1140_v30 = vsel %vm19643_vm8, %v14354_v63, 0  ;;  %v830_v11 = vsel %vm13727_vm12, %v13736_v45, %v829_v1  ;;  %v14448_v3 = vrot.slane %v1085_v29, 7  ;;  %v20038_v33 = vmov 0 }
  0x93   : > { %v1429_v62 = vsel %vm20035_vm4, %v20034_v17, %v19636_v26  ;;  %v14454_v9 = vsel %vm20036_vm3, %v14342_v6, %v14440_v10  ;;  %v834_v56 = vor.u32 %v833_v44, %v829_v1  ;;  %vm14456_vm2 = vcmp.ne.s16.totalorder %v830_v11, 0 }
  0x94   : > { %v2176_v12 = vshrl.u32 %v1429_v62, 16  ;;  %v2179_v51 = vshll.u32 %v1429_v62, 16  ;;  %20037 = vst [vmem:[#allocation33_spill] sm:$0xff] %v14454_v9  ;;  %v20039_v33 = vsel %vm14456_vm2, 4294967295, %v20038_v33  ;;  %v10745_v42 = vcombine.low %v14432_v22, %v14430_v49  ;;  %3002 = vmatprep.mubr.bf16.mxu0 %v14454_v9 }
  0x95   : > { %20040 = vst [vmem:[#allocation34_spill] sm:$0xff] %v20039_v33  ;;  %v1160_v29 = vsel %vm14456_vm2, %v14328_v48, 0  ;;  %v895_v6 = vsel %vm14456_vm2, %v14217_v7, 0  ;;  %v835_v1 = vrot.slane %v834_v56, 4  ;;  %v1090_v62 = vor.u32 %v1088_v55, %v14448_v3 }
  0x96   : > { %v2178_v40 = vrot.slane %v2176_v12, 3  ;;  %v2181_v17 = vrot.slane %v2179_v51, 4  ;;  %v1367_v44 = vshrl.u32 %v10745_v42, 16  ;;  %v1370_v11 = vshll.u32 %v10745_v42, 16 }
  0x97   : > { %v11705_v32 = vpack.c.bf16 %v205_v39, %v204_v57  ;;  %v397_v12 = vadd.s32 112, %v13568_v15  ;;  %v398_v51 = vadd.s32 120, %v13568_v15  ;;  %v840_v9 = vsel %vm13727_vm12, %v835_v1, %v13707_v19 }
  0x98   : > { %v14471_v26 = vor.u32 %v2181_v17, %v2178_v40  ;;  %v1091_v7 = vsel %vm13835_vm7, %v13828_v53, %v1090_v62  ;;  %v1369_v56 = vrot.slane %v1367_v44, 4  ;;  %v1372_v33 = vrot.slane %v1370_v11, 5 }
  0x99   : > { %vm14484_vm4 = vcmp.ne.s16.totalorder %v840_v9, 0  ;;  %v20042_v57 = vmov 0  ;;  %vm14488_vm3 = vcmp.ne.s16.totalorder %v1091_v7, 0  ;;  %v20045_v15 = vmov 0  ;;  %11834 = vst [vmem:[#allocation2 + $0x48] sm:$0xff] %v11705_v32  }
  0x9a   : > { %v2183_v55 = vsel %vm20041_vm15, %v14333_v28, %v14471_v26  ;;  %v20043_v57 = vsel %vm14484_vm4, 4294967295, %v20042_v57  ;;  %v20046_v15 = vsel %vm14488_vm3, 4294967295, %v20045_v15  ;;  %v501_v42 = vand.u32 15, %v397_v12 }
  0x9b   : > { %20044 = vst [vmem:[#allocation35_spill] sm:$0xff] %v20043_v57  ;;  %20047 = vst [vmem:[#allocation36_spill] sm:$0xff] %v20046_v15  ;;  %3092 = vmatmul.mubr.bf16.gmra.mxu1 %v2183_v55  ;;  %v1161_v39 = vsel %vm14484_vm4, %v14432_v22, 0  ;;  %v896_v40 = vsel %vm14484_vm4, %v14354_v63, 0  ;;  %v1141_v28 = vsel %vm14488_vm3, %v14328_v48, 0  ;;  %v14501_v9 = vor.u32 %v1372_v33, %v1369_v56 }
  0x9c   : > { %v10761_v17 = vcombine.low %v1160_v29, %v1161_v39  ;;  %v10735_v1 = vcombine.low %v895_v6, %v896_v40  ;;  %v14503_v62 = vcombine.low %v1140_v30, %v1141_v28  ;;  %vm605_vm15 = vcmp.ge.s32.totalorder %v501_v42, 1 }
  0x9d   : > { %vm20048_vm8 = vsmask.f32 3328  ;;  %vm686_vm2 = vmpackc.low %vm605_vm15, %vm605_vm15  ;;  %v508_v44 = vand.u32 15, %v398_v51  ;;  %v1092_v11 = vrot.slane %v14448_v3, 4  ;;  %v2365_v12 = vshrl.u32 %v14501_v9, 16 }
  0x9e   : > { %v1374_v32 = vsel %vm20048_vm8, %v14391_v34, %v14501_v9  ;;  %v2248_v7 = vshrl.u32 %v10761_v17, 16  ;;  %v2251_v55 = vshll.u32 %v10761_v17, 16  ;;  %v2230_v57 = vshrl.u32 %v10735_v1, 16 }
  0x9f   : > { %v2233_v33 = vshll.u32 %v10735_v1, 16  ;;  %v19661_v29 = vrot.slane %v14503_v62, 5  ;;  %v2212_v6 = vshrl.u32 %v1374_v32, 16  ;;  %v2215_v30 = vshll.u32 %v1374_v32, 16 }
  0xa0   : > { %v702_v56 = vsel %vm686_vm2, 65537, %v20006_v14  ;;  %v2250_v42 = vrot.slane %v2248_v7, 3  ;;  %v2253_v39 = vrot.slane %v2251_v55, 4  ;;  %v2232_v40 = vrot.slane %v2230_v57, 3 }
  0xa1   : > { %v2235_v34 = vrot.slane %v2233_v33, 4  ;;  %v20049_v3 = vrot.slane %v14411_v25, 5  ;;  %vm20050_vm8 = vcmask 1042432   ;;  %v2214_v28 = vrot.slane %v2212_v6, 3 }
  0xa2   : > { %v2217_v17 = vrot.slane %v2215_v30, 4  ;;  %v847_v15 = vshll.u32 %v702_v56, 16  ;;  %v14517_v1 = vor.u32 %v2253_v39, %v2250_v42  ;;  %v851_v57 = vshrl.u32 %v702_v56, 16  ;;  %v14538_v56 = vld [vmem:[#allocation2 + $0x4c] sm:$0xf] }
  0xa3   : > { %v1431_v51 = vsel %vm20050_vm8, %v20049_v3, %v19661_v29  ;;  %v14519_v20 = vor.u32 %v2235_v34, %v2232_v40  ;;  %vm622_vm2 = vcmp.le.s32.totalorder %v508_v44, 14  ;;  %vm20052_vm15 = vsmask.f32 4352 }
  0xa4   : > { %v2239_v32 = vshrl.u32 %v1431_v51, 16  ;;  %v2242_v2 = vshll.u32 %v1431_v51, 16  ;;  %v14521_v63 = vor.u32 %v2217_v17, %v2214_v28  ;;  %v849_v7 = vrot.slane %v847_v15, 5  ;;  %vm20053_vm8 = vmmov %vm20052_vm15  ;;  %v14561_v51 = vld [vmem:[#allocation2 + $0x48] sm:$0xf] }
  0xa5   : > { %v2255_v25 = vsel %vm20052_vm15, %v14404_v31, %v14517_v1  ;;  %v2237_v55 = vsel %vm20053_vm8, %v14406_v52, %v14519_v20  ;;  %vm948_vm4 = vmpackc.low %vm622_vm2, %vm622_vm2  ;;  %v853_v44 = vrot.slane %v851_v57, 4  ;;  %vm19660_vm15 = vcmp.ne.s16.totalorder %v13736_v45, 0 }
  0xa6   : > { %20051 = vst [vmem:[#allocation37_spill] sm:$0xff] %v14521_v63  ;;  %v2241_v33 = vrot.slane %v2239_v32, 3  ;;  %v2244_v6 = vrot.slane %v2242_v2, 4  ;;  %3099 = vmatprep.mubr.bf16.mxu1 %v2255_v25  ;;  %3003 = vmatmul.mubr.bf16.gmra.mxu0 %v2237_v55  ;;  %vm20054_vm3 = vmmov %vm20053_vm8  ;;  %v850_v15 = vsel %vm13727_vm12, %v13736_v45, %v849_v7  ;;  %v964_v31 = vsel %vm948_vm4, 65537, %v20006_v14 }
  0xa7   : > { %v14532_v30 = vsel %vm20054_vm3, %v14440_v10, %v14521_v63  ;;  %vm14543_vm2 = vcmp.ne.s16.totalorder %v850_v15, 0  ;;  %v20056_v2 = vmov 0  ;;  %v14550_v10 = vsel %vm13835_vm7, %v1092_v11, %v13732_v37  ;;  %vm20060_vm4 = vmmov %vm20054_vm3 }
  0xa8   : > { %20055 = vst [vmem:[#allocation38_spill] sm:$0xff] %v14532_v30  ;;  %v14540_v52 = vor.u32 %v2244_v6, %v2241_v33  ;;  %3010 = vmatprep.mubr.bf16.mxu0 %v14532_v30  ;;  %v20057_v2 = vsel %vm14543_vm2, 4294967295, %v20056_v2  ;;  %20059 = vst [vmem:[#allocation40_spill] sm:$0xff] %v14550_v10  ;;  %v1103_v42 = vshrl.u32 %v964_v31, 16  ;;  %v854_v39 = vor.u32 %v853_v44, %v849_v7 }
  0xa9   : > { %20058 = vst [vmem:[#allocation39_spill] sm:$0xff] %v20057_v2  ;;  %v1162_v14 = vsel %vm14543_vm2, %v14430_v49, 0  ;;  %v897_v40 = vsel %vm14543_vm2, %v14328_v48, 0  ;;  %v1106_v34 = vshll.u32 %v964_v31, 16  ;;  %vm19671_vm3 = vcmp.ne.s16.totalorder %v14550_v10, 0 }
  0xaa   : > { %v2246_v3 = vsel %vm20060_vm4, %v14471_v26, %v14540_v52  ;;  %v1105_v28 = vrot.slane %v1103_v42, 7  ;;  %v2367_v11 = vrot.slane %v2365_v12, 3  ;;  %v855_v17 = vrot.slane %v854_v39, 4  ;;  %v13413_v39 = vld [vmem:[#allocation2 + $0x10] sm:$0xf] }
  0xab   : > { %3100 = vmatmul.mubr.bf16.gmra.mxu1 %v2246_v3  ;;  %v1142_v32 = vsel %vm19671_vm3, %v14432_v22, 0  ;;  %v2368_v7 = vshll.u32 %v14501_v9, 16  ;;  %v1164_v26 = vsel %vm19660_vm15, %v14538_v56, 0  ;;  %v899_v25 = vsel %vm19660_vm15, %v14430_v49, 0 }
  0xac   : > { %v1108_v57 = vor.u32 %v1106_v34, %v1105_v28  ;;  %v1110_v12 = vrot.slane %v1105_v28, 4  ;;  %v860_v55 = vsel %vm13727_vm12, %v855_v17, %v13707_v19  ;;  %v10763_v6 = vcombine.low %v1164_v26, %v1164_v26 }
  0xad   : > { %v2370_v33 = vrot.slane %v2368_v7, 4  ;;  %v10737_v15 = vcombine.low %v899_v25, %v899_v25  ;;  %vm14578_vm8 = vcmp.ne.s16.totalorder %v860_v55, 0  ;;  %v20061_v44 = vmov 0  ;;  %v900_v55 = vld [vmem:[#allocation2 + $0x48] sm:$0x1] }
  0xae   : > { %v20062_v44 = vsel %vm14578_vm8, 4294967295, %v20061_v44  ;;  %v1109_v31 = vsel %vm13835_vm7, %v13828_v53, %v1108_v57  ;;  %vm14585_vm4 = vcmp.ne.s16.totalorder %v1110_v12, 0  ;;  %v20064_v42 = vmov 0 }
  0xaf   : > { %20063 = vst [vmem:[#allocation41_spill] sm:$0xff] %v20062_v44  ;;  %v20065_v42 = vsel %vm14585_vm4, 4294967295, %v20064_v42  ;;  %vm20067_vm15 = vcmp.ne.s16.totalorder %v13732_v37, 0  ;;  %v1163_v19 = vsel %vm14578_vm8, %v14561_v51, 0  ;;  %v898_v34 = vsel %vm14578_vm8, %v14432_v22, 0 }
  0xb0   : > { %20066 = vst [vmem:[#allocation42_spill] sm:$0xff] %v20065_v42  ;;  %v1166_v36 = vsel %vm20067_vm15, %v13413_v39, 0  ;;  %vm14597_vm12 = vcmp.ne.s16.totalorder %v1109_v31, 0  ;;  %v20068_v3 = vmov 0  ;;  %v2371_v53 = vor.u32 %v2370_v33, %v2367_v11 }
  0xb1   : > { %v20069_v3 = vsel %vm14597_vm12, 4294967295, %v20068_v3  ;;  %v10762_v13 = vcombine.low %v1162_v14, %v1163_v19  ;;  %v10736_v28 = vcombine.low %v897_v40, %v898_v34  ;;  %v1143_v17 = vsel %vm14597_vm12, %v14430_v49, 0 }
  0xb2   : > { %20070 = vst [vmem:[#allocation43_spill] sm:$0xff] %v20069_v3  ;;  %v2383_v7 = vshrl.u32 %v10763_v6, 16  ;;  %v10753_v57 = vcombine.low %v1142_v32, %v1143_v17  ;;  %vm20071_vm7 = vsmask.f32 4352  ;;  %v2386_v25 = vshll.u32 %v10763_v6, 16 }
  0xb3   : > { %v2372_v26 = vsel %vm20071_vm7, %v14521_v63, %v2371_v53  ;;  %v2356_v12 = vshrl.u32 %v10737_v15, 16  ;;  %v2311_v39 = vshrl.u32 %v10762_v13, 16  ;;  %v2314_v31 = vshll.u32 %v10762_v13, 16 }
  0xb4   : > { %v2293_v29 = vshrl.u32 %v10736_v28, 16  ;;  %v2296_v45 = vshll.u32 %v10736_v28, 16  ;;  %v1432_v44 = vrot.slane %v10753_v57, 5  ;;  %v2385_v11 = vrot.slane %v2383_v7, 3 }
  0xb5   : > { %v2388_v14 = vrot.slane %v2386_v25, 4  ;;  %v2358_v40 = vrot.slane %v2356_v12, 3  ;;  %v2313_v33 = vrot.slane %v2311_v39, 3  ;;  %v2316_v19 = vrot.slane %v2314_v31, 4  ;;  %v13414_v12 = vld [vmem:[#allocation2 + $0x14] sm:$0xf] }
  0xb6   : > { %v2295_v34 = vrot.slane %v2293_v29, 3  ;;  %v2298_v30 = vrot.slane %v2296_v45, 4  ;;  %v20072_v32 = vrot.slane %v14503_v62, 5  ;;  %vm20073_vm15 = vcmask 1042432   ;;  %v14613_v45 = vld [vmem:[#allocation2 + $0x18] sm:$0xf] }
  0xb7   : > { %v2389_v53 = vor.u32 %v2388_v14, %v2385_v11  ;;  %v2359_v6 = vshll.u32 %v10737_v15, 16  ;;  %v1144_v63 = vsel %vm14585_vm4, %v900_v55, 0  ;;  %v2317_v13 = vor.u32 %v2316_v19, %v2313_v33  ;;  %v14623_v14 = vld [vmem:[#allocation2 + $0x1c] sm:$0xf] }
  0xb8   : > { %v1433_v17 = vsel %vm20073_vm15, %v20072_v32, %v1432_v44  ;;  %v2299_v37 = vor.u32 %v2298_v30, %v2295_v34  ;;  %v10754_v25 = vcombine.low %v1144_v63, %v1144_v63  ;;  %v1167_v29 = vsel %vm13886_vm0, %v13414_v12, 0 }
  0xb9   : > { %v2302_v28 = vshrl.u32 %v1433_v17, 16  ;;  %v2305_v57 = vshll.u32 %v1433_v17, 16  ;;  %v2361_v7 = vrot.slane %v2359_v6, 4  ;;  %vm20074_vm7 = vcmp.ne.s16.totalorder %v13875_v35, 0  ;;  %v1183_v6 = vld [vmem:[#allocation2 + $0x14] sm:$0x8] }
  0xba   : > { %v1168_v62 = vsel %vm20074_vm7, %v14613_v45, 0  ;;  %vm20075_vm15 = vsmask.f32 4352  ;;  %v1434_v11 = vrot.slane %v10754_v25, 5  ;;  %v1169_v33 = vsel %vm13912_vm6, %v14623_v14, 0 }
  0xbb   : > { %v2318_v15 = vsel %vm20075_vm15, %v14517_v1, %v2317_v13  ;;  %vm20076_vm3 = vmmov %vm20075_vm15  ;;  %v2304_v55 = vrot.slane %v2302_v28, 3  ;;  %v2307_v39 = vrot.slane %v2305_v57, 4  ;;  %v2362_v31 = vor.u32 %v2361_v7, %v2358_v40 }
  0xbc   : > { %v2300_v30 = vsel %vm20076_vm3, %v14519_v20, %v2299_v37  ;;  %3107 = vmatprep.mubr.bf16.mxu1 %v2318_v15  ;;  %vm20077_vm4 = vmmov %vm20076_vm3  ;;  %v10765_v1 = vcombine.low %v1166_v36, %v1167_v29  ;;  %v14628_v34 = vcombine.low %v1168_v62, %v1169_v33  ;;  %v1942_v20 = vshrl.u32 %v13916_v0, 16 }
  0xbd   : > { %3011 = vmatmul.mubr.bf16.gmra.mxu0 %v2300_v30  ;;  %v2390_v63 = vsel %vm20077_vm4, %v2317_v13, %v2389_v53  ;;  %v2308_v19 = vor.u32 %v2307_v39, %v2304_v55  ;;  %v2363_v32 = vsel %vm20076_vm3, %v2299_v37, %v2362_v31  ;;  %vm20078_vm7 = vcmask 1042432   ;;  %vm20079_vm4 = vmmov %vm20076_vm3 }
  0xbe   : > { %3018 = vmatprep.mubr.bf16.mxu0 %v2372_v26  ;;  %v1435_v17 = vsel %vm20078_vm7, %v1432_v44, %v1434_v11  ;;  %v1945_v40 = vshll.u32 %v13916_v0, 16  ;;  %v1891_v53 = vshrl.u32 %v13797_v18, 16  ;;  %v1536_v26 = vrot.slane %v10765_v1, 5  ;;  %vm20080_vm15 = vmmov %vm20078_vm7 }
  0xbf   : > { %v2309_v13 = vsel %vm20079_vm4, %v14540_v52, %v2308_v19  ;;  %v2374_v28 = vshrl.u32 %v1435_v17, 16  ;;  %v2377_v57 = vshll.u32 %v1435_v17, 16  ;;  %v1537_v36 = vrot.slane %v14628_v34, 5  ;;  %vm20082_vm7 = vmmov %vm20079_vm4 }
  0xc0   : > { %3108 = vmatmul.mubr.bf16.gmra.mxu1 %v2309_v13  ;;  %v1944_v7 = vrot.slane %v1942_v20, 3  ;;  %v1947_v25 = vrot.slane %v1945_v40, 4  ;;  %v1893_v12 = vrot.slane %v1891_v53, 3  ;;  %v1908_v29 = vshrl.u32 %v1536_v26, 16 }
  0xc1   : > { %3115 = vmatprep.mubr.bf16.mxu1 %v2390_v63  ;;  %v2376_v37 = vrot.slane %v2374_v28, 3  ;;  %v2379_v44 = vrot.slane %v2377_v57, 4  ;;  %v1911_v0 = vshll.u32 %v1536_v26, 16  ;;  %v1538_v62 = vsel %vm20080_vm15, %v1536_v26, %v1537_v36  ;;  %v14661_v26 = vld [vmem:[#allocation2 + $0x24] sm:$0xf] }
  0xc2   : > { %v1948_v15 = vor.u32 %v1947_v25, %v1944_v7  ;;  %v1894_v52 = vshll.u32 %v13797_v18, 16  ;;  %vm20081_vm3 = vcmp.ne.s16.totalorder %v13705_v16, 0  ;;  %v1910_v39 = vrot.slane %v1908_v29, 3 }
  0xc3   : > { %v1186_v30 = vsel %vm20081_vm3, %v1183_v6, 0  ;;  %v2380_v55 = vor.u32 %v2379_v44, %v2376_v37  ;;  %v1913_v31 = vrot.slane %v1911_v0, 4  ;;  %v1916_v11 = vshrl.u32 %v1538_v62, 16  ;;  %vm20084_vm3 = vmmov %vm20079_vm4 }
  0xc4   : > { %v1919_v63 = vshll.u32 %v1538_v62, 16  ;;  %v1957_v33 = vsel %vm20082_vm7, %v1948_v15, %v14112_v41  ;;  %v1896_v1 = vrot.slane %v1894_v52, 4  ;;  %v1187_v20 = vsel %vm13762_vm13, %v14613_v45, 0  ;;  %v14673_v52 = vld [vmem:[#allocation2 + $0x28] sm:$0xf]  ;;  %vm20085_vm7 = vmmov %vm20084_vm3 }
  0xc5   : > { %3019 = vmatmul.mubr.bf16.gmra.mxu0 %v2363_v32  ;;  %v2381_v17 = vsel %vm20079_vm4, %v2308_v19, %v2380_v55  ;;  %v1914_v18 = vor.u32 %v1913_v31, %v1910_v39  ;;  %v1918_v40 = vrot.slane %v1916_v11, 3  ;;  %v1188_v53 = vsel %vm13766_vm14, %v14623_v14, 0  ;;  %v14653_v32 = vld [vmem:[#allocation2 + $0x20] sm:$0xf]  ;;  %v13164_v55 = vld [vmem:[%s19592_s1 + $0x230] sm:$0xff]  }
  0xc6   : > { %v1921_v6 = vrot.slane %v1919_v63, 4  ;;  %v1897_v13 = vor.u32 %v1896_v1, %v1893_v12  ;;  %v1189_v41 = vsel %vm13799_vm5, %v14653_v32, 0  ;;  %v10774_v28 = vcombine.low %v1186_v30, %v1187_v20 }
  0xc7   : > { %v10775_v57 = vcombine.low %v1188_v53, %v1189_v41  ;;  %vm20083_vm15 = vcmp.ne.s16.totalorder %v13940_v23, 0  ;;  %v1171_v7 = vsel %vm14033_vm11, %v14661_v26, 0  ;;  %v1190_v25 = vsel %vm13933_vm10, %v14661_v26, 0 }
  0xc8   : > { %v1170_v19 = vsel %vm20083_vm15, %v14653_v32, 0  ;;  %3116 = vmatmul.mubr.bf16.gmra.mxu1 %v2381_v17  ;;  %v14669_v12 = vor.u32 %v1921_v6, %v1918_v40  ;;  %v1906_v37 = vsel %vm20084_vm3, %v1897_v13, %v13960_v58  ;;  %v1925_v44 = vshrl.u32 %v10774_v28, 16  ;;  %v13158_v40 = vld [vmem:[%s19592_s1 + $0x38] sm:$0xff]  }
  0xc9   : > { %v1928_v29 = vshll.u32 %v10774_v28, 16  ;;  %3253 = vmatprep.mubr.bf16.mxu1 %v1957_v33  ;;  %v1933_v0 = vshrl.u32 %v10775_v57, 16  ;;  %v1936_v62 = vshll.u32 %v10775_v57, 16  ;;  %v10767_v15 = vcombine.low %v1170_v19, %v1171_v7  ;;  %v13159_v57 = vld [vmem:[%s19592_s1 + $0x70] sm:$0xff]   ;;  %v13421_v19 = vld [vmem:[%s19592_s1 + $0x238] sm:$0xff]  }
  0xca   : > { %v1191_v30 = vsel %vm13978_vm9, %v14673_v52, 0  ;;  %v1923_v39 = vsel %vm20085_vm7, %v1914_v18, %v14669_v12  ;;  %v1927_v58 = vrot.slane %v1925_v44, 3  ;;  %vm20086_vm4 = vcmp.ne.s16.totalorder %v14074_v46, 0  ;;  %v14689_v18 = vld [vmem:[#allocation2 + $0x2c] sm:$0xf] }
  0xcb   : > { %v1930_v31 = vrot.slane %v1928_v29, 4  ;;  %v10776_v11 = vcombine.low %v1190_v25, %v1191_v30  ;;  %3156 = vmatprep.mubr.bf16.mxu0 %v1923_v39  ;;  %v1935_v63 = vrot.slane %v1933_v0, 3  ;;  %v1938_v33 = vrot.slane %v1936_v62, 4  ;;  %v13160_v0 = vld [vmem:[%s19592_s1 + $0x30] sm:$0xff]  }
  0xcc   : > { %v1539_v1 = vrot.slane %v10767_v15, 5  ;;  %v1172_v20 = vsel %vm20086_vm4, %v14673_v52, 0  ;;  %vm20087_vm15 = vnez %v19987_v24  ;;  %vm20088_vm3 = vcmask 1042432   ;;  %v14710_v15 = vld [vmem:[#allocation2 + $0x30] sm:$0xf] }
  0xcd   : > { %3157 = vmatmul.mubr.bf16.vlgmr.msra.gmra.mxu0 %v1906_v37  ;;  %v1931_v17 = vor.u32 %v1930_v31, %v1927_v58  ;;  %v2014_v53 = vshrl.u32 %v10776_v11, 16  ;;  %v2017_v6 = vshll.u32 %v10776_v11, 16  ;;  %v1173_v13 = vsel %vm20087_vm15, %v14689_v18, 0  ;;  %v13167_v58 = vld [vmem:[%s19592_s1 + $0x228] sm:$0xff]  }
  0xce   : > { %v1939_v41 = vor.u32 %v1938_v33, %v1935_v63  ;;  %v1540_v28 = vsel %vm20088_vm3, %v1537_v36, %v1539_v1  ;;  %12948 = vmatpush3.bf16.msra.mxu0 %v13421_v19  ;;  %v10768_v7 = vcombine.low %v1172_v20, %v1173_v13  ;;  %vm20089_vm7 = vnez %v19980_v54  ;;  %v20095_v13 = vld [vmem:[#allocation23_spill] sm:$0xff] }
  0xcf   : > { %v1192_v25 = vsel %vm20089_vm7, %v14689_v18, 0  ;;  %v2005_v37 = vshrl.u32 %v1540_v28, 16  ;;  %v2008_v44 = vshll.u32 %v1540_v28, 16  ;;  %v2016_v29 = vrot.slane %v2014_v53, 3  ;;  %12949 = vmatprep.subr.bf16.mxu0 %v13164_v55  ;;  %v14726_v53 = vld [vmem:[#allocation2 + $0x34] sm:$0xf] }
  0xd0   : > { %v2019_v34 = vrot.slane %v2017_v6, 4  ;;  %vm20090_vm4 = vsmask.f32 4352  ;;  %v1541_v62 = vrot.slane %v10768_v7, 5  ;;  %vm20091_vm3 = vnez %v19984_v50  ;;  %v20097_v19 = vld [vmem:[#allocation27_spill] sm:$0xff] }
  0xd1   : > { %v1940_v36 = vsel %vm20090_vm4, %v1931_v17, %v1939_v41  ;;  %v1193_v30 = vsel %vm20091_vm3, %v14710_v15, 0  ;;  %vm20092_vm7 = vcmp.ne.s16.totalorder %v14225_v27, 0  ;;  %v2007_v31 = vrot.slane %v2005_v37, 3  ;;  %v13162_v17 = vld [vmem:[%s19592_s1 + $0x68] sm:$0xff]  }
  0xd2   : > { %v1174_v39 = vsel %vm20092_vm7, %v14710_v15, 0  ;;  %3254 = vmatmul.mubr.bf16.vlgmr.msra.gmra.mxu1 %v1940_v36  ;;  %v2010_v11 = vrot.slane %v2008_v44, 4  ;;  %v2020_v63 = vor.u32 %v2019_v34, %v2016_v29  ;;  %v10777_v33 = vcombine.low %v1192_v25, %v1193_v30  ;;  %12950 = vmatpush3.bf16.msra.mxu0 %v13164_v55 }
  0xd3   : > { %12132 = vmatpush3.bf16.msra.mxu1 %v13158_v40  ;;  %3261 = vmatprep.mubr.bf16.mxu1 %v14254_v43  ;;  %vm20093_vm4 = vcmask 1042432   ;;  %vm20094_vm7 = vnez %v20004_v60  ;;  %vm20096_vm3 = vnez %v20095_v13  ;;  %v20098_v40 = vld [vmem:[#allocation24_spill] sm:$0xff] }
  0xd4   : > { %v1542_v20 = vsel %vm20093_vm4, %v1539_v1, %v1541_v62  ;;  %v1175_v6 = vsel %vm20094_vm7, %v14726_v53, 0  ;;  %v1194_v28 = vsel %vm20096_vm3, %v14726_v53, 0  ;;  %vm20099_vm9 = vnez %v20098_v40  ;;  %12133 = vmatprep.subr.bf16.mxu1 %v13159_v57  ;;  %12951 = vmatprep.subr.bf16.mxu0 %v13167_v58  ;;  %v20102_v40 = vld [vmem:[#allocation28_spill] sm:$0xff] }
  0xd5   : > { %v1195_v7 = vsel %vm20099_vm9, %v20097_v19, 0  ;;  %v2011_v25 = vor.u32 %v2010_v11, %v2007_v31  ;;  %vm20100_vm4 = vsmask.f32 4352  ;;  %v2068_v37 = vshrl.u32 %v1542_v20, 16 }
  0xd6   : > { %v2021_v1 = vsel %vm20100_vm4, %v1939_v41, %v2020_v63  ;;  %v2071_v44 = vshll.u32 %v1542_v20, 16  ;;  %v2077_v29 = vshrl.u32 %v10777_v33, 16  ;;  %v2080_v34 = vshll.u32 %v10777_v33, 16  ;;  %vm20101_vm10 = vmmov %vm20100_vm4  ;;  %v13170_v41 = vld [vmem:[%s19592_s1 + $0x220] sm:$0xff]   ;;  %v20104_v33 = vld [vmem:[#allocation19_spill] sm:$0xff]  ;;  %12952 = vmatpush3.bf16.msra.mxu0 %v13167_v58 }
  0xd7   : > { %v10769_v36 = vcombine.low %v1174_v39, %v1175_v6  ;;  %v10778_v30 = vcombine.low %v1194_v28, %v1195_v7  ;;  %v2012_v13 = vsel %vm20101_vm10, %v14669_v12, %v2011_v25  ;;  %v2070_v50 = vrot.slane %v2068_v37, 3  ;;  %12134 = vmatpush3.bf16.msra.mxu1 %v13160_v0  ;;  %v13163_v12 = vld [vmem:[%s19592_s1 + $0x28] sm:$0xff]   ;;  %12953 = vmatprep.subr.bf16.mxu0 %v13170_v41 }
  0xd8   : > { %v2073_v54 = vrot.slane %v2071_v44, 4  ;;  %vm20103_vm9 = vcmp.ne.s16.totalorder %v20102_v40, 0  ;;  %3164 = vmatprep.mubr.bf16.mxu0 %v2012_v13  ;;  %v2079_v55 = vrot.slane %v2077_v29, 3  ;;  %v2082_v57 = vrot.slane %v2080_v34, 4  ;;  %12135 = vmatprep.subr.bf16.mxu1 %v13162_v17  ;;  %v20106_v13 = vld [vmem:[#allocation26_spill] sm:$0xff] }
  0xd9   : > { %v1176_v31 = vsel %vm20103_vm9, %v20097_v19, 0  ;;  %v1543_v39 = vrot.slane %v10769_v36, 5  ;;  %v2140_v11 = vshrl.u32 %v10778_v30, 16  ;;  %3165 = vmatmul.mubr.bf16.gmra.mxu0 %v20104_v33  ;;  %v2143_v6 = vshll.u32 %v10778_v30, 16  ;;  %v20109_v30 = vld [vmem:[#allocation29_spill] sm:$0xff] }
  0xda   : > { %v2074_v20 = vor.u32 %v2073_v54, %v2070_v50  ;;  %v1177_v19 = vsel %vm14393_vm1, %v14328_v48, 0  ;;  %vm20107_vm10 = vnez %v20106_v13  ;;  %v2083_v7 = vor.u32 %v2082_v57, %v2079_v55  ;;  %v13165_v54 = vld [vmem:[%s19592_s1 + $0x60] sm:$0xff]   ;;  %3262 = vmatmul.mubr.bf16.gmra.mxu1 %v2021_v1  ;;  %v13168_v55 = vld [vmem:[%s19592_s1 + $0x58] sm:$0xff]   ;;  %12954 = vmatpush3.bf16.msra.mxu0 %v13170_v41  ;;  %v20118_v13 = vld [vmem:[#allocation34_spill] sm:$0xff] }
  0xdb   : > { %v1196_v0 = vsel %vm20107_vm10, %v14328_v48, 0  ;;  %vm20108_vm9 = vcmask 1042432   ;;  %v2142_v44 = vrot.slane %v2140_v11, 3  ;;  %v14760_v50 = vcombine.low %v1176_v31, %v1177_v19  ;;  %v13166_v48 = vld [vmem:[%s19592_s1 + $0x20] sm:$0xff]   ;;  %3269 = vmatprep.mubr.bf16.mxu1 %v20109_v30  ;;  %12136 = vmatpush3.bf16.msra.mxu1 %v13163_v12 }
  0xdc   : > { %v1544_v37 = vsel %vm20108_vm9, %v1541_v62, %v1543_v39  ;;  %v2075_v17 = vsel %vm20100_vm4, %v2011_v25, %v2074_v20  ;;  %v2145_v36 = vrot.slane %v2143_v6, 4  ;;  %v13174_v62 = vld [vmem:[%s19592_s1 + $0x218] sm:$0xff]   ;;  %vm20110_vm9 = vmmov %vm20100_vm4  ;;  %v20111_v25 = vld [vmem:[#allocation30_spill] sm:$0xff]  ;;  %12137 = vmatprep.subr.bf16.mxu1 %v13165_v54  ;;  %vm20119_vm3 = vnez %v20118_v13 }
  0xdd   : > { %v2131_v29 = vshrl.u32 %v1544_v37, 16  ;;  %v2134_v34 = vshll.u32 %v1544_v37, 16  ;;  %3172 = vmatprep.mubr.bf16.mxu0 %v2075_v17  ;;  %v2084_v58 = vsel %vm20110_vm9, %v2020_v63, %v2083_v7  ;;  %v1545_v1 = vrot.slane %v14760_v50, 5  ;;  %v20113_v57 = vld [vmem:[#allocation32_spill] sm:$0xff]  ;;  %12955 = vmatprep.subr.bf16.mxu0 %v13174_v62 }
  0xde   : > { %vm20112_vm4 = vnez %v20111_v25  ;;  %vm20114_vm10 = vcmp.ne.s16.totalorder %v20113_v57, 0  ;;  %v2146_v19 = vor.u32 %v2145_v36, %v2142_v44  ;;  %vm20115_vm9 = vcmask 1042432   ;;  %v20116_v50 = vld [vmem:[#allocation36_spill] sm:$0xff]  ;;  %v13178_v36 = vld [vmem:[%s19592_s1 + $0x210] sm:$0xff]   ;;  %12956 = vmatpush3.bf16.msra.mxu0 %v13174_v62 }
  0xdf   : > { %v1197_v31 = vsel %vm20112_vm4, %v14432_v22, 0  ;;  %v1178_v11 = vsel %vm20114_vm10, %v14432_v22, 0  ;;  %v2133_v33 = vrot.slane %v2131_v29, 3  ;;  %v2136_v6 = vrot.slane %v2134_v34, 4  ;;  %12138 = vmatpush3.bf16.msra.mxu1 %v13166_v48  ;;  %12957 = vmatprep.subr.bf16.mxu0 %v13178_v36 }
  0xe0   : > { %v10779_v37 = vcombine.low %v1196_v0, %v1197_v31  ;;  %v1546_v63 = vsel %vm20115_vm9, %v1543_v39, %v1545_v1  ;;  %vm20117_vm4 = vnez %v20116_v50  ;;  %v10764_v25 = vcombine.low %v14561_v51, %v14538_v56  ;;  %12139 = vmatprep.subr.bf16.mxu1 %v13168_v55 }
  0xe1   : > { %v1179_v17 = vsel %vm20117_vm4, %v14430_v49, 0  ;;  %v1198_v22 = vsel %vm20119_vm3, %v14430_v49, 0  ;;  %v2137_v12 = vor.u32 %v2136_v6, %v2133_v33  ;;  %vm20120_vm10 = vsmask.f32 4352  ;;  %3173 = vmatmul.mubr.bf16.gmra.mxu0 %v14254_v43  ;;  %v13169_v33 = vld [vmem:[%s19592_s1 + $0x18] sm:$0xff]   ;;  %v13172_v43 = vld [vmem:[%s19592_s1 + $0x50] sm:$0xff]  }
  0xe2   : > { %v14791_v29 = vsel %vm20120_vm10, %v2083_v7, %v2146_v19  ;;  %v2194_v0 = vshrl.u32 %v1546_v63, 16  ;;  %v2197_v44 = vshll.u32 %v1546_v63, 16  ;;  %v2203_v39 = vshrl.u32 %v10779_v37, 16  ;;  %vm20121_vm9 = vmmov %vm20120_vm10  ;;  %3270 = vmatmul.mubr.bf16.gmra.mxu1 %v2084_v58  ;;  %12958 = vmatpush3.bf16.msra.mxu0 %v13178_v36 }
  0xe3   : > { %v2206_v41 = vshll.u32 %v10779_v37, 16  ;;  %v14793_v54 = vcombine.low %v1178_v11, %v1179_v17  ;;  %v1485_v34 = vshrl.u32 %v10764_v25, 16  ;;  %v2138_v49 = vsel %vm20121_vm9, %v2074_v20, %v2137_v12  ;;  %v206_v20 = vld [vmem:[%s13654_s27 + $0x80] sm:$0xff]  ;;  %12140 = vmatpush3.bf16.msra.mxu1 %v13169_v33 }
  0xe4   : > { %v2196_v7 = vrot.slane %v2194_v0, 3  ;;  %v2199_v31 = vrot.slane %v2197_v44, 4  ;;  %v1488_v6 = vshll.u32 %v10764_v25, 16  ;;  %3180 = vmatprep.mubr.bf16.mxu0 %v2138_v49  ;;  %v2205_v11 = vrot.slane %v2203_v39, 3  ;;  %v20122_v44 = vld [vmem:[#allocation35_spill] sm:$0xff]  ;;  %v13173_v39 = vld [vmem:[%s19592_s1 + $0x10] sm:$0xff]   ;;  %12141 = vmatprep.subr.bf16.mxu1 %v13172_v43 }
  0xe5   : > { %v2208_v37 = vrot.slane %v2206_v41, 4  ;;  %v1547_v63 = vrot.slane %v14793_v54, 5  ;;  %v1487_v17 = vrot.slane %v1485_v34, 4  ;;  %vm20123_vm10 = vnez %v20122_v44  ;;  %v207_v41 = vld [vmem:[%s13654_s27 + $0x88] sm:$0xff]  ;;  %v13182_v43 = vld [vmem:[%s19592_s1 + $0x200] sm:$0xff]  }
  0xe6   : > { %v2200_v48 = vor.u32 %v2199_v31, %v2196_v7  ;;  %v1490_v0 = vrot.slane %v1488_v6, 5  ;;  %v1199_v25 = vsel %vm20123_vm10, %v14561_v51, 0  ;;  %vm20124_vm9 = vcmp.ne.s16.totalorder %v14550_v10, 0  ;;  %v20125_v54 = vld [vmem:[#allocation33_spill] sm:$0xff] }
  0xe7   : > { %v1180_v55 = vsel %vm20124_vm9, %v14561_v51, 0  ;;  %3277 = vmatprep.mubr.bf16.mxu1 %v20125_v54  ;;  %v2209_v34 = vor.u32 %v2208_v37, %v2205_v11  ;;  %vm20126_vm3 = vcmask 1042432   ;;  %v10780_v49 = vcombine.low %v1198_v22, %v1199_v25  ;;  %v13176_v31 = vld [vmem:[%s19592_s1 + $0x48] sm:$0xff]   ;;  %12142 = vmatpush3.bf16.msra.mxu1 %v13173_v39 }
  0xe8   : > { %v1548_v58 = vsel %vm20126_vm3, %v1545_v1, %v1547_v63  ;;  %v1181_v7 = vsel %vm14597_vm12, %v14538_v56, 0  ;;  %v13179_v51 = vld [vmem:[%s19592_s1 + $0x208] sm:$0xff]   ;;  %vm20127_vm9 = vsmask.f32 4352  ;;  %v14830_v1 = vor.u32 %v1490_v0, %v1487_v17  ;;  %12143 = vmatprep.subr.bf16.mxu1 %v13176_v31  ;;  %v13181_v31 = vld [vmem:[%s19592_s1] sm:$0xff]  }
  0xe9   : > { %v2201_v62 = vsel %vm20127_vm9, %v2137_v12, %v2200_v48  ;;  %v2257_v6 = vshrl.u32 %v1548_v58, 16  ;;  %v2260_v11 = vshll.u32 %v1548_v58, 16  ;;  %vm20128_vm3 = vmmov %vm20127_vm9  ;;  %v2266_v37 = vshrl.u32 %v10780_v49, 16  ;;  %12959 = vmatprep.subr.bf16.mxu0 %v13179_v51  ;;  %3181 = vmatmul.mubr.bf16.gmra.mxu0 %v20109_v30  ;;  %v14860_v39 = vld [vmem:[#allocation2 + $0x48] sm:$0xf] }
  0xea   : > { %v14833_v22 = vsel %vm20128_vm3, %v2146_v19, %v2209_v34  ;;  %v2269_v25 = vshll.u32 %v10780_v49, 16  ;;  %v14835_v44 = vcombine.low %v1180_v55, %v1181_v7  ;;  %vm20129_vm10 = vsmask.f32 3328  ;;  %v13177_v19 = vld [vmem:[%s19592_s1 + $0x8] sm:$0xff]   ;;  %3188 = vmatprep.mubr.bf16.mxu0 %v2201_v62  ;;  %v13185_v49 = vld [vmem:[%s19592_s1 + $0xf8] sm:$0xff]   ;;  %3278 = vmatmul.mubr.bf16.gmra.mxu1 %v14791_v29 }
  0xeb   : > { %v2259_v13 = vrot.slane %v2257_v6, 3  ;;  %v2262_v3 = vrot.slane %v2260_v11, 4  ;;  %v1492_v10 = vsel %vm20129_vm10, %v14501_v9, %v14830_v1  ;;  %v11710_v12 = vpack.c.bf16 %v207_v41, %v206_v20  ;;  %v13180_v20 = vld [vmem:[%s19592_s1 + $0x40] sm:$0xff]   ;;  %vm20130_vm10 = vmmov %vm20128_vm3  ;;  %12960 = vmatpush3.bf16.msra.mxu0 %v13179_v51  ;;  %v20132_v11 = vld [vmem:[#allocation5_spill] sm:$0xff]  ;;  %12144 = vmatpush3.bf16.msra.mxu1 %v13177_v19 }
  0xec   : > { %v2275_v33 = vshrl.u32 %v1492_v10, 16  ;;  %v2278_v58 = vshll.u32 %v1492_v10, 16  ;;  %v2268_v17 = vrot.slane %v2266_v37, 3  ;;  %v2271_v0 = vrot.slane %v2269_v25, 4  ;;  %v14877_v29 = vld [vmem:[#allocation2 + $0x4c] sm:$0xf]  ;;  %12961 = vmatprep.subr.bf16.mxu0 %v13182_v43  ;;  %12145 = vmatprep.subr.bf16.mxu1 %v13180_v20 }
  0xed   : > { %v14847_v55 = vor.u32 %v2262_v3, %v2259_v13  ;;  %v19686_v9 = vrot.slane %v14835_v44, 5  ;;  %11835 = vst [vmem:[#allocation2 + $0x50] sm:$0xff] %v11710_v12   ;;  %v2392_v36 = vshrl.u32 %v14830_v1, 16  ;;  %v2395_v30 = vshll.u32 %v14830_v1, 16  ;;  %v208_v25 = vld [vmem:[%s13654_s27 + $0x90] sm:$0xff]  ;;  %v210_v12 = vld [vmem:[%s13654_s27 + $0xa0] sm:$0xff] }
  0xee   : > { %v2277_v41 = vrot.slane %v2275_v33, 3  ;;  %v2280_v3 = vrot.slane %v2278_v58, 4  ;;  %v14857_v13 = vor.u32 %v2271_v0, %v2268_v17  ;;  %vm20131_vm9 = vcmask 1042432   ;;  %v211_v33 = vld [vmem:[%s13654_s27 + $0xa8] sm:$0xff]  ;;  %v20134_v58 = vld [vmem:[#allocation38_spill] sm:$0xff] }
  0xef   : > { %v2264_v7 = vsel %vm20130_vm10, %v2200_v48, %v14847_v55  ;;  %v1550_v62 = vsel %vm20131_vm9, %v1547_v63, %v19686_v9  ;;  %v2394_v6 = vrot.slane %v2392_v36, 3  ;;  %vm20133_vm3 = vcmp.ne.s16.totalorder %v20132_v11, 0  ;;  %v209_v48 = vld [vmem:[%s13654_s27 + $0x98] sm:$0xff]  ;;  %3285 = vmatprep.mubr.bf16.mxu1 %v20134_v58  ;;  %v212_v36 = vld [vmem:[%s13654_s27 + $0xb0] sm:$0xff]  ;;  %12962 = vmatpush3.bf16.msra.mxu0 %v13182_v43 }
  0xf0   : > { %v1204_v37 = vsel %vm20133_vm3, %v14613_v45, 0  ;;  %v14884_v63 = vor.u32 %v2280_v3, %v2277_v41  ;;  %v14888_v51 = vsel %vm20130_vm10, %v2209_v34, %v14857_v13  ;;  %v2320_v17 = vshrl.u32 %v1550_v62, 16  ;;  %v13186_v45 = vld [vmem:[%s19592_s1 + $0x178] sm:$0xff]   ;;  %vm20137_vm3 = vmmov %vm20130_vm10  ;;  %12195 = vmatprep.subr.bf16.mxu0 %v13185_v49  ;;  %12146 = vmatpush3.bf16.msra.mxu1 %v13181_v31 }
  0xf1   : > { %v2323_v0 = vshll.u32 %v1550_v62, 16  ;;  %v213_v9 = vld [vmem:[%s13654_s27 + $0xb8] sm:$0xff]  ;;  %v2397_v10 = vrot.slane %v2395_v30, 4  ;;  %v1205_v41 = vsel %vm13886_vm0, %v14623_v14, 0  ;;  %vm20135_vm9 = vcmp.ne.s16.totalorder %v13875_v35, 0  ;;  %v20136_v62 = vld [vmem:[#allocation37_spill] sm:$0xff]  ;;  %3189 = vmatmul.mubr.bf16.gmra.mxu0 %v20125_v54  ;;  %12259 = vmatprep.subr.bf16.mxu1 %v13186_v45 }
  0xf2   : > { %v1206_v34 = vsel %vm20135_vm9, %v14653_v32, 0  ;;  %v1207_v3 = vsel %vm13912_vm6, %v14661_v26, 0  ;;  %v14907_v11 = vsel %vm20137_vm3, %v20136_v62, %v14884_v63  ;;  %v2322_v50 = vrot.slane %v2320_v17, 3  ;;  %3196 = vmatprep.mubr.bf16.mxu0 %v2264_v7  ;;  %3286 = vmatmul.mubr.bf16.gmra.mxu1 %v14833_v22 }
  0xf3   : > { %v2325_v19 = vrot.slane %v2323_v0, 4  ;;  %v10784_v30 = vcombine.low %v1204_v37, %v1205_v41  ;;  %v2398_v57 = vor.u32 %v2397_v10, %v2394_v6  ;;  %v14909_v14 = vcombine.low %v1206_v34, %v1207_v3  ;;  %v20139_v0 = vld [vmem:[#allocation41_spill] sm:$0xff]  ;;  %3293 = vmatprep.mubr.bf16.mxu1 %v14907_v11 }
  0xf4   : > { %v14913_v32 = vcombine.low %v14860_v39, %v14877_v29  ;;  %vm20138_vm10 = vcmp.ne.s16.totalorder %v13940_v23, 0  ;;  %v14922_v62 = vld [vmem:[#allocation2 + $0x50] sm:$0xf]  ;;  %v14924_v17 = vld [vmem:[#allocation2 + $0x54] sm:$0xf]  ;;  %v11715_v43 = vpack.c.bf16 %v209_v48, %v208_v25  ;;  %v11720_v10 = vpack.c.bf16 %v211_v33, %v210_v12 }
  0xf5   : > { %v14918_v26 = vsel %vm20138_vm10, %v14673_v52, 0  ;;  %v14920_v59 = vor.u32 %v2325_v19, %v2322_v50  ;;  %v1165_v20 = vld [vmem:[#allocation2 + $0x50] sm:$0x1]  ;;  %v11725_v6 = vpack.c.bf16 %v213_v9, %v212_v36  ;;  %v10783_v37 = vcombine.low %v14922_v62, %v14924_v17  ;;  %vm20141_vm10 = vmmov %vm20137_vm3 }
  0xf6   : > { %v1201_v52 = vsel %vm14578_vm8, %v14922_v62, 0  ;;  %vm20140_vm9 = vnez %v20065_v42  ;;  %v14936_v41 = vsel %vm20137_vm3, %v14884_v63, %v2398_v57  ;;  %v20142_v9 = vsel %vm14543_vm2, %v14538_v56, 0  ;;  %v20143_v48 = vld [vmem:[#allocation6_spill] sm:$0xff]  ;;  %11836 = vst [vmem:[#allocation2 + $0x58] sm:$0xff] %v11715_v43   ;;  %11837 = vst [vmem:[#allocation2 + $0x60] sm:$0xff] %v11720_v10  }
  0xf7   : > { %v1182_v50 = vsel %vm20140_vm9, %v1165_v20, 0  ;;  %v2327_v54 = vsel %vm20141_vm10, %v14847_v55, %v14920_v59  ;;  %v10781_v49 = vcombine.low %v20142_v9, %v1201_v52  ;;  %vm20144_vm8 = vcmp.ne.s16.totalorder %v20143_v48, 0  ;;  %11838 = vst [vmem:[#allocation2 + $0x68] sm:$0xff] %v11725_v6  }
  0xf8   : > { %v10773_v25 = vcombine.low %v1182_v50, %v1182_v50  ;;  %v1202_v12 = vsel %vm20144_vm8, %v14924_v17, 0  ;;  %v1602_v57 = vshrl.u32 %v10783_v37, 16  ;;  %v1605_v7 = vshll.u32 %v10783_v37, 16 }
  0xf9   : > { %v10782_v31 = vcombine.low %v1202_v12, %v1202_v12  ;;  %v1653_v55 = vrot.slane %v10784_v30, 5  ;;  %v2329_v33 = vshrl.u32 %v10781_v49, 16  ;;  %v2332_v56 = vshll.u32 %v10781_v49, 16  ;;  %3197 = vmatmul.mubr.bf16.gmra.mxu0 %v20134_v58  ;;  %v14963_v58 = vld [vmem:[#allocation2 + $0x50] sm:$0xf] }
  0xfa   : > { %v1551_v36 = vrot.slane %v10773_v25, 5  ;;  %v1654_v34 = vrot.slane %v14909_v14, 5  ;;  %v1604_v3 = vrot.slane %v1602_v57, 4  ;;  %v1607_v19 = vrot.slane %v1605_v7, 5  ;;  %3204 = vmatprep.mubr.bf16.mxu0 %v2327_v54  ;;  %3294 = vmatmul.mubr.bf16.gmra.mxu1 %v14888_v51 }
  0xfb   : > { %v2410_v20 = vshrl.u32 %v10782_v31, 16  ;;  %v2413_v45 = vshll.u32 %v10782_v31, 16  ;;  %v2331_v43 = vrot.slane %v2329_v33, 3  ;;  %v2334_v10 = vrot.slane %v2332_v56, 4 }
  0xfc   : > { %v20145_v6 = vrot.slane %v14835_v44, 5  ;;  %vm20146_vm8 = vcmask 1042432   ;;  %v1608_v37 = vor.u32 %v1607_v19, %v1604_v3  ;;  %v1959_v12 = vshrl.u32 %v1653_v55, 16 }
  0xfd   : > { %vm20147_vm3 = vmmov %vm20146_vm8  ;;  %v2412_v9 = vrot.slane %v2410_v20, 3  ;;  %v2335_v49 = vor.u32 %v2334_v10, %v2331_v43  ;;  %v2415_v25 = vrot.slane %v2413_v45, 4  ;;  %v1962_v57 = vshll.u32 %v1653_v55, 16  ;;  %v14965_v10 = vld [vmem:[#allocation2 + $0x54] sm:$0xf] }
  0xfe   : > { %v1552_v22 = vsel %vm20146_vm8, %v20145_v6, %v1551_v36  ;;  %v1655_v30 = vsel %vm20147_vm3, %v1653_v55, %v1654_v34  ;;  %vm20148_vm10 = vsmask.f32 3328  ;;  %v2419_v33 = vshrl.u32 %v1608_v37, 16 }
  0xff   : > { %v2401_v52 = vshrl.u32 %v1552_v22, 16  ;;  %v2404_v50 = vshll.u32 %v1552_v22, 16  ;;  %v1609_v7 = vsel %vm20148_vm10, %v14830_v1, %v1608_v37  ;;  %vm20149_vm8 = vsmask.f32 4352 }
 0x100   : > { %v2338_v56 = vshrl.u32 %v1609_v7, 16  ;;  %v2341_v36 = vshll.u32 %v1609_v7, 16  ;;  %v2336_v3 = vsel %vm20149_vm8, %v14857_v13, %v2335_v49  ;;  %v2422_v19 = vshll.u32 %v1608_v37, 16  ;;  %vm20150_vm3 = vmmov %vm20149_vm8 }
 0x101   : > { %v2403_v44 = vrot.slane %v2401_v52, 3  ;;  %v2406_v31 = vrot.slane %v2404_v50, 4  ;;  %v2421_v45 = vrot.slane %v2419_v33, 3  ;;  %v2416_v55 = vor.u32 %v2415_v25, %v2412_v9  ;;  %vm20151_vm10 = vmmov %vm20150_vm3  ;;  %v3511_v50 = vld [vmem:[#allocation2 + $0x44] sm:$0x8]  ;;  %3205 = vmatmul.mubr.bf16.gmra.mxu0 %v14907_v11 }
 0x102   : > { %v1961_v43 = vrot.slane %v1959_v12, 3  ;;  %v2340_v1 = vrot.slane %v2338_v56, 3  ;;  %v2343_v6 = vrot.slane %v2341_v36, 4  ;;  %v2424_v22 = vrot.slane %v2422_v19, 4  ;;  %vm20152_vm8 = vmmov %vm20150_vm3 }
 0x103   : > { %v2407_v20 = vor.u32 %v2406_v31, %v2403_v44  ;;  %v1964_v54 = vrot.slane %v1962_v57, 4  ;;  %v14970_v13 = vsel %vm20151_vm10, %v2335_v49, %v2416_v55  ;;  %v1967_v37 = vshrl.u32 %v1655_v30, 16 }
 0x104   : > { %v1970_v51 = vshll.u32 %v1655_v30, 16  ;;  %v2344_v7 = vor.u32 %v2343_v6, %v2340_v1  ;;  %v2425_v9 = vor.u32 %v2424_v22, %v2421_v45  ;;  %v10892_v12 = vcombine.low %v14963_v58, %v14965_v10 }
 0x105   : > { %v2408_v52 = vsel %vm20150_vm3, %v14920_v59, %v2407_v20  ;;  %v1965_v25 = vor.u32 %v1964_v54, %v1961_v43  ;;  %v1969_v44 = vrot.slane %v1967_v37, 3  ;;  %v3723_v33 = vshrl.u32 %v14913_v32, 16 }
 0x106   : > { %v1972_v31 = vrot.slane %v1970_v51, 4  ;;  %v3726_v57 = vshll.u32 %v14913_v32, 16  ;;  %v2345_v59 = vsel %vm20152_vm8, %v14884_v63, %v2344_v7  ;;  %v2426_v49 = vsel %vm20150_vm3, %v2344_v7, %v2425_v9  ;;  %3212 = vmatprep.mubr.bf16.mxu0 %v2408_v52  ;;  %vm20154_vm8 = vmmov %vm20150_vm3 }
 0x107   : > { %v3731_v56 = vshrl.u32 %v10892_v12, 16  ;;  %v3734_v30 = vshll.u32 %v10892_v12, 16  ;;  %3301 = vmatprep.mubr.bf16.mxu1 %v2345_v59  ;;  %v3725_v19 = vrot.slane %v3723_v33, 4  ;;  %v1209_v45 = vsel %vm14033_vm11, %v14689_v18, 0  ;;  %v15012_v59 = vld [vmem:[#allocation2 + $0x58] sm:$0xf] }
 0x108   : > { %v14980_v36 = vor.u32 %v1972_v31, %v1969_v44  ;;  %v3728_v20 = vrot.slane %v3726_v57, 5  ;;  %v14986_v63 = vcombine.low %v14918_v26, %v1209_v45  ;;  %vm20153_vm10 = vcmp.ne.s16.totalorder %v13705_v16, 0  ;;  %3302 = vmatmul.mubr.bf16.gmra.mxu1 %v2336_v3 }
 0x109   : > { %v3733_v32 = vrot.slane %v3731_v56, 4  ;;  %v3736_v55 = vrot.slane %v3734_v30, 5  ;;  %v3528_v43 = vsel %vm20153_vm10, %v3511_v50, 0  ;;  %v3529_v6 = vsel %vm13762_vm13, %v14860_v39, 0  ;;  %3309 = vmatprep.mubr.bf16.mxu1 %v2426_v49  ;;  %3213 = vmatmul.mubr.bf16.gmra.mxu0 %v14936_v41 }
 0x10a   : > { %v1974_v11 = vsel %vm20154_vm8, %v1965_v25, %v14980_v36  ;;  %v3729_v1 = vor.u32 %v3728_v20, %v3725_v19  ;;  %v3530_v18 = vsel %vm13766_vm14, %v14877_v29, 0  ;;  %v1656_v26 = vrot.slane %v14986_v63, 5 }
 0x10b   : > { %v14998_v22 = vor.u32 %v3736_v55, %v3733_v32  ;;  %v3531_v3 = vsel %vm13799_vm5, %v14963_v58, 0  ;;  %v10882_v54 = vcombine.low %v3528_v43, %v3529_v6  ;;  %vm20156_vm3 = vcmp.ne.s16.totalorder %v14074_v46, 0  ;;  %12963 = vmatprep.mubr.bf16.mxu0 %v1974_v11 }
 0x10c   : > { %v4256_v52 = vshrl.u32 %v3729_v1, 16  ;;  %v4259_v37 = vshll.u32 %v3729_v1, 16  ;;  %v10883_v51 = vcombine.low %v3530_v18, %v3531_v3  ;;  %v1210_v50 = vsel %vm20156_vm3, %v14710_v15, 0  ;;  %v15014_v15 = vld [vmem:[#allocation2 + $0x5c] sm:$0xf] }
 0x10d   : > { %20155 = vst [vmem:[#allocation27_spill] sm:$0xff] %v14998_v22  ;;  %vm20157_vm10 = vsmask.f32 3328  ;;  %vm20158_vm8 = vcmask 1042432   ;;  %v4239_v25 = vshrl.u32 %v10882_v54, 16  ;;  %v4242_v12 = vshll.u32 %v10882_v54, 16 }
 0x10e   : > { %v3738_v7 = vsel %vm20157_vm10, %v3729_v1, %v14998_v22  ;;  %v1657_v9 = vsel %vm20158_vm8, %v1654_v34, %v1656_v26  ;;  %v4258_v44 = vrot.slane %v4256_v52, 3  ;;  %v4261_v31 = vrot.slane %v4259_v37, 4  ;;  %v13424_v52 = vld [vmem:[#allocation2 + $0x38] sm:$0xf] }
 0x10f   : > { %v4264_v33 = vshrl.u32 %v3738_v7, 16  ;;  %v4267_v57 = vshll.u32 %v3738_v7, 16  ;;  %v2032_v49 = vshrl.u32 %v1657_v9, 16  ;;  %v2035_v56 = vshll.u32 %v1657_v9, 16  ;;  %v13425_v9 = vld [vmem:[#allocation2 + $0x3c] sm:$0xf] }
 0x110   : > { %v4241_v30 = vrot.slane %v4239_v25, 3  ;;  %v4244_v19 = vrot.slane %v4242_v12, 4  ;;  %v4262_v20 = vor.u32 %v4261_v31, %v4258_v44  ;;  %v4247_v34 = vshrl.u32 %v10883_v51, 16  ;;  %3310 = vmatmul.mubr.bf16.gmra.mxu1 %v14970_v13  ;;  %v13188_v44 = vld [vmem:[%s19592_s1 + $0x138] sm:$0xff]   ;;  %v13189_v31 = vld [vmem:[%s19592_s1 + $0xf0] sm:$0xff]  }
 0x111   : > { %v4266_v14 = vrot.slane %v4264_v33, 3  ;;  %v4269_v45 = vrot.slane %v4267_v57, 4  ;;  %v2034_v32 = vrot.slane %v2032_v49, 3  ;;  %v2037_v55 = vrot.slane %v2035_v56, 4 }
 0x112   : > { %v4245_v63 = vor.u32 %v4244_v19, %v4241_v30  ;;  %v4250_v43 = vshll.u32 %v10883_v51, 16  ;;  %v4249_v6 = vrot.slane %v4247_v34, 3  ;;  %v1211_v18 = vsel %vm20087_vm15, %v14726_v53, 0  ;;  %v13187_v51 = vld [vmem:[%s19592_s1 + $0xb8] sm:$0xff]  }
 0x113   : > { %v15018_v1 = vor.u32 %v4269_v45, %v4266_v14  ;;  %v10893_v41 = vcombine.low %v15012_v59, %v15014_v15  ;;  %v15025_v3 = vor.u32 %v2037_v55, %v2034_v32  ;;  %v10787_v11 = vcombine.low %v1210_v50, %v1211_v18  ;;  %v13426_v18 = vld [vmem:[#allocation2 + $0x40] sm:$0xf] }
 0x114   : > { %v4252_v54 = vrot.slane %v4250_v43, 4  ;;  %vm20159_vm3 = vcmp.ne.s16.totalorder %v14225_v27, 0  ;;  %vm20160_vm10 = vsmask.f32 4352  ;;  %v1213_v25 = vsel %vm20094_vm7, %v13425_v9, 0 }
 0x115   : > { %v1212_v37 = vsel %vm20159_vm3, %v13424_v52, 0  ;;  %v4271_v13 = vsel %vm20160_vm10, %v4262_v20, %v15018_v1  ;;  %v3740_v7 = vshrl.u32 %v10893_v41, 16  ;;  %v3743_v53 = vshll.u32 %v10893_v41, 16  ;;  %vm20161_vm8 = vmmov %vm20160_vm10  ;;  %v13190_v20 = vld [vmem:[%s19592_s1 + $0xb0] sm:$0xff]   ;;  %v15072_v41 = vld [vmem:[#allocation2 + $0x60] sm:$0xf] }
 0x116   : > { %5378 = vmatprep.mubr.bf16.mxu1 %v4271_v13  ;;  %v2039_v50 = vsel %vm20161_vm8, %v14980_v36, %v15025_v3  ;;  %v15039_v12 = vor.u32 %v4252_v54, %v4249_v6  ;;  %v1658_v33 = vrot.slane %v10787_v11, 5  ;;  %v15047_v57 = vcombine.low %v1212_v37, %v1213_v25  ;;  %v13192_v6 = vld [vmem:[%s19592_s1 + $0xe8] sm:$0xff]   ;;  %v15074_v54 = vld [vmem:[#allocation2 + $0x64] sm:$0xf]  ;;  %v13195_v13 = vld [vmem:[%s19592_s1 + $0x130] sm:$0xff]  }
 0x117   : > { %v3742_v49 = vrot.slane %v3740_v7, 4  ;;  %v3745_v56 = vrot.slane %v3743_v53, 5  ;;  %vm20162_vm3 = vnez %v19968_v21  ;;  %vm20163_vm10 = vnez %v19972_v8  ;;  %12964 = vmatmul.mubr.bf16.vlgmr.msra.gmra.mxu0 %v2039_v50  ;;  %v13427_v7 = vld [vmem:[#allocation2 + $0x44] sm:$0xf]  ;;  %v20216_v8 = vld [vmem:[#allocation34_spill] sm:$0xff] }
 0x118   : > { %v3532_v30 = vsel %vm20162_vm3, %v14965_v10, 0  ;;  %v3533_v36 = vsel %vm20163_vm10, %v15012_v59, 0  ;;  %v4254_v19 = vsel %vm20161_vm8, %v4245_v63, %v15039_v12  ;;  %vm20164_vm7 = vcmask 1042432   ;;  %v13193_v63 = vld [vmem:[%s19592_s1 + $0x170] sm:$0xff]   ;;  %12196 = vmatpush3.bf16.msra.mxu0 %v13187_v51 }
 0x119   : > { %v1659_v14 = vsel %vm20164_vm7, %v1656_v26, %v1658_v33  ;;  %v1660_v45 = vrot.slane %v15047_v57, 5  ;;  %v10884_v34 = vcombine.low %v3532_v30, %v3533_v36  ;;  %v15062_v43 = vor.u32 %v3745_v56, %v3742_v49  ;;  %5379 = vmatmul.mubr.bf16.vlgmr.msra.gmra.mxu1 %v4254_v19  ;;  %12197 = vmatprep.subr.bf16.mxu0 %v13189_v31  ;;  %v13194_v31 = vld [vmem:[%s19592_s1 + $0xa8] sm:$0xff]  }
 0x11a   : > { %v2095_v32 = vshrl.u32 %v1659_v14, 16  ;;  %v2098_v55 = vshll.u32 %v1659_v14, 16  ;;  %vm20166_vm8 = vcmp.ne.s16.totalorder %v20102_v40, 0  ;;  %v1215_v53 = vsel %vm14393_vm1, %v13427_v7, 0  ;;  %12260 = vmatpush3.bf16.msra.mxu1 %v13188_v44  ;;  %v13196_v44 = vld [vmem:[%s19592_s1 + $0xe0] sm:$0xff]  }
 0x11b   : > { %20165 = vst [vmem:[#allocation19_spill] sm:$0xff] %v15062_v43  ;;  %v1214_v26 = vsel %vm20166_vm8, %v13426_v18, 0  ;;  %v1661_v11 = vsel %vm20164_vm7, %v1658_v33, %v1660_v45  ;;  %v4392_v52 = vshrl.u32 %v10884_v34, 16  ;;  %v4395_v37 = vshll.u32 %v10884_v34, 16  ;;  %v13200_v33 = vld [vmem:[%s19592_s1 + $0x168] sm:$0xff]   ;;  %12261 = vmatprep.subr.bf16.mxu1 %v13193_v63 }
 0x11c   : > { %v2097_v9 = vrot.slane %v2095_v32, 3  ;;  %v2100_v25 = vrot.slane %v2098_v55, 4  ;;  %vm20167_vm8 = vsmask.f32 3328  ;;  %v2158_v50 = vshrl.u32 %v1661_v11, 16  ;;  %12198 = vmatpush3.bf16.msra.mxu0 %v13190_v20  ;;  %v20169_v20 = vld [vmem:[#allocation32_spill] sm:$0xff] }
 0x11d   : > { %v3747_v51 = vsel %vm20167_vm8, %v14998_v22, %v15062_v43  ;;  %v2161_v56 = vshll.u32 %v1661_v11, 16  ;;  %v4394_v30 = vrot.slane %v4392_v52, 3  ;;  %v4397_v14 = vrot.slane %v4395_v37, 4  ;;  %12199 = vmatprep.subr.bf16.mxu0 %v13192_v6 }
 0x11e   : > { %v4315_v57 = vshrl.u32 %v3747_v51, 16  ;;  %v4318_v49 = vshll.u32 %v3747_v51, 16  ;;  %v2101_v36 = vor.u32 %v2100_v25, %v2097_v9  ;;  %v2160_v19 = vrot.slane %v2158_v50, 3  ;;  %12262 = vmatpush3.bf16.msra.mxu1 %v13195_v13  ;;  %v15113_v50 = vld [vmem:[#allocation2 + $0x68] sm:$0xf] }
 0x11f   : > { %v15091_v34 = vcombine.low %v1214_v26, %v1215_v53  ;;  %v2163_v18 = vrot.slane %v2161_v56, 4  ;;  %v10894_v11 = vcombine.low %v15072_v41, %v15074_v54  ;;  %vm20168_vm7 = vsmask.f32 4352  ;;  %v13428_v26 = vld [vmem:[#allocation2 + $0x48] sm:$0xf]  ;;  %12263 = vmatprep.subr.bf16.mxu1 %v13200_v33  ;;  %v13199_v33 = vld [vmem:[%s19592_s1 + $0xd8] sm:$0xff]  }
 0x120   : > { %v4317_v32 = vrot.slane %v4315_v57, 3  ;;  %v4320_v55 = vrot.slane %v4318_v49, 4  ;;  %v2102_v52 = vsel %vm20168_vm7, %v15025_v3, %v2101_v36  ;;  %v15100_v7 = vor.u32 %v4397_v14, %v4394_v30  ;;  %v13202_v53 = vld [vmem:[%s19592_s1 + $0x128] sm:$0xff]   ;;  %v13197_v3 = vld [vmem:[%s19592_s1 + $0xa0] sm:$0xff]   ;;  %vm20176_vm15 = vmmov %vm20168_vm7  ;;  %12200 = vmatpush3.bf16.msra.mxu0 %v13194_v31 }
 0x121   : > { %v1662_v63 = vrot.slane %v15091_v34, 5  ;;  %vm20170_vm8 = vcmp.ne.s16.totalorder %v20169_v20, 0  ;;  %12967 = vmatprep.mubr.bf16.mxu0 %v2102_v52  ;;  %v2164_v25 = vor.u32 %v2163_v18, %v2160_v19  ;;  %v3749_v6 = vshrl.u32 %v10894_v11, 16  ;;  %v15115_v57 = vld [vmem:[#allocation2 + $0x6c] sm:$0xf]  ;;  %v13207_v49 = vld [vmem:[%s19592_s1 + $0x160] sm:$0xff]   ;;  %vm20177_vm2 = vmmov %vm20168_vm7  ;;  %12201 = vmatprep.subr.bf16.mxu0 %v13196_v44 }
 0x122   : > { %v1216_v37 = vsel %vm20170_vm8, %v13428_v26, 0  ;;  %v15108_v9 = vor.u32 %v4320_v55, %v4317_v32  ;;  %v3752_v51 = vshll.u32 %v10894_v11, 16  ;;  %v4399_v56 = vsel %vm20168_vm7, %v15039_v12, %v15100_v7  ;;  %v13429_v30 = vld [vmem:[#allocation2 + $0x4c] sm:$0xf]  ;;  %v20174_v34 = vld [vmem:[#allocation18_spill] sm:$0xff]  ;;  %12264 = vmatpush3.bf16.msra.mxu1 %v13202_v53 }
 0x123   : > { %vm20172_vm8 = vcmask 1042432   ;;  %v1217_v14 = vsel %vm20117_vm4, %v13429_v30, 0  ;;  %vm20175_vm1 = vnez %v20174_v34  ;;  %v2165_v18 = vsel %vm20177_vm2, %v2101_v36, %v2164_v25  ;;  %v20178_v30 = vld [vmem:[#allocation20_spill] sm:$0xff]  ;;  %v13203_v53 = vld [vmem:[%s19592_s1 + $0xd0] sm:$0xff]   ;;  %12265 = vmatprep.subr.bf16.mxu1 %v13207_v49 }
 0x124   : > { %20171 = vst [vmem:[#allocation29_spill] sm:$0xff] %v15108_v9  ;;  %v1663_v13 = vsel %vm20172_vm8, %v1660_v45, %v1662_v63  ;;  %v3534_v32 = vsel %vm20175_vm1, %v15014_v15, 0  ;;  %v4400_v55 = vsel %vm20176_vm15, %v15018_v1, %v15108_v9  ;;  %12968 = vmatmul.mubr.bf16.gmra.mxu0 %v2165_v18  ;;  %v3751_v45 = vrot.slane %v3749_v6, 4 }
 0x125   : > { %v2221_v11 = vshrl.u32 %v1663_v13, 16  ;;  %v2224_v12 = vshll.u32 %v1663_v13, 16  ;;  %5386 = vmatprep.mubr.bf16.mxu1 %v4400_v55  ;;  %v3754_v52 = vrot.slane %v3752_v51, 5  ;;  %v10790_v26 = vcombine.low %v1216_v37, %v1217_v14  ;;  %v20180_v13 = vld [vmem:[#allocation40_spill] sm:$0xff]  ;;  %v13201_v51 = vld [vmem:[%s19592_s1 + $0x98] sm:$0xff]   ;;  %12202 = vmatpush3.bf16.msra.mxu0 %v13197_v3 }
 0x126   : > { %vm20179_vm7 = vnez %v20178_v30  ;;  %5387 = vmatmul.mubr.bf16.gmra.mxu1 %v4399_v56  ;;  %vm20181_vm2 = vcmp.ne.s16.totalorder %v20180_v13, 0  ;;  %v1219_v56 = vsel %vm14597_vm12, %v14924_v17, 0  ;;  %v10895_v44 = vcombine.low %v15113_v50, %v15115_v57  ;;  %v13213_v17 = vld [vmem:[%s19592_s1 + $0x158] sm:$0xff]   ;;  %12203 = vmatprep.subr.bf16.mxu0 %v13199_v33  ;;  %v13216_v33 = vld [vmem:[%s19592_s1 + $0x150] sm:$0xff]  }
 0x127   : > { %v3535_v19 = vsel %vm20179_vm7, %v15072_v41, 0  ;;  %v2223_v1 = vrot.slane %v2221_v11, 3  ;;  %v2226_v36 = vrot.slane %v2224_v12, 4  ;;  %v1218_v55 = vsel %vm20181_vm2, %v14922_v62, 0 }
 0x128   : > { %v10885_v31 = vcombine.low %v3534_v32, %v3535_v19  ;;  %v15142_v6 = vor.u32 %v3754_v52, %v3751_v45  ;;  %v1664_v37 = vrot.slane %v10790_v26, 5  ;;  %v13209_v19 = vld [vmem:[%s19592_s1 + $0x120] sm:$0xff]   ;;  %v15160_v11 = vcombine.low %v1218_v55, %v1219_v56  ;;  %v1203_v26 = vld [vmem:[#allocation2 + $0x58] sm:$0x1] }
 0x129   : > { %v15155_v62 = vor.u32 %v2226_v36, %v2223_v1  ;;  %vm20183_vm15 = vsmask.f32 3328  ;;  %v3758_v45 = vshrl.u32 %v10895_v44, 16  ;;  %v3761_v52 = vshll.u32 %v10895_v44, 16  ;;  %v13214_v1 = vld [vmem:[%s19592_s1 + $0x118] sm:$0xff]   ;;  %v15172_v36 = vpop.f32.mrf.mxu0  ;;  %12266 = vmatpush3.bf16.msra.mxu1 %v13209_v19  ;;  %12204 = vmatpush3.bf16.msra.mxu0 %v13201_v51 }
 0x12a   : > { %v4457_v32 = vshrl.u32 %v10885_v31, 16  ;;  %v4460_v18 = vshll.u32 %v10885_v31, 16  ;;  %v3756_v12 = vsel %vm20183_vm15, %v15062_v43, %v15142_v6  ;;  %v1665_v3 = vsel %vm20172_vm8, %v1662_v63, %v1664_v37  ;;  %v13204_v63 = vld [vmem:[%s19592_s1 + $0x90] sm:$0xff]   ;;  %12267 = vmatprep.subr.bf16.mxu1 %v13213_v17  ;;  %12205 = vmatprep.subr.bf16.mxu0 %v13203_v53  ;;  %vm20185_vm15 = vmmov %vm20172_vm8  ;;  %v215_v53 = vld [vmem:[%s13654_s27 + $0xc8] sm:$0xff] }
 0x12b   : > { %vm20184_vm2 = vsmask.f32 4352  ;;  %v4366_v31 = vshrl.u32 %v3756_v12, 16  ;;  %v4369_v55 = vshll.u32 %v3756_v12, 16  ;;  %v2284_v56 = vshrl.u32 %v1665_v3, 16 }
 0x12c   : > { %v2228_v49 = vsel %vm20184_vm2, %v2164_v25, %v15155_v62  ;;  %v2287_v44 = vshll.u32 %v1665_v3, 16  ;;  %v4459_v43 = vrot.slane %v4457_v32, 3  ;;  %v4462_v14 = vrot.slane %v4460_v18, 4  ;;  %v13206_v25 = vld [vmem:[%s19592_s1 + $0xc8] sm:$0xff]   ;;  %v15191_v3 = vpop.f32.mrf.mxu0  ;;  %vm20188_vm8 = vmmov %vm20184_vm2 }
 0x12d   : > { %12971 = vmatprep.mubr.bf16.mxu0 %v2228_v49  ;;  %v1666_v13 = vrot.slane %v15160_v11, 5  ;;  %v4368_v12 = vrot.slane %v4366_v31, 3  ;;  %v4371_v20 = vrot.slane %v4369_v55, 4  ;;  %v2286_v22 = vrot.slane %v2284_v56, 3  ;;  %v15189_v11 = vpop.f32.mrf.mxu1  ;;  %v3563_v17 = vld [vmem:[#allocation2 + $0x4c] sm:$0x8]  ;;  %12268 = vmatpush3.bf16.msra.mxu1 %v13214_v1 }
 0x12e   : > { %v3760_v28 = vrot.slane %v3758_v45, 4  ;;  %v2289_v40 = vrot.slane %v2287_v44, 4  ;;  %v15186_v49 = vor.u32 %v4462_v14, %v4459_v43  ;;  %v3763_v18 = vrot.slane %v3761_v52, 5  ;;  %20186 = vst [vmem:[#allocation33_spill] sm:$0xff] %v15189_v11  ;;  %v13208_v43 = vld [vmem:[%s19592_s1 + $0x88] sm:$0xff]   ;;  %v214_v14 = vld [vmem:[%s13654_s27 + $0xc0] sm:$0xff]  ;;  %12206 = vmatpush3.bf16.msra.mxu0 %v13204_v63  ;;  %12269 = vmatprep.subr.bf16.mxu1 %v13216_v33 }
 0x12f   : > { %v1667_v32 = vsel %vm20185_vm15, %v1664_v37, %v1666_v13  ;;  %v15193_v19 = vor.u32 %v4371_v20, %v4368_v12  ;;  %v1220_v51 = vsel %vm20140_vm9, %v1203_v26, 0  ;;  %v13210_v56 = vld [vmem:[%s19592_s1 + $0xc0] sm:$0xff]   ;;  %v13217_v26 = vld [vmem:[%s19592_s1 + $0x110] sm:$0xff]   ;;  %v13219_v1 = vld [vmem:[%s19592_s1 + $0x148] sm:$0xff]   ;;  %12207 = vmatprep.subr.bf16.mxu0 %v13206_v25  ;;  %v11730_v11 = vpack.c.bf16 %v215_v53, %v214_v14 }
 0x130   : > { %v2347_v31 = vshrl.u32 %v1667_v32, 16  ;;  %v2350_v55 = vshll.u32 %v1667_v32, 16  ;;  %v2290_v37 = vor.u32 %v2289_v40, %v2286_v22  ;;  %v4464_v45 = vsel %vm20188_vm8, %v15100_v7, %v15186_v49  ;;  %vm20192_vm8 = vmmov %vm20184_vm2  ;;  %v13220_v33 = vld [vmem:[%s19592_s1 + $0x108] sm:$0xff]   ;;  %v13221_v25 = vld [vmem:[%s19592_s1 + $0x140] sm:$0xff]  }
 0x131   : > { %20187 = vst [vmem:[#allocation38_spill] sm:$0xff] %v15193_v19  ;;  %v15205_v52 = vor.u32 %v3763_v18, %v3760_v28  ;;  %v10792_v20 = vcombine.low %v1220_v51, %v1220_v51  ;;  %v15216_v40 = vsel %vm20184_vm2, %v15108_v9, %v15193_v19  ;;  %v20190_v28 = vld [vmem:[#allocation23_spill] sm:$0xff]  ;;  %vm20193_vm2 = vsmask.f32 3328  ;;  %v20194_v18 = vld [vmem:[#allocation24_spill] sm:$0xff]  ;;  %v15238_v51 = vpop.f32.mrf.mxu0  ;;  %12270 = vmatpush3.bf16.msra.mxu1 %v13217_v26  ;;  %11839 = vst [vmem:[#allocation2 + $0x70] sm:$0xff] %v11730_v11  }
 0x132   : > { %20189 = vst [vmem:[#allocation37_spill] sm:$0xff] %v15216_v40  ;;  %v2349_v22 = vrot.slane %v2347_v31, 3  ;;  %v2352_v7 = vrot.slane %v2350_v55, 4  ;;  %vm20191_vm15 = vnez %v20190_v28  ;;  %5394 = vmatprep.mubr.bf16.mxu1 %v15216_v40  ;;  %v2291_v12 = vsel %vm20192_vm8, %v15155_v62, %v2290_v37  ;;  %v15236_v55 = vpop.f32.mrf.mxu1  ;;  %20196 = vst [vmem:[#allocation44_spill] sm:$0xff] %v15238_v51  ;;  %12208 = vmatpush3.bf16.msra.mxu0 %v13208_v43 }
 0x133   : > { %v3536_v44 = vsel %vm20191_vm15, %v15074_v54, 0  ;;  %v3765_v63 = vsel %vm20193_vm2, %v15142_v6, %v15205_v52  ;;  %v1668_v32 = vrot.slane %v10792_v20, 5  ;;  %vm20195_vm9 = vnez %v20194_v18  ;;  %12972 = vmatmul.mubr.bf16.gmra.mxu0 %v2291_v12  ;;  %5395 = vmatmul.mubr.bf16.gmra.mxu1 %v4464_v45  ;;  %v13211_v20 = vld [vmem:[%s19592_s1 + $0x80] sm:$0xff]  }
 0x134   : > { %v3537_v31 = vsel %vm20195_vm9, %v15113_v50, 0  ;;  %v2353_v62 = vor.u32 %v2352_v7, %v2349_v22  ;;  %v4439_v42 = vshrl.u32 %v3765_v63, 16  ;;  %v4442_v40 = vshll.u32 %v3765_v63, 16  ;;  %12271 = vmatprep.subr.bf16.mxu1 %v13219_v1  ;;  %12209 = vmatprep.subr.bf16.mxu0 %v13210_v56 }
 0x135   : > { %v10886_v6 = vcombine.low %v3536_v44, %v3537_v31  ;;  %vm20197_vm8 = vcmask 1042432   ;;  %vm20198_vm2 = vcmp.ne.s16.totalorder %v13705_v16, 0  ;;  %v3567_v45 = vsel %vm13762_vm13, %v14963_v58, 0  ;;  %12272 = vmatpush3.bf16.msra.mxu1 %v13220_v33  ;;  %v13222_v31 = vld [vmem:[%s19592_s1 + $0x100] sm:$0xff]   ;;  %v15282_v33 = vld [vmem:[%s19592_s1 + $0x238] sm:$0xff]  }
 0x136   : > { %v1669_v9 = vsel %vm20197_vm8, %v1666_v13, %v1668_v32  ;;  %v3566_v51 = vsel %vm20198_vm2, %v3563_v17, 0  ;;  %vm20199_vm12 = vsmask.f32 4352  ;;  %v4441_v7 = vrot.slane %v4439_v42, 3  ;;  %v13223_v13 = vld [vmem:[%s19592_s1 + $0x1f8] sm:$0xff]   ;;  %v15261_v42 = vpop.f32.mrf.mxu0  ;;  %12210 = vmatpush3.bf16.msra.mxu0 %v13211_v20  ;;  %12273 = vmatprep.subr.bf16.mxu1 %v13221_v25  ;;  %v216_v20 = vld [vmem:[%s13654_s27 + $0xd0] sm:$0xff] }
 0x137   : > { %v2354_v22 = vsel %vm20199_vm12, %v2290_v37, %v2353_v62  ;;  %v4444_v44 = vrot.slane %v4442_v40, 4  ;;  %v2428_v12 = vshrl.u32 %v1669_v9, 16  ;;  %v2431_v14 = vshll.u32 %v1669_v9, 16  ;;  %v15259_v37 = vpop.f32.mrf.mxu1  ;;  %20201 = vst [vmem:[#allocation46_spill] sm:$0xff] %v15261_v42  ;;  %12323 = vmatprep.subr.bf16.mxu0 %v13223_v13 }
 0x138   : > { %12975 = vmatprep.mubr.bf16.mxu0 %v2354_v22  ;;  %v4520_v53 = vshrl.u32 %v10886_v6, 16  ;;  %v4523_v17 = vshll.u32 %v10886_v6, 16  ;;  %v3568_v26 = vsel %vm13766_vm14, %v14965_v10, 0  ;;  %20200 = vst [vmem:[#allocation45_spill] sm:$0xff] %v15259_v37  ;;  %v3569_v1 = vsel %vm13799_vm5, %v15012_v59, 0  ;;  %v20206_v37 = vld [vmem:[#allocation5_spill] sm:$0xff]  ;;  %vm20208_vm5 = vmmov %vm20199_vm12 }
 0x139   : > { %v15263_v43 = vor.u32 %v4444_v44, %v4441_v7  ;;  %v2430_v40 = vrot.slane %v2428_v12, 3  ;;  %v10908_v9 = vcombine.low %v3566_v51, %v3567_v45  ;;  %v2433_v63 = vrot.slane %v2431_v14, 4  ;;  %v20203_v51 = vld [vmem:[#allocation26_spill] sm:$0xff]  ;;  %12274 = vmatpush3.bf16.msra.mxu1 %v13222_v31 }
 0x13a   : > { %v4522_v32 = vrot.slane %v4520_v53, 3  ;;  %v4525_v56 = vrot.slane %v4523_v17, 4  ;;  %v10909_v11 = vcombine.low %v3568_v26, %v3569_v1  ;;  %vm20204_vm8 = vnez %v20203_v51  ;;  %v217_v17 = vld [vmem:[%s13654_s27 + $0xd8] sm:$0xff]  ;;  %v15289_v26 = vpop.f32.mrf.mxu1  ;;  %v15291_v1 = vpop.f32.mrf.mxu0  ;;  %12979 = vmatprep.subr.bf16.mxu1 %v15282_v33 }
 0x13b   : > { %v15274_v6 = vsel %vm20199_vm12, %v15193_v19, %v15263_v43  ;;  %v4290_v22 = vshrl.u32 %v10908_v9, 16  ;;  %v4293_v7 = vshll.u32 %v10908_v9, 16  ;;  %v3538_v45 = vsel %vm20204_vm8, %v15115_v57, 0  ;;  %20205 = vst [vmem:[#allocation48_spill] sm:$0xff] %v15289_v26  ;;  %v20260_v51 = vld [vmem:[#allocation31_spill] sm:$0xff] }
 0x13c   : > { %20202 = vst [vmem:[#allocation47_spill] sm:$0xff] %v15274_v6  ;;  %5402 = vmatprep.mubr.bf16.mxu1 %v15274_v6  ;;  %v2434_v44 = vor.u32 %v2433_v63, %v2430_v40  ;;  %v15285_v12 = vor.u32 %v4525_v56, %v4522_v32  ;;  %v4298_v14 = vshrl.u32 %v10909_v11, 16  ;;  %v4301_v53 = vshll.u32 %v10909_v11, 16  ;;  %v15303_v11 = vld [vmem:[#allocation2 + $0x70] sm:$0xf] }
 0x13d   : > { %v4292_v25 = vrot.slane %v4290_v22, 3  ;;  %v4295_v9 = vrot.slane %v4293_v7, 4  ;;  %vm20207_vm2 = vcmp.ne.s16.totalorder %v20206_v37, 0  ;;  %v3547_v40 = vsel %vm13886_vm0, %v14877_v29, 0  ;;  %v15305_v22 = vld [vmem:[#allocation2 + $0x74] sm:$0xf] }
 0x13e   : > { %v3546_v42 = vsel %vm20207_vm2, %v14860_v39, 0  ;;  %v2435_v63 = vsel %vm20199_vm12, %v2353_v62, %v2434_v44  ;;  %v4527_v13 = vsel %vm20208_vm5, %v15186_v49, %v15285_v12  ;;  %v4300_v32 = vrot.slane %v4298_v14, 3  ;;  %v20211_v14 = vld [vmem:[#allocation30_spill] sm:$0xff] }
 0x13f   : > { %v4303_v56 = vrot.slane %v4301_v53, 4  ;;  %12976 = vmatmul.mubr.bf16.gmra.mxu0 %v2435_v63  ;;  %5403 = vmatmul.mubr.bf16.gmra.mxu1 %v4527_v13  ;;  %v4296_v39 = vor.u32 %v4295_v9, %v4292_v25  ;;  %vm20209_vm2 = vcmp.ne.s16.totalorder %v13875_v35, 0  ;;  %v3549_v7 = vsel %vm13912_vm6, %v14965_v10, 0  ;;  %v15323_v25 = vpop.f32.mrf.mxu1 }
 0x140   : > { %v3548_v29 = vsel %vm20209_vm2, %v14963_v58, 0  ;;  %v10899_v44 = vcombine.low %v3546_v42, %v3547_v40  ;;  %v10896_v49 = vcombine.low %v15303_v11, %v15305_v22  ;;  %vm20212_vm5 = vnez %v20211_v14  ;;  %v15325_v58 = vpop.f32.mrf.mxu0 }
 0x141   : > { %v15315_v31 = vor.u32 %v4303_v56, %v4300_v32  ;;  %v3539_v53 = vsel %vm20212_vm5, %v15303_v11, 0  ;;  %v15320_v63 = vcombine.low %v3548_v29, %v3549_v7  ;;  %v11735_v42 = vpack.c.bf16 %v217_v17, %v216_v20 }
 0x142   : > { %v10887_v9 = vcombine.low %v3538_v45, %v3539_v53  ;;  %v3836_v10 = vrot.slane %v10899_v44, 5  ;;  %v3570_v40 = vsel %vm20162_vm3, %v15014_v15, 0  ;;  %v3767_v13 = vshrl.u32 %v10896_v49, 16 }
 0x143   : > { %v3770_v32 = vshll.u32 %v10896_v49, 16  ;;  %v4305_v56 = vsel %vm20199_vm12, %v4296_v39, %v15315_v31  ;;  %v19719_v29 = vrot.slane %v15320_v63, 5  ;;  %11840 = vst [vmem:[#allocation2 + $0x78] sm:$0xff] %v11735_v42   ;;  %vm20213_vm2 = vcmask 1042432   ;;  %v15339_v39 = vpop.f32.mrf.mxu1  ;;  %v15341_v49 = vpop.f32.mrf.mxu0 }
 0x144   : > { %5475 = vmatprep.mubr.bf16.mxu0 %v4305_v56  ;;  %v4583_v7 = vshrl.u32 %v10887_v9, 16  ;;  %v4586_v26 = vshll.u32 %v10887_v9, 16  ;;  %v4273_v19 = vshrl.u32 %v3836_v10, 16  ;;  %v4276_v38 = vshll.u32 %v3836_v10, 16  ;;  %20214 = vst [vmem:[#allocation49_spill] sm:$0xff] %v15339_v39  ;;  %20215 = vst [vmem:[#allocation50_spill] sm:$0xff] %v15341_v49 }
 0x145   : > { %v3769_v45 = vrot.slane %v3767_v13, 4  ;;  %v3772_v44 = vrot.slane %v3770_v32, 5  ;;  %v3838_v20 = vsel %vm20213_vm2, %v3836_v10, %v19719_v29  ;;  %v3571_v17 = vsel %vm20163_vm10, %v15072_v41, 0 }
 0x146   : > { %v4585_v53 = vrot.slane %v4583_v7, 3  ;;  %v4588_v9 = vrot.slane %v4586_v26, 4  ;;  %v4275_v56 = vrot.slane %v4273_v19, 3  ;;  %v4278_v42 = vrot.slane %v4276_v38, 4  ;;  %v218_v7 = vld [vmem:[%s13654_s27 + $0xe0] sm:$0xff]  ;;  %v219_v26 = vld [vmem:[%s13654_s27 + $0xe8] sm:$0xff] }
 0x147   : > { %v15343_v13 = vor.u32 %v3772_v44, %v3769_v45  ;;  %v4281_v32 = vshrl.u32 %v3838_v20, 16  ;;  %v4284_v21 = vshll.u32 %v3838_v20, 16  ;;  %v10910_v5 = vcombine.low %v3570_v40, %v3571_v17  ;;  %v15358_v44 = vpop.f32.mrf.mxu1  ;;  %v15360_v20 = vpop.f32.mrf.mxu0 }
 0x148   : > { %v15345_v10 = vor.u32 %v4588_v9, %v4585_v53  ;;  %v4279_v29 = vor.u32 %v4278_v42, %v4275_v56  ;;  %vm20217_vm12 = vnez %v20216_v8  ;;  %vm20218_vm2 = vcmp.ne.s16.totalorder %v13940_v23, 0  ;;  %20220 = vst [vmem:[#allocation51_spill] sm:$0xff] %v15358_v44  ;;  %20221 = vst [vmem:[#allocation52_spill] sm:$0xff] %v15360_v20  ;;  %v13224_v56 = vld [vmem:[%s19592_s1 + $0x1b8] sm:$0xff]  }
 0x149   : > { %v3540_v4 = vsel %vm20217_vm12, %v15305_v22, 0  ;;  %v3550_v16 = vsel %vm20218_vm2, %v15012_v59, 0  ;;  %vm20219_vm10 = vsmask.f32 3328  ;;  %v4283_v19 = vrot.slane %v4281_v32, 3 }
 0x14a   : > { %v3774_v38 = vsel %vm20219_vm10, %v15205_v52, %v15343_v13  ;;  %v4286_v45 = vrot.slane %v4284_v21, 4  ;;  %v4411_v40 = vshrl.u32 %v10910_v5, 16  ;;  %vm20222_vm3 = vsmask.f32 4352  ;;  %v15370_v52 = vld [vmem:[#allocation2 + $0x78] sm:$0xf] }
 0x14b   : > { %v4502_v17 = vshrl.u32 %v3774_v38, 16  ;;  %v4505_v53 = vshll.u32 %v3774_v38, 16  ;;  %v4590_v9 = vsel %vm20222_vm3, %v15285_v12, %v15345_v10  ;;  %v4414_v59 = vshll.u32 %v10910_v5, 16  ;;  %v15372_v21 = vld [vmem:[#allocation2 + $0x7c] sm:$0xf] }
 0x14c   : > { %v15368_v42 = vor.u32 %v4286_v45, %v4283_v19  ;;  %v4413_v32 = vrot.slane %v4411_v40, 3  ;;  %v3551_v38 = vsel %vm14033_vm11, %v15014_v15, 0  ;;  %v11740_v6 = vpack.c.bf16 %v219_v26, %v218_v7  ;;  %v13226_v19 = vld [vmem:[%s19592_s1 + $0x1f0] sm:$0xff]   ;;  %v20223_v40 = vld [vmem:[#allocation35_spill] sm:$0xff]  ;;  %v15395_v26 = vpop.f32.mrf.mxu1 }
 0x14d   : > { %v4504_v44 = vrot.slane %v4502_v17, 3  ;;  %v4507_v20 = vrot.slane %v4505_v53, 4  ;;  %v10897_v5 = vcombine.low %v15370_v52, %v15372_v21  ;;  %v4416_v12 = vrot.slane %v4414_v59, 4  ;;  %v13227_v7 = vld [vmem:[%s19592_s1 + $0x1b0] sm:$0xff]   ;;  %20225 = vst [vmem:[#allocation53_spill] sm:$0xff] %v15395_v26  ;;  %v15397_v17 = vpop.f32.mrf.mxu0 }
 0x14e   : > { %v4288_v45 = vsel %vm20222_vm3, %v4279_v29, %v15368_v42  ;;  %vm20224_vm10 = vnez %v20223_v40  ;;  %v15387_v39 = vcombine.low %v3550_v16, %v3551_v38  ;;  %11841 = vst [vmem:[#allocation2 + $0x80] sm:$0xff] %v11740_v6   ;;  %v3572_v15 = vsel %vm20175_vm1, %v15074_v54, 0  ;;  %vm20228_vm1 = vmmov %vm20222_vm3 }
 0x14f   : > { %v3541_v49 = vsel %vm20224_vm10, %v15370_v52, 0  ;;  %v15399_v29 = vor.u32 %v4507_v20, %v4504_v44  ;;  %5476 = vmatmul.mubr.bf16.vlgmr.msra.gmra.mxu0 %v4288_v45  ;;  %v3776_v53 = vshrl.u32 %v10897_v5, 16  ;;  %v3779_v59 = vshll.u32 %v10897_v5, 16  ;;  %v13228_v44 = vld [vmem:[%s19592_s1 + $0x1e8] sm:$0xff]  }
 0x150   : > { %v15401_v16 = vor.u32 %v4416_v12, %v4413_v32  ;;  %v10888_v6 = vcombine.low %v3540_v4, %v3541_v49  ;;  %v19733_v38 = vrot.slane %v15387_v39, 5  ;;  %v3573_v34 = vsel %vm20179_vm7, %v15113_v50, 0  ;;  %12324 = vmatpush3.bf16.msra.mxu0 %v13224_v56 }
 0x151   : > { %vm20226_vm2 = vnez %v20057_v2  ;;  %v15416_v20 = vsel %vm20222_vm3, %v15263_v43, %v15399_v29  ;;  %v3778_v4 = vrot.slane %v3776_v53, 4  ;;  %v3781_v49 = vrot.slane %v3779_v59, 5  ;;  %12325 = vmatprep.subr.bf16.mxu0 %v13226_v19  ;;  %v13230_v53 = vld [vmem:[%s19592_s1 + $0x1a8] sm:$0xff]   ;;  %v15430_v59 = vpop.f32.mrf.mxu1 }
 0x152   : > { %v3542_v26 = vsel %vm20226_vm2, %v15372_v21, 0  ;;  %20227 = vst [vmem:[#allocation54_spill] sm:$0xff] %v15416_v20  ;;  %v4418_v32 = vsel %vm20228_vm1, %v15315_v31, %v15401_v16  ;;  %5410 = vmatprep.mubr.bf16.mxu1 %v15416_v20  ;;  %v4646_v56 = vshrl.u32 %v10888_v6, 16  ;;  %v4649_v5 = vshll.u32 %v10888_v6, 16  ;;  %20231 = vst [vmem:[#allocation55_spill] sm:$0xff] %v15430_v59  ;;  %v15432_v31 = vpop.f32.mrf.mxu0 }
 0x153   : > { %5483 = vmatprep.mubr.bf16.mxu0 %v4418_v32  ;;  %v20229_v12 = vrot.slane %v15320_v63, 5  ;;  %vm20230_vm7 = vcmask 1042432   ;;  %v10911_v43 = vcombine.low %v3572_v15, %v3573_v34  ;;  %20232 = vst [vmem:[#allocation56_spill] sm:$0xff] %v15432_v31  ;;  %5411 = vmatmul.mubr.bf16.gmra.mxu1 %v4590_v9  ;;  %v15434_v19 = vor.u32 %v3781_v49, %v3778_v4  ;;  %v13231_v34 = vld [vmem:[%s19592_s1 + $0x1e0] sm:$0xff]  }
 0x154   : > { %vm20233_vm1 = vcmp.ne.s16.totalorder %v14074_v46, 0  ;;  %v4648_v15 = vrot.slane %v4646_v56, 3  ;;  %12326 = vmatpush3.bf16.msra.mxu0 %v13227_v7  ;;  %vm20235_vm3 = vnez %v20139_v0 }
 0x155   : > { %v3840_v45 = vsel %vm20230_vm7, %v20229_v12, %v19733_v38  ;;  %v3552_v63 = vsel %vm20233_vm1, %v15072_v41, 0  ;;  %v4651_v12 = vrot.slane %v4649_v5, 4  ;;  %v4475_v38 = vshrl.u32 %v10911_v43, 16  ;;  %v15447_v20 = vld [vmem:[#allocation2 + $0x84] sm:$0xf]  ;;  %12327 = vmatprep.subr.bf16.mxu0 %v13228_v44 }
 0x156   : > { %v4402_v32 = vshrl.u32 %v3840_v45, 16  ;;  %v4405_v6 = vshll.u32 %v3840_v45, 16  ;;  %v4478_v30 = vshll.u32 %v10911_v43, 16  ;;  %vm20234_vm7 = vsmask.f32 3328  ;;  %v15457_v43 = vpop.f32.mrf.mxu1 }
 0x157   : > { %v3783_v9 = vsel %vm20234_vm7, %v15343_v13, %v15434_v19  ;;  %v15445_v45 = vld [vmem:[#allocation2 + $0x80] sm:$0xf]  ;;  %v15451_v41 = vadd.f32 %v15191_v3, %v15172_v36  ;;  %v15453_v59 = vor.u32 %v4651_v12, %v4648_v15  ;;  %v15459_v13 = vpop.f32.mrf.mxu0  ;;  %vm20236_vm1 = vsmask.f32 4352 }
 0x158   : > { %v4404_v4 = vrot.slane %v4402_v32, 3  ;;  %v4407_v49 = vrot.slane %v4405_v6, 4  ;;  %v4565_v56 = vshrl.u32 %v3783_v9, 16  ;;  %v4568_v5 = vshll.u32 %v3783_v9, 16  ;;  %12328 = vmatpush3.bf16.msra.mxu0 %v13230_v53  ;;  %v13232_v9 = vld [vmem:[%s19592_s1 + $0x1a0] sm:$0xff]   ;;  %vm20237_vm7 = vmmov %vm20236_vm1 }
 0x159   : > { %v10898_v7 = vcombine.low %v15445_v45, %v15447_v20  ;;  %v4477_v6 = vrot.slane %v4475_v38, 3  ;;  %v4480_v31 = vrot.slane %v4478_v30, 4  ;;  %v3543_v36 = vsel %vm20235_vm3, %v15445_v45, 0  ;;  %12329 = vmatprep.subr.bf16.mxu0 %v13231_v34  ;;  %v15493_v34 = vpop.f32.mrf.mxu0 }
 0x15a   : > { %v15461_v32 = vor.u32 %v4407_v49, %v4404_v4  ;;  %v4567_v3 = vrot.slane %v4565_v56, 3  ;;  %v4570_v44 = vrot.slane %v4568_v5, 4  ;;  %v4653_v15 = vsel %vm20236_vm1, %v15345_v10, %v15453_v59  ;;  %v13233_v56 = vld [vmem:[%s19592_s1 + $0x1d8] sm:$0xff]  }
 0x15b   : > { %v3785_v12 = vshrl.u32 %v10898_v7, 16  ;;  %v3788_v38 = vshll.u32 %v10898_v7, 16  ;;  %v15475_v4 = vor.u32 %v4480_v31, %v4477_v6  ;;  %v10889_v49 = vcombine.low %v3542_v26, %v3543_v36  ;;  %v13235_v26 = vld [vmem:[%s19592_s1 + $0x198] sm:$0xff]   ;;  %v15491_v31 = vpop.f32.mrf.mxu1 }
 0x15c   : > { %v4409_v30 = vsel %vm20237_vm7, %v15368_v42, %v15461_v32  ;;  %v15480_v10 = vor.u32 %v4570_v44, %v4567_v3  ;;  %vm20238_vm1 = vnez %v19987_v24  ;;  %v3574_v42 = vsel %vm20191_vm15, %v15115_v57, 0  ;;  %vm20239_vm15 = vmmov %vm20237_vm7  ;;  %12330 = vmatpush3.bf16.msra.mxu0 %v13232_v9 }
 0x15d   : > { %5484 = vmatmul.mubr.bf16.gmra.mxu0 %v4409_v30  ;;  %v3787_v53 = vrot.slane %v3785_v12, 4  ;;  %v3553_v5 = vsel %vm20238_vm1, %v15074_v54, 0  ;;  %v3790_v7 = vrot.slane %v3788_v38, 5  ;;  %v4482_v6 = vsel %vm20237_vm7, %v15401_v16, %v15475_v4  ;;  %v13236_v54 = vld [vmem:[%s19592_s1 + $0x1d0] sm:$0xff]   ;;  %12331 = vmatprep.subr.bf16.mxu0 %v13233_v56  ;;  %v15524_v18 = vpop.f32.mrf.mxu1 }
 0x15e   : > { %v4709_v36 = vshrl.u32 %v10889_v49, 16  ;;  %v4712_v3 = vshll.u32 %v10889_v49, 16  ;;  %v15504_v44 = vsel %vm20239_vm15, %v15399_v29, %v15480_v10  ;;  %5491 = vmatprep.mubr.bf16.mxu0 %v4482_v6  ;;  %v15506_v12 = vcombine.low %v3552_v63, %v3553_v5 }
 0x15f   : > { %20240 = vst [vmem:[#allocation57_spill] sm:$0xff] %v15504_v44  ;;  %v3575_v30 = vsel %vm20195_vm9, %v15303_v11, 0  ;;  %vm20241_vm7 = vcmp.ne.s16.totalorder %v20143_v48, 0  ;;  %5418 = vmatprep.mubr.bf16.mxu1 %v15504_v44  ;;  %v15515_v38 = vor.u32 %v3790_v7, %v3787_v53  ;;  %vm20243_vm15 = vcmp.ne.s16.totalorder %v14225_v27, 0  ;;  %v15526_v53 = vpop.f32.mrf.mxu0  ;;  %v15547_v44 = vpop.f32.mrf.mxu1 }
 0x160   : > { %v3544_v16 = vsel %vm20241_vm7, %v15447_v20, 0  ;;  %v4711_v49 = vrot.slane %v4709_v36, 3  ;;  %v4714_v28 = vrot.slane %v4712_v3, 4  ;;  %v10912_v29 = vcombine.low %v3574_v42, %v3575_v30  ;;  %5419 = vmatmul.mubr.bf16.gmra.mxu1 %v4653_v15  ;;  %20245 = vst [vmem:[#allocation59_spill] sm:$0xff] %v15526_v53  ;;  %12332 = vmatpush3.bf16.msra.mxu0 %v13235_v26  ;;  %v13237_v30 = vld [vmem:[%s19592_s1 + $0x190] sm:$0xff]  }
 0x161   : > { %20242 = vst [vmem:[#allocation58_spill] sm:$0xff] %v15515_v38  ;;  %v3841_v63 = vrot.slane %v15506_v12, 5  ;;  %v10890_v5 = vcombine.low %v3544_v16, %v3544_v16  ;;  %v3554_v6 = vsel %vm20243_vm15, %v15113_v50, 0  ;;  %vm20244_vm7 = vnez %v20004_v60  ;;  %12333 = vmatprep.subr.bf16.mxu0 %v13236_v54  ;;  %v15549_v48 = vpop.f32.mrf.mxu0 }
 0x162   : > { %v3555_v9 = vsel %vm20244_vm7, %v15115_v57, 0  ;;  %vm20246_vm9 = vsmask.f32 3328  ;;  %v15531_v15 = vor.u32 %v4714_v28, %v4711_v49  ;;  %v4781_v42 = vshrl.u32 %v15515_v38, 16 }
 0x163   : > { %v3792_v56 = vsel %vm20246_vm9, %v15434_v19, %v15515_v38  ;;  %v4784_v7 = vshll.u32 %v15515_v38, 16  ;;  %v20247_v3 = vrot.slane %v15387_v39, 5  ;;  %vm20248_vm15 = vcmask 1042432   ;;  %v13239_v39 = vld [vmem:[%s19592_s1 + $0x1c8] sm:$0xff]  }
 0x164   : > { %v4628_v36 = vshrl.u32 %v3792_v56, 16  ;;  %v4631_v50 = vshll.u32 %v3792_v56, 16  ;;  %v4538_v12 = vshrl.u32 %v10912_v29, 16  ;;  %vm20249_vm9 = vsmask.f32 4352  ;;  %12334 = vmatpush3.bf16.msra.mxu0 %v13237_v30 }
 0x165   : > { %v3842_v57 = vsel %vm20248_vm15, %v20247_v3, %v3841_v63  ;;  %v4716_v28 = vsel %vm20249_vm9, %v15453_v59, %v15531_v15  ;;  %v4783_v49 = vrot.slane %v4781_v42, 3  ;;  %v4786_v38 = vrot.slane %v4784_v7, 4  ;;  %v13241_v7 = vld [vmem:[%s19592_s1 + $0x188] sm:$0xff]   ;;  %12335 = vmatprep.subr.bf16.mxu0 %v13239_v39  ;;  %vm20251_vm15 = vmmov %vm20249_vm9 }
 0x166   : > { %v4466_v19 = vshrl.u32 %v3842_v57, 16  ;;  %v4469_v16 = vshll.u32 %v3842_v57, 16  ;;  %v4630_v56 = vrot.slane %v4628_v36, 3  ;;  %v4633_v3 = vrot.slane %v4631_v50, 4 }
 0x167   : > { %v4540_v26 = vrot.slane %v4538_v12, 3  ;;  %v4541_v60 = vshll.u32 %v10912_v29, 16  ;;  %v4772_v59 = vshrl.u32 %v10890_v5, 16  ;;  %v4787_v42 = vor.u32 %v4786_v38, %v4783_v49  ;;  %v13242_v38 = vld [vmem:[%s19592_s1 + $0x1c0] sm:$0xff]  }
 0x168   : > { %v4468_v0 = vrot.slane %v4466_v19, 3  ;;  %v4471_v53 = vrot.slane %v4469_v16, 4  ;;  %v15551_v27 = vor.u32 %v4633_v3, %v4630_v56  ;;  %v4775_v54 = vshll.u32 %v10890_v5, 16  ;;  %v13430_v16 = vld [vmem:[#allocation2 + $0x50] sm:$0xf]  ;;  %12336 = vmatpush3.bf16.msra.mxu0 %v13241_v7 }
 0x169   : > { %v15553_v57 = vcombine.low %v3554_v6, %v3555_v9  ;;  %v4543_v50 = vrot.slane %v4541_v60, 4  ;;  %v4774_v12 = vrot.slane %v4772_v59, 3  ;;  %v3576_v29 = vsel %vm20204_vm8, %v15305_v22, 0  ;;  %v15574_v9 = vpop.f32.mrf.mxu1  ;;  %vm20253_vm8 = vmmov %vm20249_vm9  ;;  %v13431_v59 = vld [vmem:[#allocation2 + $0x54] sm:$0xf]  ;;  %12337 = vmatprep.subr.bf16.mxu0 %v13242_v38 }
 0x16a   : > { %20250 = vst [vmem:[#allocation60_spill] sm:$0xff] %v15551_v27  ;;  %v15558_v36 = vor.u32 %v4471_v53, %v4468_v0  ;;  %v15569_v5 = vsel %vm20251_vm15, %v15480_v10, %v15551_v27  ;;  %v4788_v0 = vsel %vm20249_vm9, %v15551_v27, %v4787_v42  ;;  %v4777_v6 = vrot.slane %v4775_v54, 4  ;;  %v15576_v53 = vpop.f32.mrf.mxu0 }
 0x16b   : > { %20252 = vst [vmem:[#allocation61_spill] sm:$0xff] %v15569_v5  ;;  %v19751_v60 = vrot.slane %v15553_v57, 5  ;;  %5426 = vmatprep.mubr.bf16.mxu1 %v15569_v5  ;;  %v4544_v19 = vor.u32 %v4543_v50, %v4540_v26  ;;  %v3577_v10 = vsel %vm20212_vm5, %v15370_v52, 0  ;;  %vm20254_vm15 = vcmp.ne.s16.totalorder %v20206_v37, 0  ;;  %v15594_v50 = vld [vmem:[#allocation2 + $0x58] sm:$0xf] }
 0x16c   : > { %v4473_v30 = vsel %vm20253_vm8, %v15461_v32, %v15558_v36  ;;  %v3584_v49 = vsel %vm20254_vm15, %v13430_v16, 0  ;;  %5427 = vmatmul.mubr.bf16.gmra.mxu1 %v4716_v28  ;;  %v4778_v39 = vor.u32 %v4777_v6, %v4774_v12  ;;  %vm20255_vm9 = vcmask 1042432   ;;  %v13243_v12 = vld [vmem:[%s19592_s1 + $0x180] sm:$0xff]   ;;  %v15609_v6 = vld [vmem:[#allocation2 + $0x5c] sm:$0xf]  ;;  %v15616_v7 = vpop.f32.mrf.mxu0 }
 0x16d   : > { %5492 = vmatmul.mubr.bf16.gmra.mxu0 %v4473_v30  ;;  %v3844_v56 = vsel %vm20255_vm9, %v3841_v63, %v19751_v60  ;;  %v10913_v3 = vcombine.low %v3576_v29, %v3577_v10  ;;  %v3585_v32 = vsel %vm13886_vm0, %v13431_v59, 0  ;;  %5434 = vmatprep.mubr.bf16.mxu1 %v4788_v0  ;;  %v4545_v26 = vsel %vm20253_vm8, %v15475_v4, %v4544_v19  ;;  %v15602_v63 = vld [vmem:[%s19593_s2] ss:$0 sm:$0xff]  ;;  %vm20257_vm9 = vmmov %vm20253_vm8  ;;  %v15614_v10 = vpop.f32.mrf.mxu1  ;;  %v13249_v16 = vld [vmem:[%s19592_s1 + $0x2b8] sm:$0xff]  }
 0x16e   : > { %v4529_v42 = vshrl.u32 %v3844_v56, 16  ;;  %v4532_v54 = vshll.u32 %v3844_v56, 16  ;;  %vm20256_vm15 = vcmp.ne.s16.totalorder %v13875_v35, 0  ;;  %5499 = vmatprep.mubr.bf16.mxu0 %v4545_v26  ;;  %v4779_v4 = vsel %vm20257_vm9, %v15531_v15, %v4778_v39  ;;  %v20258_v60 = vld [vmem:[#allocation28_spill] sm:$0xff]  ;;  %12338 = vmatpush3.bf16.msra.mxu0 %v13243_v12  ;;  %vm20264_vm5 = vmmov %vm20257_vm9 }
 0x16f   : > { %v3586_v28 = vsel %vm20256_vm15, %v15594_v50, 0  ;;  %v4601_v29 = vshrl.u32 %v10913_v3, 16  ;;  %v4604_v0 = vshll.u32 %v10913_v3, 16  ;;  %v3587_v30 = vsel %vm13912_vm6, %v15609_v6, 0  ;;  %12403 = vmatprep.subr.bf16.mxu0 %v13249_v16 }
 0x170   : > { %v4531_v56 = vrot.slane %v4529_v42, 3  ;;  %v4534_v59 = vrot.slane %v4532_v54, 4  ;;  %v10918_v15 = vcombine.low %v3584_v49, %v3585_v32  ;;  %v15621_v39 = vcombine.low %v3586_v28, %v3587_v30  ;;  %v20262_v32 = vld [vmem:[#allocation27_spill] sm:$0xff]  ;;  %v15642_v30 = vpop.f32.mrf.mxu0 }
 0x171   : > { %v4603_v3 = vrot.slane %v4601_v29, 3  ;;  %v4606_v26 = vrot.slane %v4604_v0, 4  ;;  %vm20259_vm8 = vcmp.ne.s16.totalorder %v20258_v60, 0  ;;  %vm20261_vm15 = vnez %v20260_v51  ;;  %v15640_v0 = vpop.f32.mrf.mxu1 }
 0x172   : > { %v3556_v14 = vsel %vm20259_vm8, %v15303_v11, 0  ;;  %v3557_v38 = vsel %vm20261_vm15, %v15305_v22, 0  ;;  %v15629_v62 = vor.u32 %v4534_v59, %v4531_v56  ;;  %v3953_v35 = vrot.slane %v10918_v15, 5 }
 0x173   : > { %v19762_v47 = vrot.slane %v15621_v39, 5  ;;  %v15632_v42 = vcombine.low %v3556_v14, %v3557_v38  ;;  %v15634_v49 = vor.u32 %v4606_v26, %v4603_v3  ;;  %v4307_v54 = vshrl.u32 %v20262_v32, 16 }
 0x174   : > { %v4310_v28 = vshll.u32 %v20262_v32, 16  ;;  %v2965_v29 = vadd.f32 %v15451_v41, %v15602_v63  ;;  %v4536_v14 = vsel %vm20257_vm9, %v15558_v36, %v15629_v62  ;;  %vm20263_vm8 = vcmask 1042432   ;;  %5435 = vmatmul.mubr.bf16.gmra.mxu1 %v4779_v4 }
 0x175   : > { %v3955_v12 = vsel %vm20263_vm8, %v3953_v35, %v19762_v47  ;;  %v4324_v56 = vshrl.u32 %v3953_v35, 16  ;;  %v4327_v59 = vshll.u32 %v3953_v35, 16  ;;  %5500 = vmatmul.mubr.bf16.gmra.mxu0 %v4536_v14  ;;  %v4608_v41 = vsel %vm20264_vm5, %v4544_v19, %v15634_v49  ;;  %vm20266_vm9 = vmmov %vm20263_vm8  ;;  %v20267_v14 = vld [vmem:[#allocation33_spill] sm:$0xff]  ;;  %v15660_v47 = vpop.f32.mrf.mxu1 }
 0x176   : > { %v4332_v15 = vshrl.u32 %v3955_v12, 16  ;;  %v4335_v3 = vshll.u32 %v3955_v12, 16  ;;  %v19765_v26 = vrot.slane %v15632_v42, 5  ;;  %5507 = vmatprep.mubr.bf16.mxu0 %v4608_v41  ;;  %v4309_v32 = vrot.slane %v4307_v54, 3  ;;  %v15662_v12 = vpop.f32.mrf.mxu0  ;;  %vm20270_vm8 = vmmov %vm20264_vm5 }
 0x177   : > { %v4326_v16 = vrot.slane %v4324_v56, 3  ;;  %v4329_v38 = vrot.slane %v4327_v59, 4  ;;  %v4312_v36 = vrot.slane %v4310_v28, 4  ;;  %v20265_v35 = vrot.slane %v15553_v57, 5  ;;  %v20269_v57 = vld [vmem:[#allocation29_spill] sm:$0xff] }
 0x178   : > { %v4334_v37 = vrot.slane %v4332_v15, 3  ;;  %v4337_v27 = vrot.slane %v4335_v3, 4  ;;  %v11941_v19 = vadd.f32 %v15236_v55, %v20267_v14  ;;  %v3578_v55 = vsel %vm20217_vm12, %v15372_v21, 0 }
 0x179   : > { %v3846_v4 = vsel %vm20266_vm9, %v20265_v35, %v19765_v26  ;;  %v4330_v41 = vor.u32 %v4329_v38, %v4326_v16  ;;  %v4313_v54 = vor.u32 %v4312_v36, %v4309_v32  ;;  %v13229_v16 = vld [vmem:[%s19592_s1 + $0x230] sm:$0xff]   ;;  %vm20271_vm9 = vcmp.ne.s16.totalorder %v13940_v23, 0  ;;  %v15686_v32 = vpop.f32.mrf.mxu1  ;;  %v15688_v36 = vpop.f32.mrf.mxu0 }
 0x17a   : > { %v4592_v56 = vshrl.u32 %v3846_v4, 16  ;;  %v4595_v59 = vshll.u32 %v3846_v4, 16  ;;  %v15664_v28 = vor.u32 %v4337_v27, %v4334_v37  ;;  %v15666_v15 = vadd.f32 %v11941_v19, %v2965_v29  ;;  %v15681_v29 = vld [vmem:[#allocation2 + $0x60] sm:$0xf]  ;;  %v15692_v19 = vld [vmem:[#allocation2 + $0x64] sm:$0xf] }
 0x17b   : > { %v4322_v35 = vsel %vm20264_vm5, %v4313_v54, %v20269_v57  ;;  %v3579_v37 = vsel %vm20224_vm10, %v15445_v45, 0  ;;  %v3588_v38 = vsel %vm20271_vm9, %v15681_v29, 0  ;;  %20272 = vst [vmem:[#allocation33_spill] sm:$0xff] %v15692_v19  ;;  %v220_v54 = vld [vmem:[%s13654_s27 + $0xf0] sm:$0xff]  ;;  %vm20285_vm9 = vcmask 1042432  }
 0x17c   : > { %20268 = vst [vmem:[#allocation27_spill] sm:$0xff] %v15666_v15  ;;  %v4594_v3 = vrot.slane %v4592_v56, 3  ;;  %v4597_v5 = vrot.slane %v4595_v59, 4  ;;  %v4339_v27 = vsel %vm20270_vm8, %v4330_v41, %v15664_v28  ;;  %v10914_v14 = vcombine.low %v3578_v55, %v3579_v37  ;;  %v20273_v56 = vld [vmem:[#allocation32_spill] sm:$0xff]  ;;  %v221_v55 = vld [vmem:[%s13654_s27 + $0xf8] sm:$0xff] }
 0x17d   : > { %5572 = vmatprep.mubr.bf16.mxu1 %v4339_v27  ;;  %v3589_v41 = vsel %vm14033_vm11, %v15692_v19, 0  ;;  %vm20274_vm5 = vcmp.ne.s16.totalorder %v20273_v56, 0  ;;  %v20278_v15 = vld [vmem:[#allocation52_spill] sm:$0xff]  ;;  %v11745_v26 = vpack.c.bf16 %v221_v55, %v220_v54 }
 0x17e   : > { %v15690_v4 = vor.u32 %v4597_v5, %v4594_v3  ;;  %v3558_v59 = vsel %vm20274_vm5, %v15370_v52, 0  ;;  %5573 = vmatmul.mubr.bf16.vlgmr.msra.gmra.mxu1 %v4322_v35  ;;  %v15701_v57 = vcombine.low %v3588_v38, %v3589_v41  ;;  %v3559_v5 = vsel %vm20117_vm4, %v15372_v21, 0  ;;  %v20276_v41 = vld [vmem:[#allocation49_spill] sm:$0xff]  ;;  %v20281_v35 = vld [vmem:[#allocation51_spill] sm:$0xff]  ;;  %vm20288_vm5 = vmmov %vm20285_vm9 }
 0x17f   : > { %v11883_v3 = vadd.f32 %v15325_v58, %v15291_v1  ;;  %12980 = vmatpush3.bf16.msra.mxu1 %v15282_v33  ;;  %v4664_v37 = vshrl.u32 %v10914_v14, 16  ;;  %v4667_v40 = vshll.u32 %v10914_v14, 16  ;;  %v15713_v8 = vcombine.low %v3558_v59, %v3559_v5  ;;  %v20277_v58 = vld [vmem:[#allocation50_spill] sm:$0xff]  ;;  %v13234_v33 = vld [vmem:[%s19592_s1 + $0x228] sm:$0xff]   ;;  %v15726_v14 = vpop.f32.mrf.mxu0  ;;  %11842 = vst [vmem:[#allocation2 + $0x88] sm:$0xff] %v11745_v26   ;;  %v13240_v54 = vld [vmem:[%s19592_s1 + $0x220] sm:$0xff]  }
 0x180   : > { %v4599_v27 = vsel %vm20270_vm8, %v15629_v62, %v15690_v4  ;;  %12981 = vmatprep.subr.bf16.mxu1 %v13229_v16  ;;  %v11947_v1 = vadd.f32 %v20276_v41, %v15323_v25  ;;  %v11886_v61 = vadd.f32 %v20278_v15, %v20277_v58  ;;  %v15724_v62 = vpop.f32.mrf.mxu1  ;;  %20280 = vst [vmem:[#allocation49_spill] sm:$0xff] %v15726_v14  ;;  %v20283_v25 = vrot.slane %v15701_v57, 5  ;;  %v15761_v26 = vld [vmem:[#allocation2 + $0x68] sm:$0xf] }
 0x181   : > { %5508 = vmatmul.mubr.bf16.gmra.mxu0 %v4599_v27  ;;  %v2973_v38 = vadd.f32 %v11883_v3, %v15602_v63  ;;  %20279 = vst [vmem:[#allocation29_spill] sm:$0xff] %v15724_v62  ;;  %v4666_v59 = vrot.slane %v4664_v37, 3  ;;  %v4669_v5 = vrot.slane %v4667_v40, 4  ;;  %v19774_v27 = vrot.slane %v15713_v8, 5  ;;  %v20282_v3 = vld [vmem:[#allocation53_spill] sm:$0xff] }
 0x182   : > { %v11950_v23 = vadd.f32 %v20282_v3, %v20281_v35  ;;  %v20284_v41 = vrot.slane %v15621_v39, 5  ;;  %v2976_v19 = vadd.f32 %v11886_v61, %v15602_v63  ;;  %v20287_v62 = vrot.slane %v15632_v42, 5  ;;  %v15754_v55 = vpop.f32.mrf.mxu1  ;;  %v15756_v42 = vpop.f32.mrf.mxu0 }
 0x183   : > { %v15736_v58 = vadd.f32 %v11947_v1, %v2973_v38  ;;  %v15739_v56 = vor.u32 %v4669_v5, %v4666_v59  ;;  %12982 = vmatpush3.bf16.msra.mxu1 %v13229_v16  ;;  %v3580_v61 = vsel %vm20226_vm2, %v15447_v20, 0  ;;  %v15766_v59 = vld [vmem:[#allocation2 + $0x6c] sm:$0xf]  ;;  %vm20304_vm2 = vcmask 1042432  }
 0x184   : > { %v3957_v15 = vsel %vm20285_vm9, %v20284_v41, %v20283_v25  ;;  %v3848_v35 = vsel %vm20288_vm5, %v20287_v62, %v19774_v27  ;;  %v15746_v14 = vadd.f32 %v11950_v23, %v2976_v19  ;;  %12983 = vmatprep.subr.bf16.mxu1 %v13234_v33  ;;  %vm20290_vm9 = vcmp.ne.s16.totalorder %v14074_v46, 0  ;;  %20291 = vst [vmem:[#allocation51_spill] sm:$0xff] %v15766_v59  ;;  %v20292_v25 = vld [vmem:[#allocation40_spill] sm:$0xff]  ;;  %v20297_v27 = vld [vmem:[#allocation55_spill] sm:$0xff] }
 0x185   : > { %20286 = vst [vmem:[#allocation50_spill] sm:$0xff] %v15736_v58  ;;  %v4421_v37 = vshrl.u32 %v3957_v15, 16  ;;  %v4424_v40 = vshll.u32 %v3957_v15, 16  ;;  %v4655_v3 = vshrl.u32 %v3848_v35, 16  ;;  %v4658_v39 = vshll.u32 %v3848_v35, 16  ;;  %v20296_v35 = vld [vmem:[#allocation56_spill] sm:$0xff] }
 0x186   : > { %20289 = vst [vmem:[#allocation52_spill] sm:$0xff] %v15746_v14  ;;  %v4671_v16 = vsel %vm20270_vm8, %v15634_v49, %v15739_v56  ;;  %v3590_v38 = vsel %vm20290_vm9, %v15761_v26, 0  ;;  %v3591_v5 = vsel %vm20238_vm1, %v15766_v59, 0  ;;  %vm20293_vm5 = vcmp.ne.s16.totalorder %v20292_v25, 0 }
 0x187   : > { %v4423_v23 = vrot.slane %v4421_v37, 3  ;;  %v4426_v19 = vrot.slane %v4424_v40, 4  ;;  %5515 = vmatprep.mubr.bf16.mxu0 %v4671_v16  ;;  %v4657_v1 = vrot.slane %v4655_v3, 3  ;;  %v4660_v62 = vrot.slane %v4658_v39, 4  ;;  %v20294_v37 = vld [vmem:[#allocation43_spill] sm:$0xff]  ;;  %12984 = vmatpush3.bf16.msra.mxu1 %v13234_v33 }
 0x188   : > { %v3560_v49 = vsel %vm20293_vm5, %v15445_v45, 0  ;;  %v15776_v15 = vcombine.low %v3590_v38, %v3591_v5  ;;  %vm20295_vm8 = vnez %v20294_v37  ;;  %v11889_v3 = vadd.f32 %v20296_v35, %v15397_v17  ;;  %12985 = vmatprep.subr.bf16.mxu1 %v13240_v54  ;;  %v15793_v38 = vpop.f32.mrf.mxu0  ;;  %v15823_v35 = vld [vmem:[#allocation2 + $0x8c] sm:$0xf]  ;;  %v3583_v37 = vld [vmem:[#allocation2 + $0x90] sm:$0x1] }
 0x189   : > { %v15774_v41 = vor.u32 %v4426_v19, %v4423_v23  ;;  %v3561_v40 = vsel %vm20295_vm8, %v15447_v20, 0  ;;  %v15783_v39 = vor.u32 %v4660_v62, %v4657_v1  ;;  %v11953_v14 = vadd.f32 %v15457_v43, %v20297_v27  ;;  %v15791_v19 = vpop.f32.mrf.mxu1  ;;  %v13244_v43 = vld [vmem:[%s19592_s1 + $0x218] sm:$0xff]   ;;  %v20300_v27 = vld [vmem:[#allocation22_spill] sm:$0xff] }
 0x18a   : > { %v15785_v16 = vcombine.low %v3560_v49, %v3561_v40  ;;  %v11892_v23 = vadd.f32 %v15493_v34, %v15459_v13  ;;  %vm20298_vm9 = vsmask.f32 4352  ;;  %v19776_v17 = vrot.slane %v15776_v15, 5  ;;  %v20302_v49 = vld [vmem:[#allocation37_spill] sm:$0xff] }
 0x18b   : > { %v4428_v33 = vsel %vm20298_vm9, %v15664_v28, %v15774_v41  ;;  %v2981_v1 = vadd.f32 %v11889_v3, %v15602_v63  ;;  %v11956_v62 = vadd.f32 %v15524_v18, %v15491_v31  ;;  %vm20299_vm5 = vmmov %vm20298_vm9  ;;  %vm20301_vm9 = vcmp.ne.s16.totalorder %v20300_v27, 0  ;;  %v15814_v18 = vld [vmem:[#allocation2 + $0x88] sm:$0xf]  ;;  %12986 = vmatpush3.bf16.msra.mxu1 %v13240_v54  ;;  %v20314_v27 = vld [vmem:[#allocation42_spill] sm:$0xff] }
 0x18c   : > { %5580 = vmatprep.mubr.bf16.mxu1 %v4428_v33  ;;  %v4662_v13 = vsel %vm20299_vm5, %v15690_v4, %v15783_v39  ;;  %v2984_v28 = vadd.f32 %v11892_v23, %v15602_v63  ;;  %v3592_v5 = vsel %vm20301_vm9, %v15303_v11, 0  ;;  %v20303_v31 = vrot.slane %v15701_v57, 5  ;;  %v20307_v11 = vld [vmem:[#allocation59_spill] sm:$0xff]  ;;  %12987 = vmatprep.subr.bf16.mxu1 %v13244_v43 }
 0x18d   : > { %5516 = vmatmul.mubr.bf16.gmra.mxu0 %v4662_v13  ;;  %5581 = vmatmul.mubr.bf16.gmra.mxu1 %v20302_v49  ;;  %v15821_v4 = vadd.f32 %v11953_v14, %v2981_v1  ;;  %v3593_v23 = vsel %vm20244_vm7, %v15305_v22, 0  ;;  %v11895_v33 = vadd.f32 %v15549_v48, %v20307_v11  ;;  %v3581_v49 = vsel %vm20235_vm3, %v15814_v18, 0  ;;  %v3545_v13 = vld [vmem:[#allocation2 + $0x88] sm:$0x1] }
 0x18e   : > { %v3959_v40 = vsel %vm20304_vm2, %v20303_v31, %v19776_v17  ;;  %v20309_v57 = vrot.slane %v15785_v16, 5  ;;  %v20310_v14 = vrot.slane %v15713_v8, 5  ;;  %v15838_v31 = vpop.f32.mrf.mxu1  ;;  %v15840_v17 = vpop.f32.mrf.mxu0  ;;  %v10915_v22 = vcombine.low %v3580_v61, %v3581_v49 }
 0x18f   : > { %20305 = vst [vmem:[#allocation53_spill] sm:$0xff] %v15821_v4  ;;  %v4484_v34 = vshrl.u32 %v3959_v40, 16  ;;  %v4487_v58 = vshll.u32 %v3959_v40, 16  ;;  %v15842_v11 = vadd.f32 %v11956_v62, %v2984_v28  ;;  %v13245_v40 = vld [vmem:[%s19592_s1 + $0x210] sm:$0xff]   ;;  %v15856_v3 = vcombine.low %v3592_v5, %v3593_v23  ;;  %12988 = vmatpush3.bf16.msra.mxu1 %v13244_v43  ;;  %v13246_v43 = vld [vmem:[%s19592_s1 + $0x208] sm:$0xff]  }
 0x190   : > { %v3850_v1 = vsel %vm20304_vm2, %v20310_v14, %v20309_v57  ;;  %v20312_v57 = vld [vmem:[#allocation6_spill] sm:$0xff]  ;;  %v15852_v14 = vcombine.low %v15814_v18, %v15823_v35  ;;  %v4727_v61 = vshrl.u32 %v10915_v22, 16  ;;  %v4730_v49 = vshll.u32 %v10915_v22, 16  ;;  %12989 = vmatprep.subr.bf16.mxu1 %v13245_v40 }
 0x191   : > { %v4718_v4 = vshrl.u32 %v3850_v1, 16  ;;  %v4721_v48 = vshll.u32 %v3850_v1, 16  ;;  %20311 = vst [vmem:[#allocation56_spill] sm:$0xff] %v15842_v11  ;;  %v4486_v2 = vrot.slane %v4484_v34, 3  ;;  %v4489_v8 = vrot.slane %v4487_v58, 4  ;;  %v15860_v34 = vpop.f32.mrf.mxu1 }
 0x192   : > { %vm20313_vm5 = vcmp.ne.s16.totalorder %v20312_v57, 0  ;;  %vm20315_vm9 = vnez %v20314_v27  ;;  %v15862_v57 = vpop.f32.mrf.mxu0  ;;  %v4729_v24 = vrot.slane %v4727_v61, 3  ;;  %v4732_v46 = vrot.slane %v4730_v49, 4  ;;  %v20318_v61 = vld [vmem:[#allocation47_spill] sm:$0xff] }
 0x193   : > { %v3582_v54 = vsel %vm20313_vm5, %v15823_v35, 0  ;;  %v4720_v62 = vrot.slane %v4718_v4, 3  ;;  %v4723_v28 = vrot.slane %v4721_v48, 4  ;;  %v15854_v1 = vor.u32 %v4489_v8, %v4486_v2  ;;  %12990 = vmatpush3.bf16.msra.mxu1 %v13245_v40 }
 0x194   : > { %v10916_v11 = vcombine.low %v3582_v54, %v3582_v54  ;;  %v3562_v58 = vsel %vm20315_vm9, %v3545_v13, 0  ;;  %vm20316_vm2 = vsmask.f32 4352  ;;  %v3960_v23 = vrot.slane %v15856_v3, 5  ;;  %12991 = vmatprep.subr.bf16.mxu1 %v13246_v43 }
 0x195   : > { %v15864_v59 = vor.u32 %v4723_v28, %v4720_v62  ;;  %v10907_v22 = vcombine.low %v3562_v58, %v3562_v58  ;;  %v4491_v2 = vsel %vm20316_vm2, %v15774_v41, %v15854_v1  ;;  %v4733_v13 = vor.u32 %v4732_v46, %v4729_v24  ;;  %vm20317_vm5 = vmmov %vm20316_vm2  ;;  %v15885_v24 = vpop.f32.mrf.mxu1  ;;  %v15887_v28 = vpop.f32.mrf.mxu0 }
 0x196   : > { %v4799_v5 = vshrl.u32 %v10916_v11, 16  ;;  %v4802_v4 = vshll.u32 %v10916_v11, 16  ;;  %5588 = vmatprep.mubr.bf16.mxu1 %v4491_v2  ;;  %v2989_v54 = vadd.f32 %v11895_v33, %v15602_v63  ;;  %v20319_v11 = vrot.slane %v15776_v15, 5  ;;  %v13247_v15 = vld [vmem:[%s19592_s1 + $0x200] sm:$0xff]  }
 0x197   : > { %v4725_v48 = vsel %vm20317_vm5, %v15783_v39, %v15864_v59  ;;  %v3851_v8 = vrot.slane %v10907_v22, 5  ;;  %5589 = vmatmul.mubr.bf16.gmra.mxu1 %v20318_v61  ;;  %vm20320_vm2 = vcmask 1042432   ;;  %v11959_v46 = vadd.f32 %v15574_v9, %v15547_v44 }
 0x198   : > { %v4801_v41 = vrot.slane %v4799_v5, 3  ;;  %v4804_v49 = vrot.slane %v4802_v4, 4  ;;  %v3961_v62 = vsel %vm20320_vm2, %v20319_v11, %v3960_v23  ;;  %v4734_v39 = vsel %vm20317_vm5, %v15739_v56, %v4733_v13  ;;  %vm20322_vm3 = vmmov %vm20320_vm2  ;;  %v3601_v5 = vld [vmem:[#allocation2 + $0x54] sm:$0x8]  ;;  %v15899_v56 = vpop.f32.mrf.mxu0  ;;  %12992 = vmatpush3.bf16.msra.mxu1 %v13246_v43 }
 0x199   : > { %v4547_v33 = vshrl.u32 %v3961_v62, 16  ;;  %v4550_v58 = vshll.u32 %v3961_v62, 16  ;;  %v20321_v22 = vrot.slane %v15785_v16, 5  ;;  %5523 = vmatprep.mubr.bf16.mxu0 %v4734_v39  ;;  %v15897_v11 = vadd.f32 %v11959_v46, %v2989_v54  ;;  %12993 = vmatprep.subr.bf16.mxu1 %v13247_v15 }
 0x19a   : > { %v4805_v44 = vor.u32 %v4804_v49, %v4801_v41  ;;  %5524 = vmatmul.mubr.bf16.gmra.mxu0 %v4725_v48  ;;  %v11962_v40 = vadd.f32 %v15640_v0, %v15614_v10  ;;  %vm20325_vm2 = vcmp.ne.s16.totalorder %v20258_v60, 0  ;;  %v15909_v49 = vpop.f32.mrf.mxu1  ;;  %v15911_v46 = vpop.f32.mrf.mxu0  ;;  %v3595_v10 = vsel %vm20261_vm15, %v15372_v21, 0 }
 0x19b   : > { %v3852_v2 = vsel %vm20322_vm3, %v20321_v22, %v3851_v8  ;;  %20323 = vst [vmem:[#allocation55_spill] sm:$0xff] %v15897_v11  ;;  %v4549_v62 = vrot.slane %v4547_v33, 3  ;;  %v4552_v16 = vrot.slane %v4550_v58, 4  ;;  %v11898_v8 = vadd.f32 %v15616_v7, %v15576_v53  ;;  %vm20324_vm3 = vmmov %vm20317_vm5  ;;  %v20326_v7 = vld [vmem:[#allocation19_spill] sm:$0xff] }
 0x19c   : > { %v4790_v9 = vshrl.u32 %v3852_v2, 16  ;;  %v4793_v4 = vshll.u32 %v3852_v2, 16  ;;  %v4806_v22 = vsel %vm20324_vm3, %v4733_v13, %v4805_v44  ;;  %v3594_v54 = vsel %vm20325_vm2, %v15370_v52, 0  ;;  %v13254_v52 = vld [vmem:[%s19592_s1 + $0x338] sm:$0xff]   ;;  %v20327_v2 = vld [vmem:[#allocation4_spill] sm:$0xff]  ;;  %vm20331_vm2 = vmmov %vm20324_vm3  ;;  %12994 = vmatpush3.bf16.msra.mxu1 %v13247_v15 }
 0x19d   : > { %5531 = vmatprep.mubr.bf16.mxu0 %v4806_v22  ;;  %v15913_v48 = vor.u32 %v4552_v16, %v4549_v62  ;;  %v2992_v53 = vadd.f32 %v11898_v8, %v15602_v63  ;;  %v4358_v0 = vshrl.u32 %v20326_v7, 16  ;;  %v15923_v33 = vcombine.low %v3594_v54, %v3595_v10  ;;  %12467 = vmatprep.subr.bf16.mxu1 %v13254_v52  ;;  %v20340_v16 = vld [vmem:[#allocation29_spill] sm:$0xff] }
 0x19e   : > { %v4792_v39 = vrot.slane %v4790_v9, 3  ;;  %v4795_v41 = vrot.slane %v4793_v4, 4  ;;  %v4361_v58 = vshll.u32 %v20326_v7, 16  ;;  %vm20328_vm5 = vcmp.ne.s16.totalorder %v20327_v2, 0  ;;  %v15928_v9 = vpop.f32.mrf.mxu1  ;;  %v15930_v4 = vpop.f32.mrf.mxu0 }
 0x19f   : > { %v3604_v44 = vsel %vm20328_vm5, %v3601_v5, 0  ;;  %v4554_v21 = vsel %vm20324_vm3, %v15854_v1, %v15913_v48  ;;  %v15935_v43 = vadd.f32 %v11962_v40, %v2992_v53  ;;  %v4360_v62 = vrot.slane %v4358_v0, 3  ;;  %v20333_v40 = vld [vmem:[#allocation54_spill] sm:$0xff]  ;;  %v20334_v53 = vld [vmem:[#allocation9_spill] sm:$0xff] }
 0x1a0   : > { %v4796_v13 = vor.u32 %v4795_v41, %v4792_v39  ;;  %v3605_v8 = vsel %vm13762_vm13, %v15594_v50, 0  ;;  %5596 = vmatprep.mubr.bf16.mxu1 %v4554_v21  ;;  %v19786_v22 = vrot.slane %v15923_v33, 5  ;;  %v4363_v39 = vrot.slane %v4361_v58, 4  ;;  %v15946_v10 = vpop.f32.mrf.mxu1  ;;  %v15948_v1 = vpop.f32.mrf.mxu0  ;;  %v20337_v21 = vld [vmem:[#allocation49_spill] sm:$0xff] }
 0x1a1   : > { %20329 = vst [vmem:[#allocation37_spill] sm:$0xff] %v15935_v43  ;;  %v3606_v54 = vsel %vm13766_vm14, %v15609_v6, 0  ;;  %5597 = vmatmul.mubr.bf16.gmra.mxu1 %v20333_v40  ;;  %vm20335_vm5 = vnez %v20334_v53  ;;  %v10927_v7 = vcombine.low %v3604_v44, %v3605_v8  ;;  %v11965_v0 = vadd.f32 %v15686_v32, %v15660_v47  ;;  %v20338_v8 = vld [vmem:[#allocation38_spill] sm:$0xff] }
 0x1a2   : > { %v4797_v5 = vsel %vm20331_vm2, %v15864_v59, %v4796_v13  ;;  %v3607_v50 = vsel %vm20335_vm5, %v15681_v29, 0  ;;  %v11901_v59 = vadd.f32 %v15662_v12, %v15642_v30  ;;  %vm20336_vm3 = vcmask 1042432   ;;  %v15965_v53 = vpop.f32.mrf.mxu1  ;;  %v15967_v44 = vpop.f32.mrf.mxu0 }
 0x1a3   : > { %v3963_v6 = vsel %vm20336_vm3, %v3960_v23, %v19786_v22  ;;  %v4364_v13 = vor.u32 %v4363_v39, %v4360_v62  ;;  %v10928_v58 = vcombine.low %v3606_v54, %v3607_v50  ;;  %v11904_v41 = vadd.f32 %v20337_v21, %v15688_v36  ;;  %5532 = vmatmul.mubr.bf16.gmra.mxu0 %v4797_v5 }
 0x1a4   : > { %v4610_v30 = vshrl.u32 %v3963_v6, 16  ;;  %v4613_v12 = vshll.u32 %v3963_v6, 16  ;;  %v4341_v47 = vshrl.u32 %v10927_v7, 16  ;;  %v4344_v32 = vshll.u32 %v10927_v7, 16  ;;  %v15972_v54 = vpop.f32.mrf.mxu1  ;;  %v15974_v36 = vpop.f32.mrf.mxu0 }
 0x1a5   : > { %v4373_v3 = vsel %vm20331_vm2, %v4364_v13, %v20338_v8  ;;  %v4349_v23 = vshrl.u32 %v10928_v58, 16  ;;  %v4352_v62 = vshll.u32 %v10928_v58, 16  ;;  %v2997_v39 = vadd.f32 %v11901_v59, %v15602_v63 }
 0x1a6   : > { %v4612_v15 = vrot.slane %v4610_v30, 3  ;;  %v4615_v50 = vrot.slane %v4613_v12, 4  ;;  %5669 = vmatprep.mubr.bf16.mxu0 %v4373_v3  ;;  %v4343_v5 = vrot.slane %v4341_v47, 3  ;;  %v4346_v21 = vrot.slane %v4344_v32, 4  ;;  %v15979_v13 = vpop.f32.mrf.mxu1  ;;  %v15981_v58 = vpop.f32.mrf.mxu0  ;;  %v20341_v12 = vld [vmem:[#allocation32_spill] sm:$0xff] }
 0x1a7   : > { %v4351_v6 = vrot.slane %v4349_v23, 3  ;;  %v4354_v22 = vrot.slane %v4352_v62, 4  ;;  %v15976_v7 = vadd.f32 %v11965_v0, %v2997_v39  ;;  %v3000_v52 = vadd.f32 %v11904_v41, %v15602_v63  ;;  %v13250_v0 = vld [vmem:[%s19592_s1 + $0x278] sm:$0xff]   ;;  %v20344_v23 = vld [vmem:[#allocation33_spill] sm:$0xff] }
 0x1a8   : > { %v15983_v59 = vor.u32 %v4615_v50, %v4612_v15  ;;  %v4347_v8 = vor.u32 %v4346_v21, %v4343_v5  ;;  %v11968_v30 = vadd.f32 %v15754_v55, %v20340_v16  ;;  %vm20342_vm3 = vcmp.ne.s16.totalorder %v20341_v12, 0  ;;  %v20345_v62 = vld [vmem:[#allocation13_spill] sm:$0xff]  ;;  %v20347_v15 = vld [vmem:[#allocation15_spill] sm:$0xff]  ;;  %v16002_v16 = vpop.f32.mrf.mxu1 }
 0x1a9   : > { %20339 = vst [vmem:[#allocation59_spill] sm:$0xff] %v15976_v7  ;;  %v3596_v47 = vsel %vm20342_vm3, %v15445_v45, 0  ;;  %v4355_v32 = vor.u32 %v4354_v22, %v4351_v6  ;;  %v3597_v3 = vsel %vm20117_vm4, %v15447_v20, 0  ;;  %vm20346_vm2 = vnez %v20345_v62  ;;  %v16004_v45 = vpop.f32.mrf.mxu0  ;;  %v13251_v22 = vld [vmem:[%s19592_s1 + $0x2b0] sm:$0xff]  }
 0x1aa   : > { %v3608_v39 = vsel %vm20346_vm2, %v20344_v23, 0  ;;  %vm20348_vm5 = vnez %v20347_v15  ;;  %vm20349_vm3 = vsmask.f32 4352  ;;  %v16012_v50 = vadd.f32 %v11968_v30, %v3000_v52  ;;  %v16021_v7 = vpop.f32.mrf.mxu1  ;;  %v20352_v52 = vld [vmem:[#allocation57_spill] sm:$0xff] }
 0x1ab   : > { %v3609_v55 = vsel %vm20348_vm5, %v15761_v26, 0  ;;  %v4617_v20 = vsel %vm20349_vm3, %v15913_v48, %v15983_v59  ;;  %v10924_v5 = vcombine.low %v3596_v47, %v3597_v3  ;;  %vm20351_vm2 = vmmov %vm20349_vm3  ;;  %v11907_v15 = vadd.f32 %v15793_v38, %v15756_v42  ;;  %v16023_v43 = vpop.f32.mrf.mxu0  ;;  %v13252_v48 = vld [vmem:[%s19592_s1 + $0x270] sm:$0xff]   ;;  %v13253_v38 = vld [vmem:[%s19592_s1 + $0x2a8] sm:$0xff]  }
 0x1ac   : > { %20350 = vst [vmem:[#allocation47_spill] sm:$0xff] %v16012_v50  ;;  %v10929_v21 = vcombine.low %v3608_v39, %v3609_v55  ;;  %5604 = vmatprep.mubr.bf16.mxu1 %v4617_v20  ;;  %v4356_v6 = vsel %vm20351_vm2, %v4347_v8, %v4355_v32  ;;  %v11971_v62 = vadd.f32 %v15838_v31, %v15791_v19  ;;  %vm20353_vm2 = vcmp.ne.s16.totalorder %v20292_v25, 0  ;;  %v16043_v3 = vpop.f32.mrf.mxu1 }
 0x1ad   : > { %v11910_v2 = vadd.f32 %v15862_v57, %v15840_v17  ;;  %5605 = vmatmul.mubr.bf16.gmra.mxu1 %v20352_v52  ;;  %5670 = vmatmul.mubr.bf16.vlgmr.msra.gmra.mxu0 %v4356_v6  ;;  %v3964_v8 = vrot.slane %v10924_v5, 5  ;;  %v11974_v19 = vadd.f32 %v15885_v24, %v15860_v34  ;;  %v3005_v17 = vadd.f32 %v11907_v15, %v15602_v63  ;;  %v16045_v34 = vpop.f32.mrf.mxu0 }
 0x1ae   : > { %v4430_v30 = vshrl.u32 %v10929_v21, 16  ;;  %v4433_v42 = vshll.u32 %v10929_v21, 16  ;;  %5677 = vmatprep.mubr.bf16.mxu0 %v20318_v61  ;;  %v3598_v57 = vsel %vm20353_vm2, %v15814_v18, 0  ;;  %v3599_v47 = vsel %vm20295_vm8, %v15823_v35, 0  ;;  %12404 = vmatpush3.bf16.msra.mxu0 %v13250_v0  ;;  %v16056_v35 = vpop.f32.mrf.mxu1 }
 0x1af   : > { %v3008_v31 = vadd.f32 %v11910_v2, %v15602_v63  ;;  %v20354_v24 = vrot.slane %v15923_v33, 5  ;;  %vm20355_vm3 = vcmask 1042432   ;;  %v16050_v2 = vcombine.low %v3598_v57, %v3599_v47  ;;  %12405 = vmatprep.subr.bf16.mxu0 %v13251_v22  ;;  %v16058_v6 = vpop.f32.mrf.mxu0  ;;  %v13255_v33 = vld [vmem:[%s19592_s1 + $0x268] sm:$0xff]   ;;  %v20359_v57 = vld [vmem:[#allocation18_spill] sm:$0xff] }
 0x1b0   : > { %v4432_v39 = vrot.slane %v4430_v30, 3  ;;  %v4435_v15 = vrot.slane %v4433_v42, 4  ;;  %v16052_v5 = vadd.f32 %v11971_v62, %v3005_v17  ;;  %v3902_v22 = vshrl.u32 %v15852_v14, 16  ;;  %v13259_v62 = vld [vmem:[%s19592_s1 + $0x2a0] sm:$0xff]  }
 0x1b1   : > { %v3965_v61 = vsel %vm20355_vm3, %v20354_v24, %v3964_v8  ;;  %v16054_v21 = vadd.f32 %v11974_v19, %v3008_v31  ;;  %v3966_v30 = vrot.slane %v16050_v2, 5  ;;  %v3905_v42 = vshll.u32 %v15852_v14, 16  ;;  %v20358_v31 = vld [vmem:[#allocation51_spill] sm:$0xff]  ;;  %v16074_v24 = vld [vmem:[#allocation2 + $0x70] sm:$0xf]  ;;  %v16088_v25 = vpop.f32.mrf.mxu0 }
 0x1b2   : > { %v4673_v55 = vshrl.u32 %v3965_v61, 16  ;;  %v4676_v20 = vshll.u32 %v3965_v61, 16  ;;  %20356 = vst [vmem:[#allocation19_spill] sm:$0xff] %v16052_v5  ;;  %v16063_v0 = vor.u32 %v4435_v15, %v4432_v39  ;;  %vm20360_vm2 = vnez %v20359_v57  ;;  %v20361_v61 = vld [vmem:[#allocation20_spill] sm:$0xff]  ;;  %v16079_v15 = vpop.f32.mrf.mxu1  ;;  %12406 = vmatpush3.bf16.msra.mxu0 %v13252_v48  ;;  %v13273_v2 = vld [vmem:[%s19592_s1 + $0x250] sm:$0xff]  }
 0x1b3   : > { %20357 = vst [vmem:[#allocation54_spill] sm:$0xff] %v16054_v21  ;;  %v3610_v47 = vsel %vm20360_vm2, %v20358_v31, 0  ;;  %vm20362_vm3 = vnez %v20361_v61  ;;  %vm20363_vm5 = vsmask.f32 4352  ;;  %vm20364_vm14 = vcmask 1042432   ;;  %12407 = vmatprep.subr.bf16.mxu0 %v13253_v38 }
 0x1b4   : > { %v4675_v19 = vrot.slane %v4673_v55, 3  ;;  %v4678_v17 = vrot.slane %v4676_v20, 4  ;;  %v3611_v39 = vsel %vm20362_vm3, %v16074_v24, 0  ;;  %v4437_v14 = vsel %vm20363_vm5, %v4355_v32, %v16063_v0  ;;  %v16086_v61 = vpop.f32.mrf.mxu1 }
 0x1b5   : > { %v3967_v55 = vsel %vm20364_vm14, %v3964_v8, %v3966_v30  ;;  %v3904_v20 = vrot.slane %v3902_v22, 4  ;;  %v3907_v21 = vrot.slane %v3905_v42, 5  ;;  %v10930_v11 = vcombine.low %v3610_v47, %v3611_v39  ;;  %5678 = vmatmul.mubr.bf16.gmra.mxu0 %v4437_v14  ;;  %vm20365_vm14 = vmmov %vm20363_vm5 }
 0x1b6   : > { %v4679_v57 = vor.u32 %v4678_v17, %v4675_v19  ;;  %v4736_v5 = vshrl.u32 %v3967_v55, 16  ;;  %v4739_v50 = vshll.u32 %v3967_v55, 16  ;;  %v11913_v32 = vadd.f32 %v15899_v56, %v15887_v28  ;;  %5685 = vmatprep.mubr.bf16.mxu0 %v20333_v40  ;;  %v16101_v47 = vpop.f32.mrf.mxu1  ;;  %12408 = vmatpush3.bf16.msra.mxu0 %v13255_v33  ;;  %v13261_v28 = vld [vmem:[%s19592_s1 + $0x260] sm:$0xff]   ;;  %v20366_v56 = vld [vmem:[#allocation58_spill] sm:$0xff]  ;;  %v13265_v40 = vld [vmem:[%s19592_s1 + $0x298] sm:$0xff]  }
 0x1b7   : > { %v16090_v48 = vor.u32 %v3907_v21, %v3904_v20  ;;  %v11977_v8 = vadd.f32 %v15928_v9, %v15909_v49  ;;  %v11916_v38 = vadd.f32 %v15930_v4, %v15911_v46  ;;  %v4493_v17 = vshrl.u32 %v10930_v11, 16  ;;  %v16103_v21 = vpop.f32.mrf.mxu0  ;;  %12409 = vmatprep.subr.bf16.mxu0 %v13259_v62 }
 0x1b8   : > { %v4680_v22 = vsel %vm20365_vm14, %v15983_v59, %v4679_v57  ;;  %v4738_v42 = vrot.slane %v4736_v5, 3  ;;  %v4741_v19 = vrot.slane %v4739_v50, 4  ;;  %vm20367_vm5 = vsmask.f32 3328  ;;  %v20368_v59 = vld [vmem:[#allocation61_spill] sm:$0xff]  ;;  %v16119_v14 = vpop.f32.mrf.mxu1 }
 0x1b9   : > { %5612 = vmatprep.mubr.bf16.mxu1 %v4680_v22  ;;  %v3909_v49 = vsel %vm20367_vm5, %v20366_v56, %v16090_v48  ;;  %v4496_v46 = vshll.u32 %v10930_v11, 16  ;;  %v3013_v9 = vadd.f32 %v11913_v32, %v15602_v63  ;;  %v3016_v4 = vadd.f32 %v11916_v38, %v15602_v63  ;;  %v16121_v55 = vpop.f32.mrf.mxu0 }
 0x1ba   : > { %5613 = vmatmul.mubr.bf16.gmra.mxu1 %v20368_v59  ;;  %v16117_v50 = vor.u32 %v4741_v19, %v4738_v42  ;;  %v4691_v5 = vshrl.u32 %v3909_v49, 16  ;;  %v4694_v33 = vshll.u32 %v3909_v49, 16  ;;  %v4495_v39 = vrot.slane %v4493_v17, 3  ;;  %v16131_v19 = vpop.f32.mrf.mxu1  ;;  %12410 = vmatpush3.bf16.msra.mxu0 %v13261_v28  ;;  %v20371_v28 = vld [vmem:[#allocation23_spill] sm:$0xff] }
 0x1bb   : > { %v4498_v11 = vrot.slane %v4496_v46, 4  ;;  %v16123_v20 = vadd.f32 %v11977_v8, %v3013_v9  ;;  %v11980_v63 = vadd.f32 %v15965_v53, %v15946_v10  ;;  %v3600_v62 = vsel %vm20315_vm9, %v3583_v37, 0  ;;  %v16133_v17 = vpop.f32.mrf.mxu0  ;;  %v13267_v8 = vld [vmem:[%s19592_s1 + $0x258] sm:$0xff]   ;;  %12411 = vmatprep.subr.bf16.mxu0 %v13265_v40  ;;  %v16146_v46 = vld [vmem:[#allocation2 + $0x74] sm:$0xf] }
 0x1bc   : > { %v4743_v32 = vsel %vm20365_vm14, %v4679_v57, %v16117_v50  ;;  %v4693_v38 = vrot.slane %v4691_v5, 3  ;;  %v4696_v22 = vrot.slane %v4694_v33, 4  ;;  %v10926_v42 = vcombine.low %v3600_v62, %v3600_v62  ;;  %v16151_v5 = vld [vmem:[#allocation2 + $0x78] sm:$0xf]  ;;  %v20373_v33 = vld [vmem:[#allocation24_spill] sm:$0xff]  ;;  %v13271_v40 = vld [vmem:[%s19592_s1 + $0x290] sm:$0xff]  }
 0x1bd   : > { %20369 = vst [vmem:[#allocation49_spill] sm:$0xff] %v16123_v20  ;;  %5620 = vmatprep.mubr.bf16.mxu1 %v4743_v32  ;;  %v16138_v10 = vor.u32 %v4498_v11, %v4495_v39  ;;  %v16140_v53 = vadd.f32 %v11980_v63, %v3016_v4  ;;  %v4808_v37 = vshrl.u32 %v16090_v48, 16  ;;  %v4811_v57 = vshll.u32 %v16090_v48, 16  ;;  %v16156_v39 = vpop.f32.mrf.mxu1  ;;  %v16158_v11 = vpop.f32.mrf.mxu0 }
 0x1be   : > { %v16144_v56 = vor.u32 %v4696_v22, %v4693_v38  ;;  %v3968_v49 = vrot.slane %v10926_v42, 5  ;;  %vm20372_vm5 = vnez %v20371_v28  ;;  %vm20374_vm14 = vnez %v20373_v33  ;;  %20375 = vst [vmem:[#allocation29_spill] sm:$0xff] %v16156_v39  ;;  %v20377_v22 = vld [vmem:[#allocation60_spill] sm:$0xff]  ;;  %12412 = vmatpush3.bf16.msra.mxu0 %v13267_v8  ;;  %v13275_v8 = vld [vmem:[%s19592_s1 + $0x288] sm:$0xff]  }
 0x1bf   : > { %20370 = vst [vmem:[#allocation38_spill] sm:$0xff] %v16140_v53  ;;  %v3612_v9 = vsel %vm20372_vm5, %v16146_v46, 0  ;;  %v3613_v4 = vsel %vm20374_vm14, %v16151_v5, 0  ;;  %vm20376_vm3 = vsmask.f32 4352  ;;  %v4810_v62 = vrot.slane %v4808_v37, 3  ;;  %v16180_v37 = vpop.f32.mrf.mxu0  ;;  %12413 = vmatprep.subr.bf16.mxu0 %v13271_v40 }
 0x1c0   : > { %v4500_v63 = vsel %vm20376_vm3, %v16063_v0, %v16138_v10  ;;  %v4813_v32 = vrot.slane %v4811_v57, 4  ;;  %v10931_v38 = vcombine.low %v3612_v9, %v3613_v4  ;;  %vm20378_vm5 = vmmov %vm20376_vm3  ;;  %vm20379_vm14 = vcmask 1042432   ;;  %v16178_v0 = vpop.f32.mrf.mxu1  ;;  %v13443_v40 = vld [vmem:[#allocation2 + $0x5c] sm:$0xf] }
 0x1c1   : > { %v16169_v42 = vsel %vm20378_vm5, %v20377_v22, %v16144_v56  ;;  %5686 = vmatmul.mubr.bf16.gmra.mxu0 %v4500_v63  ;;  %v3969_v33 = vsel %vm20379_vm14, %v3966_v30, %v3968_v49  ;;  %v11919_v28 = vadd.f32 %v15967_v44, %v15948_v1  ;;  %v11983_v53 = vadd.f32 %v15979_v13, %v15972_v54  ;;  %v16190_v54 = vld [vmem:[%s19593_s2] ss:$0 sm:$0xff]  ;;  %v20384_v22 = vld [vmem:[#allocation5_spill] sm:$0xff] }
 0x1c2   : > { %20380 = vst [vmem:[#allocation33_spill] sm:$0xff] %v16178_v0  ;;  %v4817_v57 = vshrl.u32 %v3969_v33, 16  ;;  %v4820_v9 = vshll.u32 %v3969_v33, 16  ;;  %5693 = vmatprep.mubr.bf16.mxu0 %v20352_v52  ;;  %v4556_v4 = vshrl.u32 %v10931_v38, 16  ;;  %5621 = vmatmul.mubr.bf16.gmra.mxu1 %v16169_v42  ;;  %v4814_v1 = vor.u32 %v4813_v32, %v4810_v62  ;;  %v16193_v30 = vpop.f32.mrf.mxu1  ;;  %v16195_v52 = vpop.f32.mrf.mxu0 }
 0x1c3   : > { %v4559_v44 = vshll.u32 %v10931_v38, 16  ;;  %v3021_v13 = vadd.f32 %v16190_v54, %v11919_v28  ;;  %20381 = vst [vmem:[#allocation57_spill] sm:$0xff] %v16193_v30  ;;  %20382 = vst [vmem:[#allocation51_spill] sm:$0xff] %v16195_v52  ;;  %v13442_v38 = vld [vmem:[#allocation2 + $0x58] sm:$0xf]  ;;  %vm20385_vm3 = vcmp.ne.s16.totalorder %v20384_v22, 0  ;;  %12414 = vmatpush3.bf16.msra.mxu0 %v13273_v2 }
 0x1c4   : > { %v4819_v49 = vrot.slane %v4817_v57, 3  ;;  %v4822_v33 = vrot.slane %v4820_v9, 4  ;;  %v4558_v63 = vrot.slane %v4556_v4, 3  ;;  %v3622_v20 = vsel %vm20385_vm3, %v13442_v38, 0  ;;  %v16204_v28 = vpop.f32.mrf.mxu1  ;;  %v16206_v30 = vpop.f32.mrf.mxu0  ;;  %v20387_v57 = vld [vmem:[#allocation10_spill] sm:$0xff]  ;;  %12415 = vmatprep.subr.bf16.mxu0 %v13275_v8 }
 0x1c5   : > { %v4561_v62 = vrot.slane %v4559_v44, 4  ;;  %v16200_v32 = vadd.f32 %v11983_v53, %v3021_v13  ;;  %v3623_v39 = vsel %vm13886_vm0, %v13443_v40, 0  ;;  %vm20388_vm5 = vcmp.ne.s16.totalorder %v20387_v57, 0  ;;  %v13277_v44 = vld [vmem:[%s19592_s1 + $0x248] sm:$0xff]   ;;  %v20393_v2 = vld [vmem:[#allocation26_spill] sm:$0xff] }
 0x1c6   : > { %v4823_v0 = vor.u32 %v4822_v33, %v4819_v49  ;;  %v3624_v9 = vsel %vm20388_vm5, %v15681_v29, 0  ;;  %v3625_v4 = vsel %vm13912_vm6, %v20344_v23, 0  ;;  %vm20390_vm14 = vsmask.f32 4352  ;;  %v16223_v40 = vpop.f32.mrf.mxu1  ;;  %v16225_v57 = vpop.f32.mrf.mxu0  ;;  %v16229_v23 = vld [vmem:[#allocation2 + $0x7c] sm:$0xf] }
 0x1c7   : > { %20383 = vst [vmem:[#allocation58_spill] sm:$0xff] %v16200_v32  ;;  %v4815_v13 = vsel %vm20390_vm14, %v16144_v56, %v4814_v1  ;;  %v16221_v49 = vor.u32 %v4561_v62, %v4558_v63  ;;  %v10937_v33 = vcombine.low %v3622_v20, %v3623_v39  ;;  %v10938_v38 = vcombine.low %v3624_v9, %v3625_v4  ;;  %vm20392_vm3 = vmmov %vm20390_vm14  ;;  %v16234_v52 = vld [vmem:[#allocation2 + $0x80] sm:$0xf]  ;;  %v20395_v1 = vld [vmem:[#allocation30_spill] sm:$0xff] }
 0x1c8   : > { %20391 = vst [vmem:[#allocation61_spill] sm:$0xff] %v16223_v40  ;;  %v4824_v29 = vsel %vm20392_vm3, %v16117_v50, %v4823_v0  ;;  %vm20394_vm5 = vnez %v20393_v2  ;;  %vm20396_vm14 = vnez %v20395_v1  ;;  %v20397_v39 = vld [vmem:[#allocation14_spill] sm:$0xff]  ;;  %v13279_v50 = vld [vmem:[%s19592_s1 + $0x280] sm:$0xff]   ;;  %v16248_v4 = vpop.f32.mrf.mxu1  ;;  %v16250_v1 = vpop.f32.mrf.mxu0  ;;  %v3627_v32 = vsel %vm14033_vm11, %v20358_v31, 0  ;;  %12416 = vmatpush3.bf16.msra.mxu0 %v13277_v44 }
 0x1c9   : > { %v3614_v53 = vsel %vm20394_vm5, %v16229_v23, 0  ;;  %v3615_v20 = vsel %vm20396_vm14, %v16234_v52, 0  ;;  %vm20398_vm2 = vcmp.ne.s16.totalorder %v20397_v39, 0  ;;  %5628 = vmatprep.mubr.bf16.mxu1 %v4824_v29  ;;  %v4563_v0 = vsel %vm20392_vm3, %v16138_v10, %v16221_v49  ;;  %20399 = vst [vmem:[#allocation60_spill] sm:$0xff] %v16248_v4  ;;  %v20400_v2 = vld [vmem:[#allocation44_spill] sm:$0xff]  ;;  %v20401_v22 = vld [vmem:[#allocation46_spill] sm:$0xff]  ;;  %12417 = vmatprep.subr.bf16.mxu0 %v13279_v50 }
 0x1ca   : > { %v3626_v63 = vsel %vm20398_vm2, %v15761_v26, 0  ;;  %v4070_v8 = vrot.slane %v10937_v33, 5  ;;  %v4071_v62 = vrot.slane %v10938_v38, 5  ;;  %v10932_v9 = vcombine.low %v3614_v53, %v3615_v20  ;;  %5694 = vmatmul.mubr.bf16.gmra.mxu0 %v4563_v0  ;;  %5629 = vmatmul.mubr.bf16.gmra.mxu1 %v4815_v13  ;;  %v20405_v13 = vld [vmem:[#allocation27_spill] sm:$0xff] }
 0x1cb   : > { %v11880_v39 = vadd.f32 %v20401_v22, %v20400_v2  ;;  %v11922_v26 = vadd.f32 %v15981_v58, %v15974_v36  ;;  %v12005_v10 = vadd.f32 %v16023_v43, %v16004_v45  ;;  %5701 = vmatprep.mubr.bf16.mxu0 %v20368_v59  ;;  %vm20403_vm2 = vcmask 1042432   ;;  %v16263_v22 = vpop.f32.mrf.mxu1  ;;  %v16265_v2 = vpop.f32.mrf.mxu0  ;;  %v13280_v43 = vld [vmem:[%s19592_s1 + $0x240] sm:$0xff]  }
 0x1cc   : > { %v4072_v53 = vsel %vm20403_vm2, %v4070_v8, %v4071_v62  ;;  %v4375_v33 = vshrl.u32 %v4070_v8, 16  ;;  %v4378_v38 = vshll.u32 %v4070_v8, 16  ;;  %v4619_v20 = vshrl.u32 %v10932_v9, 16  ;;  %20404 = vst [vmem:[#allocation44_spill] sm:$0xff] %v16263_v22  ;;  %12418 = vmatpush3.bf16.msra.mxu0 %v13280_v43 }
 0x1cd   : > { %v4383_v36 = vshrl.u32 %v4072_v53, 16  ;;  %v4386_v58 = vshll.u32 %v4072_v53, 16  ;;  %v4622_v0 = vshll.u32 %v10932_v9, 16  ;;  %v10939_v29 = vcombine.low %v3626_v63, %v3627_v32  ;;  %v16273_v8 = vpop.f32.mrf.mxu1  ;;  %v16275_v22 = vpop.f32.mrf.mxu0  ;;  %v13285_v32 = vld [vmem:[%s19592_s1 + $0x3b8] sm:$0xff]  }
 0x1ce   : > { %v4377_v45 = vrot.slane %v4375_v33, 3  ;;  %v4380_v31 = vrot.slane %v4378_v38, 4  ;;  %v4621_v59 = vrot.slane %v4619_v20, 3  ;;  %v16271_v4 = vadd.f32 %v12005_v10, %v20405_v13  ;;  %20407 = vst [vmem:[#allocation27_spill] sm:$0xff] %v16273_v8  ;;  %v20408_v10 = vld [vmem:[#allocation17_spill] sm:$0xff]  ;;  %12531 = vmatprep.subr.bf16.mxu0 %v13285_v32 }
 0x1cf   : > { %v4385_v44 = vrot.slane %v4383_v36, 3  ;;  %v4388_v63 = vrot.slane %v4386_v58, 4  ;;  %v4624_v9 = vrot.slane %v4622_v0, 4  ;;  %v4073_v53 = vrot.slane %v10939_v29, 5  ;;  %v16287_v50 = vpop.f32.mrf.mxu0  ;;  %v13446_v0 = vld [vmem:[#allocation2 + $0x84] sm:$0xf] }
 0x1d0   : > { %20406 = vst [vmem:[#allocation46_spill] sm:$0xff] %v16271_v4  ;;  %v2968_v33 = vadd.f32 %v16190_v54, %v11880_v39  ;;  %v3024_v38 = vadd.f32 %v16190_v54, %v11922_v26  ;;  %v4381_v20 = vor.u32 %v4380_v31, %v4377_v45  ;;  %vm20409_vm3 = vcmp.ne.s16.totalorder %v20408_v10, 0  ;;  %v16285_v4 = vpop.f32.mrf.mxu1 }
 0x1d1   : > { %v3628_v13 = vsel %vm20409_vm3, %v16074_v24, 0  ;;  %20410 = vst [vmem:[#allocation62_spill] sm:$0xff] %v16285_v4  ;;  %v4389_v8 = vor.u32 %v4388_v63, %v4385_v44  ;;  %v16289_v40 = vor.u32 %v4624_v9, %v4621_v59  ;;  %v4074_v36 = vsel %vm20403_vm2, %v4071_v62, %v4073_v53  ;;  %v16299_v10 = vpop.f32.mrf.mxu0  ;;  %v20417_v44 = vld [vmem:[#allocation22_spill] sm:$0xff] }
 0x1d2   : > { %v3629_v39 = vsel %vm20238_vm1, %v16146_v46, 0  ;;  %v4448_v54 = vshrl.u32 %v4074_v36, 16  ;;  %v4451_v26 = vshll.u32 %v4074_v36, 16  ;;  %v3616_v24 = vsel %vm20217_vm12, %v13446_v0, 0  ;;  %v16297_v31 = vpop.f32.mrf.mxu1  ;;  %v20420_v46 = vld [vmem:[#allocation45_spill] sm:$0xff] }
 0x1d3   : > { %v10940_v58 = vcombine.low %v3628_v13, %v3629_v39  ;;  %20413 = vst [vmem:[#allocation63_spill] sm:$0xff] %v16297_v31  ;;  %vm20414_vm3 = vsmask.f32 4352  ;;  %v3617_v43 = vsel %vm20224_vm10, %v15814_v18, 0  ;;  %vm20418_vm14 = vcmp.ne.s16.totalorder %v20417_v44, 0  ;;  %v20421_v18 = vld [vmem:[#allocation48_spill] sm:$0xff] }
 0x1d4   : > { %v4390_v59 = vsel %vm20414_vm3, %v4381_v20, %v4389_v8  ;;  %vm20415_vm2 = vmmov %vm20414_vm3  ;;  %v3630_v63 = vsel %vm20418_vm14, %v16151_v5, 0  ;;  %v4450_v9 = vrot.slane %v4448_v54, 3  ;;  %v4453_v13 = vrot.slane %v4451_v26, 4  ;;  %v16311_v39 = vpop.f32.mrf.mxu1  ;;  %v16313_v20 = vpop.f32.mrf.mxu0 }
 0x1d5   : > { %v4626_v62 = vsel %vm20415_vm2, %v16221_v49, %v16289_v40  ;;  %12995 = vmatprep.mubr.bf16.mxu1 %v4390_v59  ;;  %v4075_v36 = vrot.slane %v10940_v58, 5  ;;  %v10933_v32 = vcombine.low %v3616_v24, %v3617_v43  ;;  %20419 = vst [vmem:[#allocation64_spill] sm:$0xff] %v16311_v39  ;;  %v13256_v49 = vld [vmem:[%s19592_s1 + $0x2f8] sm:$0xff]   ;;  %v11944_v45 = vadd.f32 %v20421_v18, %v20420_v46  ;;  %v16326_v58 = vld [vmem:[#allocation2 + $0x90] sm:$0xf]  ;;  %vm20425_vm3 = vmmov %vm20415_vm2 }
 0x1d6   : > { %5702 = vmatmul.mubr.bf16.gmra.mxu0 %v4626_v62  ;;  %v11986_v5 = vadd.f32 %v16021_v7, %v16002_v16  ;;  %v3631_v26 = vsel %vm20244_vm7, %v16229_v23, 0  ;;  %v16328_v24 = vld [vmem:[#allocation2 + $0x94] sm:$0xf]  ;;  %v4454_v62 = vor.u32 %v4453_v13, %v4450_v9  ;;  %vm20423_vm14 = vcmask 1042432   ;;  %v16334_v7 = vpop.f32.mrf.mxu1  ;;  %v16336_v16 = vpop.f32.mrf.mxu0 }
 0x1d7   : > { %5709 = vmatprep.mubr.bf16.mxu0 %v16169_v42  ;;  %v13257_v59 = vld [vmem:[%s19592_s1 + $0x330] sm:$0xff]   ;;  %v4076_v46 = vsel %vm20423_vm14, %v4073_v53, %v4075_v36  ;;  %v4682_v43 = vshrl.u32 %v10933_v32, 16  ;;  %v4685_v18 = vshll.u32 %v10933_v32, 16  ;;  %v16338_v42 = vadd.f32 %v11944_v45, %v2968_v33 }
 0x1d8   : > { %v4511_v23 = vshrl.u32 %v4076_v46, 16  ;;  %v4514_v54 = vshll.u32 %v4076_v46, 16  ;;  %v10941_v44 = vcombine.low %v3630_v63, %v3631_v26  ;;  %v16340_v29 = vadd.f32 %v11986_v5, %v3024_v38  ;;  %v16343_v9 = vpop.f32.mrf.mxu1  ;;  %v16345_v53 = vpop.f32.mrf.mxu0 }
 0x1d9   : > { %v4455_v39 = vsel %vm20425_vm3, %v4389_v8, %v4454_v62  ;;  %v4684_v31 = vrot.slane %v4682_v43, 3  ;;  %v4687_v4 = vrot.slane %v4685_v18, 4  ;;  %v16349_v13 = vadd.f32 %v16058_v6, %v16045_v34  ;;  %v13258_v34 = vld [vmem:[%s19592_s1 + $0x2f0] sm:$0xff]  }
 0x1da   : > { %20424 = vst [vmem:[#allocation45_spill] sm:$0xff] %v16340_v29  ;;  %12996 = vmatmul.mubr.bf16.vlgmr.msra.gmra.mxu1 %v4455_v39  ;;  %v4513_v33 = vrot.slane %v4511_v23, 3  ;;  %v4516_v45 = vrot.slane %v4514_v54, 4  ;;  %v4077_v32 = vrot.slane %v10941_v44, 5  ;;  %v10936_v38 = vcombine.low %v16326_v58, %v16328_v24  ;;  %v16360_v39 = vpop.f32.mrf.mxu1  ;;  %v16362_v5 = vpop.f32.mrf.mxu0  ;;  %v13447_v44 = vld [vmem:[#allocation2 + $0x8c] sm:$0xf] }
 0x1db   : > { %v16351_v46 = vor.u32 %v4687_v4, %v4684_v31  ;;  %vm20426_vm2 = vcmp.ne.s16.totalorder %v20258_v60, 0  ;;  %v3633_v63 = vsel %vm20261_vm15, %v13446_v0, 0  ;;  %12468 = vmatpush3.bf16.msra.mxu1 %v13256_v49  ;;  %v20427_v54 = vld [vmem:[#allocation39_spill] sm:$0xff]  ;;  %v13260_v0 = vld [vmem:[%s19592_s1 + $0x328] sm:$0xff]  }
 0x1dc   : > { %v3632_v8 = vsel %vm20426_vm2, %v16234_v52, 0  ;;  %v4517_v6 = vor.u32 %v4516_v45, %v4513_v33  ;;  %v4078_v4 = vsel %vm20423_vm14, %v4075_v36, %v4077_v32  ;;  %vm20428_vm3 = vnez %v20427_v54  ;;  %12469 = vmatprep.subr.bf16.mxu1 %v13257_v59  ;;  %v16378_v23 = vpop.f32.mrf.mxu1  ;;  %v16380_v36 = vpop.f32.mrf.mxu0 }
 0x1dd   : > { %v16368_v31 = vcombine.low %v3632_v8, %v3633_v63  ;;  %v3618_v52 = vsel %vm20428_vm3, %v13447_v44, 0  ;;  %vm20429_vm2 = vsmask.f32 4352  ;;  %v4574_v26 = vshrl.u32 %v4078_v4, 16  ;;  %v20431_v8 = vld [vmem:[#allocation41_spill] sm:$0xff] }
 0x1de   : > { %v4689_v49 = vsel %vm20429_vm2, %v16289_v40, %v16351_v46  ;;  %v4577_v43 = vshll.u32 %v4078_v4, 16  ;;  %v4019_v18 = vshrl.u32 %v10936_v38, 16  ;;  %vm20430_vm14 = vmmov %vm20429_vm2  ;;  %v4022_v45 = vshll.u32 %v10936_v38, 16  ;;  %v16387_v60 = vpop.f32.mrf.mxu1  ;;  %v16389_v29 = vpop.f32.mrf.mxu0 }
 0x1df   : > { %v4518_v33 = vsel %vm20430_vm14, %v4454_v62, %v4517_v6  ;;  %5710 = vmatmul.mubr.bf16.gmra.mxu0 %v4689_v49  ;;  %v4079_v59 = vrot.slane %v16368_v31, 5  ;;  %vm20432_vm3 = vnez %v20431_v8  ;;  %v4576_v54 = vrot.slane %v4574_v26, 3  ;;  %20433 = vst [vmem:[#allocation48_spill] sm:$0xff] %v16387_v60  ;;  %12470 = vmatpush3.bf16.msra.mxu1 %v13258_v34  ;;  %v13262_v62 = vld [vmem:[%s19592_s1 + $0x2e8] sm:$0xff]  }
 0x1e0   : > { %v3619_v63 = vsel %vm20432_vm3, %v16326_v58, 0  ;;  %12999 = vmatprep.mubr.bf16.mxu1 %v4518_v33  ;;  %v4579_v40 = vrot.slane %v4577_v43, 4  ;;  %v4021_v51 = vrot.slane %v4019_v18, 4  ;;  %v4024_v38 = vrot.slane %v4022_v45, 5  ;;  %v13448_v49 = vld [vmem:[#allocation2 + $0x88] sm:$0xf]  ;;  %12471 = vmatprep.subr.bf16.mxu1 %v13260_v0  ;;  %v16402_v8 = vpop.f32.mrf.mxu1  ;;  %v16404_v45 = vpop.f32.mrf.mxu0 }
 0x1e1   : > { %v10934_v4 = vcombine.low %v3618_v52, %v3619_v63  ;;  %vm20434_vm2 = vcmask 1042432   ;;  %vm20435_vm14 = vcmp.ne.s16.totalorder %v20341_v12, 0  ;;  %v3635_v26 = vsel %vm20117_vm4, %v13447_v44, 0  ;;  %v13263_v52 = vld [vmem:[%s19592_s1 + $0x320] sm:$0xff]   ;;  %20436 = vst [vmem:[#allocation65_spill] sm:$0xff] %v16402_v8 }
 0x1e2   : > { %v4080_v31 = vsel %vm20434_vm2, %v4077_v32, %v4079_v59  ;;  %v3634_v33 = vsel %vm20435_vm14, %v13448_v49, 0  ;;  %v4580_v34 = vor.u32 %v4579_v40, %v4576_v54  ;;  %v16408_v32 = vadd.f32 %v16056_v35, %v16043_v3  ;;  %v13264_v0 = vld [vmem:[%s19592_s1 + $0x2e0] sm:$0xff]   ;;  %v16416_v8 = vpop.f32.mrf.mxu1  ;;  %v16418_v60 = vpop.f32.mrf.mxu0 }
 0x1e3   : > { %v4637_v43 = vshrl.u32 %v4080_v31, 16  ;;  %v4640_v18 = vshll.u32 %v4080_v31, 16  ;;  %v4745_v63 = vshrl.u32 %v10934_v4, 16  ;;  %v4025_v49 = vor.u32 %v4024_v38, %v4021_v51  ;;  %12472 = vmatpush3.bf16.msra.mxu1 %v13262_v62  ;;  %v13266_v51 = vld [vmem:[%s19592_s1 + $0x318] sm:$0xff]  }
 0x1e4   : > { %v4748_v41 = vshll.u32 %v10934_v4, 16  ;;  %v16410_v44 = vcombine.low %v3634_v33, %v3635_v26  ;;  %vm20437_vm2 = vsmask.f32 4352  ;;  %v16425_v3 = vadd.f32 %v16349_v13, %v16338_v42  ;;  %12473 = vmatprep.subr.bf16.mxu1 %v13263_v52 }
 0x1e5   : > { %v4581_v54 = vsel %vm20437_vm2, %v4517_v6, %v4580_v34  ;;  %v4639_v40 = vrot.slane %v4637_v43, 3  ;;  %v4642_v31 = vrot.slane %v4640_v18, 4  ;;  %v4747_v12 = vrot.slane %v4745_v63, 3  ;;  %v16434_v43 = vpop.f32.mrf.mxu1  ;;  %v16436_v18 = vpop.f32.mrf.mxu0 }
 0x1e6   : > { %13000 = vmatmul.mubr.bf16.gmra.mxu1 %v4581_v54  ;;  %vm20438_vm14 = vsmask.f32 3328  ;;  %v4750_v6 = vrot.slane %v4748_v41, 4  ;;  %v19795_v4 = vrot.slane %v16410_v44, 5  ;;  %v16432_v38 = vadd.f32 %v16086_v61, %v16079_v15  ;;  %v13268_v15 = vld [vmem:[%s19592_s1 + $0x2d8] sm:$0xff]  }
 0x1e7   : > { %v4026_v35 = vsel %vm20438_vm14, %v16090_v48, %v4025_v49  ;;  %v4643_v26 = vor.u32 %v4642_v31, %v4639_v40  ;;  %v12011_v42 = vadd.f32 %v16103_v21, %v16088_v25  ;;  %v16442_v41 = vadd.f32 %v16119_v14, %v16101_v47  ;;  %v3621_v25 = vld [vmem:[#allocation2 + $0x98] sm:$0x1]  ;;  %v16453_v21 = vpop.f32.mrf.mxu1  ;;  %v16455_v47 = vpop.f32.mrf.mxu0  ;;  %12474 = vmatpush3.bf16.msra.mxu1 %v13264_v0  ;;  %v20442_v0 = vld [vmem:[#allocation40_spill] sm:$0xff] }
 0x1e8   : > { %v4754_v62 = vshrl.u32 %v4026_v35, 16  ;;  %v4757_v33 = vshll.u32 %v4026_v35, 16  ;;  %v16444_v48 = vor.u32 %v4750_v6, %v4747_v12  ;;  %vm20439_vm2 = vcmask 1042432   ;;  %v13269_v12 = vld [vmem:[%s19592_s1 + $0x310] sm:$0xff]   ;;  %12475 = vmatprep.subr.bf16.mxu1 %v13266_v51 }
 0x1e9   : > { %v4082_v61 = vsel %vm20439_vm2, %v4079_v59, %v19795_v4  ;;  %vm20440_vm14 = vsmask.f32 4352  ;;  %v12014_v14 = vadd.f32 %v16133_v17, %v16121_v55  ;;  %v4835_v40 = vshrl.u32 %v4025_v49, 16  ;;  %v16470_v4 = vpop.f32.mrf.mxu0 }
 0x1ea   : > { %v4756_v13 = vrot.slane %v4754_v62, 3  ;;  %v4759_v52 = vrot.slane %v4757_v33, 4  ;;  %v4644_v63 = vsel %vm20440_vm14, %v4580_v34, %v4643_v26  ;;  %v4700_v54 = vshrl.u32 %v4082_v61, 16  ;;  %vm20441_vm2 = vmmov %vm20440_vm14  ;;  %v16468_v33 = vpop.f32.mrf.mxu1 }
 0x1eb   : > { %13003 = vmatprep.mubr.bf16.mxu1 %v4644_v63  ;;  %v4752_v59 = vsel %vm20441_vm2, %v16351_v46, %v16444_v48  ;;  %v4703_v34 = vshll.u32 %v4082_v61, 16  ;;  %v4838_v6 = vshll.u32 %v4025_v49, 16  ;;  %vm20443_vm14 = vcmp.ne.s16.totalorder %v20442_v0, 0  ;;  %v20445_v61 = vld [vmem:[#allocation6_spill] sm:$0xff]  ;;  %v16482_v0 = vpop.f32.mrf.mxu0  ;;  %12476 = vmatpush3.bf16.msra.mxu1 %v13268_v15 }
 0x1ec   : > { %v4760_v31 = vor.u32 %v4759_v52, %v4756_v13  ;;  %v4702_v35 = vrot.slane %v4700_v54, 3  ;;  %v3636_v62 = vsel %vm20443_vm14, %v16326_v58, 0  ;;  %v4837_v17 = vrot.slane %v4835_v40, 3  ;;  %v16480_v54 = vpop.f32.mrf.mxu1  ;;  %12477 = vmatprep.subr.bf16.mxu1 %v13269_v12  ;;  %v20450_v12 = vld [vmem:[#allocation29_spill] sm:$0xff] }
 0x1ed   : > { %v4705_v55 = vrot.slane %v4703_v34, 4  ;;  %v3637_v46 = vsel %vm20295_vm8, %v16328_v24, 0  ;;  %vm20446_vm2 = vcmp.ne.s16.totalorder %v20445_v61, 0  ;;  %vm20447_vm3 = vsmask.f32 4352  ;;  %v20448_v34 = vld [vmem:[#allocation50_spill] sm:$0xff] }
 0x1ee   : > { %v3620_v51 = vsel %vm20446_vm2, %v16328_v24, 0  ;;  %v4761_v49 = vsel %vm20447_vm3, %v16144_v56, %v4760_v31  ;;  %v4840_v13 = vrot.slane %v4838_v6, 4  ;;  %v10944_v52 = vcombine.low %v3636_v62, %v3637_v46  ;;  %v13270_v6 = vld [vmem:[%s19592_s1 + $0x2d0] sm:$0xff]   ;;  %vm20451_vm14 = vmmov %vm20447_vm3 }
 0x1ef   : > { %v10935_v58 = vcombine.low %v3620_v51, %v3620_v51  ;;  %v16485_v40 = vadd.f32 %v12011_v42, %v20448_v34  ;;  %5717 = vmatprep.mubr.bf16.mxu0 %v4761_v49  ;;  %v16487_v63 = vor.u32 %v4705_v55, %v4702_v35  ;;  %v12017_v24 = vadd.f32 %v16180_v37, %v16158_v11  ;;  %v16496_v51 = vpop.f32.mrf.mxu1  ;;  %v16498_v35 = vpop.f32.mrf.mxu0  ;;  %v13272_v11 = vld [vmem:[%s19592_s1 + $0x308] sm:$0xff]   ;;  %v20449_v37 = vld [vmem:[#allocation52_spill] sm:$0xff] }
 0x1f0   : > { %v3638_v56 = vsel %vm20315_vm9, %v3621_v25, 0  ;;  %5718 = vmatmul.mubr.bf16.gmra.mxu0 %v4752_v59  ;;  %v4841_v62 = vor.u32 %v4840_v13, %v4837_v17  ;;  %v4083_v15 = vrot.slane %v10944_v52, 5  ;;  %v16504_v25 = vadd.f32 %v12014_v14, %v20449_v37  ;;  %v13274_v49 = vld [vmem:[%s19592_s1 + $0x2c8] sm:$0xff]   ;;  %12478 = vmatpush3.bf16.msra.mxu1 %v13270_v6 }
 0x1f1   : > { %v4826_v46 = vshrl.u32 %v10935_v58, 16  ;;  %v4829_v42 = vshll.u32 %v10935_v58, 16  ;;  %v16508_v55 = vadd.f32 %v20450_v12, %v16131_v19  ;;  %v4707_v59 = vsel %vm20447_vm3, %v4643_v26, %v16487_v63  ;;  %v16519_v37 = vpop.f32.mrf.mxu1  ;;  %v16521_v19 = vpop.f32.mrf.mxu0  ;;  %v20455_v12 = vld [vmem:[#allocation51_spill] sm:$0xff]  ;;  %12479 = vmatprep.subr.bf16.mxu1 %v13272_v11 }
 0x1f2   : > { %v10945_v17 = vcombine.low %v3638_v56, %v3638_v56  ;;  %13004 = vmatmul.mubr.bf16.gmra.mxu1 %v4707_v59  ;;  %v4842_v13 = vsel %vm20451_vm14, %v4760_v31, %v4841_v62  ;;  %v20452_v52 = vrot.slane %v16410_v44, 5  ;;  %vm20453_vm2 = vcmask 1042432   ;;  %20454 = vst [vmem:[#allocation50_spill] sm:$0xff] %v16519_v37  ;;  %v13276_v44 = vld [vmem:[%s19592_s1 + $0x300] sm:$0xff]   ;;  %v20456_v31 = vld [vmem:[#allocation53_spill] sm:$0xff] }
 0x1f3   : > { %v4828_v58 = vrot.slane %v4826_v46, 3  ;;  %v4831_v34 = vrot.slane %v4829_v42, 4  ;;  %v12020_v26 = vadd.f32 %v16206_v30, %v20455_v12  ;;  %5725 = vmatprep.mubr.bf16.mxu0 %v4842_v13  ;;  %v16529_v62 = vadd.f32 %v12017_v24, %v20456_v31  ;;  %v20457_v46 = vld [vmem:[#allocation33_spill] sm:$0xff]  ;;  %v16537_v13 = vpop.f32.mrf.mxu1  ;;  %vm20459_vm3 = vmmov %vm20453_vm2 }
 0x1f4   : > { %v4084_v14 = vsel %vm20453_vm2, %v20452_v52, %v4083_v15  ;;  %v4085_v61 = vrot.slane %v10945_v17, 5  ;;  %v20458_v42 = vld [vmem:[#allocation57_spill] sm:$0xff]  ;;  %v12023_v30 = vadd.f32 %v16250_v1, %v16225_v57  ;;  %v12026_v24 = vadd.f32 %v16275_v22, %v16265_v2  ;;  %12480 = vmatpush3.bf16.msra.mxu1 %v13274_v49  ;;  %vm20462_vm2 = vmmov %vm20451_vm14  ;;  %v20464_v49 = vld [vmem:[#allocation60_spill] sm:$0xff] }
 0x1f5   : > { %v4763_v56 = vshrl.u32 %v4084_v14, 16  ;;  %v4766_v27 = vshll.u32 %v4084_v14, 16  ;;  %v16533_v59 = vadd.f32 %v20458_v42, %v20457_v46  ;;  %v4832_v52 = vor.u32 %v4831_v34, %v4828_v58  ;;  %v12965_v14 = vpop.f32.mrf.mxu0  ;;  %v20460_v31 = vld [vmem:[#allocation61_spill] sm:$0xff]  ;;  %v12147_v1 = vpop.f32.mrf.mxu1  ;;  %v20461_v42 = vld [vmem:[#allocation56_spill] sm:$0xff]  ;;  %12481 = vmatprep.subr.bf16.mxu1 %v13276_v44  ;;  %v20469_v44 = vld [vmem:[#allocation63_spill] sm:$0xff] }
 0x1f6   : > { %v4086_v12 = vsel %vm20459_vm3, %v4083_v15, %v4085_v61  ;;  %v16544_v37 = vadd.f32 %v20460_v31, %v16204_v28  ;;  %v16549_v11 = vadd.f32 %v12020_v26, %v20461_v42  ;;  %v12029_v61 = vadd.f32 %v16299_v10, %v16287_v50  ;;  %v13278_v28 = vld [vmem:[%s19592_s1 + $0x2c0] sm:$0xff]   ;;  %v13287_v10 = vld [vmem:[%s19592_s1 + $0x438] sm:$0xff]   ;;  %vm20473_vm3 = vmmov %vm20462_vm2 }
 0x1f7   : > { %v4765_v6 = vrot.slane %v4763_v56, 3  ;;  %v4768_v17 = vrot.slane %v4766_v27, 4  ;;  %v4833_v58 = vsel %vm20451_vm14, %v16444_v48, %v4832_v52  ;;  %v4844_v34 = vshrl.u32 %v4086_v12, 16  ;;  %v3352_v46 = vpop.f32.mrf.mxu0  ;;  %v12148_v56 = vpop.f32.mrf.mxu1 }
 0x1f8   : > { %v4847_v57 = vshll.u32 %v4086_v12, 16  ;;  %v12032_v22 = vadd.f32 %v16336_v16, %v16313_v20  ;;  %5726 = vmatmul.mubr.bf16.gmra.mxu0 %v4833_v58  ;;  %v12035_v15 = vadd.f32 %v16362_v5, %v16345_v53  ;;  %v12038_v26 = vadd.f32 %v16389_v29, %v16380_v36  ;;  %v20463_v20 = vld [vmem:[#allocation55_spill] sm:$0xff]  ;;  %v20466_v12 = vld [vmem:[#allocation37_spill] sm:$0xff]  ;;  %v20468_v36 = vld [vmem:[#allocation62_spill] sm:$0xff]  ;;  %12482 = vmatpush3.bf16.msra.mxu1 %v13278_v28 }
 0x1f9   : > { %v4769_v27 = vor.u32 %v4768_v17, %v4765_v6  ;;  %v4846_v2 = vrot.slane %v4844_v34, 3  ;;  %v12966_v52 = vpop.f32.mrf.mxu0  ;;  %v3183_v16 = vadd.f32 %v12023_v30, %v20463_v20  ;;  %v20465_v6 = vld [vmem:[#allocation44_spill] sm:$0xff]  ;;  %v3186_v53 = vadd.f32 %v12026_v24, %v20466_v12  ;;  %v20467_v29 = vld [vmem:[#allocation27_spill] sm:$0xff]  ;;  %12595 = vmatprep.subr.bf16.mxu1 %v13287_v10  ;;  %v20479_v28 = vld [vmem:[#allocation49_spill] sm:$0xff] }
 0x1fa   : > { %v4849_v48 = vrot.slane %v4847_v57, 4  ;;  %v12087_v17 = vadd.f32 %v20465_v6, %v20464_v49  ;;  %v12090_v31 = vadd.f32 %v20468_v36, %v20467_v29  ;;  %v20470_v58 = vld [vmem:[#allocation64_spill] sm:$0xff]  ;;  %v12041_v57 = vadd.f32 %v16418_v60, %v16404_v45  ;;  %v20471_v30 = vld [vmem:[#allocation59_spill] sm:$0xff]  ;;  %v20477_v29 = vld [vmem:[#allocation65_spill] sm:$0xff] }
 0x1fb   : > { %v4770_v50 = vsel %vm20462_vm2, %v16487_v63, %v4769_v27  ;;  %v16575_v34 = vadd.f32 %v20470_v58, %v20469_v44  ;;  %v12150_v63 = vpop.f32.mrf.mxu1  ;;  %v3355_v42 = vpop.f32.mrf.mxu0  ;;  %v16580_v20 = vadd.f32 %v12029_v61, %v20471_v30  ;;  %v20472_v49 = vld [vmem:[#allocation47_spill] sm:$0xff]  ;;  %v16587_v24 = vadd.f32 %v16343_v9, %v16334_v7  ;;  %v20476_v61 = vld [vmem:[#allocation48_spill] sm:$0xff] }
 0x1fc   : > { %13007 = vmatprep.mubr.bf16.mxu1 %v4770_v50  ;;  %v4850_v5 = vor.u32 %v4849_v48, %v4846_v2  ;;  %v16583_v6 = vadd.f32 %v12032_v22, %v20472_v49  ;;  %v16591_v2 = vadd.f32 %v16378_v23, %v16360_v39  ;;  %v20474_v60 = vld [vmem:[#allocation19_spill] sm:$0xff]  ;;  %v20475_v50 = vld [vmem:[#allocation54_spill] sm:$0xff]  ;;  %v16600_v22 = vadd.f32 %v20477_v29, %v20476_v61  ;;  %v5928_v61 = vld [vmem:[#allocation3 + $0x8] sm:$0xf] }
 0x1fd   : > { %v3199_v45 = vadd.f32 %v12035_v15, %v20474_v60  ;;  %v16596_v12 = vadd.f32 %v12038_v26, %v20475_v50  ;;  %v12151_v36 = vpop.f32.mrf.mxu1  ;;  %v16604_v7 = vadd.f32 %v16434_v43, %v16416_v8  ;;  %v3264_v9 = vadd.f32 %v16442_v41, %v16485_v40  ;;  %v20478_v39 = vld [vmem:[#allocation46_spill] sm:$0xff]  ;;  %v12969_v43 = vpop.f32.mrf.mxu0  ;;  %v16639_v29 = vld [vmem:[#allocation3 + $0xc] sm:$0xf] }
 0x1fe   : > { %v4851_v48 = vsel %vm20473_vm3, %v4769_v27, %v4850_v5  ;;  %v3256_v23 = vadd.f32 %v16408_v32, %v20478_v39  ;;  %v12149_v27 = vadd.f32 %v12148_v56, %v12147_v1  ;;  %v16611_v15 = vadd.f32 %v12041_v57, %v20479_v28 }
 0x1ff   : > { %13008 = vmatmul.mubr.bf16.gmra.mxu1 %v4851_v48  ;;  %v12044_v26 = vadd.f32 %v16455_v47, %v16436_v18  ;;  %v3267_v10 = vadd.f32 %v16508_v55, %v16504_v25  ;;  %v3259_v8 = vadd.f32 %v16432_v38, %v16425_v3  ;;  %v12047_v41 = vadd.f32 %v16482_v0, %v16470_v4  ;;  %v12153_v1 = vpop.f32.mrf.mxu1  ;;  %v3368_v47 = vpop.f32.mrf.mxu0 }
 0x200   : > { %v3361_v40 = vadd.f32 %v12965_v14, %v3264_v9  ;;  %v3353_v5 = vadd.f32 %v3352_v46, %v3256_v23  ;;  %v3280_v32 = vadd.f32 %v12087_v17, %v3183_v16  ;;  %v12050_v56 = vadd.f32 %v16521_v19, %v16498_v35  ;;  %v16630_v35 = vld [vmem:[%s19593_s2] ss:$0 sm:$0xff] }
 0x201   : > { %v3364_v44 = vadd.f32 %v12966_v52, %v3267_v10  ;;  %v3356_v58 = vadd.f32 %v3355_v42, %v3259_v8  ;;  %v12152_v18 = vadd.f32 %v12151_v36, %v12150_v63  ;;  %v3272_v3 = vadd.f32 %v16533_v59, %v16529_v62  ;;  %v12154_v38 = vpop.f32.mrf.mxu1  ;;  %v12970_v46 = vpop.f32.mrf.mxu0  ;;  %v20480_v59 = vld [vmem:[#allocation38_spill] sm:$0xff]  ;;  %v5927_v10 = vld [vmem:[#allocation3 + $0x4] sm:$0x8] }
 0x202   : > { %v3417_v57 = vmax.f32 %v3361_v40, 0.0  ;;  %v3377_v25 = vadd.f32 %v12969_v43, %v3280_v32  ;;  %v3283_v55 = vadd.f32 %v12090_v31, %v3186_v53  ;;  %v3415_v30 = vmax.f32 %v3353_v5, 0.0  ;;  %v20482_v36 = vld [vmem:[#allocation58_spill] sm:$0xff] }
 0x203   : > { %v3418_v4 = vmax.f32 %v3364_v44, 0.0  ;;  %v3416_v0 = vmax.f32 %v3356_v58, 0.0  ;;  %v12155_v14 = vadd.f32 %v12154_v38, %v12153_v1  ;;  %v12108_v16 = vadd.f32 %v16468_v33, %v16453_v21  ;;  %v12156_v17 = vpop.f32.mrf.mxu1  ;;  %v3371_v49 = vpop.f32.mrf.mxu0  ;;  %v20481_v21 = vld [vmem:[#allocation50_spill] sm:$0xff] }
 0x204   : > { %v3369_v19 = vadd.f32 %v3368_v47, %v3272_v3  ;;  %v3380_v52 = vadd.f32 %v12970_v46, %v3283_v55  ;;  %v3275_v62 = vadd.f32 %v16544_v37, %v16549_v11  ;;  %v3210_v53 = vadd.f32 %v12044_v26, %v20480_v59  ;;  %v20483_v37 = vld [vmem:[#allocation45_spill] sm:$0xff] }
 0x205   : > { %v12111_v31 = vadd.f32 %v16496_v51, %v16480_v54  ;;  %v11755_v63 = vpack.c.bf16 %v3418_v4, %v3417_v57  ;;  %v11750_v42 = vpack.c.bf16 %v3416_v0, %v3415_v30  ;;  %v12114_v33 = vadd.f32 %v16537_v13, %v20481_v21  ;;  %v12157_v51 = vpop.f32.mrf.mxu1  ;;  %v12973_v57 = vpop.f32.mrf.mxu0 }
 0x206   : > { %v3421_v48 = vmax.f32 %v3377_v25, 0.0  ;;  %v3422_v60 = vmax.f32 %v3380_v52, 0.0  ;;  %v3372_v50 = vadd.f32 %v3371_v49, %v3275_v62  ;;  %v3215_v9 = vadd.f32 %v12047_v41, %v20482_v36  ;;  %v20484_v41 = vld [vmem:[#allocation5_spill] sm:$0xff] }
 0x207   : > { %v3218_v11 = vadd.f32 %v12050_v56, %v20483_v37  ;;  %v16644_v39 = vadd.f32 %v12149_v27, %v16630_v35  ;;  %11844 = vst [vmem:[#allocation3 + $0x18] sm:$0xff] %v11755_v63   ;;  %11843 = vst [vmem:[#allocation3 + $0x10] sm:$0xff] %v11750_v42   ;;  %v16647_v54 = vadd.f32 %v12152_v18, %v16630_v35  ;;  %v3419_v13 = vmax.f32 %v3369_v19, 0.0  ;;  %v5979_v27 = vld [vmem:[#allocation3 + $0xc] sm:$0x8]  ;;  %v20489_v18 = vld [vmem:[#allocation7_spill] sm:$0xff]  ;;  %v12159_v25 = vpop.f32.mrf.mxu1 }
 0x208   : > { %v11765_v23 = vpack.c.bf16 %v3422_v60, %v3421_v48  ;;  %v3420_v28 = vmax.f32 %v3372_v50, 0.0  ;;  %v3296_v26 = vadd.f32 %v16591_v2, %v3199_v45  ;;  %v16651_v8 = vadd.f32 %v12155_v14, %v16630_v35  ;;  %v3384_v14 = vpop.f32.mrf.mxu0  ;;  %v20495_v60 = vld [vmem:[#allocation10_spill] sm:$0xff] }
 0x209   : > { %v3288_v43 = vadd.f32 %v16575_v34, %v16580_v20  ;;  %vm20485_vm14 = vcmp.ne.s16.totalorder %v20484_v41, 0  ;;  %v5963_v32 = vsel %vm13886_vm0, %v16639_v29, 0  ;;  %v12158_v56 = vadd.f32 %v12157_v51, %v12156_v17  ;;  %v20487_v20 = vld [vmem:[#allocation4_spill] sm:$0xff] }
 0x20a   : > { %v5962_v40 = vsel %vm20485_vm14, %v5928_v61, 0  ;;  %11846 = vst [vmem:[#allocation3 + $0x28] sm:$0xff] %v11765_v23   ;;  %v11760_v1 = vpack.c.bf16 %v3420_v28, %v3419_v13  ;;  %v16661_v2 = vcombine.low %v5928_v61, %v16639_v29  ;;  %v3299_v45 = vadd.f32 %v16600_v22, %v16596_v12  ;;  %v20491_v22 = vld [vmem:[#allocation8_spill] sm:$0xff]  ;;  %v12974_v49 = vpop.f32.mrf.mxu0 }
 0x20b   : > { %v11052_v44 = vcombine.low %v5962_v40, %v5963_v32  ;;  %v3291_v34 = vadd.f32 %v16587_v24, %v16583_v6  ;;  %vm20488_vm2 = vcmp.ne.s16.totalorder %v20487_v20, 0  ;;  %v5945_v47 = vsel %vm13762_vm13, %v5928_v61, 0  ;;  %v20497_v28 = vld [vmem:[#allocation12_spill] sm:$0xff] }
 0x20c   : > { %v5944_v58 = vsel %vm20488_vm2, %v5927_v10, 0  ;;  %11845 = vst [vmem:[#allocation3 + $0x20] sm:$0xff] %v11760_v1   ;;  %v3312_v3 = vadd.f32 %v12111_v31, %v3215_v9  ;;  %v16673_v38 = vadd.f32 %v16604_v7, %v16611_v15  ;;  %vm20490_vm3 = vmmov %vm20488_vm2  ;;  %vm20492_vm14 = vnez %v20491_v22  ;;  %v12160_v7 = vpop.f32.mrf.mxu1 }
 0x20d   : > { %v5982_v12 = vsel %vm20490_vm3, %v5979_v27, 0  ;;  %v5946_v6 = vsel %vm20492_vm14, %v16639_v29, 0  ;;  %v3393_v24 = vadd.f32 %v12973_v57, %v3296_v26  ;;  %v16680_v55 = vrot.slane %v11052_v44, 5  ;;  %v13294_v29 = vld [vmem:[%s19592_s1 + $0x3f0] sm:$0xff]  }
 0x20e   : > { %v6139_v30 = vshrl.u32 %v16661_v2, 16  ;;  %v6142_v4 = vshll.u32 %v16661_v2, 16  ;;  %v16685_v0 = vadd.f32 %v12158_v56, %v16630_v35  ;;  %v16687_v15 = vadd.f32 %v12114_v33, %v3218_v11  ;;  %v16691_v19 = vld [vmem:[#allocation3 + $0x10] sm:$0xf]  ;;  %v16693_v52 = vld [vmem:[#allocation3 + $0x14] sm:$0xf]  ;;  %v12162_v21 = vpop.f32.mrf.mxu1  ;;  %v3387_v11 = vpop.f32.mrf.mxu0 }
 0x20f   : > { %v16689_v46 = vadd.f32 %v12108_v16, %v3210_v53  ;;  %v16695_v17 = vld [vmem:[#allocation3 + $0x18] sm:$0xf]  ;;  %v16697_v62 = vcombine.low %v5944_v58, %v5945_v47  ;;  %v3425_v59 = vmax.f32 %v3393_v24, 0.0  ;;  %v3385_v31 = vadd.f32 %v3384_v14, %v3288_v43  ;;  %v20493_v53 = vld [vmem:[#allocation9_spill] sm:$0xff] }
 0x210   : > { %v12161_v63 = vadd.f32 %v12160_v7, %v12159_v25  ;;  %v5983_v42 = vsel %vm13762_vm13, %v16691_v19, 0  ;;  %v5984_v16 = vsel %vm20492_vm14, %v16693_v52, 0  ;;  %vm20494_vm2 = vnez %v20493_v53  ;;  %v12163_v51 = vpop.f32.mrf.mxu1  ;;  %v12977_v25 = vpop.f32.mrf.mxu0 }
 0x211   : > { %v5985_v33 = vsel %vm20494_vm2, %v16695_v17, 0  ;;  %v11061_v48 = vcombine.low %v5982_v12, %v5983_v42  ;;  %vm20496_vm3 = vcmp.ne.s16.totalorder %v20495_v60, 0  ;;  %v3423_v61 = vmax.f32 %v3385_v31, 0.0 }
 0x212   : > { %v5964_v50 = vsel %vm20496_vm3, %v16691_v19, 0  ;;  %v16712_v36 = vadd.f32 %v12161_v63, %v16630_v35  ;;  %v3396_v9 = vadd.f32 %v12974_v49, %v3299_v45  ;;  %v11062_v37 = vcombine.low %v5984_v16, %v5985_v33  ;;  %v12165_v12 = vpop.f32.mrf.mxu1  ;;  %v3400_v49 = vpop.f32.mrf.mxu0 }
 0x213   : > { %v6708_v13 = vshrl.u32 %v11061_v48, 16  ;;  %v6711_v23 = vshll.u32 %v11061_v48, 16  ;;  %v5965_v26 = vsel %vm13912_vm6, %v16693_v52, 0  ;;  %v6691_v10 = vshrl.u32 %v16680_v55, 16 }
 0x214   : > { %v3426_v43 = vmax.f32 %v3396_v9, 0.0  ;;  %v3388_v27 = vadd.f32 %v3387_v11, %v3291_v34  ;;  %v12164_v40 = vadd.f32 %v12163_v51, %v12162_v21  ;;  %v6716_v32 = vshrl.u32 %v11062_v37, 16  ;;  %v12166_v21 = vpop.f32.mrf.mxu1  ;;  %v12978_v11 = vpop.f32.mrf.mxu0 }
 0x215   : > { %v6710_v1 = vrot.slane %v6708_v13, 3  ;;  %v6713_v56 = vrot.slane %v6711_v23, 4  ;;  %v6719_v44 = vshll.u32 %v11062_v37, 16  ;;  %v16718_v2 = vcombine.low %v5964_v50, %v5965_v26 }
 0x216   : > { %v11775_v45 = vpack.c.bf16 %v3426_v43, %v3425_v59  ;;  %v3424_v58 = vmax.f32 %v3388_v27, 0.0  ;;  %v16721_v47 = vadd.f32 %v12164_v40, %v16630_v35  ;;  %v6718_v57 = vrot.slane %v6716_v32, 3  ;;  %v12168_v51 = vpop.f32.mrf.mxu1 }
 0x217   : > { %v6714_v24 = vor.u32 %v6713_v56, %v6710_v1  ;;  %v6721_v14 = vrot.slane %v6719_v44, 4  ;;  %v6253_v7 = vrot.slane %v16718_v2, 5  ;;  %v6693_v34 = vrot.slane %v6691_v10, 3  ;;  %v13309_v2 = vld [vmem:[%s19592_s1 + $0x410] sm:$0xff]  }
 0x218   : > { %11848 = vst [vmem:[#allocation3 + $0x38] sm:$0xff] %v11775_v45   ;;  %v11770_v31 = vpack.c.bf16 %v3424_v58, %v3423_v61  ;;  %v3409_v63 = vadd.f32 %v12977_v25, %v3312_v3  ;;  %v6694_v42 = vshll.u32 %v16680_v55, 16  ;;  %v11045_v59 = vcombine.low %v16691_v19, %v16693_v52 }
 0x219   : > { %v16727_v16 = vor.u32 %v6721_v14, %v6718_v57  ;;  %vm20498_vm3 = vcmask 1042432   ;;  %v6141_v48 = vrot.slane %v6139_v30, 4  ;;  %v6144_v50 = vrot.slane %v6142_v4, 5  ;;  %v3403_v4 = vpop.f32.mrf.mxu0 }
 0x21a   : > { %v6254_v33 = vsel %vm20498_vm3, %v16680_v55, %v6253_v7  ;;  %11847 = vst [vmem:[#allocation3 + $0x30] sm:$0xff] %v11770_v31   ;;  %v3429_v9 = vmax.f32 %v3409_v63, 0.0  ;;  %v3401_v3 = vadd.f32 %v3400_v49, %v16673_v38  ;;  %v12167_v61 = vadd.f32 %v12166_v21, %v12165_v12  ;;  %v12169_v38 = vpop.f32.mrf.mxu1 }
 0x21b   : > { %v6696_v37 = vrot.slane %v6694_v42, 4  ;;  %vm20499_vm13 = vsmask.f32 4352  ;;  %v6699_v23 = vshrl.u32 %v6254_v33, 16  ;;  %v6702_v26 = vshll.u32 %v6254_v33, 16 }
 0x21c   : > { %v6723_v13 = vsel %vm20499_vm13, %v6714_v24, %v16727_v16  ;;  %v6145_v10 = vor.u32 %v6144_v50, %v6141_v48  ;;  %v3427_v43 = vmax.f32 %v3401_v3, 0.0  ;;  %v16737_v27 = vadd.f32 %v12167_v61, %v16630_v35 }
 0x21d   : > { %v3412_v55 = vadd.f32 %v12978_v11, %v16687_v15  ;;  %7893 = vmatprep.mubr.bf16.mxu1 %v6723_v13  ;;  %v6697_v30 = vor.u32 %v6696_v37, %v6693_v34  ;;  %v6701_v40 = vrot.slane %v6699_v23, 3  ;;  %v6704_v32 = vrot.slane %v6702_v26, 4  ;;  %v13289_v15 = vld [vmem:[%s19592_s1 + $0x3f8] sm:$0xff]   ;;  %v20502_v13 = vld [vmem:[#allocation13_spill] sm:$0xff] }
 0x21e   : > { %v6147_v1 = vshrl.u32 %v11045_v59, 16  ;;  %v6150_v56 = vshll.u32 %v11045_v59, 16  ;;  %v3404_v45 = vadd.f32 %v3403_v4, %v16689_v46  ;;  %v12170_v58 = vadd.f32 %v12169_v38, %v12168_v51  ;;  %v16749_v59 = vld [vmem:[#allocation3 + $0x1c] sm:$0xf]  ;;  %v13292_v46 = vld [vmem:[%s19592_s1 + $0x430] sm:$0xff]  }
 0x21f   : > { %v3430_v44 = vmax.f32 %v3412_v55, 0.0  ;;  %v6674_v57 = vshrl.u32 %v6145_v10, 16  ;;  %v16741_v25 = vor.u32 %v6704_v32, %v6701_v40  ;;  %v6677_v14 = vshll.u32 %v6145_v10, 16  ;;  %v12211_v55 = vpop.f32.mrf.mxu0 }
 0x220   : > { %v6149_v12 = vrot.slane %v6147_v1, 4  ;;  %v6152_v24 = vrot.slane %v6150_v56, 5  ;;  %v3428_v31 = vmax.f32 %v3404_v45, 0.0  ;;  %v16747_v63 = vadd.f32 %v12170_v58, %v16630_v35  ;;  %v16785_v58 = vld [vmem:[#allocation3 + $0x24] sm:$0xf] }
 0x221   : > { %v11785_v34 = vpack.c.bf16 %v3430_v44, %v3429_v9  ;;  %v6676_v42 = vrot.slane %v6674_v57, 3  ;;  %v6706_v49 = vsel %vm20499_vm13, %v6697_v30, %v16741_v25  ;;  %v6679_v33 = vrot.slane %v6677_v14, 4  ;;  %v20504_v44 = vld [vmem:[#allocation15_spill] sm:$0xff]  ;;  %v12212_v57 = vpop.f32.mrf.mxu0 }
 0x222   : > { %v16756_v21 = vor.u32 %v6152_v24, %v6149_v12  ;;  %v5947_v48 = vsel %vm20494_vm2, %v16691_v19, 0  ;;  %v11780_v50 = vpack.c.bf16 %v3428_v31, %v3427_v43  ;;  %7894 = vmatmul.mubr.bf16.vlgmr.msra.gmra.mxu1 %v6706_v49  ;;  %v6657_v3 = vshrl.u32 %v16697_v62, 16  ;;  %v16771_v19 = vld [vmem:[#allocation3 + $0x20] sm:$0xf]  ;;  %v13297_v43 = vld [vmem:[%s19592_s1 + $0x428] sm:$0xff]   ;;  %v20506_v49 = vld [vmem:[#allocation14_spill] sm:$0xff] }
 0x223   : > { %11850 = vst [vmem:[#allocation3 + $0x48] sm:$0xff] %v11785_v34   ;;  %v11036_v9 = vcombine.low %v5946_v6, %v5947_v48  ;;  %v6660_v61 = vshll.u32 %v16697_v62, 16  ;;  %vm20501_vm3 = vsmask.f32 3328  ;;  %v6680_v11 = vor.u32 %v6679_v33, %v6676_v42  ;;  %12596 = vmatpush3.bf16.msra.mxu1 %v13289_v15  ;;  %v13299_v34 = vld [vmem:[%s19592_s1 + $0x3e8] sm:$0xff]  }
 0x224   : > { %20500 = vst [vmem:[#allocation52_spill] sm:$0xff] %v16756_v21  ;;  %v6154_v37 = vsel %vm20501_vm3, %v6145_v10, %v16756_v21  ;;  %v11046_v51 = vcombine.low %v16695_v17, %v16749_v59  ;;  %vm20503_vm13 = vnez %v20502_v13  ;;  %11849 = vst [vmem:[#allocation3 + $0x40] sm:$0xff] %v11780_v50   ;;  %v6659_v26 = vrot.slane %v6657_v3, 3  ;;  %12597 = vmatprep.subr.bf16.mxu1 %v13292_v46  ;;  %v16795_v48 = vld [vmem:[#allocation3 + $0x28] sm:$0xf]  ;;  %v13302_v50 = vld [vmem:[%s19592_s1 + $0x420] sm:$0xff]   ;;  %v12214_v3 = vpop.f32.mrf.mxu0 }
 0x225   : > { %v5986_v23 = vsel %vm20503_vm13, %v16749_v59, 0  ;;  %v6682_v6 = vshrl.u32 %v6154_v37, 16  ;;  %v6685_v62 = vshll.u32 %v6154_v37, 16  ;;  %v6662_v10 = vrot.slane %v6660_v61, 4 }
 0x226   : > { %v6665_v30 = vshrl.u32 %v11036_v9, 16  ;;  %v6668_v4 = vshll.u32 %v11036_v9, 16  ;;  %v6156_v38 = vshrl.u32 %v11046_v51, 16  ;;  %v6159_v40 = vshll.u32 %v11046_v51, 16  ;;  %v12171_v9 = vpop.f32.mrf.mxu1 }
 0x227   : > { %v6684_v32 = vrot.slane %v6682_v6, 3  ;;  %v6687_v1 = vrot.slane %v6685_v62, 4  ;;  %v6663_v56 = vor.u32 %v6662_v10, %v6659_v26  ;;  %vm20505_vm3 = vnez %v20504_v44  ;;  %12598 = vmatpush3.bf16.msra.mxu1 %v13294_v29  ;;  %v20509_v29 = vld [vmem:[#allocation18_spill] sm:$0xff]  ;;  %v13286_v62 = vld [vmem:[%s19592_s1 + $0x378] sm:$0xff]  }
 0x228   : > { %v5987_v45 = vsel %vm20505_vm3, %v16771_v19, 0  ;;  %v6667_v12 = vrot.slane %v6665_v30, 3  ;;  %v6670_v24 = vrot.slane %v6668_v4, 4  ;;  %v6158_v14 = vrot.slane %v6156_v38, 4  ;;  %12599 = vmatprep.subr.bf16.mxu1 %v13297_v43  ;;  %v13290_v30 = vld [vmem:[%s19592_s1 + $0x3b0] sm:$0xff]   ;;  %v12172_v4 = vpop.f32.mrf.mxu1  ;;  %v12215_v38 = vpop.f32.mrf.mxu0 }
 0x229   : > { %v6161_v15 = vrot.slane %v6159_v40, 5  ;;  %v12213_v31 = vadd.f32 %v12212_v57, %v12211_v55  ;;  %v16790_v42 = vor.u32 %v6687_v1, %v6684_v32  ;;  %v11063_v46 = vcombine.low %v5986_v23, %v5987_v45  ;;  %v13304_v45 = vld [vmem:[%s19592_s1 + $0x3e0] sm:$0xff]  }
 0x22a   : > { %vm20507_vm2 = vcmp.ne.s16.totalorder %v20506_v49, 0  ;;  %v16800_v61 = vor.u32 %v6670_v24, %v6667_v12  ;;  %v5967_v23 = vsel %vm14033_vm11, %v16749_v59, 0  ;;  %vm20511_vm14 = vsmask.f32 4352  ;;  %v20537_v49 = vld [vmem:[#allocation30_spill] sm:$0xff] }
 0x22b   : > { %v5966_v33 = vsel %vm20507_vm2, %v16695_v17, 0  ;;  %v16802_v37 = vor.u32 %v6161_v15, %v6158_v14  ;;  %vm20510_vm2 = vnez %v20509_v29  ;;  %v16814_v26 = vadd.f32 %v12213_v31, %v16644_v39  ;;  %vm20512_vm11 = vmmov %vm20511_vm14  ;;  %12600 = vmatpush3.bf16.msra.mxu1 %v13299_v34  ;;  %v13306_v14 = vld [vmem:[%s19592_s1 + $0x418] sm:$0xff]   ;;  %v12174_v15 = vpop.f32.mrf.mxu1 }
 0x22c   : > { %v5988_v6 = vsel %vm20510_vm2, %v16785_v58, 0  ;;  %v6689_v10 = vsel %vm20511_vm14, %v6680_v11, %v16790_v42  ;;  %v6829_v43 = vshrl.u32 %v11063_v46, 16  ;;  %v6832_v55 = vshll.u32 %v11063_v46, 16  ;;  %v20514_v11 = vld [vmem:[#allocation20_spill] sm:$0xff]  ;;  %12601 = vmatprep.subr.bf16.mxu1 %v13302_v50 }
 0x22d   : > { %7796 = vmatprep.mubr.bf16.mxu0 %v6689_v10  ;;  %v6672_v40 = vsel %vm20512_vm11, %v6663_v56, %v16800_v61  ;;  %vm20513_vm6 = vsmask.f32 3328  ;;  %v16826_v32 = vcombine.low %v5966_v33, %v5967_v23  ;;  %vm20515_vm14 = vnez %v20514_v11 }
 0x22e   : > { %v6163_v39 = vsel %vm20513_vm6, %v16756_v21, %v16802_v37  ;;  %v5989_v1 = vsel %vm20515_vm14, %v16795_v48, 0  ;;  %v12173_v57 = vadd.f32 %v12172_v4, %v12171_v9  ;;  %v12216_v12 = vadd.f32 %v12215_v38, %v12214_v3  ;;  %7797 = vmatmul.mubr.bf16.vlgmr.msra.gmra.mxu0 %v6672_v40  ;;  %v13291_v9 = vld [vmem:[%s19592_s1 + $0x370] sm:$0xff]  }
 0x22f   : > { %v6733_v24 = vshrl.u32 %v6163_v39, 16  ;;  %v6736_v56 = vshll.u32 %v6163_v39, 16  ;;  %v6831_v31 = vrot.slane %v6829_v43, 3  ;;  %v6834_v46 = vrot.slane %v6832_v55, 4  ;;  %12532 = vmatpush3.bf16.msra.mxu0 %v13286_v62  ;;  %v13295_v43 = vld [vmem:[%s19592_s1 + $0x3a8] sm:$0xff]   ;;  %v12175_v55 = vpop.f32.mrf.mxu1  ;;  %12602 = vmatpush3.bf16.msra.mxu1 %v13304_v45  ;;  %v12217_v39 = vpop.f32.mrf.mxu0 }
 0x230   : > { %v19805_v33 = vrot.slane %v16826_v32, 5  ;;  %v11064_v34 = vcombine.low %v5988_v6, %v5989_v1  ;;  %v16842_v3 = vadd.f32 %v12173_v57, %v16630_v35  ;;  %v16845_v50 = vadd.f32 %v12216_v12, %v16647_v54  ;;  %12533 = vmatprep.subr.bf16.mxu0 %v13290_v30  ;;  %v13308_v54 = vld [vmem:[%s19592_s1 + $0x3d8] sm:$0xff]   ;;  %12603 = vmatprep.subr.bf16.mxu1 %v13306_v14 }
 0x231   : > { %v6735_v23 = vrot.slane %v6733_v24, 3  ;;  %v6738_v10 = vrot.slane %v6736_v56, 4  ;;  %v6835_v6 = vor.u32 %v6834_v46, %v6831_v31  ;;  %vm20516_vm6 = vcmask 1042432   ;;  %v13296_v56 = vld [vmem:[%s19592_s1 + $0x368] sm:$0xff]  }
 0x232   : > { %v6256_v62 = vsel %vm20516_vm6, %v6253_v7, %v19805_v33  ;;  %v6893_v4 = vshrl.u32 %v11064_v34, 16  ;;  %v6896_v38 = vshll.u32 %v11064_v34, 16  ;;  %v12176_v30 = vadd.f32 %v12175_v55, %v12174_v15  ;;  %vm20518_vm6 = vmmov %vm20512_vm11 }
 0x233   : > { %v16858_v40 = vor.u32 %v6738_v10, %v6735_v23  ;;  %v6820_v1 = vshrl.u32 %v6256_v62, 16  ;;  %v6823_v57 = vshll.u32 %v6256_v62, 16  ;;  %v6836_v7 = vsel %vm20512_vm11, %v16727_v16, %v6835_v6  ;;  %12534 = vmatpush3.bf16.msra.mxu0 %v13291_v9  ;;  %v12218_v16 = vpop.f32.mrf.mxu0  ;;  %12604 = vmatpush3.bf16.msra.mxu1 %v13308_v54  ;;  %v12177_v10 = vpop.f32.mrf.mxu1 }
 0x234   : > { %v6895_v12 = vrot.slane %v6893_v4, 3  ;;  %v6898_v45 = vrot.slane %v6896_v38, 4  ;;  %v5948_v24 = vsel %vm20503_vm13, %v16693_v52, 0  ;;  %v16872_v14 = vadd.f32 %v12176_v30, %v16630_v35  ;;  %7901 = vmatprep.mubr.bf16.mxu1 %v6836_v7  ;;  %12535 = vmatprep.subr.bf16.mxu0 %v13295_v43  ;;  %v13300_v52 = vld [vmem:[%s19592_s1 + $0x3a0] sm:$0xff]   ;;  %v20519_v4 = vld [vmem:[#allocation17_spill] sm:$0xff] }
 0x235   : > { %20517 = vst [vmem:[#allocation29_spill] sm:$0xff] %v16858_v40  ;;  %v6818_v15 = vsel %vm20518_vm6, %v16790_v42, %v16858_v40  ;;  %v6822_v31 = vrot.slane %v6820_v1, 3  ;;  %v6825_v46 = vrot.slane %v6823_v57, 4  ;;  %v12219_v34 = vadd.f32 %v12218_v16, %v12217_v39  ;;  %v12220_v43 = vpop.f32.mrf.mxu0  ;;  %12605 = vmatprep.subr.bf16.mxu1 %v13309_v2  ;;  %v13312_v2 = vld [vmem:[%s19592_s1 + $0x408] sm:$0xff]  }
 0x236   : > { %7804 = vmatprep.mubr.bf16.mxu0 %v6818_v15  ;;  %v16880_v9 = vor.u32 %v6898_v45, %v6895_v12  ;;  %v5949_v23 = vsel %vm20505_vm3, %v16695_v17, 0  ;;  %v11047_v42 = vcombine.low %v16771_v19, %v16785_v58  ;;  %vm20520_vm11 = vcmp.ne.s16.totalorder %v20519_v4, 0  ;;  %v13310_v17 = vld [vmem:[%s19592_s1 + $0x3d0] sm:$0xff]   ;;  %v16903_v12 = vld [vmem:[#allocation3 + $0x2c] sm:$0xf]  ;;  %v13301_v45 = vld [vmem:[%s19592_s1 + $0x360] sm:$0xff]  }
 0x237   : > { %v16887_v55 = vor.u32 %v6825_v46, %v6822_v31  ;;  %v11037_v62 = vcombine.low %v5948_v24, %v5949_v23  ;;  %v5968_v38 = vsel %vm20520_vm11, %v16771_v19, 0  ;;  %v5969_v39 = vsel %vm20238_vm1, %v16785_v58, 0  ;;  %12536 = vmatpush3.bf16.msra.mxu0 %v13296_v56  ;;  %v12178_v24 = vpop.f32.mrf.mxu1  ;;  %vm20522_vm11 = vmmov %vm20518_vm6  ;;  %v12221_v15 = vpop.f32.mrf.mxu0  ;;  %v16916_v46 = vld [vmem:[#allocation3 + $0x30] sm:$0xf]  ;;  %v13305_v56 = vld [vmem:[%s19592_s1 + $0x398] sm:$0xff]   ;;  %12606 = vmatpush3.bf16.msra.mxu1 %v13310_v17 }
 0x238   : > { %v16899_v54 = vadd.f32 %v12219_v34, %v16651_v8  ;;  %v6900_v1 = vsel %vm20518_vm6, %v6835_v6, %v16880_v9  ;;  %v6165_v57 = vshrl.u32 %v11047_v42, 16  ;;  %v6168_v7 = vshll.u32 %v11047_v42, 16  ;;  %12537 = vmatprep.subr.bf16.mxu0 %v13300_v52  ;;  %v13314_v52 = vld [vmem:[%s19592_s1 + $0x3c8] sm:$0xff]   ;;  %12607 = vmatprep.subr.bf16.mxu1 %v13312_v2  ;;  %v13316_v17 = vld [vmem:[%s19592_s1 + $0x400] sm:$0xff]  }
 0x239   : > { %v6827_v8 = vsel %vm20522_vm11, %v16741_v25, %v16887_v55  ;;  %v6810_v6 = vshrl.u32 %v11037_v62, 16  ;;  %v6813_v16 = vshll.u32 %v11037_v62, 16  ;;  %v16914_v31 = vcombine.low %v5968_v38, %v5969_v39  ;;  %v12180_v30 = vpop.f32.mrf.mxu1  ;;  %v20523_v38 = vld [vmem:[#allocation23_spill] sm:$0xff] }
 0x23a   : > { %v12179_v34 = vadd.f32 %v12178_v24, %v12177_v10  ;;  %7902 = vmatmul.mubr.bf16.gmra.mxu1 %v6827_v8  ;;  %v12222_v23 = vadd.f32 %v12221_v15, %v12220_v43  ;;  %v6167_v42 = vrot.slane %v6165_v57, 4  ;;  %v6170_v33 = vrot.slane %v6168_v7, 5  ;;  %v20525_v57 = vld [vmem:[#allocation24_spill] sm:$0xff] }
 0x23b   : > { %7909 = vmatprep.mubr.bf16.mxu1 %v6900_v1  ;;  %v6812_v25 = vrot.slane %v6810_v6, 3  ;;  %v6815_v4 = vrot.slane %v6813_v16, 4  ;;  %v19808_v62 = vrot.slane %v16914_v31, 5  ;;  %vm20524_vm6 = vnez %v20523_v38  ;;  %12538 = vmatpush3.bf16.msra.mxu0 %v13301_v45  ;;  %v12181_v24 = vpop.f32.mrf.mxu1  ;;  %v13307_v45 = vld [vmem:[%s19592_s1 + $0x358] sm:$0xff]  }
 0x23c   : > { %v5990_v39 = vsel %vm20524_vm6, %v16903_v12, 0  ;;  %v16929_v10 = vadd.f32 %v12179_v34, %v16630_v35  ;;  %v16932_v43 = vadd.f32 %v12222_v23, %v16685_v0  ;;  %v16934_v1 = vor.u32 %v6170_v33, %v6167_v42  ;;  %12539 = vmatprep.subr.bf16.mxu0 %v13305_v56  ;;  %12608 = vmatpush3.bf16.msra.mxu1 %v13314_v52 }
 0x23d   : > { %vm20526_vm11 = vnez %v20525_v57  ;;  %v16942_v8 = vor.u32 %v6815_v4, %v6812_v25  ;;  %v20527_v0 = vrot.slane %v16826_v32, 5  ;;  %vm20528_vm1 = vcmask 1042432   ;;  %v13311_v32 = vld [vmem:[%s19592_s1 + $0x390] sm:$0xff]   ;;  %12609 = vmatprep.subr.bf16.mxu1 %v13316_v17 }
 0x23e   : > { %v5991_v7 = vsel %vm20526_vm11, %v16916_v46, 0  ;;  %v5950_v6 = vsel %vm20510_vm2, %v16749_v59, 0  ;;  %v12182_v2 = vadd.f32 %v12181_v24, %v12180_v30  ;;  %vm20529_vm3 = vsmask.f32 3328  ;;  %v13318_v30 = vld [vmem:[%s19592_s1 + $0x3c0] sm:$0xff]  }
 0x23f   : > { %v6258_v33 = vsel %vm20528_vm1, %v20527_v0, %v19808_v62  ;;  %v11065_v15 = vcombine.low %v5990_v39, %v5991_v7  ;;  %v6172_v4 = vsel %vm20529_vm3, %v16802_v37, %v16934_v1  ;;  %vm20530_vm1 = vsmask.f32 4352  ;;  %v16970_v0 = vld [vmem:[#allocation3 + $0x34] sm:$0xf]  ;;  %v12223_v62 = vpop.f32.mrf.mxu0  ;;  %12540 = vmatpush3.bf16.msra.mxu0 %v13307_v45 }
 0x240   : > { %v6884_v16 = vshrl.u32 %v6258_v33, 16  ;;  %v6887_v34 = vshll.u32 %v6258_v33, 16  ;;  %v6817_v59 = vsel %vm20530_vm1, %v16800_v61, %v16942_v8  ;;  %v6784_v56 = vshrl.u32 %v6172_v4, 16  ;;  %v13322_v61 = vld [vmem:[%s19592_s1 + $0x2b8] sm:$0xff]   ;;  %12541 = vmatprep.subr.bf16.mxu0 %v13311_v32  ;;  %12610 = vmatpush3.bf16.msra.mxu1 %v13318_v30 }
 0x241   : > { %v6787_v23 = vshll.u32 %v6172_v4, 16  ;;  %v6956_v42 = vshrl.u32 %v11065_v15, 16  ;;  %v16968_v25 = vadd.f32 %v12182_v2, %v16630_v35  ;;  %7805 = vmatmul.mubr.bf16.gmra.mxu0 %v6817_v59  ;;  %v6959_v24 = vshll.u32 %v11065_v15, 16  ;;  %v12183_v4 = vpop.f32.mrf.mxu1  ;;  %v13313_v15 = vld [vmem:[%s19592_s1 + $0x350] sm:$0xff]   ;;  %v12224_v45 = vpop.f32.mrf.mxu0  ;;  %12675 = vmatprep.subr.bf16.mxu1 %v13322_v61 }
 0x242   : > { %v6886_v39 = vrot.slane %v6884_v16, 3  ;;  %v6889_v7 = vrot.slane %v6887_v34, 4  ;;  %v6786_v33 = vrot.slane %v6784_v56, 3  ;;  %v5951_v2 = vsel %vm20515_vm14, %v16771_v19, 0  ;;  %v13315_v56 = vld [vmem:[%s19592_s1 + $0x388] sm:$0xff]  }
 0x243   : > { %v6789_v52 = vrot.slane %v6787_v23, 4  ;;  %v6958_v29 = vrot.slane %v6956_v42, 3  ;;  %v6961_v17 = vrot.slane %v6959_v24, 4  ;;  %v11038_v34 = vcombine.low %v5950_v6, %v5951_v2  ;;  %v12184_v19 = vpop.f32.mrf.mxu1  ;;  %v20531_v42 = vld [vmem:[#allocation22_spill] sm:$0xff]  ;;  %v12226_v44 = vpop.f32.mrf.mxu0  ;;  %12542 = vmatpush3.bf16.msra.mxu0 %v13313_v15  ;;  %v13319_v15 = vld [vmem:[%s19592_s1 + $0x380] sm:$0xff]  }
 0x244   : > { %v16981_v16 = vor.u32 %v6889_v7, %v6886_v39  ;;  %v11048_v59 = vcombine.low %v16795_v48, %v16903_v12  ;;  %vm20532_vm3 = vcmp.ne.s16.totalorder %v20531_v42, 0  ;;  %v5971_v6 = vsel %vm20244_vm7, %v16903_v12, 0  ;;  %12543 = vmatprep.subr.bf16.mxu0 %v13315_v56 }
 0x245   : > { %v16988_v23 = vor.u32 %v6789_v52, %v6786_v33  ;;  %v5970_v11 = vsel %vm20532_vm3, %v16795_v48, 0  ;;  %v5992_v32 = vsel %vm20394_vm5, %v16970_v0, 0  ;;  %v12185_v24 = vadd.f32 %v12184_v19, %v12183_v4  ;;  %vm20535_vm3 = vmmov %vm20530_vm1  ;;  %v12186_v39 = vpop.f32.mrf.mxu1  ;;  %v17009_v4 = vld [vmem:[#allocation3 + $0x38] sm:$0xf]  ;;  %v12227_v19 = vpop.f32.mrf.mxu0 }
 0x246   : > { %v12225_v2 = vadd.f32 %v12224_v45, %v12223_v62  ;;  %v6891_v33 = vsel %vm20530_vm1, %v16887_v55, %v16981_v16  ;;  %v17002_v52 = vor.u32 %v6961_v17, %v6958_v29  ;;  %v6875_v13 = vshrl.u32 %v11038_v34, 16  ;;  %v13317_v29 = vld [vmem:[%s19592_s1 + $0x348] sm:$0xff]  }
 0x247   : > { %v17007_v42 = vsel %vm20535_vm3, %v16858_v40, %v16988_v23  ;;  %7910 = vmatmul.mubr.bf16.gmra.mxu1 %v6891_v33  ;;  %v6878_v51 = vshll.u32 %v11038_v34, 16  ;;  %v6174_v30 = vshrl.u32 %v11048_v59, 16  ;;  %v17016_v55 = vadd.f32 %v12185_v24, %v16630_v35  ;;  %v12187_v34 = vpop.f32.mrf.mxu1  ;;  %v12229_v21 = vpop.f32.mrf.mxu0  ;;  %12544 = vmatpush3.bf16.msra.mxu0 %v13317_v29 }
 0x248   : > { %20536 = vst [vmem:[#allocation51_spill] sm:$0xff] %v17007_v42  ;;  %7812 = vmatprep.mubr.bf16.mxu0 %v17007_v42  ;;  %v17019_v62 = vadd.f32 %v12225_v2, %v16712_v36  ;;  %v6963_v61 = vsel %vm20530_vm1, %v16880_v9, %v17002_v52  ;;  %v6177_v17 = vshll.u32 %v11048_v59, 16  ;;  %v6877_v45 = vrot.slane %v6875_v13, 3  ;;  %12545 = vmatprep.subr.bf16.mxu0 %v13319_v15 }
 0x249   : > { %7917 = vmatprep.mubr.bf16.mxu1 %v6963_v61  ;;  %v6880_v33 = vrot.slane %v6878_v51, 4  ;;  %v6176_v24 = vrot.slane %v6174_v30, 4  ;;  %v17027_v42 = vcombine.low %v5970_v11, %v5971_v6  ;;  %v12188_v36 = vadd.f32 %v12187_v34, %v12186_v39  ;;  %v12189_v56 = vpop.f32.mrf.mxu1  ;;  %v12230_v29 = vpop.f32.mrf.mxu0 }
 0x24a   : > { %v12228_v2 = vadd.f32 %v12227_v19, %v12226_v44  ;;  %v6179_v40 = vrot.slane %v6177_v17, 5  ;;  %vm20538_vm3 = vnez %v20537_v49  ;;  %v5952_v13 = vsel %vm20524_vm6, %v16785_v58, 0  ;;  %v13320_v44 = vld [vmem:[%s19592_s1 + $0x340] sm:$0xff]   ;;  %v17055_v58 = vld [vmem:[%s19592_s1 + $0x478] sm:$0xff]  }
 0x24b   : > { %v5993_v9 = vsel %vm20538_vm3, %v17009_v4, 0  ;;  %v17032_v59 = vor.u32 %v6880_v33, %v6877_v45  ;;  %v19820_v61 = vrot.slane %v17027_v42, 5  ;;  %v17042_v51 = vadd.f32 %v12188_v36, %v16630_v35  ;;  %v12190_v30 = vpop.f32.mrf.mxu1  ;;  %12546 = vmatpush3.bf16.msra.mxu0 %v13320_v44 }
 0x24c   : > { %v11066_v53 = vcombine.low %v5992_v32, %v5993_v9  ;;  %v17045_v11 = vadd.f32 %v12228_v2, %v16721_v47  ;;  %v17047_v39 = vor.u32 %v6179_v40, %v6176_v24  ;;  %v5953_v6 = vsel %vm20526_vm11, %v16795_v48, 0  ;;  %v12232_v9 = vpop.f32.mrf.mxu0  ;;  %13011 = vmatprep.subr.bf16.mxu0 %v17055_v58 }
 0x24d   : > { %v6882_v32 = vsel %vm20530_vm1, %v16942_v8, %v17032_v59  ;;  %v20539_v47 = vrot.slane %v16914_v31, 5  ;;  %vm20540_vm6 = vcmask 1042432   ;;  %vm20541_vm11 = vsmask.f32 3328  ;;  %v12192_v2 = vpop.f32.mrf.mxu1 }
 0x24e   : > { %v7019_v17 = vshrl.u32 %v11066_v53, 16  ;;  %v7022_v48 = vshll.u32 %v11066_v53, 16  ;;  %7813 = vmatmul.mubr.bf16.gmra.mxu0 %v6882_v32  ;;  %v6181_v15 = vsel %vm20541_vm11, %v16934_v1, %v17047_v39  ;;  %v12191_v34 = vadd.f32 %v12190_v30, %v12189_v56  ;;  %vm20544_vm11 = vmmov %vm20530_vm1 }
 0x24f   : > { %v6260_v40 = vsel %vm20540_vm6, %v20539_v47, %v19820_v61  ;;  %v12231_v19 = vadd.f32 %v12230_v29, %v12229_v21  ;;  %v6857_v33 = vshrl.u32 %v6181_v15, 16  ;;  %v6860_v8 = vshll.u32 %v6181_v15, 16  ;;  %v12193_v30 = vpop.f32.mrf.mxu1  ;;  %v12233_v29 = vpop.f32.mrf.mxu0  ;;  %vm20542_vm6 = vmmov %vm20530_vm1 }
 0x250   : > { %v6947_v45 = vshrl.u32 %v6260_v40, 16  ;;  %v6950_v24 = vshll.u32 %v6260_v40, 16  ;;  %v7021_v36 = vrot.slane %v7019_v17, 3  ;;  %v17069_v31 = vadd.f32 %v12191_v34, %v16630_v35 }
 0x251   : > { %v17072_v53 = vadd.f32 %v12231_v19, %v16737_v27  ;;  %v7024_v47 = vrot.slane %v7022_v48, 4  ;;  %v6859_v1 = vrot.slane %v6857_v33, 3  ;;  %v6862_v21 = vrot.slane %v6860_v8, 4 }
 0x252   : > { %v6949_v32 = vrot.slane %v6947_v45, 3  ;;  %v6952_v56 = vrot.slane %v6950_v24, 4  ;;  %v11039_v40 = vcombine.low %v5952_v13, %v5953_v6  ;;  %v12194_v15 = vadd.f32 %v12193_v30, %v12192_v2  ;;  %v12275_v45 = vpop.f32.mrf.mxu1  ;;  %v17092_v24 = vld [vmem:[#allocation3 + $0x3c] sm:$0xf] }
 0x253   : > { %v17075_v17 = vor.u32 %v7024_v47, %v7021_v36  ;;  %v12234_v44 = vadd.f32 %v12233_v29, %v12232_v9  ;;  %v11049_v34 = vcombine.low %v16916_v46, %v16970_v0  ;;  %v17079_v61 = vor.u32 %v6862_v21, %v6859_v1  ;;  %v17094_v36 = vld [vmem:[#allocation3 + $0x40] sm:$0xf] }
 0x254   : > { %v17081_v27 = vor.u32 %v6952_v56, %v6949_v32  ;;  %v6938_v48 = vshrl.u32 %v11039_v40, 16  ;;  %v6941_v19 = vshll.u32 %v11039_v40, 16  ;;  %v17087_v13 = vadd.f32 %v12194_v15, %v16630_v35  ;;  %20543 = vst [vmem:[#allocation53_spill] sm:$0xff] %v17094_v36  ;;  %v12235_v32 = vpop.f32.mrf.mxu0  ;;  %v12276_v47 = vpop.f32.mrf.mxu1  ;;  %v20545_v56 = vld [vmem:[#allocation28_spill] sm:$0xff] }
 0x255   : > { %v7026_v33 = vsel %vm20542_vm6, %v17002_v52, %v17075_v17  ;;  %v17090_v6 = vadd.f32 %v12234_v44, %v16747_v63  ;;  %v6183_v8 = vshrl.u32 %v11049_v34, 16  ;;  %v17099_v2 = vsel %vm20544_vm11, %v16988_v23, %v17079_v61  ;;  %vm20551_vm11 = vmmov %vm20530_vm1 }
 0x256   : > { %v6954_v52 = vsel %vm20530_vm1, %v16981_v16, %v17081_v27  ;;  %v6940_v9 = vrot.slane %v6938_v48, 3  ;;  %v6943_v35 = vrot.slane %v6941_v19, 4  ;;  %7820 = vmatprep.mubr.bf16.mxu0 %v17099_v2  ;;  %v6186_v1 = vshll.u32 %v11049_v34, 16  ;;  %v12236_v40 = vpop.f32.mrf.mxu0 }
 0x257   : > { %7918 = vmatmul.mubr.bf16.gmra.mxu1 %v6954_v52  ;;  %v6185_v63 = vrot.slane %v6183_v8, 4  ;;  %v12277_v21 = vadd.f32 %v12276_v47, %v12275_v45  ;;  %vm20546_vm6 = vcmp.ne.s16.totalorder %v20545_v56, 0  ;;  %v5973_v15 = vsel %vm20261_vm15, %v16970_v0, 0  ;;  %v12278_v45 = vpop.f32.mrf.mxu1 }
 0x258   : > { %v5972_v30 = vsel %vm20546_vm6, %v16916_v46, 0  ;;  %7925 = vmatprep.mubr.bf16.mxu1 %v7026_v33  ;;  %v17108_v29 = vor.u32 %v6943_v35, %v6940_v9  ;;  %v5994_v48 = vsel %vm20217_vm12, %v17092_v24, 0  ;;  %v5995_v34 = vsel %vm20224_vm10, %v17094_v36, 0  ;;  %v12238_v16 = vpop.f32.mrf.mxu0 }
 0x259   : > { %v6188_v8 = vrot.slane %v6186_v1, 5  ;;  %v12237_v52 = vadd.f32 %v12236_v40, %v12235_v32  ;;  %v17120_v33 = vadd.f32 %v12277_v21, %v16814_v26  ;;  %v17122_v9 = vcombine.low %v5972_v30, %v5973_v15  ;;  %v12279_v56 = vpop.f32.mrf.mxu1 }
 0x25a   : > { %v6945_v35 = vsel %vm20551_vm11, %v17032_v59, %v17108_v29  ;;  %v11067_v47 = vcombine.low %v5994_v48, %v5995_v34  ;;  %v5954_v57 = vsel %vm20394_vm5, %v16903_v12, 0  ;;  %v5955_v32 = vsel %vm20538_vm3, %v16916_v46, 0  ;;  %v12239_v15 = vpop.f32.mrf.mxu0 }
 0x25b   : > { %20550 = vst [vmem:[#allocation33_spill] sm:$0xff] %v17120_v33  ;;  %7821 = vmatmul.mubr.bf16.gmra.mxu0 %v6945_v35  ;;  %v17133_v26 = vor.u32 %v6188_v8, %v6185_v63  ;;  %v17136_v1 = vadd.f32 %v12237_v52, %v16842_v3  ;;  %v19825_v21 = vrot.slane %v17122_v9, 5  ;;  %v12280_v59 = vadd.f32 %v12279_v56, %v12278_v45 }
 0x25c   : > { %v7082_v30 = vshrl.u32 %v11067_v47, 16  ;;  %v7085_v40 = vshll.u32 %v11067_v47, 16  ;;  %v11040_v48 = vcombine.low %v5954_v57, %v5955_v32  ;;  %v11050_v12 = vcombine.low %v17009_v4, %v17092_v24 }
 0x25d   : > { %vm20552_vm1 = vsmask.f32 3328  ;;  %v20553_v63 = vrot.slane %v17027_v42, 5  ;;  %vm20554_vm6 = vcmask 1042432   ;;  %v12240_v34 = vadd.f32 %v12239_v15, %v12238_v16 }
 0x25e   : > { %v6190_v46 = vsel %vm20552_vm1, %v17047_v39, %v17133_v26  ;;  %v17150_v56 = vadd.f32 %v12280_v59, %v16845_v50  ;;  %v7084_v35 = vrot.slane %v7082_v30, 3  ;;  %v7087_v47 = vrot.slane %v7085_v40, 4  ;;  %v12241_v59 = vpop.f32.mrf.mxu0 }
 0x25f   : > { %v6262_v3 = vsel %vm20554_vm6, %v20553_v63, %v19825_v21  ;;  %v6920_v45 = vshrl.u32 %v6190_v46, 16  ;;  %v6923_v8 = vshll.u32 %v6190_v46, 16  ;;  %v17153_v32 = vadd.f32 %v12240_v34, %v16872_v14  ;;  %v12281_v63 = vpop.f32.mrf.mxu1  ;;  %v20556_v14 = vld [vmem:[#allocation32_spill] sm:$0xff] }
 0x260   : > { %20555 = vst [vmem:[#allocation57_spill] sm:$0xff] %v17150_v56  ;;  %v7010_v57 = vshrl.u32 %v6262_v3, 16  ;;  %v7013_v52 = vshll.u32 %v6262_v3, 16  ;;  %v7001_v39 = vshrl.u32 %v11040_v48, 16  ;;  %v17155_v38 = vor.u32 %v7087_v47, %v7084_v35  ;;  %v17164_v34 = vld [vmem:[#allocation3 + $0x44] sm:$0xf] }
 0x261   : > { %v6922_v49 = vrot.slane %v6920_v45, 3  ;;  %v6925_v7 = vrot.slane %v6923_v8, 4  ;;  %v7004_v15 = vshll.u32 %v11040_v48, 16  ;;  %v6192_v50 = vshrl.u32 %v11050_v12, 16 }
 0x262   : > { %v7012_v33 = vrot.slane %v7010_v57, 3  ;;  %v7015_v42 = vrot.slane %v7013_v52, 4  ;;  %v7003_v16 = vrot.slane %v7001_v39, 3  ;;  %v6195_v30 = vshll.u32 %v11050_v12, 16  ;;  %v12242_v57 = vpop.f32.mrf.mxu0  ;;  %v12282_v52 = vpop.f32.mrf.mxu1 }
 0x263   : > { %v17157_v46 = vor.u32 %v6925_v7, %v6922_v49  ;;  %vm20557_vm11 = vcmp.ne.s16.totalorder %v20556_v14, 0  ;;  %vm20558_vm1 = vsmask.f32 4352  ;;  %v7006_v8 = vrot.slane %v7004_v15, 4 }
 0x264   : > { %v17159_v3 = vor.u32 %v7015_v42, %v7012_v33  ;;  %v5974_v40 = vsel %vm20557_vm11, %v17009_v4, 0  ;;  %v7089_v45 = vsel %vm20558_vm1, %v17075_v17, %v17155_v38  ;;  %v6194_v48 = vrot.slane %v6192_v50, 4  ;;  %v17172_v33 = vld [vmem:[#allocation3 + $0x48] sm:$0xf]  ;;  %vm20561_vm6 = vmmov %vm20558_vm1  ;;  %v20563_v50 = vld [vmem:[#allocation39_spill] sm:$0xff]  ;;  %v12284_v49 = vpop.f32.mrf.mxu1 }
 0x265   : > { %v5975_v7 = vsel %vm20117_vm4, %v17092_v24, 0  ;;  %20560 = vst [vmem:[#allocation61_spill] sm:$0xff] %v17172_v33  ;;  %v17177_v12 = vsel %vm20561_vm6, %v17079_v61, %v17157_v46  ;;  %vm20562_vm11 = vmmov %vm20558_vm1  ;;  %v6197_v17 = vrot.slane %v6195_v30, 5  ;;  %v12243_v47 = vadd.f32 %v12242_v57, %v12241_v59  ;;  %v12244_v61 = vpop.f32.mrf.mxu0  ;;  %v20565_v59 = vld [vmem:[#allocation41_spill] sm:$0xff] }
 0x266   : > { %v7017_v35 = vsel %vm20562_vm11, %v17081_v27, %v17159_v3  ;;  %7828 = vmatprep.mubr.bf16.mxu0 %v17177_v12  ;;  %v17183_v39 = vor.u32 %v7006_v8, %v7003_v16  ;;  %v12283_v42 = vadd.f32 %v12282_v52, %v12281_v63  ;;  %v17185_v15 = vcombine.low %v5974_v40, %v5975_v7 }
 0x267   : > { %7926 = vmatmul.mubr.bf16.gmra.mxu1 %v7017_v35  ;;  %vm20564_vm1 = vnez %v20563_v50  ;;  %v17190_v14 = vor.u32 %v6197_v17, %v6194_v48  ;;  %v17193_v27 = vadd.f32 %v12243_v47, %v16929_v10  ;;  %vm20566_vm6 = vnez %v20565_v59  ;;  %v12245_v10 = vpop.f32.mrf.mxu0  ;;  %v12285_v48 = vpop.f32.mrf.mxu1 }
 0x268   : > { %v5996_v21 = vsel %vm20564_vm1, %v17164_v34, 0  ;;  %7933 = vmatprep.mubr.bf16.mxu1 %v7089_v45  ;;  %v5997_v16 = vsel %vm20566_vm6, %v17172_v33, 0  ;;  %v5956_v63 = vsel %vm20217_vm12, %v16970_v0, 0  ;;  %v7008_v30 = vsel %vm20562_vm11, %v17108_v29, %v17183_v39 }
 0x269   : > { %v17205_v40 = vadd.f32 %v12283_v42, %v16899_v54  ;;  %v19832_v45 = vrot.slane %v17185_v15, 5  ;;  %v11068_v8 = vcombine.low %v5996_v21, %v5997_v16  ;;  %7829 = vmatmul.mubr.bf16.gmra.mxu0 %v7008_v30  ;;  %vm20567_vm4 = vsmask.f32 3328 }
 0x26a   : > { %v6199_v57 = vsel %vm20567_vm4, %v17133_v26, %v17190_v14  ;;  %v12246_v52 = vadd.f32 %v12245_v10, %v12244_v61  ;;  %v12286_v7 = vadd.f32 %v12285_v48, %v12284_v49  ;;  %v5957_v35 = vsel %vm20224_vm10, %v17009_v4, 0  ;;  %v12287_v49 = vpop.f32.mrf.mxu1 }
 0x26b   : > { %v6983_v29 = vshrl.u32 %v6199_v57, 16  ;;  %v6986_v17 = vshll.u32 %v6199_v57, 16  ;;  %v20568_v54 = vrot.slane %v17122_v9, 5  ;;  %vm20569_vm11 = vcmask 1042432  }
 0x26c   : > { %v7145_v47 = vshrl.u32 %v11068_v8, 16  ;;  %v7148_v30 = vshll.u32 %v11068_v8, 16  ;;  %v17220_v26 = vadd.f32 %v12246_v52, %v16968_v25  ;;  %v17223_v19 = vadd.f32 %v12286_v7, %v16932_v43  ;;  %v12288_v33 = vpop.f32.mrf.mxu1  ;;  %v20571_v52 = vld [vmem:[#allocation40_spill] sm:$0xff] }
 0x26d   : > { %v6264_v21 = vsel %vm20569_vm11, %v20568_v54, %v19832_v45  ;;  %v6985_v61 = vrot.slane %v6983_v29, 3  ;;  %v6988_v10 = vrot.slane %v6986_v17, 4  ;;  %v11041_v9 = vcombine.low %v5956_v63, %v5957_v35 }
 0x26e   : > { %v7073_v42 = vshrl.u32 %v6264_v21, 16  ;;  %v7076_v16 = vshll.u32 %v6264_v21, 16  ;;  %v7147_v48 = vrot.slane %v7145_v47, 3  ;;  %20570 = vst [vmem:[#allocation56_spill] sm:$0xff] %v17223_v19  ;;  %v7150_v56 = vrot.slane %v7148_v30, 4  ;;  %v12247_v21 = vpop.f32.mrf.mxu0 }
 0x26f   : > { %v17225_v54 = vor.u32 %v6988_v10, %v6985_v61  ;;  %v11051_v8 = vcombine.low %v17094_v36, %v17164_v34  ;;  %v12289_v25 = vadd.f32 %v12288_v33, %v12287_v49  ;;  %vm20572_vm4 = vcmp.ne.s16.totalorder %v20571_v52, 0  ;;  %v17244_v49 = vld [vmem:[#allocation3 + $0x4c] sm:$0xf]  ;;  %v20579_v52 = vld [vmem:[#allocation6_spill] sm:$0xff] }
 0x270   : > { %v7075_v57 = vrot.slane %v7073_v42, 3  ;;  %v7078_v44 = vrot.slane %v7076_v16, 4  ;;  %v5976_v29 = vsel %vm20572_vm4, %v17094_v36, 0  ;;  %v17234_v43 = vor.u32 %v7150_v56, %v7147_v48  ;;  %v12290_v42 = vpop.f32.mrf.mxu1  ;;  %v12248_v30 = vpop.f32.mrf.mxu0  ;;  %20575 = vst [vmem:[#allocation60_spill] sm:$0xff] %v17244_v49 }
 0x271   : > { %v7064_v7 = vshrl.u32 %v11041_v9, 16  ;;  %v7067_v47 = vshll.u32 %v11041_v9, 16  ;;  %vm20573_vm11 = vsmask.f32 4352  ;;  %v6201_v35 = vshrl.u32 %v11051_v8, 16 }
 0x272   : > { %v17232_v17 = vor.u32 %v7078_v44, %v7075_v57  ;;  %v17239_v63 = vsel %vm20573_vm11, %v17157_v46, %v17225_v54  ;;  %v6204_v16 = vshll.u32 %v11051_v8, 16  ;;  %v17242_v33 = vadd.f32 %v12289_v25, %v17019_v62  ;;  %vm20576_vm4 = vmmov %vm20573_vm11  ;;  %v12291_v10 = vpop.f32.mrf.mxu1  ;;  %v12250_v25 = vpop.f32.mrf.mxu0 }
 0x273   : > { %7836 = vmatprep.mubr.bf16.mxu0 %v17239_v63  ;;  %vm20577_vm10 = vmmov %vm20576_vm4  ;;  %v7066_v46 = vrot.slane %v7064_v7, 3  ;;  %v7069_v61 = vrot.slane %v7067_v47, 4  ;;  %v6203_v48 = vrot.slane %v6201_v35, 4  ;;  %v12249_v62 = vadd.f32 %v12248_v30, %v12247_v21 }
 0x274   : > { %20574 = vst [vmem:[#allocation55_spill] sm:$0xff] %v17242_v33  ;;  %v7080_v44 = vsel %vm20576_vm4, %v17159_v3, %v17232_v17  ;;  %v7152_v56 = vsel %vm20577_vm10, %v17155_v38, %v17234_v43  ;;  %v6206_v57 = vrot.slane %v6204_v16, 5  ;;  %v5977_v8 = vsel %vm20295_vm8, %v17164_v34, 0  ;;  %v12251_v16 = vpop.f32.mrf.mxu0  ;;  %vm20581_vm11 = vmmov %vm20576_vm4 }
 0x275   : > { %7934 = vmatmul.mubr.bf16.gmra.mxu1 %v7080_v44  ;;  %v17256_v45 = vor.u32 %v7069_v61, %v7066_v46  ;;  %v17258_v3 = vcombine.low %v5976_v29, %v5977_v8  ;;  %vm20580_vm10 = vcmp.ne.s16.totalorder %v20579_v52, 0  ;;  %v12292_v7 = vadd.f32 %v12291_v10, %v12290_v42  ;;  %v12293_v44 = vpop.f32.mrf.mxu1 }
 0x276   : > { %7941 = vmatprep.mubr.bf16.mxu1 %v7152_v56  ;;  %v5998_v38 = vsel %vm20580_vm10, %v17244_v49, 0  ;;  %v17263_v47 = vor.u32 %v6206_v57, %v6203_v48  ;;  %v17266_v35 = vadd.f32 %v12249_v62, %v17016_v55  ;;  %v5958_v30 = vsel %vm20564_vm1, %v17092_v24, 0  ;;  %v12253_v57 = vpop.f32.mrf.mxu0 }
 0x277   : > { %v11069_v21 = vcombine.low %v5998_v38, %v5998_v38  ;;  %v7071_v29 = vsel %vm20581_vm11, %v17183_v39, %v17256_v45  ;;  %v19837_v56 = vrot.slane %v17258_v3, 5  ;;  %v12252_v46 = vadd.f32 %v12251_v16, %v12250_v25  ;;  %v12294_v62 = vpop.f32.mrf.mxu1 }
 0x278   : > { %v17276_v42 = vadd.f32 %v12292_v7, %v17045_v11  ;;  %7837 = vmatmul.mubr.bf16.gmra.mxu0 %v7071_v29  ;;  %vm20583_vm4 = vsmask.f32 3328  ;;  %v5959_v48 = vsel %vm20566_vm6, %v17094_v36, 0  ;;  %v20584_v11 = vrot.slane %v17185_v15, 5  ;;  %v12254_v29 = vpop.f32.mrf.mxu0 }
 0x279   : > { %v6208_v55 = vsel %vm20583_vm4, %v17190_v14, %v17263_v47  ;;  %v7217_v61 = vshrl.u32 %v11069_v21, 16  ;;  %v7220_v10 = vshll.u32 %v11069_v21, 16  ;;  %vm20585_vm10 = vcmask 1042432   ;;  %v12296_v59 = vpop.f32.mrf.mxu1  ;;  %vm20586_vm4 = vmmov %vm20581_vm11 }
 0x27a   : > { %20582 = vst [vmem:[#allocation44_spill] sm:$0xff] %v17276_v42  ;;  %v7046_v39 = vshrl.u32 %v6208_v55, 16  ;;  %v7049_v8 = vshll.u32 %v6208_v55, 16  ;;  %v6266_v25 = vsel %vm20585_vm10, %v20584_v11, %v19837_v56  ;;  %v17290_v38 = vadd.f32 %v12252_v46, %v17042_v51  ;;  %v12256_v11 = vpop.f32.mrf.mxu0  ;;  %vm20587_vm10 = vmmov %vm20586_vm4 }
 0x27b   : > { %v7136_v14 = vshrl.u32 %v6266_v25, 16  ;;  %v7139_v7 = vshll.u32 %v6266_v25, 16  ;;  %v7219_v21 = vrot.slane %v7217_v61, 3  ;;  %v7222_v16 = vrot.slane %v7220_v10, 4  ;;  %v12297_v56 = vpop.f32.mrf.mxu1  ;;  %v5961_v10 = vld [vmem:[#allocation3 + $0x48] sm:$0x1] }
 0x27c   : > { %v7048_v50 = vrot.slane %v7046_v39, 3  ;;  %v7051_v9 = vrot.slane %v7049_v8, 4  ;;  %v11042_v42 = vcombine.low %v5958_v30, %v5959_v48  ;;  %v7199_v55 = vshrl.u32 %v17263_v47, 16  ;;  %v12257_v8 = vpop.f32.mrf.mxu0 }
 0x27d   : > { %v7138_v33 = vrot.slane %v7136_v14, 3  ;;  %v7141_v19 = vrot.slane %v7139_v7, 4  ;;  %v7223_v49 = vor.u32 %v7222_v16, %v7219_v21  ;;  %v7202_v15 = vshll.u32 %v17263_v47, 16 }
 0x27e   : > { %v17294_v51 = vor.u32 %v7051_v9, %v7048_v50  ;;  %v7127_v46 = vshrl.u32 %v11042_v42, 16  ;;  %v7130_v25 = vshll.u32 %v11042_v42, 16  ;;  %v7201_v61 = vrot.slane %v7199_v55, 3  ;;  %v12339_v21 = vpop.f32.mrf.mxu0 }
 0x27f   : > { %v17296_v36 = vor.u32 %v7141_v19, %v7138_v33  ;;  %v7224_v30 = vsel %vm20581_vm11, %v17234_v43, %v7223_v49  ;;  %v7204_v48 = vrot.slane %v7202_v15, 4  ;;  %v12255_v39 = vadd.f32 %v12254_v29, %v12253_v57  ;;  %v12299_v57 = vpop.f32.mrf.mxu1  ;;  %vm20589_vm11 = vmmov %vm20586_vm4 }
 0x280   : > { %v17303_v14 = vsel %vm20586_vm4, %v17225_v54, %v17294_v51  ;;  %v7129_v7 = vrot.slane %v7127_v46, 3  ;;  %v7132_v50 = vrot.slane %v7130_v25, 4  ;;  %v12295_v9 = vadd.f32 %v12294_v62, %v12293_v44  ;;  %v12340_v46 = vpop.f32.mrf.mxu0 }
 0x281   : > { %7844 = vmatprep.mubr.bf16.mxu0 %v17303_v14  ;;  %v7143_v19 = vsel %vm20587_vm10, %v17232_v17, %v17296_v36  ;;  %v7205_v33 = vor.u32 %v7204_v48, %v7201_v61  ;;  %v17310_v43 = vadd.f32 %v12255_v39, %v17069_v31  ;;  %v5978_v42 = vsel %vm20315_vm9, %v5961_v10, 0  ;;  %v12300_v15 = vpop.f32.mrf.mxu1 }
 0x282   : > { %7942 = vmatmul.mubr.bf16.gmra.mxu1 %v7143_v19  ;;  %v17314_v54 = vor.u32 %v7132_v50, %v7129_v7  ;;  %v17317_v44 = vadd.f32 %v12295_v9, %v17072_v53  ;;  %v11060_v62 = vcombine.low %v5978_v42, %v5978_v42  ;;  %v6776_v16 = vshrl.u32 %v16802_v37, 16  ;;  %v13450_v50 = vld [vmem:[#allocation3 + $0x14] sm:$0xf]  ;;  %v17342_v9 = vld [vmem:[#allocation3 + $0x18] sm:$0xf] }
 0x283   : > { %7949 = vmatprep.mubr.bf16.mxu1 %v7224_v30  ;;  %v7206_v17 = vsel %vm20589_vm11, %v17294_v51, %v7205_v33  ;;  %v6779_v31 = vshll.u32 %v16802_v37, 16  ;;  %v12258_v29 = vadd.f32 %v12257_v8, %v12256_v11  ;;  %v12298_v55 = vadd.f32 %v12297_v56, %v12296_v59  ;;  %v12302_v56 = vpop.f32.mrf.mxu1  ;;  %v12342_v11 = vpop.f32.mrf.mxu0  ;;  %v13449_v8 = vld [vmem:[#allocation3 + $0x10] sm:$0xf] }
 0x284   : > { %v7134_v25 = vsel %vm20586_vm4, %v17256_v45, %v17314_v54  ;;  %v6267_v61 = vrot.slane %v11060_v62, 5  ;;  %v6778_v53 = vrot.slane %v6776_v16, 3  ;;  %vm20590_vm10 = vcmp.ne.s16.totalorder %v20579_v52, 0 }
 0x285   : > { %v5960_v10 = vsel %vm20590_vm10, %v17164_v34, 0  ;;  %7845 = vmatmul.mubr.bf16.gmra.mxu0 %v7134_v25  ;;  %v6781_v30 = vrot.slane %v6779_v31, 4  ;;  %v17330_v48 = vadd.f32 %v12258_v29, %v17087_v13  ;;  %v17333_v37 = vadd.f32 %v12298_v55, %v17090_v6  ;;  %v12343_v62 = vpop.f32.mrf.mxu0  ;;  %v6017_v25 = vld [vmem:[#allocation3 + $0x14] sm:$0x8] }
 0x286   : > { %v11043_v59 = vcombine.low %v5960_v10, %v5960_v10  ;;  %7852 = vmatprep.mubr.bf16.mxu0 %v7206_v17  ;;  %v20591_v45 = vrot.slane %v17258_v3, 5  ;;  %vm20592_vm11 = vcmask 1042432   ;;  %vm20593_vm4 = vcmp.ne.s16.totalorder %v20484_v41, 0  ;;  %v17347_v17 = vld [vmem:[#allocation3 + $0x1c] sm:$0xf] }
 0x287   : > { %v6000_v7 = vsel %vm20593_vm4, %v13449_v8, 0  ;;  %v6001_v13 = vsel %vm13886_vm0, %v13450_v50, 0  ;;  %vm20594_vm10 = vcmp.ne.s16.totalorder %v20495_v60, 0  ;;  %v6782_v42 = vor.u32 %v6781_v30, %v6778_v53  ;;  %v17354_v53 = vpop.f32.mrf.mxu0 }
 0x288   : > { %v6268_v39 = vsel %vm20592_vm11, %v20591_v45, %v6267_v61  ;;  %v6002_v6 = vsel %vm20594_vm10, %v17342_v9, 0  ;;  %v7190_v3 = vshrl.u32 %v11043_v59, 16  ;;  %v7193_v16 = vshll.u32 %v11043_v59, 16  ;;  %v12303_v61 = vpop.f32.mrf.mxu1 }
 0x289   : > { %v7208_v19 = vshrl.u32 %v6268_v39, 16  ;;  %v7211_v33 = vshll.u32 %v6268_v39, 16  ;;  %vm20595_vm11 = vnez %v20497_v28  ;;  %v11071_v29 = vcombine.low %v6000_v7, %v6001_v13 }
 0x28a   : > { %v6003_v31 = vsel %vm20595_vm11, %v17347_v17, 0  ;;  %v12301_v55 = vadd.f32 %v12300_v15, %v12299_v57  ;;  %vm20596_vm4 = vsmask.f32 4352  ;;  %v7192_v39 = vrot.slane %v7190_v3, 3  ;;  %v12346_v15 = vpop.f32.mrf.mxu0  ;;  %v20601_v3 = vld [vmem:[#allocation9_spill] sm:$0xff] }
 0x28b   : > { %v7210_v10 = vrot.slane %v7208_v19, 3  ;;  %v7213_v45 = vrot.slane %v7211_v33, 4  ;;  %v6791_v8 = vsel %vm20596_vm4, %v6782_v42, %v16988_v23  ;;  %v7195_v30 = vrot.slane %v7193_v16, 4  ;;  %v12305_v42 = vpop.f32.mrf.mxu1 }
 0x28c   : > { %v17356_v59 = vcombine.low %v6002_v6, %v6003_v31  ;;  %v6369_v50 = vrot.slane %v11071_v29, 5  ;;  %v17359_v52 = vadd.f32 %v12301_v55, %v17136_v1  ;;  %v17361_v7 = vadd.f32 %v12340_v46, %v12339_v21  ;;  %v17374_v46 = vld [vmem:[#allocation3 + $0x20] sm:$0xf]  ;;  %v12348_v29 = vpop.f32.mrf.mxu0 }
 0x28d   : > { %v7214_v28 = vor.u32 %v7213_v45, %v7210_v10  ;;  %vm20597_vm10 = vcmp.ne.s16.totalorder %v20487_v20, 0  ;;  %vm20598_vm6 = vnez %v20489_v18  ;;  %v7196_v13 = vor.u32 %v7195_v30, %v7192_v39  ;;  %20600 = vst [vmem:[#allocation37_spill] sm:$0xff] %v17374_v46  ;;  %v12306_v10 = vpop.f32.mrf.mxu1 }
 0x28e   : > { %v6020_v57 = vsel %vm20597_vm10, %v6017_v25, 0  ;;  %v6021_v23 = vsel %vm20598_vm6, %v17342_v9, 0  ;;  %v19847_v19 = vrot.slane %v17356_v59, 5  ;;  %v6742_v6 = vshrl.u32 %v6369_v50, 16  ;;  %vm20603_vm6 = vmmov %vm20596_vm4 }
 0x28f   : > { %v6745_v33 = vshll.u32 %v6369_v50, 16  ;;  %v7215_v1 = vsel %vm20596_vm4, %v17296_v36, %v7214_v28  ;;  %vm20599_vm1 = vnez %v20491_v22  ;;  %vm20602_vm10 = vnez %v20601_v3  ;;  %v12349_v22 = vpop.f32.mrf.mxu0 }
 0x290   : > { %v6022_v21 = vsel %vm20599_vm1, %v17347_v17, 0  ;;  %v6023_v16 = vsel %vm20602_vm10, %v17374_v46, 0  ;;  %v11080_v31 = vcombine.low %v6020_v57, %v6021_v23  ;;  %7950 = vmatmul.mubr.bf16.gmra.mxu1 %v7215_v1  ;;  %v7197_v55 = vsel %vm20603_vm6, %v17314_v54, %v7196_v13  ;;  %v12308_v54 = vpop.f32.mrf.mxu1 }
 0x291   : > { %vm20604_vm11 = vcmask 1042432   ;;  %v6744_v36 = vrot.slane %v6742_v6, 3  ;;  %v6747_v25 = vrot.slane %v6745_v33, 4  ;;  %8087 = vmatprep.mubr.bf16.mxu1 %v6791_v8  ;;  %7853 = vmatmul.mubr.bf16.gmra.mxu0 %v7197_v55  ;;  %v11081_v30 = vcombine.low %v6022_v21, %v6023_v16  ;;  %v20605_v55 = vld [vmem:[#allocation52_spill] sm:$0xff]  ;;  %v12351_v16 = vpop.f32.mrf.mxu0 }
 0x292   : > { %v6371_v28 = vsel %vm20604_vm11, %v6369_v50, %v19847_v19  ;;  %v6759_v3 = vshrl.u32 %v11080_v31, 16  ;;  %v6762_v23 = vshll.u32 %v11080_v31, 16  ;;  %v12304_v1 = vadd.f32 %v12303_v61, %v12302_v56  ;;  %v12309_v21 = vpop.f32.mrf.mxu1 }
 0x293   : > { %v6750_v45 = vshrl.u32 %v6371_v28, 16  ;;  %v6753_v39 = vshll.u32 %v6371_v28, 16  ;;  %v6748_v57 = vor.u32 %v6747_v25, %v6744_v36  ;;  %v17384_v18 = vadd.f32 %v12343_v62, %v12342_v11  ;;  %v20606_v11 = vld [vmem:[#allocation14_spill] sm:$0xff]  ;;  %v17396_v25 = vld [vmem:[#allocation3 + $0x24] sm:$0xf] }
 0x294   : > { %v6761_v60 = vrot.slane %v6759_v3, 3  ;;  %v6767_v50 = vshrl.u32 %v11081_v30, 16  ;;  %v6764_v6 = vrot.slane %v6762_v23, 4  ;;  %v6770_v33 = vshll.u32 %v11081_v30, 16  ;;  %20608 = vst [vmem:[#allocation27_spill] sm:$0xff] %v17396_v25  ;;  %v12352_v30 = vpop.f32.mrf.mxu0 }
 0x295   : > { %v6752_v13 = vrot.slane %v6750_v45, 3  ;;  %v6755_v20 = vrot.slane %v6753_v39, 4  ;;  %v17387_v8 = vadd.f32 %v12304_v1, %v17153_v32  ;;  %v6725_v28 = vshrl.u32 %v20605_v55, 16  ;;  %v20609_v32 = vld [vmem:[#allocation16_spill] sm:$0xff]  ;;  %v12311_v39 = vpop.f32.mrf.mxu1 }
 0x296   : > { %v6769_v31 = vrot.slane %v6767_v50, 3  ;;  %v6728_v56 = vshll.u32 %v20605_v55, 16  ;;  %vm20607_vm6 = vcmp.ne.s16.totalorder %v20606_v11, 0  ;;  %v6765_v61 = vor.u32 %v6764_v6, %v6761_v60  ;;  %v17411_v55 = vld [vmem:[#allocation3 + $0x28] sm:$0xf] }
 0x297   : > { %v17390_v19 = vor.u32 %v6755_v20, %v6752_v13  ;;  %v6004_v62 = vsel %vm20607_vm6, %v17374_v46, 0  ;;  %v6772_v3 = vrot.slane %v6770_v33, 4  ;;  %v6727_v36 = vrot.slane %v6725_v28, 3  ;;  %20612 = vst [vmem:[#allocation62_spill] sm:$0xff] %v17411_v55  ;;  %v20613_v28 = vld [vmem:[#allocation15_spill] sm:$0xff] }
 0x298   : > { %vm20610_vm11 = vnez %v20609_v32  ;;  %v6730_v23 = vrot.slane %v6728_v56, 4  ;;  %v12307_v13 = vadd.f32 %v12306_v10, %v12305_v42  ;;  %v17406_v60 = vadd.f32 %v12346_v15, %v17354_v53  ;;  %v12354_v56 = vpop.f32.mrf.mxu0  ;;  %v13323_v15 = vld [vmem:[%s19592_s1 + $0x278] sm:$0xff]  }
 0x299   : > { %v6005_v45 = vsel %vm20610_vm11, %v17396_v25, 0  ;;  %v6757_v20 = vsel %vm20596_vm4, %v6748_v57, %v17390_v19  ;;  %v6773_v50 = vor.u32 %v6772_v3, %v6769_v31  ;;  %v6024_v33 = vsel %vm20503_vm13, %v17396_v25, 0  ;;  %v12312_v57 = vpop.f32.mrf.mxu1 }
 0x29a   : > { %v17403_v1 = vcombine.low %v6004_v62, %v6005_v45  ;;  %7990 = vmatprep.mubr.bf16.mxu0 %v6757_v20  ;;  %vm20614_vm6 = vnez %v20613_v28  ;;  %v6731_v62 = vor.u32 %v6730_v23, %v6727_v36  ;;  %v17418_v10 = vadd.f32 %v12307_v13, %v17193_v27  ;;  %v20615_v20 = vld [vmem:[#allocation17_spill] sm:$0xff]  ;;  %v12355_v23 = vpop.f32.mrf.mxu0  ;;  %v13324_v27 = vld [vmem:[%s19592_s1 + $0x470] sm:$0xff]  }
 0x29b   : > { %v6025_v32 = vsel %vm20614_vm6, %v17411_v55, 0  ;;  %v6774_v31 = vsel %vm20596_vm4, %v6765_v61, %v6773_v50  ;;  %v12310_v3 = vadd.f32 %v12309_v21, %v12308_v54  ;;  %v17424_v45 = vadd.f32 %v12349_v22, %v12348_v29  ;;  %v12314_v36 = vpop.f32.mrf.mxu1 }
 0x29c   : > { %v6372_v42 = vrot.slane %v17403_v1, 5  ;;  %v11082_v53 = vcombine.low %v6024_v33, %v6025_v32  ;;  %vm20616_vm6 = vcmp.ne.s16.totalorder %v20615_v20, 0  ;;  %v13325_v32 = vld [vmem:[%s19592_s1 + $0x2b0] sm:$0xff]   ;;  %8088 = vmatmul.mubr.bf16.vlgmr.msra.gmra.mxu1 %v6774_v31  ;;  %v20617_v1 = vld [vmem:[#allocation29_spill] sm:$0xff]  ;;  %v20618_v22 = vrot.slane %v17356_v59, 5 }
 0x29d   : > { %v6006_v28 = vsel %vm20616_vm6, %v17411_v55, 0  ;;  %v6740_v54 = vsel %vm20596_vm4, %v6731_v62, %v20617_v1  ;;  %vm20619_vm13 = vcmask 1042432   ;;  %8095 = vmatprep.mubr.bf16.mxu1 %v17099_v2  ;;  %v17442_v6 = vadd.f32 %v12310_v3, %v17220_v26  ;;  %v17444_v20 = vld [vmem:[#allocation3 + $0x2c] sm:$0xf]  ;;  %v12315_v1 = vpop.f32.mrf.mxu1  ;;  %12676 = vmatpush3.bf16.msra.mxu1 %v13323_v15  ;;  %v13326_v26 = vld [vmem:[%s19592_s1 + $0x270] sm:$0xff]  }
 0x29e   : > { %v6373_v29 = vsel %vm20619_vm13, %v20618_v22, %v6372_v42  ;;  %v6848_v21 = vshrl.u32 %v11082_v53, 16  ;;  %v6851_v61 = vshll.u32 %v11082_v53, 16  ;;  %7991 = vmatmul.mubr.bf16.vlgmr.msra.gmra.mxu0 %v6740_v54  ;;  %20620 = vst [vmem:[#allocation63_spill] sm:$0xff] %v17444_v20  ;;  %v20621_v31 = vld [vmem:[#allocation21_spill] sm:$0xff]  ;;  %v12313_v53 = vadd.f32 %v12312_v57, %v12311_v39  ;;  %v12357_v54 = vpop.f32.mrf.mxu0  ;;  %12677 = vmatprep.subr.bf16.mxu1 %v13325_v32  ;;  %v17472_v57 = vld [vmem:[#allocation3 + $0x30] sm:$0xf]  ;;  %vm20626_vm13 = vmmov %vm20596_vm4 }
 0x29f   : > { %v6839_v13 = vshrl.u32 %v6373_v29, 16  ;;  %v6842_v33 = vshll.u32 %v6373_v29, 16  ;;  %vm20622_vm6 = vnez %v20621_v31  ;;  %13012 = vmatpush3.bf16.msra.mxu0 %v17055_v58  ;;  %v17455_v55 = vadd.f32 %v12352_v30, %v12351_v16  ;;  %v13327_v58 = vld [vmem:[%s19592_s1 + $0x468] sm:$0xff]   ;;  %20624 = vst [vmem:[#allocation64_spill] sm:$0xff] %v17472_v57 }
 0x2a0   : > { %v6007_v62 = vsel %vm20622_vm6, %v17444_v20, 0  ;;  %v6850_v59 = vrot.slane %v6848_v21, 3  ;;  %v6853_v11 = vrot.slane %v6851_v61, 4  ;;  %v6026_v21 = vsel %vm20510_vm2, %v17444_v20, 0  ;;  %v12317_v61 = vpop.f32.mrf.mxu1  ;;  %13013 = vmatprep.subr.bf16.mxu0 %v13324_v27  ;;  %v13329_v39 = vld [vmem:[%s19592_s1 + $0x2a8] sm:$0xff]  }
 0x2a1   : > { %v17449_v22 = vcombine.low %v6006_v28, %v6007_v62  ;;  %v6841_v3 = vrot.slane %v6839_v13, 3  ;;  %v6844_v29 = vrot.slane %v6842_v33, 4  ;;  %v17470_v30 = vadd.f32 %v12313_v53, %v17266_v35  ;;  %v12358_v13 = vpop.f32.mrf.mxu0  ;;  %v20628_v35 = vld [vmem:[#allocation22_spill] sm:$0xff]  ;;  %12678 = vmatpush3.bf16.msra.mxu1 %v13326_v26 }
 0x2a2   : > { %v17466_v28 = vor.u32 %v6853_v11, %v6850_v59  ;;  %v6027_v32 = vsel %vm20515_vm14, %v17472_v57, 0  ;;  %v12316_v31 = vadd.f32 %v12315_v1, %v12314_v36  ;;  %v17477_v20 = vadd.f32 %v12355_v23, %v12354_v56  ;;  %v12318_v25 = vpop.f32.mrf.mxu1  ;;  %v13330_v56 = vld [vmem:[%s19592_s1 + $0x268] sm:$0xff]   ;;  %vm20631_vm14 = vmmov %vm20626_vm13  ;;  %12679 = vmatprep.subr.bf16.mxu1 %v13329_v39  ;;  %v20632_v39 = vld [vmem:[#allocation51_spill] sm:$0xff] }
 0x2a3   : > { %v6374_v16 = vrot.slane %v17449_v22, 5  ;;  %v6845_v33 = vor.u32 %v6844_v29, %v6841_v3  ;;  %v11083_v62 = vcombine.low %v6026_v21, %v6027_v32  ;;  %vm20627_vm4 = vcmask 1042432   ;;  %13014 = vmatpush3.bf16.msra.mxu0 %v13324_v27  ;;  %v12360_v3 = vpop.f32.mrf.mxu0  ;;  %v13332_v27 = vld [vmem:[%s19592_s1 + $0x2a0] sm:$0xff]  }
 0x2a4   : > { %v6855_v11 = vsel %vm20626_vm13, %v6773_v50, %v17466_v28  ;;  %vm20629_vm2 = vcmp.ne.s16.totalorder %v20628_v35, 0  ;;  %v6009_v15 = vsel %vm20244_vm7, %v16970_v0, 0  ;;  %v12320_v1 = vpop.f32.mrf.mxu1  ;;  %13015 = vmatprep.subr.bf16.mxu0 %v13327_v58  ;;  %v13331_v0 = vld [vmem:[%s19592_s1 + $0x460] sm:$0xff]   ;;  %v17500_v29 = vadd.f32 %v12316_v31, %v17290_v38  ;;  %v17512_v31 = vld [vmem:[#allocation3 + $0x34] sm:$0xf]  ;;  %vm20637_vm13 = vmmov %vm20627_vm4 }
 0x2a5   : > { %v6375_v59 = vsel %vm20627_vm4, %v6372_v42, %v6374_v16  ;;  %v6008_v22 = vsel %vm20629_vm2, %v17472_v57, 0  ;;  %v6846_v50 = vsel %vm20631_vm14, %v17390_v19, %v6845_v33  ;;  %v6911_v23 = vshrl.u32 %v11083_v62, 16  ;;  %8096 = vmatmul.mubr.bf16.gmra.mxu1 %v6855_v11  ;;  %v12361_v32 = vpop.f32.mrf.mxu0  ;;  %v20635_v11 = vld [vmem:[#allocation24_spill] sm:$0xff] }
 0x2a6   : > { %v6902_v36 = vshrl.u32 %v6375_v59, 16  ;;  %v6905_v42 = vshll.u32 %v6375_v59, 16  ;;  %7998 = vmatprep.mubr.bf16.mxu0 %v6846_v50  ;;  %v6914_v26 = vshll.u32 %v11083_v62, 16  ;;  %v17502_v19 = vcombine.low %v6008_v22, %v6009_v15  ;;  %8103 = vmatprep.mubr.bf16.mxu1 %v17177_v12  ;;  %v12321_v46 = vpop.f32.mrf.mxu1 }
 0x2a7   : > { %v12319_v21 = vadd.f32 %v12318_v25, %v12317_v61  ;;  %7999 = vmatmul.mubr.bf16.gmra.mxu0 %v20632_v39  ;;  %v6913_v35 = vrot.slane %v6911_v23, 3  ;;  %v17506_v57 = vadd.f32 %v12358_v13, %v12357_v54  ;;  %v20633_v25 = vld [vmem:[#allocation23_spill] sm:$0xff]  ;;  %12680 = vmatpush3.bf16.msra.mxu1 %v13330_v56  ;;  %vm20636_vm14 = vnez %v20635_v11 }
 0x2a8   : > { %v6904_v59 = vrot.slane %v6902_v36, 3  ;;  %v6907_v53 = vrot.slane %v6905_v42, 4  ;;  %v6916_v50 = vrot.slane %v6914_v26, 4  ;;  %v19856_v62 = vrot.slane %v17502_v19, 5  ;;  %13016 = vmatpush3.bf16.msra.mxu0 %v13327_v58  ;;  %v12363_v36 = vpop.f32.mrf.mxu0  ;;  %12681 = vmatprep.subr.bf16.mxu1 %v13332_v27  ;;  %v13334_v58 = vld [vmem:[%s19592_s1 + $0x458] sm:$0xff]  }
 0x2a9   : > { %v17510_v38 = vadd.f32 %v12319_v21, %v17310_v43  ;;  %vm20634_vm2 = vnez %v20633_v25  ;;  %v6029_v54 = vsel %vm20636_vm14, %v17009_v4, 0  ;;  %v12322_v13 = vadd.f32 %v12321_v46, %v12320_v1  ;;  %13017 = vmatprep.subr.bf16.mxu0 %v13331_v0  ;;  %v13333_v43 = vld [vmem:[%s19592_s1 + $0x260] sm:$0xff]   ;;  %v13335_v23 = vld [vmem:[%s19592_s1 + $0x298] sm:$0xff]  }
 0x2aa   : > { %v6028_v61 = vsel %vm20634_vm2, %v17512_v31, 0  ;;  %v6908_v15 = vor.u32 %v6907_v53, %v6904_v59  ;;  %v17520_v22 = vadd.f32 %v12361_v32, %v12360_v3  ;;  %v6917_v56 = vor.u32 %v6916_v50, %v6913_v35  ;;  %v20638_v46 = vld [vmem:[#allocation28_spill] sm:$0xff]  ;;  %v12364_v35 = vpop.f32.mrf.mxu0 }
 0x2ab   : > { %v6377_v53 = vsel %vm20637_vm13, %v6374_v16, %v19856_v62  ;;  %v11084_v42 = vcombine.low %v6028_v61, %v6029_v54  ;;  %vm20639_vm4 = vcmp.ne.s16.totalorder %v20638_v46, 0  ;;  %vm20640_vm14 = vsmask.f32 4352  ;;  %12682 = vmatpush3.bf16.msra.mxu1 %v13333_v43  ;;  %v20648_v62 = vld [vmem:[#allocation61_spill] sm:$0xff] }
 0x2ac   : > { %v6010_v3 = vsel %vm20639_vm4, %v17009_v4, 0  ;;  %v6909_v1 = vsel %vm20640_vm14, %v6845_v33, %v6908_v15  ;;  %v6965_v27 = vshrl.u32 %v6377_v53, 16  ;;  %v6968_v26 = vshll.u32 %v6377_v53, 16  ;;  %vm20641_vm13 = vmmov %vm20640_vm14  ;;  %13018 = vmatpush3.bf16.msra.mxu0 %v13331_v0  ;;  %v12366_v54 = vpop.f32.mrf.mxu0  ;;  %12683 = vmatprep.subr.bf16.mxu1 %v13335_v23  ;;  %v20645_v23 = vld [vmem:[#allocation53_spill] sm:$0xff] }
 0x2ad   : > { %v17539_v21 = vadd.f32 %v12322_v13, %v17330_v48  ;;  %8006 = vmatprep.mubr.bf16.mxu0 %v6909_v1  ;;  %v6918_v16 = vsel %vm20641_vm13, %v17466_v28, %v6917_v56  ;;  %v6974_v32 = vshrl.u32 %v11084_v42, 16  ;;  %v6977_v39 = vshll.u32 %v11084_v42, 16  ;;  %13019 = vmatprep.subr.bf16.mxu0 %v13334_v58  ;;  %v13336_v28 = vld [vmem:[%s19592_s1 + $0x258] sm:$0xff]   ;;  %v13337_v13 = vld [vmem:[%s19592_s1 + $0x450] sm:$0xff]   ;;  %v12997_v42 = vpop.f32.mrf.mxu1  ;;  %v20643_v1 = vld [vmem:[#allocation33_spill] sm:$0xff] }
 0x2ae   : > { %v6011_v59 = vsel %vm20261_vm15, %v17092_v24, 0  ;;  %v6967_v50 = vrot.slane %v6965_v27, 3  ;;  %v6970_v61 = vrot.slane %v6968_v26, 4  ;;  %v5680_v48 = vadd.f32 %v17406_v60, %v17205_v40  ;;  %8104 = vmatmul.mubr.bf16.gmra.mxu1 %v6918_v16  ;;  %v13338_v60 = vld [vmem:[%s19592_s1 + $0x290] sm:$0xff]   ;;  %vm20650_vm14 = vmmov %vm20641_vm13 }
 0x2af   : > { %v17546_v33 = vcombine.low %v6010_v3, %v6011_v59  ;;  %v6976_v0 = vrot.slane %v6974_v32, 3  ;;  %v6979_v53 = vrot.slane %v6977_v39, 4  ;;  %v17556_v3 = vadd.f32 %v12364_v35, %v12363_v36  ;;  %8111 = vmatprep.mubr.bf16.mxu1 %v17239_v63  ;;  %8007 = vmatmul.mubr.bf16.gmra.mxu0 %v17099_v2  ;;  %v12367_v35 = vpop.f32.mrf.mxu0  ;;  %v20649_v2 = vld [vmem:[#allocation56_spill] sm:$0xff] }
 0x2b0   : > { %v5672_v40 = vadd.f32 %v17361_v7, %v20643_v1  ;;  %v6971_v43 = vor.u32 %v6970_v61, %v6967_v50  ;;  %v5777_v26 = vadd.f32 %v12997_v42, %v5680_v48  ;;  %v6030_v36 = vsel %vm20394_vm5, %v17092_v24, 0  ;;  %v5768_v7 = vpop.f32.mrf.mxu1  ;;  %v20647_v1 = vld [vmem:[#allocation60_spill] sm:$0xff]  ;;  %13020 = vmatpush3.bf16.msra.mxu0 %v13334_v58  ;;  %12684 = vmatpush3.bf16.msra.mxu1 %v13336_v28  ;;  %v13339_v42 = vld [vmem:[%s19592_s1 + $0x250] sm:$0xff]   ;;  %v13342_v28 = vld [vmem:[%s19592_s1 + $0x288] sm:$0xff]  }
 0x2b1   : > { %v19857_v27 = vrot.slane %v17546_v33, 5  ;;  %v17569_v32 = vor.u32 %v6979_v53, %v6976_v0  ;;  %v6031_v59 = vsel %vm20538_vm3, %v20645_v23, 0  ;;  %v11070_v11 = vcombine.low %v20648_v62, %v20647_v1  ;;  %13021 = vmatprep.subr.bf16.mxu0 %v13337_v13  ;;  %12685 = vmatprep.subr.bf16.mxu1 %v13338_v60 }
 0x2b2   : > { %v5683_v50 = vadd.f32 %v17424_v45, %v20649_v2  ;;  %v6972_v61 = vsel %vm20650_vm14, %v6908_v15, %v6971_v43  ;;  %v20651_v24 = vrot.slane %v17502_v19, 5  ;;  %vm20652_vm4 = vcmask 1042432   ;;  %v13340_v45 = vld [vmem:[%s19592_s1 + $0x448] sm:$0xff]  }
 0x2b3   : > { %v5833_v0 = vmax.f32 %v5777_v26, 0.0  ;;  %v17584_v53 = vadd.f32 %v5768_v7, %v5672_v40  ;;  %8014 = vmatprep.mubr.bf16.mxu0 %v6972_v61  ;;  %v6981_v15 = vsel %vm20641_vm13, %v6917_v56, %v17569_v32  ;;  %v11085_v23 = vcombine.low %v6030_v36, %v6031_v59  ;;  %v12998_v26 = vpop.f32.mrf.mxu1  ;;  %v12369_v40 = vpop.f32.mrf.mxu0 }
 0x2b4   : > { %v6379_v48 = vsel %vm20652_vm4, %v20651_v24, %v19857_v27  ;;  %v6318_v2 = vshrl.u32 %v11070_v11, 16  ;;  %v6321_v24 = vshll.u32 %v11070_v11, 16  ;;  %v5780_v27 = vadd.f32 %v12998_v26, %v5683_v50  ;;  %13022 = vmatpush3.bf16.msra.mxu0 %v13337_v13  ;;  %12686 = vmatpush3.bf16.msra.mxu1 %v13339_v42  ;;  %v20653_v50 = vld [vmem:[#allocation57_spill] sm:$0xff]  ;;  %v13343_v13 = vld [vmem:[%s19592_s1 + $0x440] sm:$0xff]  }
 0x2b5   : > { %v7028_v19 = vshrl.u32 %v6379_v48, 16  ;;  %v7031_v58 = vshll.u32 %v6379_v48, 16  ;;  %v5831_v7 = vmax.f32 %v17584_v53, 0.0  ;;  %v7037_v16 = vshrl.u32 %v11085_v23, 16  ;;  %v5771_v56 = vpop.f32.mrf.mxu1  ;;  %v12370_v4 = vpop.f32.mrf.mxu0  ;;  %13023 = vmatprep.subr.bf16.mxu0 %v13340_v45  ;;  %12687 = vmatprep.subr.bf16.mxu1 %v13342_v28 }
 0x2b6   : > { %v7040_v25 = vshll.u32 %v11085_v23, 16  ;;  %v6320_v36 = vrot.slane %v6318_v2, 4  ;;  %v6323_v59 = vrot.slane %v6321_v24, 5  ;;  %v5834_v48 = vmax.f32 %v5780_v27, 0.0  ;;  %8112 = vmatmul.mubr.bf16.gmra.mxu1 %v6981_v15  ;;  %v13347_v15 = vld [vmem:[%s19592_s1 + $0x280] sm:$0xff]  }
 0x2b7   : > { %v7030_v39 = vrot.slane %v7028_v19, 3  ;;  %v7033_v61 = vrot.slane %v7031_v58, 4  ;;  %v17598_v60 = vadd.f32 %v12367_v35, %v12366_v54  ;;  %v7039_v53 = vrot.slane %v7037_v16, 3  ;;  %v13344_v54 = vld [vmem:[%s19592_s1 + $0x248] sm:$0xff]   ;;  %8119 = vmatprep.mubr.bf16.mxu1 %v17303_v14  ;;  %8015 = vmatmul.mubr.bf16.gmra.mxu0 %v17177_v12  ;;  %v13001_v26 = vpop.f32.mrf.mxu1  ;;  %v12372_v28 = vpop.f32.mrf.mxu0 }
 0x2b8   : > { %v7042_v11 = vrot.slane %v7040_v25, 4  ;;  %v5675_v19 = vadd.f32 %v17384_v18, %v20653_v50  ;;  %v17612_v27 = vor.u32 %v6323_v59, %v6320_v36  ;;  %v11795_v16 = vpack.c.bf16 %v5834_v48, %v5833_v0  ;;  %v17614_v25 = vld [vmem:[#allocation3 + $0x40] sm:$0xf]  ;;  %13024 = vmatpush3.bf16.msra.mxu0 %v13340_v45  ;;  %v20659_v36 = vld [vmem:[#allocation55_spill] sm:$0xff]  ;;  %12688 = vmatpush3.bf16.msra.mxu1 %v13344_v54 }
 0x2b9   : > { %v17600_v46 = vor.u32 %v7033_v61, %v7030_v39  ;;  %v20654_v18 = vld [vmem:[#allocation32_spill] sm:$0xff]  ;;  %v5696_v24 = vadd.f32 %v17506_v57, %v17317_v44  ;;  %v12371_v61 = vadd.f32 %v12370_v4, %v12369_v40  ;;  %13025 = vmatprep.subr.bf16.mxu0 %v13343_v13  ;;  %v6032_v40 = vsel %vm20217_vm12, %v17164_v34, 0  ;;  %12689 = vmatprep.subr.bf16.mxu1 %v13347_v15 }
 0x2ba   : > { %vm20655_vm14 = vcmp.ne.s16.totalorder %v20654_v18, 0  ;;  %v20656_v39 = vld [vmem:[#allocation36_spill] sm:$0xff]  ;;  %v17627_v58 = vor.u32 %v7042_v11, %v7039_v53  ;;  %v5772_v0 = vadd.f32 %v5771_v56, %v5675_v19  ;;  %11852 = vst [vmem:[#allocation3 + $0x58] sm:$0xff] %v11795_v16   ;;  %v13345_v56 = vld [vmem:[%s19592_s1 + $0x338] sm:$0xff]   ;;  %vm20673_vm12 = vsmask.f32 4352 }
 0x2bb   : > { %v6012_v35 = vsel %vm20655_vm14, %v17614_v25, 0  ;;  %vm20657_vm4 = vnez %v20656_v39  ;;  %v7035_v12 = vsel %vm20641_vm13, %v6971_v43, %v17600_v46  ;;  %vm20658_vm14 = vsmask.f32 3328  ;;  %v13348_v11 = vld [vmem:[%s19592_s1 + $0x240] sm:$0xff]   ;;  %v20661_v16 = vld [vmem:[#allocation35_spill] sm:$0xff]  ;;  %vm20677_vm3 = vmmov %vm20673_vm12 }
 0x2bc   : > { %v6013_v42 = vsel %vm20657_vm4, %v17164_v34, 0  ;;  %8022 = vmatprep.mubr.bf16.mxu0 %v7035_v12  ;;  %v6325_v2 = vsel %vm20658_vm14, %v17263_v47, %v17612_v27  ;;  %v5688_v43 = vadd.f32 %v17455_v55, %v20659_v36  ;;  %v7044_v45 = vsel %vm20641_vm13, %v17569_v32, %v17627_v58  ;;  %v5784_v47 = vpop.f32.mrf.mxu1  ;;  %v20660_v55 = vld [vmem:[#allocation34_spill] sm:$0xff]  ;;  %13026 = vmatpush3.bf16.msra.mxu0 %v13343_v13  ;;  %v13355_v12 = vld [vmem:[%s19592_s1 + $0x3b8] sm:$0xff]  }
 0x2bd   : > { %v17629_v23 = vcombine.low %v6012_v35, %v6013_v42  ;;  %v7109_v59 = vshrl.u32 %v6325_v2, 16  ;;  %v7112_v48 = vshll.u32 %v6325_v2, 16  ;;  %v5832_v53 = vmax.f32 %v5772_v0, 0.0  ;;  %v12373_v42 = vpop.f32.mrf.mxu0  ;;  %12739 = vmatprep.subr.bf16.mxu0 %v13345_v56  ;;  %12690 = vmatpush3.bf16.msra.mxu1 %v13348_v11 }
 0x2be   : > { %v5793_v57 = vadd.f32 %v13001_v26, %v5696_v24  ;;  %v5785_v4 = vadd.f32 %v5784_v47, %v5688_v43  ;;  %vm20662_vm14 = vnez %v20661_v16  ;;  %v13002_v35 = vpop.f32.mrf.mxu1  ;;  %v20663_v34 = vrot.slane %v17546_v33, 5  ;;  %8120 = vmatmul.mubr.bf16.gmra.mxu1 %v7044_v45  ;;  %12803 = vmatprep.subr.bf16.mxu1 %v13355_v12 }
 0x2bf   : > { %v6380_v44 = vrot.slane %v17629_v23, 5  ;;  %v7111_v32 = vrot.slane %v7109_v59, 3  ;;  %v7114_v50 = vrot.slane %v7112_v48, 4  ;;  %v11790_v19 = vpack.c.bf16 %v5832_v53, %v5831_v7  ;;  %8023 = vmatmul.mubr.bf16.gmra.mxu0 %v17239_v63  ;;  %v20665_v53 = vld [vmem:[#allocation44_spill] sm:$0xff] }
 0x2c0   : > { %v6033_v54 = vsel %vm20662_vm14, %v20648_v62, 0  ;;  %vm20664_vm13 = vcmask 1042432   ;;  %v5837_v0 = vmax.f32 %v5793_v57, 0.0  ;;  %v5835_v26 = vmax.f32 %v5785_v4, 0.0  ;;  %v5787_v43 = vpop.f32.mrf.mxu1 }
 0x2c1   : > { %v6381_v15 = vsel %vm20664_vm13, %v20663_v34, %v6380_v44  ;;  %v11086_v7 = vcombine.low %v6032_v40, %v6033_v54  ;;  %v17662_v2 = vor.u32 %v7114_v50, %v7111_v32  ;;  %11851 = vst [vmem:[#allocation3 + $0x50] sm:$0xff] %v11790_v19   ;;  %v5699_v36 = vadd.f32 %v17520_v22, %v17333_v37 }
 0x2c2   : > { %v7091_v24 = vshrl.u32 %v6381_v15, 16  ;;  %v7094_v13 = vshll.u32 %v6381_v15, 16  ;;  %v12374_v48 = vadd.f32 %v12373_v42, %v12372_v28  ;;  %v5691_v47 = vadd.f32 %v17477_v20, %v20665_v53  ;;  %v20667_v28 = vld [vmem:[#allocation40_spill] sm:$0xff]  ;;  %v12375_v20 = vpop.f32.mrf.mxu0  ;;  %v13005_v12 = vpop.f32.mrf.mxu1 }
 0x2c3   : > { %v7100_v59 = vshrl.u32 %v11086_v7, 16  ;;  %v7103_v33 = vshll.u32 %v11086_v7, 16  ;;  %vm20666_vm13 = vsmask.f32 4352  ;;  %v5796_v4 = vadd.f32 %v13002_v35, %v5699_v36 }
 0x2c4   : > { %v17672_v56 = vsel %vm20666_vm13, %v17294_v51, %v17662_v2  ;;  %v7093_v45 = vrot.slane %v7091_v24, 3  ;;  %v7096_v57 = vrot.slane %v7094_v13, 4  ;;  %v5788_v22 = vadd.f32 %v5787_v43, %v5691_v47  ;;  %v12376_v34 = vpop.f32.mrf.mxu0  ;;  %v5800_v36 = vpop.f32.mrf.mxu1 }
 0x2c5   : > { %8127 = vmatprep.mubr.bf16.mxu1 %v17672_v56  ;;  %v7102_v37 = vrot.slane %v7100_v59, 3  ;;  %v7105_v63 = vrot.slane %v7103_v33, 4  ;;  %vm20668_vm14 = vcmp.ne.s16.totalorder %v20667_v28, 0  ;;  %v5838_v32 = vmax.f32 %v5796_v4, 0.0 }
 0x2c6   : > { %v6014_v40 = vsel %vm20668_vm14, %v20648_v62, 0  ;;  %v17678_v11 = vor.u32 %v7096_v57, %v7093_v45  ;;  %v6015_v50 = vsel %vm20295_vm8, %v20647_v1, 0  ;;  %v5712_v19 = vadd.f32 %v12371_v61, %v17418_v10  ;;  %vm20670_vm14 = vmmov %vm20666_vm13  ;;  %v12378_v43 = vpop.f32.mrf.mxu0 }
 0x2c7   : > { %v17684_v54 = vor.u32 %v7105_v63, %v7102_v37  ;;  %v5836_v35 = vmax.f32 %v5788_v22, 0.0  ;;  %v11078_v42 = vcombine.low %v6014_v40, %v6015_v50  ;;  %v5704_v15 = vadd.f32 %v17556_v3, %v17359_v52 }
 0x2c8   : > { %v7098_v62 = vsel %vm20670_vm14, %v17600_v46, %v17678_v11  ;;  %v11805_v7 = vpack.c.bf16 %v5838_v32, %v5837_v0  ;;  %v5809_v24 = vadd.f32 %v13005_v12, %v5712_v19  ;;  %v12377_v13 = vadd.f32 %v12376_v34, %v12375_v20  ;;  %v5999_v33 = vld [vmem:[#allocation3 + $0x50] sm:$0x1]  ;;  %v12379_v53 = vpop.f32.mrf.mxu0 }
 0x2c9   : > { %8030 = vmatprep.mubr.bf16.mxu0 %v7098_v62  ;;  %v7107_v10 = vsel %vm20666_vm13, %v17627_v58, %v17684_v54  ;;  %v11800_v1 = vpack.c.bf16 %v5836_v35, %v5835_v26  ;;  %v6382_v61 = vrot.slane %v11078_v42, 5  ;;  %v5715_v59 = vadd.f32 %v12374_v48, %v17442_v6  ;;  %v13006_v26 = vpop.f32.mrf.mxu1 }
 0x2ca   : > { %8128 = vmatmul.mubr.bf16.gmra.mxu1 %v7107_v10  ;;  %11854 = vst [vmem:[#allocation3 + $0x68] sm:$0xff] %v11805_v7   ;;  %v5841_v52 = vmax.f32 %v5809_v24, 0.0  ;;  %v5801_v3 = vadd.f32 %v5800_v36, %v5704_v15  ;;  %v5707_v46 = vadd.f32 %v17598_v60, %v17387_v8  ;;  %v5720_v0 = vadd.f32 %v12377_v13, %v17470_v30  ;;  %v17710_v7 = vld [vmem:[#allocation3 + $0x50] sm:$0xf]  ;;  %v17712_v24 = vld [vmem:[#allocation3 + $0x54] sm:$0xf] }
 0x2cb   : > { %11853 = vst [vmem:[#allocation3 + $0x60] sm:$0xff] %v11800_v1   ;;  %8031 = vmatmul.mubr.bf16.gmra.mxu0 %v17303_v14  ;;  %vm20671_vm14 = vcmask 1042432   ;;  %v6016_v6 = vsel %vm20315_vm9, %v5999_v33, 0  ;;  %v7226_v48 = vshrl.u32 %v17612_v27, 16  ;;  %v7229_v47 = vshll.u32 %v17612_v27, 16  ;;  %v5803_v4 = vpop.f32.mrf.mxu1  ;;  %v12381_v14 = vpop.f32.mrf.mxu0  ;;  %v20674_v36 = vld [vmem:[#allocation37_spill] sm:$0xff] }
 0x2cc   : > { %v6383_v58 = vsel %vm20671_vm14, %v6380_v44, %v6382_v61  ;;  %v5839_v60 = vmax.f32 %v5801_v3, 0.0  ;;  %v5812_v30 = vadd.f32 %v13006_v26, %v5715_v59  ;;  %v12380_v57 = vadd.f32 %v12379_v53, %v12378_v43  ;;  %v20678_v26 = vld [vmem:[#allocation27_spill] sm:$0xff]  ;;  %v20679_v53 = vld [vmem:[#allocation12_spill] sm:$0xff] }
 0x2cd   : > { %v7154_v45 = vshrl.u32 %v6383_v58, 16  ;;  %v7157_v8 = vshll.u32 %v6383_v58, 16  ;;  %v11079_v37 = vcombine.low %v6016_v6, %v6016_v6  ;;  %v7228_v23 = vrot.slane %v7226_v48, 3  ;;  %v12382_v32 = vpop.f32.mrf.mxu0 }
 0x2ce   : > { %v7231_v63 = vrot.slane %v7229_v47, 4  ;;  %v5842_v40 = vmax.f32 %v5812_v30, 0.0  ;;  %v5804_v20 = vadd.f32 %v5803_v4, %v5707_v46  ;;  %v5723_v50 = vadd.f32 %v12380_v57, %v17500_v29 }
 0x2cf   : > { %v7156_v44 = vrot.slane %v7154_v45, 3  ;;  %v7159_v22 = vrot.slane %v7157_v8, 4  ;;  %v6384_v19 = vrot.slane %v11079_v37, 5  ;;  %vm20672_vm13 = vcmp.ne.s16.totalorder %v20484_v41, 0  ;;  %v12384_v13 = vpop.f32.mrf.mxu0 }
 0x2d0   : > { %v7232_v35 = vor.u32 %v7231_v63, %v7228_v23  ;;  %v6038_v42 = vsel %vm20672_vm13, %v17342_v9, 0  ;;  %v11815_v34 = vpack.c.bf16 %v5842_v40, %v5841_v52  ;;  %v5840_v15 = vmax.f32 %v5804_v20, 0.0  ;;  %v20675_v9 = vld [vmem:[#allocation10_spill] sm:$0xff]  ;;  %v13009_v52 = vpop.f32.mrf.mxu1 }
 0x2d1   : > { %v7160_v12 = vor.u32 %v7159_v22, %v7156_v44  ;;  %v12383_v62 = vadd.f32 %v12382_v32, %v12381_v14  ;;  %v6385_v10 = vsel %vm20671_vm14, %v6382_v61, %v6384_v19  ;;  %v6039_v1 = vsel %vm13886_vm0, %v17347_v17, 0  ;;  %v12385_v46 = vpop.f32.mrf.mxu0 }
 0x2d2   : > { %v7233_v29 = vsel %vm20673_vm12, %v17662_v2, %v7232_v35  ;;  %vm20676_vm13 = vcmp.ne.s16.totalorder %v20675_v9, 0  ;;  %11856 = vst [vmem:[#allocation3 + $0x78] sm:$0xff] %v11815_v34   ;;  %v11810_v33 = vpack.c.bf16 %v5840_v15, %v5839_v60  ;;  %v7235_v61 = vshrl.u32 %v6385_v10, 16  ;;  %v5816_v47 = vpop.f32.mrf.mxu1 }
 0x2d3   : > { %v6040_v43 = vsel %vm20676_vm13, %v20674_v36, 0  ;;  %v7161_v59 = vsel %vm20677_vm3, %v17678_v11, %v7160_v12  ;;  %v5728_v3 = vadd.f32 %v12383_v62, %v17510_v38  ;;  %v7238_v58 = vshll.u32 %v6385_v10, 16  ;;  %vm20681_vm3 = vmmov %vm20671_vm14 }
 0x2d4   : > { %8038 = vmatprep.mubr.bf16.mxu0 %v7161_v59  ;;  %vm20680_vm12 = vnez %v20679_v53  ;;  %v11090_v6 = vcombine.low %v6038_v42, %v6039_v1  ;;  %v11089_v48 = vcombine.low %v17710_v7, %v17712_v24  ;;  %11855 = vst [vmem:[#allocation3 + $0x70] sm:$0xff] %v11810_v33   ;;  %v12386_v45 = vadd.f32 %v12385_v46, %v12384_v13  ;;  %v13010_v37 = vpop.f32.mrf.mxu1  ;;  %v17740_v33 = vld [vmem:[#allocation3 + $0x4c] sm:$0xf] }
 0x2d5   : > { %v6041_v17 = vsel %vm20680_vm12, %v20678_v26, 0  ;;  %8039 = vmatmul.mubr.bf16.gmra.mxu0 %v17672_v56  ;;  %v5825_v11 = vadd.f32 %v13009_v52, %v5728_v3  ;;  %v7237_v8 = vrot.slane %v7235_v61, 3  ;;  %v5817_v60 = vadd.f32 %v5816_v47, %v5720_v0  ;;  %v20683_v52 = vld [vmem:[#allocation39_spill] sm:$0xff]  ;;  %v20685_v61 = vld [vmem:[#allocation41_spill] sm:$0xff] }
 0x2d6   : > { %v17732_v38 = vcombine.low %v6040_v43, %v6041_v17  ;;  %v7240_v30 = vrot.slane %v7238_v58, 4  ;;  %v6486_v57 = vrot.slane %v11090_v6, 5  ;;  %v6435_v4 = vshrl.u32 %v11089_v48, 16  ;;  %v5819_v19 = vpop.f32.mrf.mxu1 }
 0x2d7   : > { %v5845_v14 = vmax.f32 %v5825_v11, 0.0  ;;  %v5731_v23 = vadd.f32 %v12386_v45, %v17539_v21  ;;  %v6438_v44 = vshll.u32 %v11089_v48, 16  ;;  %v5843_v22 = vmax.f32 %v5817_v60, 0.0  ;;  %v20688_v60 = vld [vmem:[#allocation62_spill] sm:$0xff] }
 0x2d8   : > { %v6487_v63 = vrot.slane %v17732_v38, 5  ;;  %v7241_v40 = vor.u32 %v7240_v30, %v7237_v8  ;;  %v6793_v56 = vshrl.u32 %v6486_v57, 16  ;;  %v6796_v20 = vshll.u32 %v6486_v57, 16  ;;  %v20689_v30 = vld [vmem:[#allocation14_spill] sm:$0xff] }
 0x2d9   : > { %v5828_v32 = vadd.f32 %v13010_v37, %v5731_v23  ;;  %v6437_v35 = vrot.slane %v6435_v4, 4  ;;  %v6440_v42 = vrot.slane %v6438_v44, 5  ;;  %v5820_v34 = vadd.f32 %v5819_v19, %v5723_v50  ;;  %v17755_v23 = vld [vmem:[#allocation3 + $0x48] sm:$0xf] }
 0x2da   : > { %v6488_v0 = vsel %vm20681_vm3, %v6486_v57, %v6487_v63  ;;  %vm20682_vm14 = vsmask.f32 4352  ;;  %v6795_v62 = vrot.slane %v6793_v56, 3  ;;  %v6798_v21 = vrot.slane %v6796_v20, 4 }
 0x2db   : > { %v7242_v15 = vsel %vm20682_vm14, %v7160_v12, %v7241_v40  ;;  %v5846_v13 = vmax.f32 %v5828_v32, 0.0  ;;  %v6801_v10 = vshrl.u32 %v6488_v0, 16  ;;  %v6804_v1 = vshll.u32 %v6488_v0, 16  ;;  %v20692_v40 = vld [vmem:[#allocation63_spill] sm:$0xff]  ;;  %v17762_v32 = vld [vmem:[#allocation3 + $0x4c] sm:$0xf] }
 0x2dc   : > { %8046 = vmatprep.mubr.bf16.mxu0 %v7242_v15  ;;  %v6441_v36 = vor.u32 %v6440_v42, %v6437_v35  ;;  %v5844_v43 = vmax.f32 %v5820_v34, 0.0  ;;  %v6799_v59 = vor.u32 %v6798_v21, %v6795_v62  ;;  %vm20684_vm13 = vnez %v20683_v52  ;;  %v17764_v34 = vld [vmem:[#allocation3 + $0x50] sm:$0xf]  ;;  %v17766_v15 = vld [vmem:[#allocation3 + $0x54] sm:$0xf]  ;;  %v20694_v21 = vld [vmem:[#allocation64_spill] sm:$0xff] }
 0x2dd   : > { %v6034_v3 = vsel %vm20684_vm13, %v17740_v33, 0  ;;  %vm20686_vm3 = vnez %v20685_v61  ;;  %v11825_v12 = vpack.c.bf16 %v5846_v13, %v5845_v14  ;;  %8047 = vmatmul.mubr.bf16.gmra.mxu0 %v7233_v29  ;;  %v6803_v46 = vrot.slane %v6801_v10, 3  ;;  %v20695_v13 = vld [vmem:[#allocation17_spill] sm:$0xff] }
 0x2de   : > { %v6035_v50 = vsel %vm20686_vm3, %v17710_v7, 0  ;;  %v6806_v58 = vrot.slane %v6804_v1, 4  ;;  %vm20687_vm14 = vsmask.f32 3328  ;;  %v11820_v17 = vpack.c.bf16 %v5844_v43, %v5843_v22  ;;  %v20698_v43 = vld [vmem:[#allocation6_spill] sm:$0xff] }
 0x2df   : > { %v6442_v26 = vsel %vm20687_vm14, %v17612_v27, %v6441_v36  ;;  %v11087_v11 = vcombine.low %v6034_v3, %v6035_v50  ;;  %11858 = vst [vmem:[#allocation3 + $0x88] sm:$0xff] %v11825_v12   ;;  %v7253_v45 = vshrl.u32 %v6441_v36, 16  ;;  %v7256_v8 = vshll.u32 %v6441_v36, 16 }
 0x2e0   : > { %v7172_v6 = vshrl.u32 %v6442_v26, 16  ;;  %v7175_v48 = vshll.u32 %v6442_v26, 16  ;;  %v17750_v47 = vor.u32 %v6806_v58, %v6803_v46  ;;  %vm20690_vm13 = vcmp.ne.s16.totalorder %v20689_v30, 0  ;;  %11857 = vst [vmem:[#allocation3 + $0x80] sm:$0xff] %v11820_v17  }
 0x2e1   : > { %v6042_v57 = vsel %vm20690_vm13, %v20688_v60, 0  ;;  %v7163_v14 = vshrl.u32 %v11087_v11, 16  ;;  %v7166_v37 = vshll.u32 %v11087_v11, 16  ;;  %vm20691_vm14 = vsmask.f32 4352 }
 0x2e2   : > { %v7174_v29 = vrot.slane %v7172_v6, 3  ;;  %v7177_v4 = vrot.slane %v7175_v48, 4  ;;  %v6808_v27 = vsel %vm20691_vm14, %v6799_v59, %v17750_v47  ;;  %v7255_v44 = vrot.slane %v7253_v45, 3  ;;  %v13461_v11 = vld [vmem:[#allocation3 + $0x38] sm:$0xf]  ;;  %v20704_v45 = vld [vmem:[#allocation22_spill] sm:$0xff] }
 0x2e3   : > { %v7258_v22 = vrot.slane %v7256_v8, 4  ;;  %v6043_v20 = vsel %vm20610_vm11, %v20692_v40, 0  ;;  %13027 = vmatprep.mubr.bf16.mxu0 %v6808_v27  ;;  %v7165_v0 = vrot.slane %v7163_v14, 3  ;;  %v7168_v35 = vrot.slane %v7166_v37, 4 }
 0x2e4   : > { %v7178_v19 = vor.u32 %v7177_v4, %v7174_v29  ;;  %v11092_v42 = vcombine.low %v6042_v57, %v6043_v20  ;;  %vm20696_vm13 = vcmp.ne.s16.totalorder %v20695_v13, 0  ;;  %v6045_v36 = vsel %vm20622_vm6, %v17512_v31, 0 }
 0x2e5   : > { %v7259_v62 = vor.u32 %v7258_v22, %v7255_v44  ;;  %v6044_v10 = vsel %vm20696_vm13, %v20694_v21, 0  ;;  %vm20699_vm14 = vcmp.ne.s16.totalorder %v20698_v43, 0  ;;  %vm20700_vm3 = vsmask.f32 4352  ;;  %v13346_v21 = vld [vmem:[%s19592_s1 + $0x2f8] sm:$0xff]  }
 0x2e6   : > { %v6036_v59 = vsel %vm20699_vm14, %v17712_v24, 0  ;;  %v7179_v3 = vsel %vm20700_vm3, %v17662_v2, %v7178_v19  ;;  %v7169_v50 = vor.u32 %v7168_v35, %v7165_v0  ;;  %v6489_v12 = vrot.slane %v11092_v42, 5  ;;  %vm20701_vm5 = vmmov %vm20700_vm3 }
 0x2e7   : > { %v17779_v46 = vcombine.low %v6044_v10, %v6045_v36  ;;  %8135 = vmatprep.mubr.bf16.mxu1 %v7179_v3  ;;  %v7260_v58 = vsel %vm20701_vm5, %v7178_v19, %v7259_v62  ;;  %v11088_v26 = vcombine.low %v6036_v59, %v6036_v59  ;;  %v11326_v17 = vcombine.low %v17755_v23, %v17762_v32  ;;  %vm20702_vm13 = vmmov %vm20700_vm3 }
 0x2e8   : > { %v11327_v31 = vcombine.low %v17764_v34, %v17766_v15  ;;  %v7170_v6 = vsel %vm20702_vm13, %v17684_v54, %v7169_v50  ;;  %vm20703_vm3 = vcmask 1042432   ;;  %vm20705_vm14 = vcmp.ne.s16.totalorder %v20704_v45, 0 }
 0x2e9   : > { %v6490_v2 = vsel %vm20703_vm3, %v6487_v63, %v6489_v12  ;;  %v6491_v48 = vrot.slane %v17779_v46, 5  ;;  %v6046_v8 = vsel %vm20705_vm14, %v13461_v11, 0  ;;  %8136 = vmatmul.mubr.bf16.gmra.mxu1 %v7170_v6  ;;  %v7244_v29 = vshrl.u32 %v11088_v26, 16  ;;  %vm20706_vm5 = vmmov %vm20703_vm3  ;;  %v13462_v46 = vld [vmem:[#allocation3 + $0x3c] sm:$0xf] }
 0x2ea   : > { %v6866_v60 = vshrl.u32 %v6490_v2, 16  ;;  %v6869_v57 = vshll.u32 %v6490_v2, 16  ;;  %v7247_v4 = vshll.u32 %v11088_v26, 16  ;;  %8143 = vmatprep.mubr.bf16.mxu1 %v7260_v58  ;;  %v8493_v37 = vshrl.u32 %v11326_v17, 16  ;;  %vm20710_vm14 = vmmov %vm20702_vm13 }
 0x2eb   : > { %v6492_v14 = vsel %vm20706_vm5, %v6489_v12, %v6491_v48  ;;  %v8496_v54 = vshll.u32 %v11326_v17, 16  ;;  %v8501_v27 = vshrl.u32 %v11327_v31, 16  ;;  %v7246_v40 = vrot.slane %v7244_v29, 3  ;;  %v13351_v12 = vld [vmem:[%s19592_s1 + $0x330] sm:$0xff]   ;;  %v8281_v17 = vld [vmem:[#allocation3 + $0x44] sm:$0x8]  ;;  %vm20711_vm5 = vmmov %vm20702_vm13 }
 0x2ec   : > { %v6868_v38 = vrot.slane %v6866_v60, 3  ;;  %v6871_v44 = vrot.slane %v6869_v57, 4  ;;  %v6929_v63 = vshrl.u32 %v6492_v14, 16  ;;  %v6932_v22 = vshll.u32 %v6492_v14, 16  ;;  %v20708_v60 = vld [vmem:[#allocation28_spill] sm:$0xff] }
 0x2ed   : > { %v7249_v20 = vrot.slane %v7247_v4, 4  ;;  %v8495_v19 = vrot.slane %v8493_v37, 4  ;;  %v8498_v0 = vrot.slane %v8496_v54, 5  ;;  %v8503_v10 = vrot.slane %v8501_v27, 4 }
 0x2ee   : > { %v6872_v35 = vor.u32 %v6871_v44, %v6868_v38  ;;  %v6931_v42 = vrot.slane %v6929_v63, 3  ;;  %v6934_v62 = vrot.slane %v6932_v22, 4  ;;  %v8504_v3 = vshll.u32 %v11327_v31, 16  ;;  %v17940_v49 = vpop.f32.mrf.mxu0 }
 0x2ef   : > { %v7250_v36 = vor.u32 %v7249_v20, %v7246_v40  ;;  %v8499_v59 = vor.u32 %v8498_v0, %v8495_v19  ;;  %v6047_v26 = vsel %vm20244_vm7, %v13462_v46, 0  ;;  %vm20709_vm3 = vcmp.ne.s16.totalorder %v20708_v60, 0  ;;  %v13353_v40 = vld [vmem:[%s19592_s1 + $0x328] sm:$0xff]   ;;  %v17824_v19 = vld [vmem:[#allocation3 + $0x58] sm:$0xf] }
 0x2f0   : > { %v6873_v6 = vsel %vm20702_vm13, %v17750_v47, %v6872_v35  ;;  %v6935_v2 = vor.u32 %v6934_v62, %v6931_v42  ;;  %v11094_v11 = vcombine.low %v6046_v8, %v6047_v26  ;;  %v6048_v57 = vsel %vm20709_vm3, %v17614_v25, 0  ;;  %v13352_v47 = vld [vmem:[%s19592_s1 + $0x2f0] sm:$0xff]   ;;  %v13463_v8 = vld [vmem:[#allocation3 + $0x44] sm:$0xf] }
 0x2f1   : > { %13028 = vmatmul.mubr.bf16.vlgmr.msra.gmra.mxu0 %v6873_v6  ;;  %v7251_v31 = vsel %vm20710_vm14, %v7169_v50, %v7250_v36  ;;  %v8506_v29 = vrot.slane %v8504_v3, 5  ;;  %v9026_v4 = vshrl.u32 %v8499_v59, 16  ;;  %v9029_v14 = vshll.u32 %v8499_v59, 16  ;;  %v20713_v25 = vld [vmem:[#allocation4_spill] sm:$0xff]  ;;  %v17836_v3 = vld [vmem:[#allocation3 + $0x5c] sm:$0xf] }
 0x2f2   : > { %v6936_v37 = vsel %vm20711_vm5, %v6872_v35, %v6935_v2  ;;  %12740 = vmatpush3.bf16.msra.mxu0 %v13346_v21  ;;  %8144 = vmatmul.mubr.bf16.gmra.mxu1 %v7251_v31  ;;  %v6493_v54 = vrot.slane %v11094_v11, 5  ;;  %v6049_v38 = vsel %vm20261_vm15, %v13463_v8, 0  ;;  %vm20714_vm13 = vcmp.ne.s16.totalorder %v20713_v25, 0  ;;  %v20717_v35 = vld [vmem:[#allocation7_spill] sm:$0xff] }
 0x2f3   : > { %v8298_v44 = vsel %vm20714_vm13, %v8281_v17, 0  ;;  %13031 = vmatprep.mubr.bf16.mxu0 %v6936_v37  ;;  %v17817_v50 = vor.u32 %v8506_v29, %v8503_v10  ;;  %v9028_v63 = vrot.slane %v9026_v4, 3  ;;  %v9031_v22 = vrot.slane %v9029_v14, 4  ;;  %12741 = vmatprep.subr.bf16.mxu0 %v13351_v12  ;;  %v13357_v37 = vld [vmem:[%s19592_s1 + $0x320] sm:$0xff]  }
 0x2f4   : > { %v17822_v20 = vcombine.low %v6048_v57, %v6049_v38  ;;  %vm20716_vm3 = vcmask 1042432   ;;  %vm20718_vm14 = vnez %v20717_v35  ;;  %v8300_v21 = vsel %vm20599_vm1, %v17762_v32, 0  ;;  %v13354_v57 = vld [vmem:[%s19592_s1 + $0x2e8] sm:$0xff]  }
 0x2f5   : > { %20715 = vst [vmem:[#allocation59_spill] sm:$0xff] %v17817_v50  ;;  %v6494_v0 = vsel %vm20716_vm3, %v6491_v48, %v6493_v54  ;;  %v8299_v42 = vsel %vm20718_vm14, %v17755_v23, 0  ;;  %v8301_v36 = vsel %vm20602_vm10, %v17764_v34, 0  ;;  %vm20721_vm5 = vsmask.f32 3328  ;;  %vm20722_vm13 = vmmov %vm20716_vm3 }
 0x2f6   : > { %v8508_v12 = vsel %vm20721_vm5, %v8499_v59, %v17817_v50  ;;  %v9032_v46 = vor.u32 %v9031_v22, %v9028_v63  ;;  %v6992_v26 = vshrl.u32 %v6494_v0, 16  ;;  %v6995_v48 = vshll.u32 %v6494_v0, 16  ;;  %12742 = vmatpush3.bf16.msra.mxu0 %v13352_v47 }
 0x2f7   : > { %v9034_v17 = vshrl.u32 %v8508_v12, 16  ;;  %v9037_v6 = vshll.u32 %v8508_v12, 16  ;;  %v6495_v11 = vrot.slane %v17822_v20, 5  ;;  %v11317_v31 = vcombine.low %v8298_v44, %v8299_v42  ;;  %12743 = vmatprep.subr.bf16.mxu0 %v13353_v40 }
 0x2f8   : > { %v6994_v29 = vrot.slane %v6992_v26, 3  ;;  %v6997_v4 = vrot.slane %v6995_v48, 4  ;;  %v11318_v14 = vcombine.low %v8300_v21, %v8301_v36  ;;  %v11328_v59 = vcombine.low %v17824_v19, %v17836_v3  ;;  %v13359_v26 = vld [vmem:[%s19592_s1 + $0x2e0] sm:$0xff]  }
 0x2f9   : > { %v9036_v8 = vrot.slane %v9034_v17, 3  ;;  %v9039_v47 = vrot.slane %v9037_v6, 4  ;;  %v6496_v38 = vsel %vm20722_vm13, %v6493_v54, %v6495_v11  ;;  %v9009_v63 = vshrl.u32 %v11317_v31, 16 }
 0x2fa   : > { %v6998_v22 = vor.u32 %v6997_v4, %v6994_v29  ;;  %v7055_v44 = vshrl.u32 %v6496_v38, 16  ;;  %v7058_v0 = vshll.u32 %v6496_v38, 16  ;;  %v9012_v42 = vshll.u32 %v11317_v31, 16  ;;  %12744 = vmatpush3.bf16.msra.mxu0 %v13354_v57  ;;  %v13360_v31 = vld [vmem:[%s19592_s1 + $0x318] sm:$0xff]   ;;  %v13464_v38 = vld [vmem:[#allocation3 + $0x48] sm:$0xf] }
 0x2fb   : > { %v17852_v40 = vor.u32 %v9039_v47, %v9036_v8  ;;  %v9011_v21 = vrot.slane %v9009_v63, 3  ;;  %v9017_v36 = vshrl.u32 %v11318_v14, 16  ;;  %v9020_v12 = vshll.u32 %v11318_v14, 16  ;;  %12745 = vmatprep.subr.bf16.mxu0 %v13357_v37  ;;  %v13358_v37 = vld [vmem:[%s19592_s1 + $0x378] sm:$0xff]  }
 0x2fc   : > { %vm20723_vm3 = vsmask.f32 4352  ;;  %v7057_v17 = vrot.slane %v7055_v44, 3  ;;  %v7060_v6 = vrot.slane %v7058_v0, 4  ;;  %v9014_v54 = vrot.slane %v9012_v42, 4 }
 0x2fd   : > { %v6999_v48 = vsel %vm20723_vm3, %v6935_v2, %v6998_v22  ;;  %vm20724_vm5 = vmmov %vm20723_vm3  ;;  %v9019_v29 = vrot.slane %v9017_v36, 3  ;;  %v9022_v4 = vrot.slane %v9020_v12, 4  ;;  %v8510_v14 = vshrl.u32 %v11328_v59, 16  ;;  %v17870_v44 = vld [vmem:[#allocation3 + $0x60] sm:$0xf]  ;;  %v13361_v36 = vld [vmem:[%s19592_s1 + $0x2d8] sm:$0xff]  }
 0x2fe   : > { %v9041_v57 = vsel %vm20724_vm5, %v9032_v46, %v17852_v40  ;;  %13032 = vmatmul.mubr.bf16.gmra.mxu0 %v6999_v48  ;;  %v17863_v8 = vor.u32 %v7060_v6, %v7057_v17  ;;  %v9015_v47 = vor.u32 %v9014_v54, %v9011_v21  ;;  %v8513_v2 = vshll.u32 %v11328_v59, 16  ;;  %v8333_v46 = vld [vmem:[#allocation3 + $0x4c] sm:$0x8]  ;;  %v17883_v12 = vld [vmem:[#allocation3 + $0x64] sm:$0xf]  ;;  %v17885_v48 = vpop.f32.mrf.mxu1  ;;  %v13364_v54 = vld [vmem:[%s19592_s1 + $0x310] sm:$0xff]  }
 0x2ff   : > { %10148 = vmatprep.mubr.bf16.mxu1 %v9041_v57  ;;  %vm20725_vm13 = vcmp.ne.s16.totalorder %v20654_v18, 0  ;;  %v17872_v0 = vor.u32 %v9022_v4, %v9019_v29  ;;  %v8512_v42 = vrot.slane %v8510_v14, 4  ;;  %12746 = vmatpush3.bf16.msra.mxu0 %v13359_v26  ;;  %v6051_v21 = vsel %vm20657_vm4, %v17740_v33, 0  ;;  %v6037_v57 = vld [vmem:[#allocation3 + $0x58] sm:$0x1] }
 0x300   : > { %v6050_v63 = vsel %vm20725_vm13, %v13464_v38, 0  ;;  %vm20726_vm3 = vcmp.ne.s16.totalorder %v20667_v28, 0  ;;  %v7062_v17 = vsel %vm20724_vm5, %v6998_v22, %v17863_v8  ;;  %v8515_v26 = vrot.slane %v8513_v2, 5  ;;  %12747 = vmatprep.subr.bf16.mxu0 %v13360_v31  ;;  %vm20727_vm13 = vmmov %vm20724_vm5  ;;  %v20728_v31 = vld [vmem:[#allocation13_spill] sm:$0xff] }
 0x301   : > { %v6052_v59 = vsel %vm20726_vm3, %v17710_v7, 0  ;;  %v11096_v6 = vcombine.low %v6050_v63, %v6051_v21  ;;  %v6053_v33 = vsel %vm20295_vm8, %v17712_v24, 0  ;;  %v13362_v7 = vld [vmem:[%s19592_s1 + $0x3b0] sm:$0xff]   ;;  %13035 = vmatprep.mubr.bf16.mxu0 %v7062_v17  ;;  %v9024_v22 = vsel %vm20727_vm13, %v9015_v47, %v17872_v0  ;;  %v20730_v24 = vld [vmem:[#allocation15_spill] sm:$0xff] }
 0x302   : > { %v17900_v29 = vcombine.low %v6052_v59, %v6053_v33  ;;  %vm20729_vm3 = vnez %v20728_v31  ;;  %vm20731_vm5 = vnez %v20730_v24  ;;  %10149 = vmatmul.mubr.bf16.vlgmr.msra.gmra.mxu1 %v9024_v22  ;;  %v17908_v2 = vor.u32 %v8515_v26, %v8512_v42  ;;  %v13365_v59 = vld [vmem:[%s19592_s1 + $0x370] sm:$0xff]  }
 0x303   : > { %v8302_v4 = vsel %vm20729_vm3, %v17766_v15, 0  ;;  %v8303_v14 = vsel %vm20731_vm5, %v17824_v19, 0  ;;  %v6497_v38 = vrot.slane %v11096_v6, 5  ;;  %v11329_v21 = vcombine.low %v17870_v44, %v17883_v12  ;;  %12804 = vmatpush3.bf16.msra.mxu1 %v13358_v37  ;;  %12748 = vmatpush3.bf16.msra.mxu0 %v13361_v36  ;;  %v13366_v17 = vld [vmem:[%s19592_s1 + $0x2d0] sm:$0xff]   ;;  %v17926_v6 = vpop.f32.mrf.mxu1 }
 0x304   : > { %20732 = vst [vmem:[#allocation47_spill] sm:$0xff] %v17908_v2  ;;  %v11319_v63 = vcombine.low %v8302_v4, %v8303_v14  ;;  %v6054_v42 = vsel %vm20315_vm9, %v6037_v57, 0  ;;  %vm20733_vm13 = vcmp.ne.s16.totalorder %v20713_v25, 0  ;;  %v8337_v37 = vsel %vm20718_vm14, %v17764_v34, 0  ;;  %12805 = vmatprep.subr.bf16.mxu1 %v13362_v7  ;;  %12749 = vmatprep.subr.bf16.mxu0 %v13364_v54  ;;  %v13369_v57 = vld [vmem:[%s19592_s1 + $0x3a8] sm:$0xff]  }
 0x305   : > { %v8336_v26 = vsel %vm20733_vm13, %v8333_v46, 0  ;;  %vm20734_vm8 = vsmask.f32 3328  ;;  %vm20735_vm4 = vcmask 1042432   ;;  %v13367_v46 = vld [vmem:[%s19592_s1 + $0x308] sm:$0xff]   ;;  %v20736_v20 = vrot.slane %v17900_v29, 5  ;;  %v17951_v18 = vpop.f32.mrf.mxu1 }
 0x306   : > { %v8517_v36 = vsel %vm20734_vm8, %v17817_v50, %v17908_v2  ;;  %v6498_v33 = vsel %vm20735_vm4, %v6495_v11, %v6497_v38  ;;  %v9162_v22 = vshrl.u32 %v11319_v63, 16  ;;  %v9165_v4 = vshll.u32 %v11319_v63, 16  ;;  %vm20737_vm8 = vmmov %vm20735_vm4  ;;  %20738 = vst [vmem:[#allocation19_spill] sm:$0xff] %v17951_v18 }
 0x307   : > { %v9085_v14 = vshrl.u32 %v8517_v36, 16  ;;  %v9088_v47 = vshll.u32 %v8517_v36, 16  ;;  %v7118_v35 = vshrl.u32 %v6498_v33, 16  ;;  %v7121_v25 = vshll.u32 %v6498_v33, 16  ;;  %12806 = vmatpush3.bf16.msra.mxu1 %v13365_v59  ;;  %12750 = vmatpush3.bf16.msra.mxu0 %v13366_v17  ;;  %v13368_v36 = vld [vmem:[%s19592_s1 + $0x2c8] sm:$0xff]   ;;  %v13371_v17 = vld [vmem:[%s19592_s1 + $0x300] sm:$0xff]  }
 0x308   : > { %v6500_v11 = vsel %vm20737_vm8, %v6497_v38, %v20736_v20  ;;  %v9164_v7 = vrot.slane %v9162_v22, 3  ;;  %v9167_v54 = vrot.slane %v9165_v4, 4  ;;  %v8519_v63 = vshrl.u32 %v11329_v21, 16  ;;  %v13372_v33 = vld [vmem:[%s19592_s1 + $0x368] sm:$0xff]   ;;  %12751 = vmatprep.subr.bf16.mxu0 %v13367_v46  ;;  %12807 = vmatprep.subr.bf16.mxu1 %v13369_v57  ;;  %v17960_v20 = vpop.f32.mrf.mxu0  ;;  %v17979_v46 = vpop.f32.mrf.mxu1 }
 0x309   : > { %v9087_v51 = vrot.slane %v9085_v14, 3  ;;  %v9090_v28 = vrot.slane %v9088_v47, 4  ;;  %v7120_v50 = vrot.slane %v7118_v35, 3  ;;  %v7123_v39 = vrot.slane %v7121_v25, 4  ;;  %20743 = vst [vmem:[#allocation48_spill] sm:$0xff] %v17979_v46 }
 0x30a   : > { %v7181_v38 = vshrl.u32 %v6500_v11, 16  ;;  %v7184_v22 = vshll.u32 %v6500_v11, 16  ;;  %v17953_v4 = vor.u32 %v9167_v54, %v9164_v7  ;;  %v8521_v14 = vrot.slane %v8519_v63, 4  ;;  %v13376_v63 = vld [vmem:[%s19592_s1 + $0x360] sm:$0xff]  }
 0x30b   : > { %v17955_v25 = vor.u32 %v9090_v28, %v9087_v51  ;;  %v7124_v35 = vor.u32 %v7123_v39, %v7120_v50  ;;  %v8522_v47 = vshll.u32 %v11329_v21, 16  ;;  %v11098_v59 = vcombine.low %v6054_v42, %v6054_v42  ;;  %v13374_v39 = vld [vmem:[%s19592_s1 + $0x3a0] sm:$0xff]   ;;  %12752 = vmatpush3.bf16.msra.mxu0 %v13368_v36  ;;  %12808 = vmatpush3.bf16.msra.mxu1 %v13372_v33  ;;  %v13377_v36 = vld [vmem:[%s19592_s1 + $0x438] sm:$0xff]  }
 0x30c   : > { %v7183_v43 = vrot.slane %v7181_v38, 3  ;;  %v7186_v18 = vrot.slane %v7184_v22, 4  ;;  %vm20740_vm4 = vsmask.f32 4352  ;;  %v8338_v28 = vsel %vm20599_vm1, %v17766_v15, 0  ;;  %12753 = vmatprep.subr.bf16.mxu0 %v13371_v17  ;;  %v13379_v22 = vld [vmem:[%s19592_s1 + $0x398] sm:$0xff]   ;;  %12809 = vmatprep.subr.bf16.mxu1 %v13374_v39 }
 0x30d   : > { %20739 = vst [vmem:[#allocation54_spill] sm:$0xff] %v17955_v25  ;;  %v9169_v11 = vsel %vm20740_vm4, %v17872_v0, %v17953_v4  ;;  %vm20741_vm13 = vmmov %vm20740_vm4  ;;  %v8524_v21 = vrot.slane %v8522_v47, 5  ;;  %v6501_v42 = vrot.slane %v11098_v59, 5  ;;  %v13373_v0 = vld [vmem:[%s19592_s1 + $0x2c0] sm:$0xff]   ;;  %v11343_v7 = vcombine.low %v8336_v26, %v8337_v37  ;;  %v18004_v47 = vpop.f32.mrf.mxu0 }
 0x30e   : > { %v9170_v51 = vsel %vm20741_vm13, %v17852_v40, %v17955_v25  ;;  %vm20742_vm8 = vmmov %vm20740_vm4  ;;  %v7187_v57 = vor.u32 %v7186_v18, %v7183_v43  ;;  %v8339_v40 = vsel %vm20602_vm10, %v17824_v19, 0  ;;  %v20746_v18 = vrot.slane %v17900_v29, 5  ;;  %v20748_v37 = vld [vmem:[#allocation20_spill] sm:$0xff]  ;;  %20750 = vst [vmem:[#allocation65_spill] sm:$0xff] %v18004_v47 }
 0x30f   : > { %v7125_v50 = vsel %vm20742_vm8, %v17863_v8, %v7124_v35  ;;  %10156 = vmatprep.mubr.bf16.mxu1 %v9170_v51  ;;  %v20744_v8 = vld [vmem:[#allocation18_spill] sm:$0xff]  ;;  %v17993_v33 = vor.u32 %v8524_v21, %v8521_v14  ;;  %vm20747_vm13 = vcmask 1042432   ;;  %v11344_v26 = vcombine.low %v8338_v28, %v8339_v40  ;;  %v18010_v21 = vld [vmem:[#allocation3 + $0x68] sm:$0xf]  ;;  %12754 = vmatpush3.bf16.msra.mxu0 %v13373_v0  ;;  %v18022_v10 = vpop.f32.mrf.mxu0 }
 0x310   : > { %13036 = vmatmul.mubr.bf16.gmra.mxu0 %v7125_v50  ;;  %vm20745_vm4 = vnez %v20744_v8  ;;  %10157 = vmatmul.mubr.bf16.gmra.mxu1 %v9169_v11  ;;  %v6502_v43 = vsel %vm20747_vm13, %v20746_v18, %v6501_v42  ;;  %vm20749_vm8 = vnez %v20748_v37  ;;  %vm20751_vm10 = vsmask.f32 4352  ;;  %v13381_v42 = vld [vmem:[%s19592_s1 + $0x358] sm:$0xff]   ;;  %v13384_v0 = vld [vmem:[%s19592_s1 + $0x390] sm:$0xff]   ;;  %20754 = vst [vmem:[#allocation49_spill] sm:$0xff] %v18022_v10  ;;  %v13394_v10 = vld [vmem:[%s19592_s1 + $0x340] sm:$0xff]  }
 0x311   : > { %v8304_v54 = vsel %vm20745_vm4, %v17836_v3, 0  ;;  %v8305_v38 = vsel %vm20749_vm8, %v17870_v44, 0  ;;  %v7188_v59 = vsel %vm20751_vm10, %v7124_v35, %v7187_v57  ;;  %v7262_v14 = vshrl.u32 %v6502_v43, 16  ;;  %v18015_v35 = vpop.f32.mrf.mxu1  ;;  %12810 = vmatpush3.bf16.msra.mxu1 %v13376_v63  ;;  %12867 = vmatprep.subr.bf16.mxu0 %v13377_v36 }
 0x312   : > { %v7265_v11 = vshll.u32 %v6502_v43, 16  ;;  %v9060_v51 = vshrl.u32 %v11343_v7, 16  ;;  %13039 = vmatprep.mubr.bf16.mxu0 %v7188_v59  ;;  %vm20752_vm13 = vsmask.f32 3328  ;;  %v9063_v28 = vshll.u32 %v11343_v7, 16  ;;  %20753 = vst [vmem:[#allocation46_spill] sm:$0xff] %v18015_v35  ;;  %12811 = vmatprep.subr.bf16.mxu1 %v13379_v22 }
 0x313   : > { %v8526_v29 = vsel %vm20752_vm13, %v17908_v2, %v17993_v33  ;;  %v9068_v50 = vshrl.u32 %v11344_v26, 16  ;;  %v9071_v17 = vshll.u32 %v11344_v26, 16  ;;  %v7264_v39 = vrot.slane %v7262_v14, 3  ;;  %v18017_v59 = vld [vmem:[#allocation3 + $0x6c] sm:$0xf]  ;;  %v18024_v62 = vpop.f32.mrf.mxu1 }
 0x314   : > { %v9136_v40 = vshrl.u32 %v8526_v29, 16  ;;  %v9139_v18 = vshll.u32 %v8526_v29, 16  ;;  %v7267_v43 = vrot.slane %v7265_v11, 4  ;;  %v9062_v7 = vrot.slane %v9060_v51, 3 }
 0x315   : > { %v9065_v46 = vrot.slane %v9063_v28, 4  ;;  %v9070_v26 = vrot.slane %v9068_v50, 3  ;;  %v9073_v47 = vrot.slane %v9071_v17, 4  ;;  %v11320_v2 = vcombine.low %v8304_v54, %v8305_v38  ;;  %v18033_v51 = vpop.f32.mrf.mxu1  ;;  %12812 = vmatpush3.bf16.msra.mxu1 %v13381_v42 }
 0x316   : > { %v9138_v29 = vrot.slane %v9136_v40, 3  ;;  %v9141_v14 = vrot.slane %v9139_v18, 4  ;;  %v7268_v11 = vor.u32 %v7267_v43, %v7264_v39  ;;  %v11330_v36 = vcombine.low %v18010_v21, %v18017_v59  ;;  %20756 = vst [vmem:[#allocation38_spill] sm:$0xff] %v18033_v51  ;;  %12813 = vmatprep.subr.bf16.mxu1 %v13384_v0 }
 0x317   : > { %v9066_v35 = vor.u32 %v9065_v46, %v9062_v7  ;;  %v18026_v63 = vor.u32 %v9073_v47, %v9070_v26  ;;  %vm20755_vm10 = vcmp.ne.s16.totalorder %v20484_v41, 0  ;;  %vm20758_vm13 = vsmask.f32 4352  ;;  %v13386_v46 = vld [vmem:[%s19592_s1 + $0x350] sm:$0xff]   ;;  %v18061_v43 = vpop.f32.mrf.mxu1 }
 0x318   : > { %v8316_v22 = vsel %vm20755_vm10, %v17755_v23, 0  ;;  %v18035_v28 = vor.u32 %v9141_v14, %v9138_v29  ;;  %v7269_v50 = vsel %vm20758_vm13, %v7187_v57, %v7268_v11  ;;  %v9227_v17 = vshrl.u32 %v11320_v2, 16  ;;  %vm20759_vm1 = vmmov %vm20758_vm13  ;;  %v18049_v57 = vpop.f32.mrf.mxu0  ;;  %20764 = vst [vmem:[#allocation52_spill] sm:$0xff] %v18061_v43  ;;  %v18067_v14 = vld [vmem:[#allocation3 + $0x74] sm:$0xf] }
 0x319   : > { %v9230_v40 = vshll.u32 %v11320_v2, 16  ;;  %13040 = vmatmul.mubr.bf16.gmra.mxu0 %v7269_v50  ;;  %v9075_v54 = vsel %vm20759_vm1, %v9066_v35, %v18026_v63  ;;  %v8528_v38 = vshrl.u32 %v11330_v36, 16  ;;  %v8531_v47 = vshll.u32 %v11330_v36, 16  ;;  %v13389_v2 = vld [vmem:[%s19592_s1 + $0x388] sm:$0xff]   ;;  %20760 = vst [vmem:[#allocation58_spill] sm:$0xff] %v18049_v57  ;;  %vm20761_vm10 = vmmov %vm20759_vm1  ;;  %12814 = vmatpush3.bf16.msra.mxu1 %v13386_v46 }
 0x31a   : > { %20757 = vst [vmem:[#allocation50_spill] sm:$0xff] %v18035_v28  ;;  %v8317_v23 = vsel %vm13886_vm0, %v17762_v32, 0  ;;  %v18054_v42 = vsel %vm20761_vm10, %v17955_v25, %v18035_v28  ;;  %10245 = vmatprep.mubr.bf16.mxu0 %v9075_v54  ;;  %v9229_v35 = vrot.slane %v9227_v17, 3  ;;  %vm20763_vm1 = vcmp.ne.s16.totalorder %v20675_v9, 0  ;;  %v18059_v32 = vld [vmem:[#allocation3 + $0x70] sm:$0xf]  ;;  %v18069_v11 = vpop.f32.mrf.mxu0  ;;  %12815 = vmatprep.subr.bf16.mxu1 %v13389_v2  ;;  %vm20768_vm13 = vmmov %vm20761_vm10  ;;  %v18103_v2 = vpop.f32.mrf.mxu1 }
 0x31b   : > { %20762 = vst [vmem:[#allocation45_spill] sm:$0xff] %v18054_v42  ;;  %v9232_v18 = vrot.slane %v9230_v40, 4  ;;  %v8318_v39 = vsel %vm20763_vm1, %v17764_v34, 0  ;;  %10164 = vmatprep.mubr.bf16.mxu1 %v18054_v42  ;;  %v8530_v7 = vrot.slane %v8528_v38, 4  ;;  %v8533_v26 = vrot.slane %v8531_v47, 5  ;;  %20765 = vst [vmem:[#allocation29_spill] sm:$0xff] %v18069_v11 }
 0x31c   : > { %v8319_v0 = vsel %vm20680_vm12, %v17766_v15, 0  ;;  %v11334_v29 = vcombine.low %v8316_v22, %v8317_v23  ;;  %v8340_v50 = vsel %vm20729_vm3, %v17836_v3, 0  ;;  %v8341_v17 = vsel %vm20731_vm5, %v17870_v44, 0  ;;  %v13390_v15 = vld [vmem:[%s19592_s1 + $0x348] sm:$0xff]   ;;  %v13393_v23 = vld [vmem:[%s19592_s1 + $0x380] sm:$0xff]   ;;  %20771 = vst [vmem:[#allocation33_spill] sm:$0xff] %v18103_v2  ;;  %v18116_v25 = vpop.f32.mrf.mxu1 }
 0x31d   : > { %v18071_v36 = vor.u32 %v9232_v18, %v9229_v35  ;;  %v18073_v34 = vcombine.low %v8318_v39, %v8319_v0  ;;  %v18084_v22 = vor.u32 %v8533_v26, %v8530_v7  ;;  %v11345_v54 = vcombine.low %v8340_v50, %v8341_v17  ;;  %v18092_v35 = vpop.f32.mrf.mxu0  ;;  %v20769_v39 = vld [vmem:[#allocation24_spill] sm:$0xff]  ;;  %12816 = vmatpush3.bf16.msra.mxu1 %v13390_v15 }
 0x31e   : > { %v8606_v40 = vrot.slane %v11334_v29, 5  ;;  %v8306_v47 = vsel %vm20634_vm2, %v17883_v12, 0  ;;  %20767 = vst [vmem:[#allocation51_spill] sm:$0xff] %v18092_v35  ;;  %vm20770_vm10 = vnez %v20769_v39  ;;  %v11331_v26 = vcombine.low %v18059_v32, %v18067_v14  ;;  %12817 = vmatprep.subr.bf16.mxu1 %v13393_v23  ;;  %20775 = vst [vmem:[#allocation60_spill] sm:$0xff] %v18116_v25 }
 0x31f   : > { %v9234_v46 = vsel %vm20768_vm13, %v17953_v4, %v18071_v36  ;;  %v19882_v18 = vrot.slane %v18073_v34, 5  ;;  %v8307_v7 = vsel %vm20770_vm10, %v18010_v21, 0  ;;  %vm20772_vm1 = vsmask.f32 3328 }
 0x320   : > { %10165 = vmatmul.mubr.bf16.gmra.mxu1 %v9234_v46  ;;  %v8535_v0 = vsel %vm20772_vm1, %v17993_v33, %v18084_v22  ;;  %v9043_v29 = vshrl.u32 %v8606_v40, 16  ;;  %v9046_v50 = vshll.u32 %v8606_v40, 16  ;;  %v9181_v17 = vshrl.u32 %v11345_v54, 16  ;;  %v18114_v33 = vpop.f32.mrf.mxu0 }
 0x321   : > { %v9209_v4 = vshrl.u32 %v8535_v0, 16  ;;  %v9212_v35 = vshll.u32 %v8535_v0, 16  ;;  %vm20773_vm13 = vcmask 1042432   ;;  %v9184_v51 = vshll.u32 %v11345_v54, 16  ;;  %20774 = vst [vmem:[#allocation53_spill] sm:$0xff] %v18114_v33  ;;  %v18121_v0 = vld [vmem:[%s19592_s1 + $0x478] sm:$0xff]   ;;  %12818 = vmatpush3.bf16.msra.mxu1 %v13394_v10 }
 0x322   : > { %v8608_v43 = vsel %vm20773_vm13, %v8606_v40, %v19882_v18  ;;  %v9045_v46 = vrot.slane %v9043_v29, 3  ;;  %v9048_v24 = vrot.slane %v9046_v50, 4  ;;  %20776 = vst [vmem:[#allocation61_spill] sm:$0xff] %v18121_v0  ;;  %v9183_v54 = vrot.slane %v9181_v17, 3  ;;  %13043 = vmatprep.subr.bf16.mxu1 %v18121_v0 }
 0x323   : > { %v9051_v31 = vshrl.u32 %v8608_v43, 16  ;;  %v9054_v42 = vshll.u32 %v8608_v43, 16  ;;  %v9211_v40 = vrot.slane %v9209_v4, 3  ;;  %v9214_v15 = vrot.slane %v9212_v35, 4 }
 0x324   : > { %v9186_v18 = vrot.slane %v9184_v51, 4  ;;  %v9049_v2 = vor.u32 %v9048_v24, %v9045_v46  ;;  %v11321_v50 = vcombine.low %v8306_v47, %v8307_v7  ;;  %v8537_v23 = vshrl.u32 %v11331_v26, 16  ;;  %v18135_v24 = vpop.f32.mrf.mxu0  ;;  %v18137_v51 = vpop.f32.mrf.mxu1  ;;  %v13382_v7 = vld [vmem:[%s19592_s1 + $0x430] sm:$0xff]  }
 0x325   : > { %v9053_v11 = vrot.slane %v9051_v31, 3  ;;  %v9056_v29 = vrot.slane %v9054_v42, 4  ;;  %v18123_v57 = vor.u32 %v9214_v15, %v9211_v40  ;;  %v8540_v33 = vshll.u32 %v11331_v26, 16  ;;  %v13378_v31 = vld [vmem:[%s19592_s1 + $0x3f8] sm:$0xff]   ;;  %20778 = vst [vmem:[#allocation56_spill] sm:$0xff] %v18137_v51 }
 0x326   : > { %v18125_v43 = vor.u32 %v9186_v18, %v9183_v54  ;;  %v9290_v53 = vshrl.u32 %v11321_v50, 16  ;;  %v9293_v9 = vshll.u32 %v11321_v50, 16  ;;  %vm20777_vm1 = vcmp.ne.s16.totalorder %v20689_v30, 0  ;;  %v18148_v18 = vld [vmem:[#allocation3 + $0x78] sm:$0xf] }
 0x327   : > { %v18127_v25 = vor.u32 %v9056_v29, %v9053_v11  ;;  %v8320_v35 = vsel %vm20777_vm1, %v17824_v19, 0  ;;  %vm20779_vm13 = vsmask.f32 4352  ;;  %v8539_v11 = vrot.slane %v8537_v23, 4  ;;  %v20784_v29 = vld [vmem:[#allocation26_spill] sm:$0xff] }
 0x328   : > { %v18143_v10 = vsel %vm20779_vm13, %v18035_v28, %v18123_v57  ;;  %vm20781_vm5 = vmmov %vm20779_vm13  ;;  %v8542_v47 = vrot.slane %v8540_v33, 5  ;;  %v9292_v17 = vrot.slane %v9290_v53, 3  ;;  %v9295_v4 = vrot.slane %v9293_v9, 4  ;;  %v18161_v33 = vpop.f32.mrf.mxu0  ;;  %v20786_v23 = vld [vmem:[#allocation30_spill] sm:$0xff] }
 0x329   : > { %20780 = vst [vmem:[#allocation57_spill] sm:$0xff] %v18143_v10  ;;  %v9188_v42 = vsel %vm20781_vm5, %v18026_v63, %v18125_v43  ;;  %10172 = vmatprep.mubr.bf16.mxu1 %v18143_v10  ;;  %vm20782_vm1 = vmmov %vm20781_vm5  ;;  %v8321_v46 = vsel %vm20610_vm11, %v17836_v3, 0  ;;  %v18159_v63 = vld [vmem:[#allocation3 + $0x7c] sm:$0xf]  ;;  %v8342_v54 = vsel %vm20745_vm4, %v17883_v12, 0  ;;  %v8343_v9 = vsel %vm20749_vm8, %v18010_v21, 0 }
 0x32a   : > { %v9058_v26 = vsel %vm20782_vm1, %v9049_v2, %v18127_v25  ;;  %20783 = vst [vmem:[#allocation55_spill] sm:$0xff] %v18161_v33  ;;  %v18163_v40 = vor.u32 %v8542_v47, %v8539_v11  ;;  %v18165_v15 = vcombine.low %v8320_v35, %v8321_v46  ;;  %v9296_v53 = vor.u32 %v9295_v4, %v9292_v17  ;;  %v13383_v11 = vld [vmem:[%s19592_s1 + $0x3f0] sm:$0xff]   ;;  %v18182_v47 = vpop.f32.mrf.mxu1  ;;  %v13387_v46 = vld [vmem:[%s19592_s1 + $0x428] sm:$0xff]  }
 0x32b   : > { %10246 = vmatmul.mubr.bf16.vlgmr.msra.gmra.mxu0 %v9058_v26  ;;  %v11346_v2 = vcombine.low %v8342_v54, %v8343_v9  ;;  %vm20785_vm5 = vnez %v20784_v29  ;;  %vm20787_vm13 = vnez %v20786_v23  ;;  %20788 = vst [vmem:[#allocation44_spill] sm:$0xff] %v18182_v47  ;;  %v18184_v26 = vpop.f32.mrf.mxu0  ;;  %vm20790_vm1 = vsmask.f32 3328 }
 0x32c   : > { %10253 = vmatprep.mubr.bf16.mxu0 %v9188_v42  ;;  %12868 = vmatpush3.bf16.msra.mxu0 %v13378_v31  ;;  %v8308_v50 = vsel %vm20785_vm5, %v18017_v59, 0  ;;  %v8309_v35 = vsel %vm20787_vm13, %v18059_v32, 0  ;;  %20789 = vst [vmem:[#allocation37_spill] sm:$0xff] %v18184_v26  ;;  %v8544_v31 = vsel %vm20790_vm1, %v18084_v22, %v18163_v40  ;;  %v19893_v42 = vrot.slane %v18165_v15, 5 }
 0x32d   : > { %v11322_v17 = vcombine.low %v8308_v50, %v8309_v35  ;;  %v11332_v4 = vcombine.low %v18148_v18, %v18159_v63  ;;  %12869 = vmatprep.subr.bf16.mxu0 %v13382_v7  ;;  %vm20791_vm8 = vsmask.f32 4352  ;;  %v9272_v9 = vshrl.u32 %v8544_v31, 16 }
 0x32e   : > { %v9297_v54 = vsel %vm20791_vm8, %v18071_v36, %v9296_v53  ;;  %v9275_v47 = vshll.u32 %v8544_v31, 16  ;;  %v9245_v51 = vshrl.u32 %v11346_v2, 16  ;;  %v20792_v22 = vrot.slane %v18073_v34, 5  ;;  %v13388_v36 = vld [vmem:[%s19592_s1 + $0x3e8] sm:$0xff]   ;;  %v18205_v31 = vpop.f32.mrf.mxu1 }
 0x32f   : > { %10173 = vmatmul.mubr.bf16.gmra.mxu1 %v9297_v54  ;;  %vm20793_vm1 = vcmask 1042432   ;;  %v9248_v35 = vshll.u32 %v11346_v2, 16  ;;  %v9353_v26 = vshrl.u32 %v11322_v17, 16  ;;  %v9356_v7 = vshll.u32 %v11322_v17, 16  ;;  %20794 = vst [vmem:[#allocation27_spill] sm:$0xff] %v18205_v31  ;;  %v18207_v54 = vpop.f32.mrf.mxu0  ;;  %v13391_v2 = vld [vmem:[%s19592_s1 + $0x420] sm:$0xff]  }
 0x330   : > { %v8610_v50 = vsel %vm20793_vm1, %v20792_v22, %v19893_v42  ;;  %v9274_v37 = vrot.slane %v9272_v9, 3  ;;  %v9277_v8 = vrot.slane %v9275_v47, 4  ;;  %12870 = vmatpush3.bf16.msra.mxu0 %v13383_v11  ;;  %20795 = vst [vmem:[#allocation62_spill] sm:$0xff] %v18207_v54  ;;  %v9247_v0 = vrot.slane %v9245_v51, 3 }
 0x331   : > { %v9172_v10 = vshrl.u32 %v8610_v50, 16  ;;  %v9175_v28 = vshll.u32 %v8610_v50, 16  ;;  %v9250_v34 = vrot.slane %v9248_v35, 4  ;;  %v9355_v33 = vrot.slane %v9353_v26, 3  ;;  %12871 = vmatprep.subr.bf16.mxu0 %v13387_v46  ;;  %v18214_v50 = vpop.f32.mrf.mxu1 }
 0x332   : > { %v9358_v22 = vrot.slane %v9356_v7, 4  ;;  %v18212_v47 = vor.u32 %v9277_v8, %v9274_v37  ;;  %v8546_v9 = vshrl.u32 %v11332_v4, 16  ;;  %v8549_v51 = vshll.u32 %v11332_v4, 16  ;;  %v18246_v7 = vld [vmem:[#allocation3 + $0x80] sm:$0xf] }
 0x333   : > { %v9174_v11 = vrot.slane %v9172_v10, 3  ;;  %v9177_v17 = vrot.slane %v9175_v28, 4  ;;  %v18216_v42 = vor.u32 %v9250_v34, %v9247_v0  ;;  %vm20796_vm8 = vcmp.ne.s16.totalorder %v20695_v13, 0  ;;  %v13392_v0 = vld [vmem:[%s19592_s1 + $0x3e0] sm:$0xff]   ;;  %v18236_v10 = vpop.f32.mrf.mxu0  ;;  %v13395_v34 = vld [vmem:[%s19592_s1 + $0x418] sm:$0xff]  }
 0x334   : > { %v18218_v31 = vor.u32 %v9358_v22, %v9355_v33  ;;  %v8322_v26 = vsel %vm20796_vm8, %v17870_v44, 0  ;;  %vm20797_vm1 = vsmask.f32 4352  ;;  %v8548_v37 = vrot.slane %v8546_v9, 4  ;;  %12872 = vmatpush3.bf16.msra.mxu0 %v13388_v36  ;;  %20799 = vst [vmem:[#allocation64_spill] sm:$0xff] %v18236_v10  ;;  %v13399_v10 = vld [vmem:[%s19592_s1 + $0x3d0] sm:$0xff]  }
 0x335   : > { %v18226_v46 = vsel %vm20797_vm1, %v18123_v57, %v18212_v47  ;;  %v18228_v8 = vor.u32 %v9177_v17, %v9174_v11  ;;  %v8323_v28 = vsel %vm20622_vm6, %v17883_v12, 0  ;;  %vm20800_vm8 = vmmov %vm20797_vm1  ;;  %v8551_v4 = vrot.slane %v8549_v51, 5  ;;  %v18248_v36 = vld [vmem:[#allocation3 + $0x84] sm:$0xf]  ;;  %12873 = vmatprep.subr.bf16.mxu0 %v13391_v2  ;;  %v18265_v11 = vpop.f32.mrf.mxu1  ;;  %v18267_v17 = vpop.f32.mrf.mxu0 }
 0x336   : > { %20798 = vst [vmem:[#allocation63_spill] sm:$0xff] %v18226_v46  ;;  %10180 = vmatprep.mubr.bf16.mxu1 %v18226_v46  ;;  %v9252_v57 = vsel %vm20800_vm8, %v18125_v43, %v18216_v42  ;;  %v9360_v33 = vsel %vm20797_vm1, %v9296_v53, %v18218_v31  ;;  %v18244_v35 = vcombine.low %v8322_v26, %v8323_v28  ;;  %vm20801_vm4 = vmmov %vm20797_vm1  ;;  %v8344_v43 = vsel %vm20634_vm2, %v18017_v59, 0 }
 0x337   : > { %v9179_v22 = vsel %vm20801_vm4, %v18127_v25, %v18228_v8  ;;  %v8345_v53 = vsel %vm20770_vm10, %v18059_v32, 0  ;;  %vm20802_vm8 = vnez %v20660_v55  ;;  %20803 = vst [vmem:[#allocation17_spill] sm:$0xff] %v18265_v11  ;;  %20804 = vst [vmem:[#allocation28_spill] sm:$0xff] %v18267_v17  ;;  %10181 = vmatmul.mubr.bf16.gmra.mxu1 %v9360_v33  ;;  %v18269_v9 = vor.u32 %v8551_v4, %v8548_v37  ;;  %v13396_v33 = vld [vmem:[%s19592_s1 + $0x3d8] sm:$0xff]  }
 0x338   : > { %v8310_v2 = vsel %vm20802_vm8, %v18067_v14, 0  ;;  %10254 = vmatmul.mubr.bf16.gmra.mxu0 %v9179_v22  ;;  %v19903_v25 = vrot.slane %v18244_v35, 5  ;;  %v11347_v51 = vcombine.low %v8344_v43, %v8345_v53  ;;  %vm20805_vm4 = vnez %v20661_v16 }
 0x339   : > { %v8311_v26 = vsel %vm20805_vm4, %v18148_v18, 0  ;;  %10261 = vmatprep.mubr.bf16.mxu0 %v9252_v57  ;;  %v11333_v54 = vcombine.low %v18246_v7, %v18248_v36  ;;  %vm20806_vm1 = vcmp.ne.s16.totalorder %v20704_v45, 0  ;;  %v8325_v37 = vsel %vm20244_vm7, %v18017_v59, 0  ;;  %12874 = vmatpush3.bf16.msra.mxu0 %v13392_v0  ;;  %v13398_v0 = vld [vmem:[%s19592_s1 + $0x410] sm:$0xff]  }
 0x33a   : > { %v11323_v28 = vcombine.low %v8310_v2, %v8311_v26  ;;  %v8324_v11 = vsel %vm20806_vm1, %v18010_v21, 0  ;;  %vm20807_vm10 = vsmask.f32 3328  ;;  %v20808_v4 = vrot.slane %v18165_v15, 5  ;;  %12875 = vmatprep.subr.bf16.mxu0 %v13395_v34  ;;  %v18297_v2 = vpop.f32.mrf.mxu0 }
 0x33b   : > { %v8553_v57 = vsel %vm20807_vm10, %v18163_v40, %v18269_v9  ;;  %vm20809_vm2 = vcmask 1042432   ;;  %v9308_v43 = vshrl.u32 %v11347_v51, 16  ;;  %v9311_v53 = vshll.u32 %v11347_v51, 16  ;;  %20810 = vst [vmem:[#allocation31_spill] sm:$0xff] %v18297_v2  ;;  %v18299_v40 = vpop.f32.mrf.mxu1 }
 0x33c   : > { %v8612_v22 = vsel %vm20809_vm2, %v20808_v4, %v19903_v25  ;;  %v9335_v26 = vshrl.u32 %v8553_v57, 16  ;;  %v9338_v39 = vshll.u32 %v8553_v57, 16  ;;  %20811 = vst [vmem:[#allocation66_spill] sm:$0xff] %v18299_v40  ;;  %v9416_v15 = vshrl.u32 %v11323_v28, 16  ;;  %v18306_v40 = vpop.f32.mrf.mxu0 }
 0x33d   : > { %v9236_v38 = vshrl.u32 %v8612_v22, 16  ;;  %v9239_v46 = vshll.u32 %v8612_v22, 16  ;;  %v9310_v58 = vrot.slane %v9308_v43, 3  ;;  %v9313_v45 = vrot.slane %v9311_v53, 4  ;;  %12876 = vmatpush3.bf16.msra.mxu0 %v13396_v33  ;;  %20812 = vst [vmem:[#allocation67_spill] sm:$0xff] %v18306_v40 }
 0x33e   : > { %v9419_v17 = vshll.u32 %v11323_v28, 16  ;;  %v9337_v4 = vrot.slane %v9335_v26, 3  ;;  %v9340_v25 = vrot.slane %v9338_v39, 4  ;;  %v9418_v57 = vrot.slane %v9416_v15, 3  ;;  %12877 = vmatprep.subr.bf16.mxu0 %v13398_v0  ;;  %v18355_v53 = vpop.f32.mrf.mxu0  ;;  %v13405_v0 = vld [vmem:[%s19592_s1 + $0x400] sm:$0xff]  }
 0x33f   : > { %v9238_v51 = vrot.slane %v9236_v38, 3  ;;  %v9241_v34 = vrot.slane %v9239_v46, 4  ;;  %v18304_v2 = vor.u32 %v9313_v45, %v9310_v58  ;;  %v8555_v22 = vshrl.u32 %v11333_v54, 16  ;;  %v18314_v46 = vpop.f32.mrf.mxu1 }
 0x340   : > { %v9421_v1 = vrot.slane %v9419_v17, 4  ;;  %v18308_v43 = vor.u32 %v9340_v25, %v9337_v4  ;;  %v8558_v39 = vshll.u32 %v11333_v54, 16  ;;  %v18312_v38 = vcombine.low %v8324_v11, %v8325_v37  ;;  %v13402_v25 = vld [vmem:[%s19592_s1 + $0x408] sm:$0xff]  }
 0x341   : > { %v18310_v28 = vor.u32 %v9241_v34, %v9238_v51  ;;  %vm20813_vm2 = vsmask.f32 4352  ;;  %v8557_v17 = vrot.slane %v8555_v22, 4  ;;  %v18323_v33 = vadd.f32 %v17926_v6, %v17885_v48  ;;  %12878 = vmatpush3.bf16.msra.mxu0 %v13399_v10  ;;  %v13403_v48 = vld [vmem:[%s19592_s1 + $0x3c8] sm:$0xff]   ;;  %v18340_v6 = vpop.f32.mrf.mxu1 }
 0x342   : > { %v9315_v45 = vsel %vm20813_vm2, %v18216_v42, %v18304_v2  ;;  %v18319_v58 = vor.u32 %v9421_v1, %v9418_v57  ;;  %vm20814_vm10 = vmmov %vm20813_vm2  ;;  %v8560_v1 = vrot.slane %v8558_v39, 5  ;;  %v19905_v11 = vrot.slane %v18312_v38, 5  ;;  %12879 = vmatprep.subr.bf16.mxu0 %v13402_v25 }
 0x343   : > { %v18331_v54 = vsel %vm20814_vm10, %v18212_v47, %v18308_v43  ;;  %vm20815_vm1 = vmmov %vm20813_vm2  ;;  %v8347_v10 = vsel %vm20787_vm13, %v18148_v18, 0  ;;  %vm20817_vm10 = vnez %v20683_v52  ;;  %v20818_v26 = vrot.slane %v18244_v35, 5  ;;  %v18370_v34 = vpop.f32.mrf.mxu1 }
 0x344   : > { %v9243_v42 = vsel %vm20815_vm1, %v18228_v8, %v18310_v28  ;;  %10188 = vmatprep.mubr.bf16.mxu1 %v18331_v54  ;;  %vm20816_vm2 = vmmov %vm20815_vm1  ;;  %v8346_v8 = vsel %vm20785_vm5, %v18067_v14, 0  ;;  %v8312_v37 = vsel %vm20817_vm10, %v18159_v63, 0  ;;  %vm20819_vm1 = vcmask 1042432   ;;  %20821 = vst [vmem:[#allocation68_spill] sm:$0xff] %v18370_v34 }
 0x345   : > { %10262 = vmatmul.mubr.bf16.gmra.mxu0 %v9243_v42  ;;  %v9423_v47 = vsel %vm20816_vm2, %v18218_v31, %v18319_v58  ;;  %v18360_v31 = vor.u32 %v8560_v1, %v8557_v17  ;;  %v8614_v15 = vsel %vm20819_vm1, %v20818_v26, %v19905_v11  ;;  %v11348_v4 = vcombine.low %v8346_v8, %v8347_v10  ;;  %v18376_v17 = vpop.f32.mrf.mxu0  ;;  %v13406_v8 = vld [vmem:[%s19592_s1 + $0x3c0] sm:$0xff]   ;;  %v18385_v11 = vpop.f32.mrf.mxu1 }
 0x346   : > { %10269 = vmatprep.mubr.bf16.mxu0 %v9315_v45  ;;  %10189 = vmatmul.mubr.bf16.gmra.mxu1 %v9423_v47  ;;  %vm20820_vm2 = vnez %v20685_v61  ;;  %v9299_v57 = vshrl.u32 %v8614_v15, 16  ;;  %v9302_v22 = vshll.u32 %v8614_v15, 16  ;;  %v18374_v45 = vadd.f32 %v17960_v20, %v17940_v49  ;;  %20823 = vst [vmem:[#allocation69_spill] sm:$0xff] %v18385_v11 }
 0x347   : > { %v8313_v51 = vsel %vm20820_vm2, %v18246_v7, 0  ;;  %vm20822_vm1 = vsmask.f32 3328  ;;  %v9371_v42 = vshrl.u32 %v11348_v4, 16  ;;  %v9374_v1 = vshll.u32 %v11348_v4, 16  ;;  %12880 = vmatpush3.bf16.msra.mxu0 %v13403_v48 }
 0x348   : > { %v11324_v39 = vcombine.low %v8312_v37, %v8313_v51  ;;  %v8562_v35 = vsel %vm20822_vm1, %v18269_v9, %v18360_v31  ;;  %v9551_v47 = vshrl.u32 %v18360_v31, 16  ;;  %v9301_v49 = vrot.slane %v9299_v57, 3  ;;  %12881 = vmatprep.subr.bf16.mxu0 %v13405_v0  ;;  %v18387_v9 = vpop.f32.mrf.mxu0 }
 0x349   : > { %v9398_v10 = vshrl.u32 %v8562_v35, 16  ;;  %v9401_v37 = vshll.u32 %v8562_v35, 16  ;;  %v9304_v20 = vrot.slane %v9302_v22, 4  ;;  %v9373_v25 = vrot.slane %v9371_v42, 3  ;;  %20824 = vst [vmem:[#allocation70_spill] sm:$0xff] %v18387_v9 }
 0x34a   : > { %v9376_v26 = vrot.slane %v9374_v1, 4  ;;  %v9479_v15 = vshrl.u32 %v11324_v39, 16  ;;  %v9482_v51 = vshll.u32 %v11324_v39, 16  ;;  %v9553_v40 = vrot.slane %v9551_v47, 3 }
 0x34b   : > { %v9400_v4 = vrot.slane %v9398_v10, 3  ;;  %v9403_v34 = vrot.slane %v9401_v37, 4  ;;  %v18389_v48 = vor.u32 %v9304_v20, %v9301_v49  ;;  %v9554_v57 = vshll.u32 %v18360_v31, 16  ;;  %12882 = vmatpush3.bf16.msra.mxu0 %v13406_v8  ;;  %v18407_v10 = vpop.f32.mrf.mxu1 }
 0x34c   : > { %v18391_v23 = vor.u32 %v9376_v26, %v9373_v25  ;;  %v9481_v29 = vrot.slane %v9479_v15, 3  ;;  %v9484_v35 = vrot.slane %v9482_v51, 4  ;;  %vm20825_vm1 = vsmask.f32 4352  ;;  %v20833_v26 = vld [vmem:[#allocation6_spill] sm:$0xff] }
 0x34d   : > { %v18394_v0 = vor.u32 %v9403_v34, %v9400_v4  ;;  %v9306_v22 = vsel %vm20825_vm1, %v18310_v28, %v18389_v48  ;;  %vm20826_vm13 = vmmov %vm20825_vm1  ;;  %v9556_v1 = vrot.slane %v9554_v57, 4  ;;  %vm20827_vm5 = vcmp.ne.s16.totalorder %v20708_v60, 0  ;;  %v18409_v34 = vpop.f32.mrf.mxu0  ;;  %v13465_v51 = vld [vmem:[#allocation3 + $0x50] sm:$0xf] }
 0x34e   : > { %10270 = vmatmul.mubr.bf16.gmra.mxu0 %v9306_v22  ;;  %v9378_v39 = vsel %vm20826_vm13, %v18304_v2, %v18391_v23  ;;  %v18402_v42 = vor.u32 %v9484_v35, %v9481_v29  ;;  %v8326_v47 = vsel %vm20827_vm5, %v18059_v32, 0  ;;  %20828 = vst [vmem:[#allocation71_spill] sm:$0xff] %v18409_v34  ;;  %vm20829_vm3 = vmmov %vm20825_vm1  ;;  %v8327_v29 = vsel %vm20261_vm15, %v18067_v14, 0  ;;  %v20830_v2 = vld [vmem:[#allocation46_spill] sm:$0xff] }
 0x34f   : > { %v18414_v28 = vsel %vm20829_vm3, %v18308_v43, %v18394_v0  ;;  %10277 = vmatprep.mubr.bf16.mxu0 %v9378_v39  ;;  %v18421_v8 = vadd.f32 %v18024_v62, %v20830_v2  ;;  %vm20832_vm5 = vmmov %vm20825_vm1  ;;  %v9557_v49 = vor.u32 %v9556_v1, %v9553_v40  ;;  %v18427_v20 = vcombine.low %v8326_v47, %v8327_v29  ;;  %v18429_v43 = vpop.f32.mrf.mxu1  ;;  %v18445_v22 = vpop.f32.mrf.mxu0  ;;  %v13466_v39 = vld [vmem:[#allocation3 + $0x54] sm:$0xf] }
 0x350   : > { %10196 = vmatprep.mubr.bf16.mxu1 %v18414_v28  ;;  %v9486_v37 = vsel %vm20832_vm5, %v18319_v58, %v18402_v42  ;;  %v8348_v25 = vsel %vm20802_vm8, %v18159_v63, 0  ;;  %v8349_v62 = vsel %vm20805_vm4, %v18246_v7, 0  ;;  %vm20834_vm3 = vcmp.ne.s16.totalorder %v20833_v26, 0  ;;  %v20836_v47 = vld [vmem:[#allocation10_spill] sm:$0xff] }
 0x351   : > { %20831 = vst [vmem:[#allocation46_spill] sm:$0xff] %v18421_v8  ;;  %10197 = vmatmul.mubr.bf16.gmra.mxu1 %v9486_v37  ;;  %v8314_v15 = vsel %vm20834_vm3, %v18248_v36, 0  ;;  %vm20835_vm13 = vcmp.ne.s16.totalorder %v20484_v41, 0  ;;  %v9558_v58 = vsel %vm20825_vm1, %v18394_v0, %v9557_v49  ;;  %v11349_v35 = vcombine.low %v8348_v25, %v8349_v62  ;;  %v20839_v49 = vld [vmem:[#allocation58_spill] sm:$0xff]  ;;  %v18459_v25 = vpop.f32.mrf.mxu1 }
 0x352   : > { %v8354_v40 = vsel %vm20835_vm13, %v13465_v51, 0  ;;  %v11325_v57 = vcombine.low %v8314_v15, %v8314_v15  ;;  %10204 = vmatprep.mubr.bf16.mxu1 %v9558_v58  ;;  %v8355_v1 = vsel %vm13886_vm0, %v13466_v39, 0  ;;  %vm20837_vm5 = vcmp.ne.s16.totalorder %v20836_v47, 0  ;;  %v20840_v51 = vld [vmem:[#allocation29_spill] sm:$0xff]  ;;  %20841 = vst [vmem:[#allocation58_spill] sm:$0xff] %v18459_v25 }
 0x353   : > { %v8356_v29 = vsel %vm20837_vm5, %v17824_v19, 0  ;;  %v8357_v37 = vsel %vm20680_vm12, %v17836_v3, 0  ;;  %v18457_v4 = vadd.f32 %v20840_v51, %v20839_v49  ;;  %v20842_v62 = vrot.slane %v18427_v20, 5  ;;  %v18466_v19 = vpop.f32.mrf.mxu0 }
 0x354   : > { %v20843_v15 = vrot.slane %v18312_v38, 5  ;;  %vm20844_vm3 = vcmask 1042432   ;;  %v9434_v39 = vshrl.u32 %v11349_v35, 16  ;;  %v9437_v34 = vshll.u32 %v11349_v35, 16 }
 0x355   : > { %v9542_v9 = vshrl.u32 %v11325_v57, 16  ;;  %v9545_v3 = vshll.u32 %v11325_v57, 16  ;;  %v11353_v55 = vcombine.low %v8354_v40, %v8355_v1  ;;  %v18468_v2 = vcombine.low %v8356_v29, %v8357_v37  ;;  %v18470_v25 = vpop.f32.mrf.mxu0  ;;  %vm20847_vm13 = vmmov %vm20844_vm3  ;;  %v18488_v1 = vld [vmem:[#allocation3 + $0x88] sm:$0xf] }
 0x356   : > { %v8616_v58 = vsel %vm20844_vm3, %v20843_v15, %v20842_v62  ;;  %v9436_v8 = vrot.slane %v9434_v39, 3  ;;  %v9439_v49 = vrot.slane %v9437_v34, 4  ;;  %20845 = vst [vmem:[#allocation29_spill] sm:$0xff] %v18470_v25  ;;  %v18472_v15 = vpop.f32.mrf.mxu1  ;;  %vm20853_vm3 = vsmask.f32 4352 }
 0x357   : > { %v9362_v11 = vshrl.u32 %v8616_v58, 16  ;;  %v9365_v16 = vshll.u32 %v8616_v58, 16  ;;  %v9544_v51 = vrot.slane %v9542_v9, 3  ;;  %v9547_v5 = vrot.slane %v9545_v3, 4  ;;  %20846 = vst [vmem:[#allocation72_spill] sm:$0xff] %v18472_v15  ;;  %v18490_v29 = vpop.f32.mrf.mxu0  ;;  %vm20854_vm4 = vmmov %vm20853_vm3  ;;  %v20857_v15 = vld [vmem:[#allocation60_spill] sm:$0xff] }
 0x358   : > { %v8723_v62 = vrot.slane %v11353_v55, 5  ;;  %v18474_v35 = vor.u32 %v9439_v49, %v9436_v8  ;;  %v19916_v41 = vrot.slane %v18468_v2, 5  ;;  %v20850_v55 = vld [vmem:[#allocation36_spill] sm:$0xff]  ;;  %v18497_v3 = vpop.f32.mrf.mxu1 }
 0x359   : > { %v9364_v47 = vrot.slane %v9362_v11, 3  ;;  %v9367_v38 = vrot.slane %v9365_v16, 4  ;;  %v9548_v40 = vor.u32 %v9547_v5, %v9544_v51  ;;  %v20848_v11 = vld [vmem:[#allocation32_spill] sm:$0xff]  ;;  %vm20851_vm5 = vnez %v20850_v55 }
 0x35a   : > { %v9094_v57 = vshrl.u32 %v8723_v62, 16  ;;  %v9097_v34 = vshll.u32 %v8723_v62, 16  ;;  %v8725_v9 = vsel %vm20847_vm13, %v8723_v62, %v19916_v41  ;;  %vm20849_vm1 = vcmp.ne.s16.totalorder %v20848_v11, 0  ;;  %20852 = vst [vmem:[#allocation32_spill] sm:$0xff] %v18490_v29  ;;  %vm20855_vm13 = vmmov %vm20853_vm3 }
 0x35b   : > { %v18477_v58 = vor.u32 %v9367_v38, %v9364_v47  ;;  %v8328_v16 = vsel %vm20849_vm1, %v18148_v18, 0  ;;  %v8329_v8 = vsel %vm20851_vm5, %v18159_v63, 0  ;;  %v9549_v47 = vsel %vm20854_vm4, %v18402_v42, %v9548_v40  ;;  %v18511_v40 = vpop.f32.mrf.mxu1 }
 0x35c   : > { %v9096_v37 = vrot.slane %v9094_v57, 3  ;;  %v9099_v39 = vrot.slane %v9097_v34, 4  ;;  %v9441_v49 = vsel %vm20855_vm13, %v18391_v23, %v18474_v35  ;;  %10205 = vmatmul.mubr.bf16.gmra.mxu1 %v9549_v47  ;;  %v9102_v51 = vshrl.u32 %v8725_v9, 16 }
 0x35d   : > { %v9369_v5 = vsel %vm20853_vm3, %v18389_v48, %v18477_v58  ;;  %v9105_v38 = vshll.u32 %v8725_v9, 16  ;;  %v18502_v62 = vcombine.low %v8328_v16, %v8329_v8  ;;  %v20856_v48 = vld [vmem:[#allocation33_spill] sm:$0xff]  ;;  %v8351_v42 = vsel %vm20820_vm2, %v18488_v1, 0  ;;  %v18517_v16 = vpop.f32.mrf.mxu0 }
 0x35e   : > { %10278 = vmatmul.mubr.bf16.gmra.mxu0 %v9369_v5  ;;  %v9100_v41 = vor.u32 %v9099_v39, %v9096_v37  ;;  %v18506_v29 = vadd.f32 %v20857_v15, %v20856_v48  ;;  %v9104_v57 = vrot.slane %v9102_v51, 3  ;;  %v8350_v9 = vsel %vm20817_vm10, %v18248_v36, 0  ;;  %v20859_v5 = vld [vmem:[#allocation59_spill] sm:$0xff]  ;;  %v18524_v39 = vpop.f32.mrf.mxu1 }
 0x35f   : > { %10285 = vmatprep.mubr.bf16.mxu0 %v9441_v49  ;;  %v9107_v34 = vrot.slane %v9105_v38, 4  ;;  %v8617_v23 = vrot.slane %v18502_v62, 5  ;;  %v11350_v8 = vcombine.low %v8350_v9, %v8351_v42  ;;  %v9077_v15 = vshrl.u32 %v20859_v5, 16  ;;  %20861 = vst [vmem:[#allocation33_spill] sm:$0xff] %v18524_v39  ;;  %v20864_v48 = vld [vmem:[#allocation55_spill] sm:$0xff]  ;;  %v18538_v9 = vpop.f32.mrf.mxu0 }
 0x360   : > { %20858 = vst [vmem:[#allocation36_spill] sm:$0xff] %v18506_v29  ;;  %v9080_v47 = vshll.u32 %v20859_v5, 16  ;;  %vm20860_vm4 = vcmp.ne.s16.totalorder %v20689_v30, 0  ;;  %v20862_v51 = vrot.slane %v18427_v20, 5  ;;  %vm20863_vm1 = vcmask 1042432   ;;  %v18546_v29 = vpop.f32.mrf.mxu1 }
 0x361   : > { %v8358_v37 = vsel %vm20860_vm4, %v17870_v44, 0  ;;  %v18526_v49 = vor.u32 %v9107_v34, %v9104_v57  ;;  %v8359_v62 = vsel %vm20610_vm11, %v17883_v12, 0  ;;  %v18536_v42 = vadd.f32 %v20864_v48, %v18135_v24  ;;  %v18544_v61 = vpop.f32.mrf.mxu0  ;;  %20866 = vst [vmem:[#allocation59_spill] sm:$0xff] %v18546_v29 }
 0x362   : > { %v8618_v38 = vsel %vm20863_vm1, %v20862_v51, %v8617_v23  ;;  %v9497_v25 = vshrl.u32 %v11350_v8, 16  ;;  %v9500_v39 = vshll.u32 %v11350_v8, 16  ;;  %v9079_v20 = vrot.slane %v9077_v15, 3  ;;  %20865 = vst [vmem:[#allocation60_spill] sm:$0xff] %v18544_v61  ;;  %v20868_v15 = vld [vmem:[#allocation40_spill] sm:$0xff]  ;;  %vm20873_vm1 = vmmov %vm20853_vm3 }
 0x363   : > { %v9425_v5 = vshrl.u32 %v8618_v38, 16  ;;  %v9428_v44 = vshll.u32 %v8618_v38, 16  ;;  %v9109_v57 = vsel %vm20853_vm3, %v9100_v41, %v18526_v49  ;;  %v9082_v34 = vrot.slane %v9080_v47, 4  ;;  %v18549_v8 = vpop.f32.mrf.mxu0 }
 0x364   : > { %v18542_v51 = vcombine.low %v8358_v37, %v8359_v62  ;;  %10342 = vmatprep.mubr.bf16.mxu1 %v9109_v57  ;;  %v9499_v24 = vrot.slane %v9497_v25, 3  ;;  %v9502_v48 = vrot.slane %v9500_v39, 4  ;;  %20867 = vst [vmem:[#allocation55_spill] sm:$0xff] %v18549_v8  ;;  %vm20869_vm13 = vcmp.ne.s16.totalorder %v20868_v15, 0  ;;  %v20870_v37 = vld [vmem:[#allocation43_spill] sm:$0xff]  ;;  %v13401_v62 = vld [vmem:[%s19592_s1 + $0x470] sm:$0xff]  }
 0x365   : > { %v9427_v12 = vrot.slane %v9425_v5, 3  ;;  %v9430_v52 = vrot.slane %v9428_v44, 4  ;;  %v9083_v56 = vor.u32 %v9082_v34, %v9079_v20  ;;  %v8330_v47 = vsel %vm20869_vm13, %v18246_v7, 0  ;;  %v18561_v39 = vld [vmem:[#allocation3 + $0x8c] sm:$0xf]  ;;  %v20872_v5 = vld [vmem:[#allocation54_spill] sm:$0xff]  ;;  %vm20876_vm13 = vmmov %vm20873_vm1 }
 0x366   : > { %v19921_v38 = vrot.slane %v18542_v51, 5  ;;  %v18553_v41 = vor.u32 %v9502_v48, %v9499_v24  ;;  %vm20871_vm4 = vnez %v20870_v37  ;;  %v20874_v44 = vrot.slane %v18468_v2, 5  ;;  %v18578_v48 = vpop.f32.mrf.mxu1 }
 0x367   : > { %v18551_v30 = vor.u32 %v9430_v52, %v9427_v12  ;;  %v8331_v25 = vsel %vm20871_vm4, %v18248_v36, 0  ;;  %v9092_v52 = vsel %vm20873_vm1, %v9083_v56, %v20872_v5  ;;  %vm20875_vm3 = vcmask 1042432   ;;  %20877 = vst [vmem:[#allocation40_spill] sm:$0xff] %v18578_v48  ;;  %v20878_v5 = vld [vmem:[#allocation61_spill] sm:$0xff] }
 0x368   : > { %v8727_v57 = vsel %vm20875_vm3, %v20874_v44, %v19921_v38  ;;  %v18573_v20 = vcombine.low %v8330_v47, %v8331_v25  ;;  %10343 = vmatmul.mubr.bf16.vlgmr.msra.gmra.mxu1 %v9092_v52  ;;  %v9504_v56 = vsel %vm20873_vm1, %v18474_v35, %v18553_v41  ;;  %v20879_v47 = vld [vmem:[#allocation27_spill] sm:$0xff]  ;;  %vm20881_vm3 = vcmp.ne.s16.totalorder %v20833_v26, 0  ;;  %v18592_v52 = vpop.f32.mrf.mxu0  ;;  %v13404_v35 = vld [vmem:[%s19592_s1 + $0x468] sm:$0xff]  }
 0x369   : > { %v9432_v34 = vsel %vm20876_vm13, %v18477_v58, %v18551_v30  ;;  %v9191_v12 = vshrl.u32 %v8727_v57, 16  ;;  %v9194_v24 = vshll.u32 %v8727_v57, 16  ;;  %13044 = vmatpush3.bf16.msra.mxu1 %v20878_v5  ;;  %v18587_v25 = vadd.f32 %v18214_v50, %v20879_v47  ;;  %v18597_v5 = vpop.f32.mrf.mxu1 }
 0x36a   : > { %10286 = vmatmul.mubr.bf16.gmra.mxu0 %v9432_v34  ;;  %v19922_v2 = vrot.slane %v18573_v20, 5  ;;  %v8352_v58 = vsel %vm20881_vm3, %v18561_v39, 0  ;;  %13045 = vmatprep.subr.bf16.mxu1 %v13401_v62  ;;  %20882 = vst [vmem:[#allocation61_spill] sm:$0xff] %v18597_v5  ;;  %vm20883_vm13 = vcmask 1042432   ;;  %vm20884_vm1 = vcmp.ne.s16.totalorder %v20695_v13, 0  ;;  %v18612_v48 = vpop.f32.mrf.mxu0 }
 0x36b   : > { %20880 = vst [vmem:[#allocation54_spill] sm:$0xff] %v18587_v25  ;;  %10293 = vmatprep.mubr.bf16.mxu0 %v9504_v56  ;;  %v9193_v44 = vrot.slane %v9191_v12, 3  ;;  %v9196_v57 = vrot.slane %v9194_v24, 4  ;;  %v11351_v34 = vcombine.low %v8352_v58, %v8352_v58  ;;  %v8360_v47 = vsel %vm20884_vm1, %v18010_v21, 0  ;;  %v20886_v24 = vld [vmem:[#allocation64_spill] sm:$0xff] }
 0x36c   : > { %v8620_v50 = vsel %vm20883_vm13, %v8617_v23, %v19922_v2  ;;  %v8361_v12 = vsel %vm20622_vm6, %v18017_v59, 0  ;;  %v20887_v58 = vld [vmem:[#allocation28_spill] sm:$0xff]  ;;  %v8315_v23 = vld [vmem:[#allocation3 + $0x88] sm:$0x1]  ;;  %v18616_v2 = vpop.f32.mrf.mxu1  ;;  %v18620_v25 = vpop.f32.mrf.mxu0  ;;  %vm20890_vm3 = vsmask.f32 4352 }
 0x36d   : > { %v18610_v38 = vadd.f32 %v20887_v58, %v20886_v24  ;;  %v18614_v8 = vor.u32 %v9196_v57, %v9193_v44  ;;  %v9488_v5 = vshrl.u32 %v8620_v50, 16  ;;  %v9491_v61 = vshll.u32 %v8620_v50, 16  ;;  %20888 = vst [vmem:[#allocation27_spill] sm:$0xff] %v18616_v2  ;;  %13046 = vmatpush3.bf16.msra.mxu1 %v13401_v62  ;;  %20889 = vst [vmem:[#allocation64_spill] sm:$0xff] %v18620_v25  ;;  %v13407_v57 = vld [vmem:[%s19592_s1 + $0x460] sm:$0xff]  }
 0x36e   : > { %v9569_v29 = vshrl.u32 %v11351_v34, 16  ;;  %v9572_v26 = vshll.u32 %v11351_v34, 16  ;;  %v18618_v21 = vcombine.low %v8360_v47, %v8361_v12  ;;  %13047 = vmatprep.subr.bf16.mxu1 %v13404_v35  ;;  %v8332_v62 = vsel %vm20315_vm9, %v8315_v23, 0  ;;  %v18631_v12 = vpop.f32.mrf.mxu1  ;;  %vm20898_vm1 = vmmov %vm20890_vm3 }
 0x36f   : > { %v9198_v59 = vsel %vm20890_vm3, %v18526_v49, %v18614_v8  ;;  %v9490_v24 = vrot.slane %v9488_v5, 3  ;;  %v9493_v58 = vrot.slane %v9491_v61, 4  ;;  %20892 = vst [vmem:[#allocation28_spill] sm:$0xff] %v18631_v12  ;;  %v20893_v49 = vld [vmem:[#allocation45_spill] sm:$0xff]  ;;  %v11342_v61 = vcombine.low %v8332_v62, %v8332_v62  ;;  %v20895_v5 = vld [vmem:[#allocation47_spill] sm:$0xff]  ;;  %vm20899_vm3 = vmmov %vm20898_vm1 }
 0x370   : > { %v9571_v44 = vrot.slane %v9569_v29, 3  ;;  %10350 = vmatprep.mubr.bf16.mxu1 %v9198_v59  ;;  %v9574_v50 = vrot.slane %v9572_v26, 4  ;;  %v8728_v34 = vrot.slane %v18618_v21, 5  ;;  %v18638_v29 = vadd.f32 %v18340_v6, %v18314_v46  ;;  %v18641_v59 = vpop.f32.mrf.mxu0  ;;  %v13408_v6 = vld [vmem:[%s19592_s1 + $0x458] sm:$0xff]  }
 0x371   : > { %v18633_v2 = vor.u32 %v9493_v58, %v9490_v24  ;;  %10351 = vmatmul.mubr.bf16.gmra.mxu1 %v20893_v49  ;;  %v9128_v25 = vshrl.u32 %v20895_v5, 16  ;;  %20896 = vst [vmem:[#allocation45_spill] sm:$0xff] %v18641_v59  ;;  %v20897_v21 = vrot.slane %v18542_v51, 5  ;;  %v9131_v12 = vshll.u32 %v20895_v5, 16  ;;  %v8371_v5 = vld [vmem:[#allocation3 + $0x54] sm:$0x8] }
 0x372   : > { %20894 = vst [vmem:[#allocation42_spill] sm:$0xff] %v18638_v29  ;;  %v9575_v26 = vor.u32 %v9574_v50, %v9571_v44  ;;  %13048 = vmatpush3.bf16.msra.mxu1 %v13404_v35  ;;  %v8621_v46 = vrot.slane %v11342_v61, 5  ;;  %v20900_v35 = vld [vmem:[#allocation22_spill] sm:$0xff] }
 0x373   : > { %v8729_v23 = vsel %vm20883_vm13, %v20897_v21, %v8728_v34  ;;  %v9495_v24 = vsel %vm20898_vm1, %v18551_v30, %v18633_v2  ;;  %13049 = vmatprep.subr.bf16.mxu1 %v13407_v57  ;;  %v9130_v44 = vrot.slane %v9128_v25, 3  ;;  %v9133_v50 = vrot.slane %v9131_v12, 4  ;;  %v18658_v30 = vpop.f32.mrf.mxu1  ;;  %v18666_v25 = vpop.f32.mrf.mxu0 }
 0x374   : > { %v9254_v58 = vshrl.u32 %v8729_v23, 16  ;;  %v9257_v62 = vshll.u32 %v8729_v23, 16  ;;  %10294 = vmatmul.mubr.bf16.gmra.mxu0 %v9495_v24  ;;  %v9576_v51 = vsel %vm20899_vm3, %v18553_v41, %v9575_v26  ;;  %vm20901_vm13 = vcmp.ne.s16.totalorder %v20900_v35, 0  ;;  %20902 = vst [vmem:[#allocation47_spill] sm:$0xff] %v18658_v30  ;;  %v20922_v35 = vld [vmem:[#allocation57_spill] sm:$0xff] }
 0x375   : > { %v8362_v49 = vsel %vm20901_vm13, %v18059_v32, 0  ;;  %10301 = vmatprep.mubr.bf16.mxu0 %v9576_v51  ;;  %v20903_v23 = vrot.slane %v18573_v20, 5  ;;  %vm20904_vm1 = vcmask 1042432   ;;  %v8363_v41 = vsel %vm20244_vm7, %v18067_v14, 0  ;;  %v18670_v32 = vpop.f32.mrf.mxu1  ;;  %v20908_v20 = vld [vmem:[#allocation4_spill] sm:$0xff]  ;;  %v13409_v14 = vld [vmem:[%s19592_s1 + $0x450] sm:$0xff]  }
 0x376   : > { %v9256_v61 = vrot.slane %v9254_v58, 3  ;;  %v9259_v21 = vrot.slane %v9257_v62, 4  ;;  %v18668_v29 = vcombine.low %v8362_v49, %v8363_v41  ;;  %13050 = vmatpush3.bf16.msra.mxu1 %v13407_v57  ;;  %20906 = vst [vmem:[#allocation73_spill] sm:$0xff] %v18670_v32  ;;  %v18674_v58 = vadd.f32 %v18376_v17, %v18355_v53  ;;  %v18693_v41 = vld [vmem:[#allocation3 + $0x5c] sm:$0xf] }
 0x377   : > { %v8622_v59 = vsel %vm20904_vm1, %v20903_v23, %v8621_v46  ;;  %vm20909_vm3 = vcmp.ne.s16.totalorder %v20908_v20, 0  ;;  %13051 = vmatprep.subr.bf16.mxu1 %v13408_v6  ;;  %v18681_v46 = vpop.f32.mrf.mxu0  ;;  %v18684_v23 = vpop.f32.mrf.mxu1  ;;  %vm20911_vm13 = vsmask.f32 4352  ;;  %v9134_v17 = vor.u32 %v9133_v50, %v9130_v44  ;;  %v20913_v20 = vld [vmem:[#allocation8_spill] sm:$0xff]  ;;  %v20917_v50 = vld [vmem:[#allocation9_spill] sm:$0xff] }
 0x378   : > { %v9560_v12 = vshrl.u32 %v8622_v59, 16  ;;  %v9563_v26 = vshll.u32 %v8622_v59, 16  ;;  %v9260_v51 = vor.u32 %v9259_v21, %v9256_v61  ;;  %20907 = vst [vmem:[#allocation74_spill] sm:$0xff] %v18674_v58  ;;  %v8374_v62 = vsel %vm20909_vm3, %v8371_v5, 0  ;;  %20910 = vst [vmem:[#allocation4_spill] sm:$0xff] %v18684_v23 }
 0x379   : > { %v18688_v61 = vld [vmem:[#allocation3 + $0x58] sm:$0xf]  ;;  %vm20914_vm1 = vnez %v20913_v20  ;;  %v20915_v23 = vrot.slane %v18668_v29, 5  ;;  %vm20916_vm3 = vcmask 1042432   ;;  %v18703_v44 = vld [vmem:[#allocation3 + $0x60] sm:$0xf]  ;;  %v18708_v30 = vpop.f32.mrf.mxu1 }
 0x37a   : > { %v9562_v59 = vrot.slane %v9560_v12, 3  ;;  %v9565_v49 = vrot.slane %v9563_v26, 4  ;;  %v9261_v53 = vsel %vm20911_vm13, %v18614_v8, %v9260_v51  ;;  %v8375_v21 = vsel %vm20718_vm14, %v18688_v61, 0  ;;  %v18698_v26 = vpop.f32.mrf.mxu0  ;;  %13052 = vmatpush3.bf16.msra.mxu1 %v13408_v6  ;;  %20919 = vst [vmem:[#allocation7_spill] sm:$0xff] %v18708_v30  ;;  %v20920_v20 = vld [vmem:[#allocation50_spill] sm:$0xff] }
 0x37b   : > { %v8376_v12 = vsel %vm20914_vm1, %v18693_v41, 0  ;;  %10358 = vmatprep.mubr.bf16.mxu1 %v9261_v53  ;;  %v8731_v8 = vsel %vm20916_vm3, %v8728_v34, %v20915_v23  ;;  %vm20918_vm13 = vnez %v20917_v50  ;;  %v11362_v32 = vcombine.low %v8374_v62, %v8375_v21  ;;  %13053 = vmatprep.subr.bf16.mxu1 %v13409_v14  ;;  %v13410_v34 = vld [vmem:[%s19592_s1 + $0x448] sm:$0xff]   ;;  %v18724_v50 = vpop.f32.mrf.mxu1 }
 0x37c   : > { %v9566_v57 = vor.u32 %v9565_v49, %v9562_v59  ;;  %v8377_v5 = vsel %vm20918_vm13, %v18703_v44, 0  ;;  %vm20921_vm14 = vsmask.f32 4352  ;;  %10359 = vmatmul.mubr.bf16.gmra.mxu1 %v20922_v35  ;;  %v9317_v59 = vshrl.u32 %v8731_v8, 16  ;;  %v18716_v23 = vpop.f32.mrf.mxu0  ;;  %20925 = vst [vmem:[#allocation9_spill] sm:$0xff] %v18724_v50 }
 0x37d   : > { %v9143_v24 = vsel %vm20921_vm14, %v9134_v17, %v20920_v20  ;;  %v9320_v49 = vshll.u32 %v8731_v8, 16  ;;  %v11363_v53 = vcombine.low %v8376_v12, %v8377_v5  ;;  %vm20923_vm1 = vmmov %vm20921_vm14  ;;  %v9111_v62 = vshrl.u32 %v11362_v32, 16 }
 0x37e   : > { %v9567_v6 = vsel %vm20923_vm1, %v18633_v2, %v9566_v57  ;;  %v9114_v21 = vshll.u32 %v11362_v32, 16  ;;  %v18722_v17 = vadd.f32 %v18429_v43, %v18407_v10  ;;  %v9319_v12 = vrot.slane %v9317_v59, 3  ;;  %v18726_v30 = vpop.f32.mrf.mxu0  ;;  %13054 = vmatpush3.bf16.msra.mxu1 %v13409_v14  ;;  %v18731_v32 = vpop.f32.mrf.mxu1  ;;  %vm20931_vm13 = vmmov %vm20923_vm1 }
 0x37f   : > { %10302 = vmatmul.mubr.bf16.gmra.mxu0 %v9567_v6  ;;  %v9322_v8 = vrot.slane %v9320_v49, 4  ;;  %v9119_v5 = vshrl.u32 %v11363_v53, 16  ;;  %v9122_v20 = vshll.u32 %v11363_v53, 16  ;;  %20926 = vst [vmem:[#allocation50_spill] sm:$0xff] %v18726_v30  ;;  %v9113_v58 = vrot.slane %v9111_v62, 3  ;;  %20928 = vst [vmem:[#allocation57_spill] sm:$0xff] %v18731_v32  ;;  %13055 = vmatprep.subr.bf16.mxu1 %v13410_v34 }
 0x380   : > { %20924 = vst [vmem:[#allocation8_spill] sm:$0xff] %v18722_v17  ;;  %10439 = vmatprep.mubr.bf16.mxu0 %v9143_v24  ;;  %v9116_v56 = vrot.slane %v9114_v21, 4  ;;  %vm20927_vm3 = vcmp.ne.s16.totalorder %v20708_v60, 0  ;;  %v8365_v59 = vsel %vm20261_vm15, %v18159_v63, 0  ;;  %v13411_v24 = vld [vmem:[%s19592_s1 + $0x440] sm:$0xff]   ;;  %v18741_v49 = vpop.f32.mrf.mxu0  ;;  %v18747_v14 = vpop.f32.mrf.mxu1  ;;  %v20932_v63 = vld [vmem:[#allocation13_spill] sm:$0xff] }
 0x381   : > { %v8364_v2 = vsel %vm20927_vm3, %v18148_v18, 0  ;;  %v18733_v10 = vor.u32 %v9322_v8, %v9319_v12  ;;  %v9121_v43 = vrot.slane %v9119_v5, 3  ;;  %v9124_v57 = vrot.slane %v9122_v20, 4  ;;  %20929 = vst [vmem:[#allocation75_spill] sm:$0xff] %v18741_v49  ;;  %20930 = vst [vmem:[#allocation76_spill] sm:$0xff] %v18747_v14  ;;  %v20934_v5 = vld [vmem:[#allocation15_spill] sm:$0xff] }
 0x382   : > { %v11358_v53 = vcombine.low %v8364_v2, %v8365_v59  ;;  %v18745_v18 = vadd.f32 %v18466_v19, %v18445_v22  ;;  %v18751_v21 = vld [vmem:[#allocation3 + $0x64] sm:$0xf]  ;;  %vm20933_vm14 = vnez %v20932_v63  ;;  %v18756_v8 = vld [vmem:[#allocation3 + $0x68] sm:$0xf]  ;;  %vm20935_vm1 = vnez %v20934_v5  ;;  %v18761_v22 = vpop.f32.mrf.mxu0  ;;  %13056 = vmatpush3.bf16.msra.mxu1 %v13410_v34 }
 0x383   : > { %v9324_v6 = vsel %vm20931_vm13, %v9260_v51, %v18733_v10  ;;  %v9125_v62 = vor.u32 %v9124_v57, %v9121_v43  ;;  %v8378_v12 = vsel %vm20933_vm14, %v18751_v21, 0  ;;  %v8379_v20 = vsel %vm20935_vm1, %v18756_v8, 0  ;;  %20936 = vst [vmem:[#allocation13_spill] sm:$0xff] %v18761_v22  ;;  %v18763_v51 = vpop.f32.mrf.mxu1  ;;  %v20938_v43 = vld [vmem:[#allocation63_spill] sm:$0xff]  ;;  %13057 = vmatprep.subr.bf16.mxu1 %v13411_v24  ;;  %v20977_v22 = vld [vmem:[#allocation53_spill] sm:$0xff] }
 0x384   : > { %10366 = vmatprep.mubr.bf16.mxu1 %v9324_v6  ;;  %v9117_v19 = vor.u32 %v9116_v56, %v9113_v58  ;;  %v8732_v2 = vrot.slane %v11358_v53, 5  ;;  %v11364_v59 = vcombine.low %v8378_v12, %v8379_v20  ;;  %20937 = vst [vmem:[#allocation15_spill] sm:$0xff] %v18763_v51  ;;  %v18768_v57 = vadd.f32 %v18511_v40, %v18497_v3  ;;  %v18776_v56 = vpop.f32.mrf.mxu0  ;;  %v18781_v58 = vld [vmem:[%s19593_s2 + $0x1] ss:$0 sm:$0xff] }
 0x385   : > { %10367 = vmatmul.mubr.bf16.gmra.mxu1 %v20938_v43  ;;  %vm20940_vm3 = vcmp.ne.s16.totalorder %v20848_v11, 0  ;;  %v8367_v6 = vsel %vm20851_vm5, %v18248_v36, 0  ;;  %20941 = vst [vmem:[#allocation77_spill] sm:$0xff] %v18776_v56  ;;  %v20942_v3 = vrot.slane %v18668_v29, 5  ;;  %vm20943_vm14 = vcmask 1042432   ;;  %v18787_v5 = vpop.f32.mrf.mxu1 }
 0x386   : > { %20939 = vst [vmem:[#allocation63_spill] sm:$0xff] %v18768_v57  ;;  %v8366_v63 = vsel %vm20940_vm3, %v18246_v7, 0  ;;  %v9126_v34 = vsel %vm20931_vm13, %v9117_v19, %v9125_v62  ;;  %v9200_v53 = vshrl.u32 %v11364_v59, 16  ;;  %v9203_v12 = vshll.u32 %v11364_v59, 16  ;;  %20944 = vst [vmem:[#allocation78_spill] sm:$0xff] %v18787_v5  ;;  %v18795_v14 = vpop.f32.mrf.mxu0  ;;  %13058 = vmatpush3.bf16.msra.mxu1 %v13411_v24  ;;  %v20950_v24 = vld [vmem:[#allocation18_spill] sm:$0xff] }
 0x387   : > { %v8733_v40 = vsel %vm20943_vm14, %v20942_v3, %v8732_v2  ;;  %10440 = vmatmul.mubr.bf16.vlgmr.msra.gmra.mxu0 %v9126_v34  ;;  %v18789_v57 = vcombine.low %v8366_v63, %v8367_v6  ;;  %v18793_v51 = vadd.f32 %v18538_v9, %v18517_v16  ;;  %20945 = vst [vmem:[#allocation79_spill] sm:$0xff] %v18795_v14  ;;  %v18798_v3 = vpop.f32.mrf.mxu1  ;;  %v20948_v16 = vld [vmem:[#allocation65_spill] sm:$0xff]  ;;  %vm20955_vm13 = vmmov %vm20943_vm14  ;;  %vm20956_vm14 = vcmp.ne.s16.totalorder %v20868_v15, 0  ;;  %v8353_v56 = vld [vmem:[#allocation3 + $0x90] sm:$0x1] }
 0x388   : > { %v9380_v36 = vshrl.u32 %v8733_v40, 16  ;;  %v9383_v20 = vshll.u32 %v8733_v40, 16  ;;  %10447 = vmatprep.mubr.bf16.mxu0 %v20922_v35  ;;  %v9202_v29 = vrot.slane %v9200_v53, 3  ;;  %v9205_v19 = vrot.slane %v9203_v12, 4  ;;  %20946 = vst [vmem:[#allocation80_spill] sm:$0xff] %v18798_v3  ;;  %v18805_v40 = vpop.f32.mrf.mxu0  ;;  %v20949_v9 = vld [vmem:[#allocation49_spill] sm:$0xff] }
 0x389   : > { %v18802_v59 = vadd.f32 %v18374_v45, %v18781_v58  ;;  %v8734_v6 = vrot.slane %v18789_v57, 5  ;;  %20947 = vst [vmem:[#allocation81_spill] sm:$0xff] %v18805_v40  ;;  %v12424_v5 = vadd.f32 %v20949_v9, %v20948_v16  ;;  %v18809_v35 = vld [vmem:[#allocation3 + $0x6c] sm:$0xf]  ;;  %vm20951_vm1 = vnez %v20950_v24  ;;  %v18814_v12 = vld [vmem:[#allocation3 + $0x70] sm:$0xf] }
 0x38a   : > { %v9382_v34 = vrot.slane %v9380_v36, 3  ;;  %v9385_v63 = vrot.slane %v9383_v20, 4  ;;  %v9206_v14 = vor.u32 %v9205_v19, %v9202_v29  ;;  %v8380_v53 = vsel %vm20951_vm1, %v18809_v35, 0  ;;  %v20952_v45 = vld [vmem:[#allocation20_spill] sm:$0xff]  ;;  %v18819_v20 = vpop.f32.mrf.mxu1  ;;  %v18825_v19 = vpop.f32.mrf.mxu0 }
 0x38b   : > { %vm20953_vm3 = vnez %v20952_v45  ;;  %20954 = vst [vmem:[#allocation65_spill] sm:$0xff] %v18819_v20  ;;  %v8735_v3 = vsel %vm20955_vm13, %v8732_v2, %v8734_v6  ;;  %v8368_v29 = vsel %vm20956_vm14, %v18488_v1, 0  ;;  %20957 = vst [vmem:[#allocation49_spill] sm:$0xff] %v18825_v19  ;;  %v11352_v16 = vcombine.low %v18488_v1, %v18561_v39 }
 0x38c   : > { %v8381_v36 = vsel %vm20953_vm3, %v18814_v12, 0  ;;  %v9386_v57 = vor.u32 %v9385_v63, %v9382_v34  ;;  %vm20958_vm1 = vsmask.f32 4352  ;;  %v9443_v24 = vshrl.u32 %v8735_v3, 16  ;;  %v18830_v32 = vpop.f32.mrf.mxu1 }
 0x38d   : > { %v11365_v40 = vcombine.low %v8380_v53, %v8381_v36  ;;  %v9207_v9 = vsel %vm20958_vm1, %v9125_v62, %v9206_v14  ;;  %v9446_v45 = vshll.u32 %v8735_v3, 16  ;;  %20959 = vst [vmem:[#allocation18_spill] sm:$0xff] %v18830_v32  ;;  %vm20960_vm3 = vmmov %vm20958_vm1  ;;  %v8369_v53 = vsel %vm20871_vm4, %v18561_v39, 0  ;;  %v18837_v36 = vpop.f32.mrf.mxu0  ;;  %v20965_v32 = vld [vmem:[#allocation48_spill] sm:$0xff] }
 0x38e   : > { %v9387_v34 = vsel %vm20960_vm3, %v18733_v10, %v9386_v57  ;;  %20961 = vst [vmem:[#allocation20_spill] sm:$0xff] %v18837_v36  ;;  %v9445_v20 = vrot.slane %v9443_v24, 3  ;;  %v18839_v50 = vcombine.low %v8368_v29, %v8369_v53  ;;  %v18843_v62 = vadd.f32 %v18612_v48, %v18592_v52  ;;  %v18845_v3 = vpop.f32.mrf.mxu1  ;;  %v20964_v10 = vld [vmem:[#allocation19_spill] sm:$0xff] }
 0x38f   : > { %v9263_v2 = vshrl.u32 %v11365_v40, 16  ;;  %v9266_v63 = vshll.u32 %v11365_v40, 16  ;;  %10374 = vmatprep.mubr.bf16.mxu1 %v9387_v34  ;;  %v9448_v19 = vrot.slane %v9446_v45, 4  ;;  %20963 = vst [vmem:[#allocation83_spill] sm:$0xff] %v18845_v3  ;;  %v18849_v40 = vadd.f32 %v20965_v32, %v20964_v10  ;;  %10448 = vmatmul.mubr.bf16.gmra.mxu0 %v9207_v9  ;;  %v18852_v34 = vld [vmem:[#allocation3 + $0x74] sm:$0xf]  ;;  %v18857_v45 = vpop.f32.mrf.mxu0 }
 0x390   : > { %20962 = vst [vmem:[#allocation82_spill] sm:$0xff] %v18843_v62  ;;  %10375 = vmatmul.mubr.bf16.gmra.mxu1 %v18331_v54  ;;  %v20966_v29 = vld [vmem:[#allocation23_spill] sm:$0xff]  ;;  %20968 = vst [vmem:[#allocation19_spill] sm:$0xff] %v18857_v45  ;;  %v18860_v48 = vadd.f32 %v12424_v5, %v18781_v58  ;;  %10455 = vmatprep.mubr.bf16.mxu0 %v20938_v43  ;;  %v8736_v32 = vrot.slane %v18839_v50, 5  ;;  %v18869_v53 = vpop.f32.mrf.mxu1  ;;  %v18873_v10 = vadd.f32 %v18457_v4, %v18781_v58  ;;  %v20973_v5 = vld [vmem:[#allocation52_spill] sm:$0xff]  ;;  %vm20975_vm3 = vcmask 1042432  }
 0x391   : > { %v9265_v17 = vrot.slane %v9263_v2, 3  ;;  %v9268_v36 = vrot.slane %v9266_v63, 4  ;;  %vm20967_vm13 = vnez %v20966_v29  ;;  %v9449_v52 = vor.u32 %v9448_v19, %v9445_v20  ;;  %v18864_v9 = vld [vmem:[#allocation3 + $0x78] sm:$0xf]  ;;  %v20969_v2 = vld [vmem:[#allocation24_spill] sm:$0xff]  ;;  %20971 = vst [vmem:[#allocation48_spill] sm:$0xff] %v18869_v53  ;;  %v18879_v19 = vpop.f32.mrf.mxu0 }
 0x392   : > { %v8382_v24 = vsel %vm20967_vm13, %v18852_v34, 0  ;;  %vm20970_vm14 = vnez %v20969_v2  ;;  %v20972_v29 = vld [vmem:[#allocation38_spill] sm:$0xff]  ;;  %20974 = vst [vmem:[#allocation23_spill] sm:$0xff] %v18879_v19  ;;  %v8737_v3 = vsel %vm20975_vm3, %v8734_v6, %v8736_v32  ;;  %v8672_v2 = vshrl.u32 %v11352_v16, 16  ;;  %v20976_v53 = vld [vmem:[#allocation51_spill] sm:$0xff]  ;;  %vm20978_vm13 = vmmov %vm20958_vm1 }
 0x393   : > { %v8383_v63 = vsel %vm20970_vm14, %v18864_v9, 0  ;;  %v18877_v62 = vadd.f32 %v20973_v5, %v20972_v29  ;;  %v9269_v43 = vor.u32 %v9268_v36, %v9265_v17  ;;  %v9450_v50 = vsel %vm20958_vm1, %v9386_v57, %v9449_v52  ;;  %v18885_v29 = vpop.f32.mrf.mxu0  ;;  %v18888_v57 = vpop.f32.mrf.mxu1 }
 0x394   : > { %v11366_v20 = vcombine.low %v8382_v24, %v8383_v63  ;;  %v8675_v45 = vshll.u32 %v11352_v16, 16  ;;  %v12430_v49 = vadd.f32 %v20977_v22, %v20976_v53  ;;  %10382 = vmatprep.mubr.bf16.mxu1 %v9450_v50  ;;  %v9506_v4 = vshrl.u32 %v8737_v3, 16 }
 0x395   : > { %v9509_v30 = vshll.u32 %v8737_v3, 16  ;;  %v9270_v17 = vsel %vm20978_vm13, %v9206_v14, %v9269_v43  ;;  %v8674_v24 = vrot.slane %v8672_v2, 4  ;;  %v8370_v19 = vsel %vm20315_vm9, %v8353_v56, 0  ;;  %v18892_v22 = vpop.f32.mrf.mxu0  ;;  %v18904_v56 = vld [vmem:[#allocation3 + $0x7c] sm:$0xf] }
 0x396   : > { %v9326_v37 = vshrl.u32 %v11366_v20, 16  ;;  %v9329_v36 = vshll.u32 %v11366_v20, 16  ;;  %v8677_v63 = vrot.slane %v8675_v45, 5  ;;  %v9508_v6 = vrot.slane %v9506_v4, 3  ;;  %v20979_v45 = vld [vmem:[#allocation26_spill] sm:$0xff] }
 0x397   : > { %v9511_v5 = vrot.slane %v9509_v30, 4  ;;  %v11361_v50 = vcombine.low %v8370_v19, %v8370_v19  ;;  %v7896_v14 = vadd.f32 %v18323_v33, %v18802_v59  ;;  %v18899_v20 = vadd.f32 %v12430_v49, %v18781_v58  ;;  %10456 = vmatmul.mubr.bf16.gmra.mxu0 %v9270_v17  ;;  %v18909_v19 = vpop.f32.mrf.mxu0  ;;  %v20983_v4 = vld [vmem:[#allocation30_spill] sm:$0xff] }
 0x398   : > { %v9328_v16 = vrot.slane %v9326_v37, 3  ;;  %v9331_v53 = vrot.slane %v9329_v36, 4  ;;  %v18894_v3 = vor.u32 %v8677_v63, %v8674_v24  ;;  %10383 = vmatmul.mubr.bf16.gmra.mxu1 %v18414_v28  ;;  %v12549_v37 = vadd.f32 %v18681_v46, %v18666_v25  ;;  %20981 = vst [vmem:[#allocation24_spill] sm:$0xff] %v18909_v19  ;;  %10463 = vmatprep.mubr.bf16.mxu0 %v18331_v54  ;;  %v18920_v46 = vpop.f32.mrf.mxu1 }
 0x399   : > { %v9512_v30 = vor.u32 %v9511_v5, %v9508_v6  ;;  %vm20980_vm14 = vnez %v20979_v45  ;;  %vm20982_vm1 = vsmask.f32 3328  ;;  %v8738_v59 = vrot.slane %v11361_v50, 5  ;;  %v18925_v54 = vpop.f32.mrf.mxu0  ;;  %v20985_v6 = vld [vmem:[#allocation37_spill] sm:$0xff]  ;;  %v20986_v5 = vld [vmem:[#allocation62_spill] sm:$0xff] }
 0x39a   : > { %v8384_v2 = vsel %vm20980_vm14, %v18904_v56, 0  ;;  %v18912_v33 = vor.u32 %v9331_v53, %v9328_v16  ;;  %v8679_v49 = vsel %vm20982_vm1, %v18360_v31, %v18894_v3  ;;  %vm20984_vm3 = vnez %v20983_v4  ;;  %vm20987_vm14 = vmmov %vm20978_vm13 }
 0x39b   : > { %v8385_v25 = vsel %vm20984_vm3, %v18246_v7, 0  ;;  %v9513_v17 = vsel %vm20978_vm13, %v9449_v52, %v9512_v30  ;;  %v9461_v36 = vshrl.u32 %v8679_v49, 16  ;;  %v9464_v24 = vshll.u32 %v8679_v49, 16  ;;  %v18932_v19 = vpop.f32.mrf.mxu0  ;;  %vm20993_vm3 = vmmov %vm20978_vm13 }
 0x39c   : > { %v18923_v63 = vadd.f32 %v12549_v37, %v7896_v14  ;;  %v12436_v16 = vadd.f32 %v20986_v5, %v20985_v6  ;;  %10390 = vmatprep.mubr.bf16.mxu1 %v9513_v17  ;;  %v9333_v31 = vsel %vm20987_vm14, %v9269_v43, %v18912_v33  ;;  %vm20988_vm1 = vcmask 1042432   ;;  %20989 = vst [vmem:[#allocation38_spill] sm:$0xff] %v18932_v19  ;;  %v18938_v6 = vpop.f32.mrf.mxu1 }
 0x39d   : > { %v8739_v53 = vsel %vm20988_vm1, %v8736_v32, %v8738_v59  ;;  %v11367_v7 = vcombine.low %v8384_v2, %v8385_v25  ;;  %v9463_v50 = vrot.slane %v9461_v36, 3  ;;  %v9466_v45 = vrot.slane %v9464_v24, 4  ;;  %20990 = vst [vmem:[#allocation52_spill] sm:$0xff] %v18938_v6  ;;  %v18943_v25 = vpop.f32.mrf.mxu0  ;;  %vm21000_vm1 = vmmov %vm20993_vm3 }
 0x39e   : > { %v9587_v4 = vshrl.u32 %v8739_v53, 16  ;;  %v9590_v52 = vshll.u32 %v8739_v53, 16  ;;  %v7899_v49 = vadd.f32 %v18849_v40, %v18860_v48  ;;  %v12552_v17 = vadd.f32 %v18716_v23, %v18698_v26  ;;  %20991 = vst [vmem:[#allocation51_spill] sm:$0xff] %v18943_v25  ;;  %v20994_v48 = vld [vmem:[#allocation5_spill] sm:$0xff] }
 0x39f   : > { %v9389_v14 = vshrl.u32 %v11367_v7, 16  ;;  %v9392_v37 = vshll.u32 %v11367_v7, 16  ;;  %v18940_v43 = vor.u32 %v9466_v45, %v9463_v50  ;;  %v9578_v59 = vshrl.u32 %v18894_v3, 16  ;;  %10464 = vmatmul.mubr.bf16.gmra.mxu0 %v9333_v31  ;;  %v18954_v50 = vpop.f32.mrf.mxu0 }
 0x3a0   : > { %v9589_v32 = vrot.slane %v9587_v4, 3  ;;  %v9592_v2 = vrot.slane %v9590_v52, 4  ;;  %v18945_v5 = vadd.f32 %v12552_v17, %v7899_v49  ;;  %v9581_v53 = vshll.u32 %v18894_v3, 16  ;;  %10471 = vmatprep.mubr.bf16.mxu0 %v18414_v28 }
 0x3a1   : > { %v9391_v36 = vrot.slane %v9389_v14, 3  ;;  %v9394_v24 = vrot.slane %v9392_v37, 4  ;;  %v9468_v26 = vsel %vm20993_vm3, %v18394_v0, %v18940_v43  ;;  %v9580_v40 = vrot.slane %v9578_v59, 3  ;;  %v20997_v0 = vld [vmem:[#allocation10_spill] sm:$0xff]  ;;  %v18965_v37 = vpop.f32.mrf.mxu1  ;;  %v18975_v59 = vpop.f32.mrf.mxu0 }
 0x3a2   : > { %20992 = vst [vmem:[#allocation53_spill] sm:$0xff] %v18945_v5  ;;  %v9593_v23 = vor.u32 %v9592_v2, %v9589_v32  ;;  %vm20995_vm13 = vcmp.ne.s16.totalorder %v20994_v48, 0  ;;  %10391 = vmatmul.mubr.bf16.gmra.mxu1 %v9468_v26  ;;  %v9583_v4 = vrot.slane %v9581_v53, 4  ;;  %v8393_v52 = vsel %vm13886_vm0, %v18693_v41, 0  ;;  %20999 = vst [vmem:[#allocation26_spill] sm:$0xff] %v18965_v37  ;;  %v21002_v32 = vld [vmem:[#allocation46_spill] sm:$0xff] }
 0x3a3   : > { %v8392_v7 = vsel %vm20995_vm13, %v18688_v61, 0  ;;  %v18957_v45 = vor.u32 %v9394_v24, %v9391_v36  ;;  %vm20998_vm14 = vcmp.ne.s16.totalorder %v20997_v0, 0  ;;  %v8395_v28 = vsel %vm20680_vm12, %v18751_v21, 0  ;;  %v21003_v36 = vld [vmem:[#allocation56_spill] sm:$0xff]  ;;  %v19007_v49 = vpop.f32.mrf.mxu1  ;;  %vm21012_vm12 = vmmov %vm21000_vm1 }
 0x3a4   : > { %v8394_v14 = vsel %vm20998_vm14, %v18703_v44, 0  ;;  %v9594_v61 = vsel %vm21000_vm1, %v9512_v30, %v9593_v23  ;;  %v11372_v17 = vcombine.low %v8392_v7, %v8393_v52  ;;  %v18973_v2 = vadd.f32 %v21002_v32, %v18873_v10  ;;  %v21004_v44 = vld [vmem:[#allocation44_spill] sm:$0xff]  ;;  %v18996_v52 = vpop.f32.mrf.mxu0  ;;  %21011 = vst [vmem:[#allocation37_spill] sm:$0xff] %v19007_v49 }
 0x3a5   : > { %v7815_v41 = vadd.f32 %v18536_v42, %v18781_v58  ;;  %v18981_v24 = vadd.f32 %v21004_v44, %v21003_v36  ;;  %10398 = vmatprep.mubr.bf16.mxu1 %v9594_v61  ;;  %v9584_v30 = vor.u32 %v9583_v4, %v9580_v40  ;;  %v18983_v53 = vcombine.low %v8394_v14, %v8395_v28  ;;  %v18988_v48 = vld [vmem:[#allocation3 + $0x84] sm:$0xf]  ;;  %v21006_v42 = vld [vmem:[#allocation35_spill] sm:$0xff]  ;;  %v21009_v4 = vld [vmem:[#allocation17_spill] sm:$0xff] }
 0x3a6   : > { %v18986_v21 = vadd.f32 %v12436_v16, %v18781_v58  ;;  %v8840_v23 = vrot.slane %v11372_v17, 5  ;;  %v8386_v7 = vsel %vm20802_vm8, %v18988_v48, 0  ;;  %vm21007_vm0 = vnez %v21006_v42  ;;  %21008 = vst [vmem:[#allocation30_spill] sm:$0xff] %v18996_v52  ;;  %v21010_v16 = vld [vmem:[#allocation66_spill] sm:$0xff]  ;;  %v19020_v10 = vpop.f32.mrf.mxu0  ;;  %vm21014_vm8 = vmmov %vm21000_vm1 }
 0x3a7   : > { %v8387_v31 = vsel %vm21007_vm0, %v18488_v1, 0  ;;  %v19000_v40 = vadd.f32 %v18610_v38, %v18781_v58  ;;  %v19004_v0 = vadd.f32 %v21010_v16, %v21009_v4  ;;  %v8841_v14 = vrot.slane %v18983_v53, 5  ;;  %v19016_v38 = vld [vmem:[#allocation3 + $0x90] sm:$0xf]  ;;  %v19018_v44 = vld [vmem:[#allocation3 + $0x94] sm:$0xf] }
 0x3a8   : > { %v11368_v61 = vcombine.low %v8386_v7, %v8387_v31  ;;  %v9396_v28 = vsel %vm21012_vm12, %v18912_v33, %v18957_v45  ;;  %v9145_v17 = vshrl.u32 %v8840_v23, 16  ;;  %v9148_v32 = vshll.u32 %v8840_v23, 16  ;;  %21013 = vst [vmem:[#allocation62_spill] sm:$0xff] %v19020_v10 }
 0x3a9   : > { %v19014_v36 = vadd.f32 %v18877_v62, %v18899_v20  ;;  %v9585_v53 = vsel %vm21014_vm8, %v18940_v43, %v9584_v30  ;;  %vm21015_vm3 = vcmask 1042432   ;;  %10472 = vmatmul.mubr.bf16.gmra.mxu0 %v9396_v28  ;;  %v21016_v62 = vld [vmem:[#allocation31_spill] sm:$0xff]  ;;  %v11371_v19 = vcombine.low %v19016_v38, %v19018_v44  ;;  %v19029_v30 = vpop.f32.mrf.mxu1 }
 0x3aa   : > { %v8842_v7 = vsel %vm21015_vm3, %v8840_v23, %v8841_v14  ;;  %v9452_v42 = vshrl.u32 %v11368_v61, 16  ;;  %v9455_v31 = vshll.u32 %v11368_v61, 16  ;;  %v9147_v33 = vrot.slane %v9145_v17, 3  ;;  %v21017_v20 = vld [vmem:[#allocation67_spill] sm:$0xff]  ;;  %10479 = vmatprep.mubr.bf16.mxu0 %v9468_v26  ;;  %10399 = vmatmul.mubr.bf16.gmra.mxu1 %v9585_v53  ;;  %21018 = vst [vmem:[#allocation5_spill] sm:$0xff] %v19029_v30  ;;  %v19031_v23 = vpop.f32.mrf.mxu0 }
 0x3ab   : > { %v9150_v4 = vrot.slane %v9148_v32, 4  ;;  %v9153_v16 = vshrl.u32 %v8842_v7, 16  ;;  %v9156_v49 = vshll.u32 %v8842_v7, 16  ;;  %v12442_v37 = vadd.f32 %v21017_v20, %v21016_v62  ;;  %21019 = vst [vmem:[#allocation11_spill] sm:$0xff] %v19031_v23  ;;  %v21020_v32 = vld [vmem:[#allocation14_spill] sm:$0xff] }
 0x3ac   : > { %v9454_v6 = vrot.slane %v9452_v42, 3  ;;  %v9457_v25 = vrot.slane %v9455_v31, 4  ;;  %vm21021_vm13 = vcmp.ne.s16.totalorder %v21020_v32, 0  ;;  %v8789_v26 = vshrl.u32 %v11371_v19, 16  ;;  %v19041_v62 = vpop.f32.mrf.mxu0  ;;  %v21033_v42 = vld [vmem:[#allocation71_spill] sm:$0xff] }
 0x3ad   : > { %v9151_v61 = vor.u32 %v9150_v4, %v9147_v33  ;;  %v9155_v28 = vrot.slane %v9153_v16, 3  ;;  %v9158_v17 = vrot.slane %v9156_v49, 4  ;;  %v8396_v7 = vsel %vm21021_vm13, %v18756_v8, 0  ;;  %21023 = vst [vmem:[#allocation10_spill] sm:$0xff] %v19041_v62 }
 0x3ae   : > { %v19036_v10 = vor.u32 %v9457_v25, %v9454_v6  ;;  %v8792_v53 = vshll.u32 %v11371_v19, 16  ;;  %v8397_v31 = vsel %vm20610_vm11, %v18809_v35, 0  ;;  %vm21024_vm14 = vcmp.ne.s16.totalorder %v20695_v13, 0  ;;  %v19054_v35 = vpop.f32.mrf.mxu1  ;;  %v19056_v16 = vpop.f32.mrf.mxu0  ;;  %vm21030_vm11 = vmmov %vm21000_vm1 }
 0x3af   : > { %v9159_v20 = vor.u32 %v9158_v17, %v9155_v28  ;;  %v11374_v30 = vcombine.low %v8396_v7, %v8397_v31  ;;  %v8398_v49 = vsel %vm21024_vm14, %v18814_v12, 0  ;;  %v8399_v8 = vsel %vm20622_vm6, %v18852_v34, 0  ;;  %21026 = vst [vmem:[#allocation12_spill] sm:$0xff] %v19054_v35  ;;  %21027 = vst [vmem:[#allocation46_spill] sm:$0xff] %v19056_v16  ;;  %v21028_v28 = vld [vmem:[#allocation68_spill] sm:$0xff]  ;;  %v21029_v17 = vld [vmem:[#allocation69_spill] sm:$0xff] }
 0x3b0   : > { %v19050_v6 = vadd.f32 %v12442_v37, %v18781_v58  ;;  %v8791_v19 = vrot.slane %v8789_v26, 4  ;;  %v8794_v25 = vrot.slane %v8792_v53, 5  ;;  %v19052_v4 = vcombine.low %v8398_v49, %v8399_v8  ;;  %v21031_v7 = vld [vmem:[#allocation36_spill] sm:$0xff]  ;;  %v21032_v37 = vld [vmem:[#allocation70_spill] sm:$0xff]  ;;  %vm21034_vm6 = vmmov %vm21000_vm1 }
 0x3b1   : > { %v19060_v32 = vadd.f32 %v21029_v17, %v21028_v28  ;;  %v9160_v13 = vsel %vm21030_vm11, %v9151_v61, %v9159_v20  ;;  %v8843_v12 = vrot.slane %v11374_v30, 5  ;;  %v19064_v34 = vadd.f32 %v21031_v7, %v7815_v41  ;;  %vm21035_vm1 = vmmov %vm21015_vm3  ;;  %v19083_v17 = vpop.f32.mrf.mxu0  ;;  %v21045_v35 = vld [vmem:[#allocation32_spill] sm:$0xff] }
 0x3b2   : > { %v12448_v26 = vadd.f32 %v21033_v42, %v21032_v37  ;;  %13059 = vmatprep.mubr.bf16.mxu1 %v9160_v13  ;;  %v9459_v53 = vsel %vm21034_vm6, %v18957_v45, %v19036_v10  ;;  %v8795_v31 = vor.u32 %v8794_v25, %v8791_v19  ;;  %v19925_v49 = vrot.slane %v19052_v4, 5  ;;  %21038 = vst [vmem:[#allocation56_spill] sm:$0xff] %v19083_v17  ;;  %vm21040_vm12 = vmmov %vm21035_vm1  ;;  %v19090_v13 = vpop.f32.mrf.mxu1 }
 0x3b3   : > { %10480 = vmatmul.mubr.bf16.gmra.mxu0 %v9459_v53  ;;  %v8844_v33 = vsel %vm21035_vm1, %v8841_v14, %v8843_v12  ;;  %v8388_v30 = vsel %vm20817_vm10, %v18561_v39, 0  ;;  %v8389_v8 = vsel %vm20820_vm2, %v19016_v38, 0  ;;  %v19081_v28 = vadd.f32 %v18981_v24, %v18986_v21  ;;  %21041 = vst [vmem:[#allocation44_spill] sm:$0xff] %v19090_v13  ;;  %v19092_v61 = vpop.f32.mrf.mxu0  ;;  %v21043_v24 = vld [vmem:[#allocation74_spill] sm:$0xff]  ;;  %vm21046_vm10 = vmmov %vm21034_vm6 }
 0x3b4   : > { %vm21039_vm0 = vsmask.f32 3328  ;;  %v9218_v19 = vshrl.u32 %v8844_v33, 16  ;;  %v9221_v25 = vshll.u32 %v8844_v33, 16  ;;  %v8846_v14 = vsel %vm21040_vm12, %v8843_v12, %v19925_v49  ;;  %21042 = vst [vmem:[#allocation34_spill] sm:$0xff] %v19092_v61  ;;  %v21044_v61 = vld [vmem:[#allocation29_spill] sm:$0xff]  ;;  %vm21047_vm2 = vmmov %vm21034_vm6 }
 0x3b5   : > { %v8796_v45 = vsel %vm21039_vm0, %v18894_v3, %v8795_v31  ;;  %v9281_v42 = vshrl.u32 %v8846_v14, 16  ;;  %v9284_v53 = vshll.u32 %v8846_v14, 16  ;;  %v19096_v21 = vadd.f32 %v21043_v24, %v18781_v58  ;;  %v19101_v14 = vpop.f32.mrf.mxu1  ;;  %vm21048_vm8 = vmmov %vm21047_vm2 }
 0x3b6   : > { %v9524_v7 = vshrl.u32 %v8796_v45, 16  ;;  %v9527_v37 = vshll.u32 %v8796_v45, 16  ;;  %v9220_v41 = vrot.slane %v9218_v19, 3  ;;  %v9223_v3 = vrot.slane %v9221_v25, 4  ;;  %vm21061_vm14 = vmmov %vm21047_vm2 }
 0x3b7   : > { %v11369_v17 = vcombine.low %v8388_v30, %v8389_v8  ;;  %v9283_v62 = vrot.slane %v9281_v42, 3  ;;  %v9286_v23 = vrot.slane %v9284_v53, 4  ;;  %v19099_v12 = vadd.f32 %v12448_v26, %v18781_v58  ;;  %v19107_v30 = vpop.f32.mrf.mxu0  ;;  %v19124_v53 = vpop.f32.mrf.mxu1  ;;  %vm21063_vm11 = vmmov %vm21035_vm1 }
 0x3b8   : > { %v9526_v33 = vrot.slane %v9524_v7, 3  ;;  %v9529_v16 = vrot.slane %v9527_v37, 4  ;;  %v9224_v49 = vor.u32 %v9223_v3, %v9220_v41  ;;  %v12454_v52 = vadd.f32 %v21045_v35, %v21044_v61  ;;  %v21049_v35 = vld [vmem:[#allocation22_spill] sm:$0xff]  ;;  %v21054_v61 = vld [vmem:[#allocation72_spill] sm:$0xff]  ;;  %vm21073_vm0 = vmmov %vm21047_vm2 }
 0x3b9   : > { %v9515_v45 = vshrl.u32 %v11369_v17, 16  ;;  %v9518_v13 = vshll.u32 %v11369_v17, 16  ;;  %v19105_v5 = vor.u32 %v9286_v23, %v9283_v62  ;;  %v9605_v19 = vshrl.u32 %v8795_v31, 16  ;;  %vm21075_vm12 = vmmov %vm21073_vm0 }
 0x3ba   : > { %v9530_v24 = vor.u32 %v9529_v16, %v9526_v33  ;;  %v9225_v8 = vsel %vm21046_vm10, %v9159_v20, %v9224_v49  ;;  %v9608_v26 = vshll.u32 %v8795_v31, 16  ;;  %vm21050_vm3 = vcmp.ne.s16.totalorder %v21049_v35, 0  ;;  %v21055_v33 = vld [vmem:[#allocation54_spill] sm:$0xff]  ;;  %vm21076_vm10 = vmmov %vm21073_vm0 }
 0x3bb   : > { %v9517_v25 = vrot.slane %v9515_v45, 3  ;;  %v9520_v7 = vrot.slane %v9518_v13, 4  ;;  %13060 = vmatmul.mubr.bf16.vlgmr.msra.gmra.mxu1 %v9225_v8  ;;  %v9288_v17 = vsel %vm21048_vm8, %v9224_v49, %v19105_v5  ;;  %v9607_v42 = vrot.slane %v9605_v19, 3  ;;  %v13478_v13 = vld [vmem:[#allocation3 + $0x80] sm:$0xf]  ;;  %v21053_v49 = vld [vmem:[#allocation58_spill] sm:$0xff]  ;;  %vm21097_vm8 = vmmov %vm21035_vm1 }
 0x3bc   : > { %v9531_v37 = vsel %vm21047_vm2, %v18940_v43, %v9530_v24  ;;  %v8400_v23 = vsel %vm21050_vm3, %v18864_v9, 0  ;;  %13063 = vmatprep.mubr.bf16.mxu1 %v9288_v17  ;;  %v9610_v20 = vrot.slane %v9608_v26, 4  ;;  %v8401_v31 = vsel %vm20244_vm7, %v18904_v56, 0  ;;  %v19137_v56 = vpop.f32.mrf.mxu0  ;;  %vm21056_vm7 = vmmov %vm21047_vm2  ;;  %v21060_v17 = vld [vmem:[#allocation59_spill] sm:$0xff] }
 0x3bd   : > { %10487 = vmatprep.mubr.bf16.mxu0 %v9531_v37  ;;  %v19117_v62 = vor.u32 %v9520_v7, %v9517_v25  ;;  %vm21052_vm13 = vcmp.ne.s16.totalorder %v20708_v60, 0  ;;  %v19128_v41 = vadd.f32 %v21054_v61, %v21053_v49  ;;  %v11376_v9 = vcombine.low %v8400_v23, %v8401_v31  ;;  %v19146_v7 = vpop.f32.mrf.mxu1  ;;  %v21059_v37 = vld [vmem:[#allocation33_spill] sm:$0xff]  ;;  %vm21088_vm2 = vmmov %vm21035_vm1 }
 0x3be   : > { %v8402_v43 = vsel %vm21052_vm13, %v13478_v13, 0  ;;  %v8403_v3 = vsel %vm20261_vm15, %v18988_v48, 0  ;;  %v19135_v45 = vadd.f32 %v21055_v33, %v19000_v40  ;;  %v19141_v60 = vadd.f32 %v18745_v18, %v18781_v58  ;;  %v21057_v40 = vld [vmem:[#allocation6_spill] sm:$0xff]  ;;  %v19178_v31 = vpop.f32.mrf.mxu0  ;;  %vm21102_vm3 = vmmov %vm21073_vm0 }
 0x3bf   : > { %v9522_v19 = vsel %vm21056_vm7, %v19036_v10, %v19117_v62  ;;  %v9611_v8 = vor.u32 %v9610_v20, %v9607_v42  ;;  %v11377_v25 = vcombine.low %v8402_v43, %v8403_v3  ;;  %v19149_v27 = vadd.f32 %v12454_v52, %v18781_v58  ;;  %v19163_v52 = vpop.f32.mrf.mxu1  ;;  %vm21109_vm13 = vmmov %vm21073_vm0 }
 0x3c0   : > { %10488 = vmatmul.mubr.bf16.gmra.mxu0 %v9522_v19  ;;  %v8847_v48 = vrot.slane %v11376_v9, 5  ;;  %vm21058_vm15 = vcmp.ne.s16.totalorder %v21057_v40, 0  ;;  %v19156_v18 = vadd.f32 %v19004_v0, %v19050_v6  ;;  %v19160_v10 = vadd.f32 %v21060_v17, %v21059_v37  ;;  %v21066_v9 = vld [vmem:[#allocation55_spill] sm:$0xff]  ;;  %v19190_v17 = vpop.f32.mrf.mxu0 }
 0x3c1   : > { %v8390_v26 = vsel %vm21058_vm15, %v19018_v44, 0  ;;  %v9612_v42 = vsel %vm21061_vm14, %v9530_v24, %v9611_v8  ;;  %v8849_v35 = vrot.slane %v11377_v25, 5  ;;  %v19167_v20 = vadd.f32 %v18793_v51, %v18781_v58  ;;  %v19181_v61 = vpop.f32.mrf.mxu1 }
 0x3c2   : > { %v11370_v23 = vcombine.low %v8390_v26, %v8390_v26  ;;  %10495 = vmatprep.mubr.bf16.mxu0 %v9612_v42  ;;  %v21062_v16 = vrot.slane %v19052_v4, 5  ;;  %vm21064_vm6 = vcmp.ne.s16.totalorder %v20848_v11, 0  ;;  %v8405_v24 = vsel %vm20851_vm5, %v18561_v39, 0  ;;  %v21065_v4 = vld [vmem:[#allocation60_spill] sm:$0xff] }
 0x3c3   : > { %v8404_v6 = vsel %vm21064_vm6, %v18488_v1, 0  ;;  %v8850_v51 = vsel %vm21035_vm1, %v8847_v48, %v8849_v35  ;;  %v12460_v3 = vadd.f32 %v21066_v9, %v21065_v4  ;;  %v19185_v39 = vpop.f32.mrf.mxu1  ;;  %vm21068_vm5 = vcmp.ne.s16.totalorder %v20868_v15, 0  ;;  %v21071_v4 = vld [vmem:[#allocation50_spill] sm:$0xff]  ;;  %v21072_v9 = vld [vmem:[#allocation75_spill] sm:$0xff] }
 0x3c4   : > { %v8848_v0 = vsel %vm21063_vm11, %v21062_v16, %v8847_v48  ;;  %v9596_v49 = vshrl.u32 %v11370_v23, 16  ;;  %v9407_v33 = vshrl.u32 %v8850_v51, 16  ;;  %v9410_v19 = vshll.u32 %v8850_v51, 16  ;;  %21067 = vst [vmem:[#allocation35_spill] sm:$0xff] %v19185_v39  ;;  %v21087_v39 = vld [vmem:[#allocation15_spill] sm:$0xff] }
 0x3c5   : > { %v9344_v13 = vshrl.u32 %v8848_v0, 16  ;;  %v9347_v43 = vshll.u32 %v8848_v0, 16  ;;  %v9599_v11 = vshll.u32 %v11370_v23, 16  ;;  %v11378_v55 = vcombine.low %v8404_v6, %v8405_v24  ;;  %v19199_v24 = vpop.f32.mrf.mxu1  ;;  %v21082_v0 = vld [vmem:[#allocation77_spill] sm:$0xff] }
 0x3c6   : > { %v9598_v25 = vrot.slane %v9596_v49, 3  ;;  %v9409_v40 = vrot.slane %v9407_v33, 3  ;;  %v9412_v26 = vrot.slane %v9410_v19, 4  ;;  %v8406_v48 = vsel %vm21068_vm5, %v19016_v38, 0  ;;  %v19202_v38 = vpop.f32.mrf.mxu0 }
 0x3c7   : > { %v9346_v1 = vrot.slane %v9344_v13, 3  ;;  %v9349_v8 = vrot.slane %v9347_v43, 4  ;;  %v9601_v37 = vrot.slane %v9599_v11, 4  ;;  %v8851_v16 = vrot.slane %v11378_v55, 5  ;;  %v21070_v13 = vld [vmem:[#allocation42_spill] sm:$0xff] }
 0x3c8   : > { %v8407_v23 = vsel %vm20871_vm4, %v19018_v44, 0  ;;  %v19197_v6 = vadd.f32 %v21070_v13, %v19096_v21  ;;  %v7850_v43 = vadd.f32 %v12460_v3, %v18781_v58  ;;  %v9413_v51 = vor.u32 %v9412_v26, %v9409_v40  ;;  %vm21074_vm4 = vmmov %vm21035_vm1  ;;  %v8391_v11 = vld [vmem:[#allocation3 + $0x98] sm:$0x1]  ;;  %v19216_v55 = vpop.f32.mrf.mxu0  ;;  %v19218_v40 = vpop.f32.mrf.mxu1  ;;  %v21078_v26 = vld [vmem:[#allocation73_spill] sm:$0xff] }
 0x3c9   : > { %v9350_v42 = vor.u32 %v9349_v8, %v9346_v1  ;;  %v9602_v49 = vor.u32 %v9601_v37, %v9598_v25  ;;  %v11379_v15 = vcombine.low %v8406_v48, %v8407_v23  ;;  %v12555_v33 = vadd.f32 %v21072_v9, %v21071_v4  ;;  %v21079_v37 = vld [vmem:[#allocation4_spill] sm:$0xff]  ;;  %v21080_v48 = vld [vmem:[#allocation7_spill] sm:$0xff] }
 0x3ca   : > { %v8852_v44 = vsel %vm21074_vm4, %v8849_v35, %v8851_v16  ;;  %v19211_v21 = vadd.f32 %v19060_v32, %v19099_v12  ;;  %v12616_v32 = vadd.f32 %v21080_v48, %v21079_v37  ;;  %v21081_v12 = vld [vmem:[#allocation13_spill] sm:$0xff]  ;;  %v21083_v4 = vld [vmem:[#allocation8_spill] sm:$0xff]  ;;  %v19236_v47 = vpop.f32.mrf.mxu1 }
 0x3cb   : > { %v9351_v19 = vsel %vm21073_vm0, %v19105_v5, %v9350_v42  ;;  %v9414_v3 = vsel %vm21075_vm12, %v9350_v42, %v9413_v51  ;;  %v9603_v1 = vsel %vm21076_vm10, %v19117_v62, %v9602_v49  ;;  %v9470_v8 = vshrl.u32 %v8852_v44, 16  ;;  %v21077_v5 = vld [vmem:[#allocation47_spill] sm:$0xff] }
 0x3cc   : > { %13064 = vmatmul.mubr.bf16.gmra.mxu1 %v9351_v19  ;;  %v9473_v25 = vshll.u32 %v8852_v44, 16  ;;  %v12613_v35 = vadd.f32 %v21078_v26, %v21077_v5  ;;  %v12558_v23 = vadd.f32 %v21082_v0, %v21081_v12  ;;  %10496 = vmatmul.mubr.bf16.gmra.mxu0 %v9603_v1  ;;  %v8853_v42 = vrot.slane %v11379_v15, 5  ;;  %v21084_v19 = vld [vmem:[#allocation9_spill] sm:$0xff]  ;;  %v21086_v26 = vld [vmem:[#allocation76_spill] sm:$0xff] }
 0x3cd   : > { %13067 = vmatprep.mubr.bf16.mxu1 %v9414_v3  ;;  %v9472_v13 = vrot.slane %v9470_v8, 3  ;;  %v8408_v49 = vsel %vm20315_vm9, %v8391_v11, 0  ;;  %v7936_v9 = vadd.f32 %v21083_v4, %v19141_v60  ;;  %v21085_v44 = vld [vmem:[#allocation57_spill] sm:$0xff]  ;;  %v12622_v37 = vadd.f32 %v21087_v39, %v21086_v26  ;;  %v8189_v3 = vpop.f32.mrf.mxu0  ;;  %v21089_v60 = vld [vmem:[#allocation79_spill] sm:$0xff]  ;;  %vm21096_vm9 = vmmov %vm21073_vm0 }
 0x3ce   : > { %v9475_v62 = vrot.slane %v9473_v25, 4  ;;  %v12619_v5 = vadd.f32 %v21085_v44, %v21084_v19  ;;  %v8854_v48 = vsel %vm21088_vm2, %v8851_v16, %v8853_v42  ;;  %v11380_v12 = vcombine.low %v8408_v49, %v8408_v49  ;;  %v21090_v0 = vld [vmem:[#allocation81_spill] sm:$0xff]  ;;  %v21091_v16 = vld [vmem:[#allocation19_spill] sm:$0xff] }
 0x3cf   : > { %v8001_v15 = vadd.f32 %v12555_v33, %v18973_v2  ;;  %v9533_v8 = vshrl.u32 %v8854_v48, 16  ;;  %v9536_v25 = vshll.u32 %v8854_v48, 16  ;;  %v8004_v11 = vadd.f32 %v12558_v23, %v19014_v36  ;;  %v21092_v49 = vld [vmem:[#allocation23_spill] sm:$0xff]  ;;  %v21095_v48 = vld [vmem:[#allocation20_spill] sm:$0xff] }
 0x3d0   : > { %v9476_v1 = vor.u32 %v9475_v62, %v9472_v13  ;;  %v12561_v4 = vadd.f32 %v21090_v0, %v21089_v60  ;;  %v8855_v19 = vrot.slane %v11380_v12, 5  ;;  %v19243_v39 = vadd.f32 %v19128_v41, %v19149_v27  ;;  %v21093_v33 = vld [vmem:[#allocation63_spill] sm:$0xff]  ;;  %v21094_v62 = vld [vmem:[#allocation49_spill] sm:$0xff]  ;;  %v13033_v41 = vpop.f32.mrf.mxu0 }
 0x3d1   : > { %v12567_v44 = vadd.f32 %v21092_v49, %v21091_v16  ;;  %v9535_v26 = vrot.slane %v9533_v8, 3  ;;  %v9538_v2 = vrot.slane %v9536_v25, 4  ;;  %v19249_v13 = vadd.f32 %v21093_v33, %v19167_v20  ;;  %v19260_v20 = vpop.f32.mrf.mxu1  ;;  %v21098_v16 = vld [vmem:[#allocation78_spill] sm:$0xff]  ;;  %v21099_v49 = vld [vmem:[#allocation80_spill] sm:$0xff] }
 0x3d2   : > { %v12564_v36 = vadd.f32 %v21095_v48, %v21094_v62  ;;  %v9477_v23 = vsel %vm21096_vm9, %v9413_v51, %v9476_v1  ;;  %v8856_v12 = vsel %vm21097_vm8, %v8853_v42, %v8855_v19  ;;  %v19256_v60 = vadd.f32 %v19160_v10, %v7850_v43  ;;  %v21100_v62 = vld [vmem:[#allocation65_spill] sm:$0xff]  ;;  %v21101_v42 = vld [vmem:[#allocation18_spill] sm:$0xff]  ;;  %v8202_v43 = vpop.f32.mrf.mxu0 }
 0x3d3   : > { %v12570_v27 = vadd.f32 %v18892_v22, %v18885_v29  ;;  %v9539_v8 = vor.u32 %v9538_v2, %v9535_v26  ;;  %v9614_v25 = vshrl.u32 %v8856_v12, 16  ;;  %v9617_v0 = vshll.u32 %v8856_v12, 16  ;;  %v21104_v12 = vld [vmem:[#allocation48_spill] sm:$0xff] }
 0x3d4   : > { %13068 = vmatmul.mubr.bf16.gmra.mxu1 %v9477_v23  ;;  %v12625_v33 = vadd.f32 %v21099_v49, %v21098_v16  ;;  %v8009_v51 = vadd.f32 %v12561_v4, %v19064_v34  ;;  %v12628_v19 = vadd.f32 %v21101_v42, %v21100_v62  ;;  %v12579_v10 = vadd.f32 %v18975_v59, %v18954_v50  ;;  %v21103_v23 = vld [vmem:[#allocation83_spill] sm:$0xff]  ;;  %v21106_v62 = vld [vmem:[#allocation53_spill] sm:$0xff] }
 0x3d5   : > { %v8017_v29 = vadd.f32 %v12567_v44, %v19135_v45  ;;  %v9540_v22 = vsel %vm21102_vm3, %v9476_v1, %v9539_v8  ;;  %v9616_v26 = vrot.slane %v9614_v25, 3  ;;  %v9619_v2 = vrot.slane %v9617_v0, 4  ;;  %v12691_v1 = vpop.f32.mrf.mxu1  ;;  %v13034_v25 = vpop.f32.mrf.mxu0  ;;  %v21105_v0 = vld [vmem:[#allocation24_spill] sm:$0xff] }
 0x3d6   : > { %v8012_v48 = vadd.f32 %v12564_v36, %v19081_v28  ;;  %v12631_v16 = vadd.f32 %v21104_v12, %v21103_v23  ;;  %v12634_v34 = vadd.f32 %v18920_v46, %v18888_v57  ;;  %13071 = vmatprep.mubr.bf16.mxu1 %v9540_v22  ;;  %v8098_v4 = vadd.f32 %v12619_v5, %v8001_v15  ;;  %v21107_v23 = vld [vmem:[#allocation30_spill] sm:$0xff] }
 0x3d7   : > { %v8020_v50 = vadd.f32 %v12570_v27, %v19156_v18  ;;  %v9620_v59 = vor.u32 %v9619_v2, %v9616_v26  ;;  %v8090_v45 = vadd.f32 %v12613_v35, %v18923_v63  ;;  %v8101_v44 = vadd.f32 %v12622_v37, %v8004_v11  ;;  %v21108_v57 = vld [vmem:[#allocation62_spill] sm:$0xff]  ;;  %v12692_v35 = vpop.f32.mrf.mxu1 }
 0x3d8   : > { %v12573_v28 = vadd.f32 %v18925_v54, %v21105_v0  ;;  %v8033_v36 = vadd.f32 %v12579_v10, %v7936_v9  ;;  %v8195_v49 = vadd.f32 %v19190_v17, %v8098_v4  ;;  %v8093_v42 = vadd.f32 %v12616_v32, %v21106_v62  ;;  %v8205_v10 = vpop.f32.mrf.mxu0  ;;  %v21110_v26 = vld [vmem:[#allocation38_spill] sm:$0xff]  ;;  %v21118_v62 = vld [vmem:[#allocation45_spill] sm:$0xff] }
 0x3d9   : > { %v12582_v46 = vadd.f32 %v21108_v57, %v21107_v23  ;;  %v8187_v63 = vadd.f32 %v19202_v38, %v8090_v45  ;;  %v8198_v18 = vadd.f32 %v19216_v55, %v8101_v44  ;;  %v8114_v54 = vadd.f32 %v12631_v16, %v8017_v29  ;;  %v12694_v22 = vpop.f32.mrf.mxu1  ;;  %v21112_v16 = vld [vmem:[#allocation12_spill] sm:$0xff]  ;;  %v21116_v0 = vld [vmem:[#allocation82_spill] sm:$0xff] }
 0x3da   : > { %v9621_v17 = vsel %vm21109_vm13, %v9539_v8, %v9620_v59  ;;  %v8251_v9 = vmax.f32 %v8195_v49, 0.0  ;;  %v8190_v32 = vadd.f32 %v8189_v3, %v8093_v42  ;;  %v8106_v5 = vadd.f32 %v12625_v33, %v8009_v51  ;;  %v21111_v33 = vld [vmem:[#allocation51_spill] sm:$0xff]  ;;  %v21115_v59 = vld [vmem:[#allocation26_spill] sm:$0xff]  ;;  %v21117_v49 = vld [vmem:[#allocation64_spill] sm:$0xff]  ;;  %v13037_v23 = vpop.f32.mrf.mxu0 }
 0x3db   : > { %v8249_v37 = vmax.f32 %v8187_v63, 0.0  ;;  %v8252_v15 = vmax.f32 %v8198_v18, 0.0  ;;  %v8211_v11 = vadd.f32 %v13033_v41, %v8114_v54  ;;  %v8117_v27 = vadd.f32 %v12634_v34, %v8020_v50  ;;  %v12695_v12 = vpop.f32.mrf.mxu1  ;;  %v21113_v34 = vld [vmem:[#allocation44_spill] sm:$0xff] }
 0x3dc   : > { %13072 = vmatmul.mubr.bf16.gmra.mxu1 %v9621_v17  ;;  %8267 = vst [vmem:[%s19289_s11 + $0x10] sm:$0xff] %v8251_v9  ;;  %v8250_v38 = vmax.f32 %v8190_v32, 0.0  ;;  %v8203_v55 = vadd.f32 %v8202_v43, %v8106_v5  ;;  %v19295_v29 = vadd.f32 %v12692_v35, %v12691_v1  ;;  %v8109_v8 = vadd.f32 %v12628_v19, %v8012_v48  ;;  %v21114_v48 = vld [vmem:[#allocation52_spill] sm:$0xff]  ;;  %v21121_v17 = vld [vmem:[#allocation37_spill] sm:$0xff]  ;;  %v21123_v5 = vld [vmem:[#allocation34_spill] sm:$0xff] }
 0x3dd   : > { %v8025_v3 = vadd.f32 %v12573_v28, %v19197_v6  ;;  %v12576_v51 = vadd.f32 %v21111_v33, %v21110_v26  ;;  %8265 = vst [vmem:[%s19289_s11] sm:$0xff] %v8249_v37  ;;  %8268 = vst [vmem:[%s19289_s11 + $0x18] sm:$0xff] %v8252_v15  ;;  %v8255_v41 = vmax.f32 %v8211_v11, 0.0  ;;  %v8214_v2 = vadd.f32 %v13034_v25, %v8117_v27  ;;  %v21122_v9 = vld [vmem:[#allocation5_spill] sm:$0xff]  ;;  %v8218_v15 = vpop.f32.mrf.mxu0  ;;  %v21124_v11 = vld [vmem:[#allocation11_spill] sm:$0xff] }
 0x3de   : > { %v12643_v4 = vadd.f32 %v21113_v34, %v21112_v16  ;;  %8266 = vst [vmem:[%s19289_s11 + $0x8] sm:$0xff] %v8250_v38  ;;  %v8253_v43 = vmax.f32 %v8203_v55, 0.0  ;;  %v8206_v50 = vadd.f32 %v8205_v10, %v8109_v8  ;;  %v19305_v19 = vadd.f32 %v12695_v12, %v12694_v22  ;;  %v21127_v12 = vld [vmem:[#allocation28_spill] sm:$0xff] }
 0x3df   : > { %8271 = vst [vmem:[%s19289_s11 + $0x30] sm:$0xff] %v8255_v41  ;;  %v8256_v6 = vmax.f32 %v8214_v2, 0.0  ;;  %v12637_v45 = vadd.f32 %v21115_v59, %v21114_v48  ;;  %v8036_v44 = vadd.f32 %v12582_v46, %v19243_v39  ;;  %v7855_v28 = vadd.f32 %v21116_v0, %v18781_v58  ;;  %v12697_v39 = vpop.f32.mrf.mxu1  ;;  %v21119_v46 = vld [vmem:[#allocation40_spill] sm:$0xff]  ;;  %v21126_v2 = vld [vmem:[#allocation27_spill] sm:$0xff] }
 0x3e0   : > { %8269 = vst [vmem:[%s19289_s11 + $0x20] sm:$0xff] %v8253_v43  ;;  %v8254_v1 = vmax.f32 %v8206_v50, 0.0  ;;  %v8130_v25 = vadd.f32 %v12643_v4, %v8033_v36  ;;  %v12466_v42 = vadd.f32 %v21118_v62, %v21117_v49  ;;  %v8028_v57 = vadd.f32 %v12576_v51, %v19211_v21  ;;  %v21120_v36 = vld [vmem:[#allocation61_spill] sm:$0xff]  ;;  %v21125_v21 = vld [vmem:[#allocation10_spill] sm:$0xff]  ;;  %v21129_v50 = vld [vmem:[#allocation56_spill] sm:$0xff] }
 0x3e1   : > { %8272 = vst [vmem:[%s19289_s11 + $0x38] sm:$0xff] %v8256_v6  ;;  %v12646_v63 = vadd.f32 %v19124_v53, %v19101_v14  ;;  %v8122_v54 = vadd.f32 %v12637_v45, %v8025_v3  ;;  %v12527_v35 = vadd.f32 %v21120_v36, %v21119_v46  ;;  %v12640_v32 = vadd.f32 %v21122_v9, %v21121_v17  ;;  %v12698_v22 = vpop.f32.mrf.mxu1  ;;  %v13038_v3 = vpop.f32.mrf.mxu0  ;;  %v21128_v43 = vld [vmem:[#allocation46_spill] sm:$0xff] }
 0x3e2   : > { %8270 = vst [vmem:[%s19289_s11 + $0x28] sm:$0xff] %v8254_v1  ;;  %v8227_v18 = vadd.f32 %v13037_v23, %v8130_v25  ;;  %v12591_v37 = vadd.f32 %v19107_v30, %v21123_v5  ;;  %v12585_v27 = vadd.f32 %v21125_v21, %v21124_v11  ;;  %v7858_v38 = vadd.f32 %v12466_v42, %v18781_v58 }
 0x3e3   : > { %v8219_v14 = vadd.f32 %v8218_v15, %v8122_v54  ;;  %v8133_v53 = vadd.f32 %v12646_v63, %v8036_v44  ;;  %v7952_v55 = vadd.f32 %v12527_v35, %v7855_v28  ;;  %v12655_v8 = vadd.f32 %v19218_v40, %v19199_v24  ;;  %v12700_v41 = vpop.f32.mrf.mxu1  ;;  %v8221_v24 = vpop.f32.mrf.mxu0 }
 0x3e4   : > { %v8259_v10 = vmax.f32 %v8227_v18, 0.0  ;;  %v19332_v26 = vadd.f32 %v12698_v22, %v12697_v39  ;;  %v8125_v51 = vadd.f32 %v12640_v32, %v8028_v57  ;;  %v12530_v16 = vadd.f32 %v21127_v12, %v21126_v2 }
 0x3e5   : > { %v8257_v30 = vmax.f32 %v8219_v14, 0.0  ;;  %v8230_v33 = vadd.f32 %v13038_v3, %v8133_v53  ;;  %v8049_v34 = vadd.f32 %v12591_v37, %v7952_v55  ;;  %v12649_v58 = vadd.f32 %v19163_v52, %v19146_v7  ;;  %v12701_v45 = vpop.f32.mrf.mxu1  ;;  %v13041_v52 = vpop.f32.mrf.mxu0  ;;  %v19359_v37 = vld [vmem:[%s19593_s2 + $0x1] ss:$0 sm:$0xff] }
 0x3e6   : > { %8275 = vst [vmem:[%s19289_s11 + $0x50] sm:$0xff] %v8259_v10  ;;  %v12594_v4 = vadd.f32 %v19178_v31, %v19137_v56  ;;  %v8041_v40 = vadd.f32 %v12585_v27, %v19249_v13  ;;  %v12588_v6 = vadd.f32 %v21129_v50, %v21128_v43  ;;  %v8222_v59 = vadd.f32 %v8221_v24, %v8125_v51  ;;  %v21130_v13 = vld [vmem:[#allocation35_spill] sm:$0xff] }
 0x3e7   : > { %8273 = vst [vmem:[%s19289_s11 + $0x40] sm:$0xff] %v8257_v30  ;;  %v8260_v48 = vmax.f32 %v8230_v33, 0.0  ;;  %v7955_v44 = vadd.f32 %v12530_v16, %v7858_v38  ;;  %v12658_v1 = vadd.f32 %v19260_v20, %v19236_v47  ;;  %v8146_v25 = vadd.f32 %v12655_v8, %v8049_v34  ;;  %v8234_v62 = vpop.f32.mrf.mxu0  ;;  %v12703_v39 = vpop.f32.mrf.mxu1  ;;  %21131 = vst [vmem:[#allocation17_spill] sm:$0xff] %v19359_v37 }
 0x3e8   : > { %v12702_v7 = vadd.f32 %v12701_v45, %v12700_v41  ;;  %v8258_v56 = vmax.f32 %v8222_v59, 0.0  ;;  %v12652_v0 = vadd.f32 %v21130_v13, %v19181_v61  ;;  %v8138_v49 = vadd.f32 %v12649_v58, %v8041_v40 }
 0x3e9   : > { %8276 = vst [vmem:[%s19289_s11 + $0x58] sm:$0xff] %v8260_v48  ;;  %v8052_v31 = vadd.f32 %v12594_v4, %v7955_v44  ;;  %v8243_v28 = vadd.f32 %v13041_v52, %v8146_v25  ;;  %v8044_v42 = vadd.f32 %v12588_v6, %v19256_v60  ;;  %v13042_v57 = vpop.f32.mrf.mxu0  ;;  %v12704_v35 = vpop.f32.mrf.mxu1  ;;  %v10151_v21 = vadd.f32 %v19295_v29, %v19359_v37 }
 0x3ea   : > { %8274 = vst [vmem:[%s19289_s11 + $0x48] sm:$0xff] %v8258_v56  ;;  %v8235_v47 = vadd.f32 %v8234_v62, %v8138_v49  ;;  %v12705_v17 = vadd.f32 %v12704_v35, %v12703_v39  ;;  %v10154_v55 = vadd.f32 %v19305_v19, %v19359_v37  ;;  %v10159_v34 = vadd.f32 %v19332_v26, %v19359_v37 }
 0x3eb   : > { %v8263_v23 = vmax.f32 %v8243_v28, 0.0  ;;  %v8149_v20 = vadd.f32 %v12658_v1, %v8052_v31  ;;  %v8141_v54 = vadd.f32 %v12652_v0, %v8044_v42  ;;  %v8237_v46 = vpop.f32.mrf.mxu0  ;;  %v12706_v32 = vpop.f32.mrf.mxu1  ;;  %v10162_v6 = vadd.f32 %v12702_v7, %v19359_v37 }
 0x3ec   : > { %v8261_v63 = vmax.f32 %v8235_v47, 0.0  ;;  %v10167_v56 = vadd.f32 %v12705_v17, %v19359_v37 }
 0x3ed   : > { %8279 = vst [vmem:[%s19289_s11 + $0x70] sm:$0xff] %v8263_v23  ;;  %v8246_v18 = vadd.f32 %v13042_v57, %v8149_v20  ;;  %v8238_v36 = vadd.f32 %v8237_v46, %v8141_v54  ;;  %v12707_v60 = vpop.f32.mrf.mxu1  ;;  %v12755_v15 = vpop.f32.mrf.mxu0 }
 0x3ee   : > { %8277 = vst [vmem:[%s19289_s11 + $0x60] sm:$0xff] %v8261_v63  ;;  %v12708_v5 = vadd.f32 %v12707_v60, %v12706_v32 }
 0x3ef   : > { %v8264_v61 = vmax.f32 %v8246_v18, 0.0  ;;  %v8262_v9 = vmax.f32 %v8238_v36, 0.0  ;;  %v12756_v11 = vpop.f32.mrf.mxu0  ;;  %v12709_v10 = vpop.f32.mrf.mxu1 }
 0x3f0   : > { %v12757_v27 = vadd.f32 %v12756_v11, %v12755_v15  ;;  %v10170_v62 = vadd.f32 %v12708_v5, %v19359_v37 }
 0x3f1   : > { %8280 = vst [vmem:[%s19289_s11 + $0x78] sm:$0xff] %v8264_v61  ;;  %8278 = vst [vmem:[%s19289_s11 + $0x68] sm:$0xff] %v8262_v9  ;;  %v12758_v14 = vpop.f32.mrf.mxu0  ;;  %v12710_v22 = vpop.f32.mrf.mxu1 }
 0x3f2   : > { %v19363_v53 = vadd.f32 %v12757_v27, %v10151_v21  ;;  %v12711_v8 = vadd.f32 %v12710_v22, %v12709_v10 }
 0x3f3   : > { %v12759_v38 = vpop.f32.mrf.mxu0  ;;  %v12712_v30 = vpop.f32.mrf.mxu1 }
 0x3f4   : > { %v12760_v3 = vadd.f32 %v12759_v38, %v12758_v14  ;;  %v10175_v63 = vadd.f32 %v12711_v8, %v19359_v37 }
 0x3f5   : > { %v12713_v51 = vpop.f32.mrf.mxu1 }
 0x3f6   : > { %v19367_v33 = vadd.f32 %v12760_v3, %v10154_v55  ;;  %v12714_v41 = vadd.f32 %v12713_v51, %v12712_v30 }
 0x3f7   : > { %v12715_v12 = vpop.f32.mrf.mxu1 }
 0x3f8   : > { %v12761_v2 = vpop.f32.mrf.mxu0  ;;  %v10178_v17 = vadd.f32 %v12714_v41, %v19359_v37 }
 0x3f9   : > { %v12716_v16 = vpop.f32.mrf.mxu1 }
 0x3fa   : > { %v12762_v29 = vpop.f32.mrf.mxu0  ;;  %v12717_v4 = vadd.f32 %v12716_v16, %v12715_v12 }
 0x3fb   : > { %v12763_v58 = vadd.f32 %v12762_v29, %v12761_v2  ;;  %v12718_v40 = vpop.f32.mrf.mxu1 }
 0x3fc   : > { %v12764_v24 = vpop.f32.mrf.mxu0  ;;  %v10183_v14 = vadd.f32 %v12717_v4, %v19359_v37 }
 0x3fd   : > { %v19371_v43 = vadd.f32 %v12763_v58, %v10159_v34  ;;  %v12719_v50 = vpop.f32.mrf.mxu1 }
 0x3fe   : > { %v12765_v19 = vpop.f32.mrf.mxu0  ;;  %v12720_v59 = vadd.f32 %v12719_v50, %v12718_v40 }
 0x3ff   : > { %v12766_v48 = vadd.f32 %v12765_v19, %v12764_v24 }
 0x400   : > { %v10186_v41 = vadd.f32 %v12720_v59, %v19359_v37 }
 0x401   : > { %v19374_v45 = vadd.f32 %v12766_v48, %v10162_v6 }
 0x405   : > { %v12767_v44 = vpop.f32.mrf.mxu0 }
 0x406   : > { %v12721_v1 = vpop.f32.mrf.mxu1 }
 0x407   : > { %v12768_v25 = vpop.f32.mrf.mxu0 }
 0x408   : > { %v12769_v26 = vadd.f32 %v12768_v25, %v12767_v44  ;;  %v12722_v52 = vpop.f32.mrf.mxu1 }
 0x409   : > { %v12770_v31 = vpop.f32.mrf.mxu0  ;;  %v12723_v13 = vadd.f32 %v12722_v52, %v12721_v1 }
 0x40a   : > { %v19377_v0 = vadd.f32 %v12769_v26, %v10167_v56  ;;  %v12724_v28 = vpop.f32.mrf.mxu1 }
 0x40b   : > { %v12771_v49 = vpop.f32.mrf.mxu0  ;;  %v10191_v24 = vadd.f32 %v12723_v13, %v19359_v37 }
 0x40c   : > { %v12772_v7 = vadd.f32 %v12771_v49, %v12770_v31  ;;  %v12725_v42 = vpop.f32.mrf.mxu1 }
 0x40d   : > { %v12726_v23 = vadd.f32 %v12725_v42, %v12724_v28 }
 0x40e   : > { %v19380_v47 = vadd.f32 %v12772_v7, %v10170_v62  ;;  %v12773_v20 = vpop.f32.mrf.mxu0 }
 0x40f   : > { %v10194_v44 = vadd.f32 %v12726_v23, %v19359_v37 }
 0x410   : > { %v12774_v57 = vpop.f32.mrf.mxu0 }
 0x411   : > { %v12775_v18 = vadd.f32 %v12774_v57, %v12773_v20  ;;  %v12727_v54 = vpop.f32.mrf.mxu1 }
 0x412   : > { %v12776_v39 = vpop.f32.mrf.mxu0 }
 0x413   : > { %v19383_v46 = vadd.f32 %v12775_v18, %v10175_v63  ;;  %v12728_v61 = vpop.f32.mrf.mxu1 }
 0x414   : > { %v12729_v36 = vadd.f32 %v12728_v61, %v12727_v54  ;;  %v12777_v35 = vpop.f32.mrf.mxu0 }
 0x415   : > { %v12778_v9 = vadd.f32 %v12777_v35, %v12776_v39  ;;  %v12730_v32 = vpop.f32.mrf.mxu1 }
 0x416   : > { %v10199_v28 = vadd.f32 %v12729_v36, %v19359_v37 }
 0x417   : > { %v19386_v60 = vadd.f32 %v12778_v9, %v10178_v17  ;;  %v12731_v5 = vpop.f32.mrf.mxu1 }
 0x418   : > { %v12732_v15 = vadd.f32 %v12731_v5, %v12730_v32 }
 0x41a   : > { %v10202_v23 = vadd.f32 %v12732_v15, %v19359_v37 }
 0x41c   : > { %v12733_v21 = vpop.f32.mrf.mxu1 }
 0x41e   : > { %v12779_v11 = vpop.f32.mrf.mxu0  ;;  %v12734_v10 = vpop.f32.mrf.mxu1 }
 0x41f   : > { %v19389_v38 = vadd.f32 %v12734_v10, %v12733_v21 }
 0x420   : > { %v12780_v27 = vpop.f32.mrf.mxu0  ;;  %v12736_v8 = vpop.f32.mrf.mxu1 }
 0x421   : > { %v12781_v22 = vadd.f32 %v12780_v27, %v12779_v11  ;;  %21132 = vst [vmem:[#allocation66_spill] sm:$0xff] %v19389_v38 }
 0x422   : > { %v12782_v55 = vpop.f32.mrf.mxu0  ;;  %v12737_v51 = vpop.f32.mrf.mxu1 }
 0x423   : > { %v19391_v3 = vadd.f32 %v12781_v22, %v10183_v14  ;;  %v19394_v12 = vadd.f32 %v12737_v51, %v12736_v8 }
 0x424   : > { %v12783_v30 = vpop.f32.mrf.mxu0 }
 0x425   : > { %21133 = vst [vmem:[#allocation31_spill] sm:$0xff] %v19391_v3  ;;  %v12784_v2 = vadd.f32 %v12783_v30, %v12782_v55  ;;  %21134 = vst [vmem:[#allocation67_spill] sm:$0xff] %v19394_v12 }
 0x427   : > { %v19396_v29 = vadd.f32 %v12784_v2, %v10186_v41 }
 0x428   : > { %v19398_v16 = vpop.f32.mrf.mxu1 }
 0x429   : > { %21135 = vst [vmem:[#allocation14_spill] sm:$0xff] %v19396_v29 }
 0x42a   : > { %v12785_v34 = vpop.f32.mrf.mxu0  ;;  %v19400_v58 = vpop.f32.mrf.mxu1 }
 0x42c   : > { %v12786_v4 = vpop.f32.mrf.mxu0  ;;  %v19403_v19 = vpop.f32.mrf.mxu1 }
 0x42d   : > { %v12787_v40 = vadd.f32 %v12786_v4, %v12785_v34 }
 0x42e   : > { %v12788_v50 = vpop.f32.mrf.mxu0  ;;  %v19407_v48 = vpop.f32.mrf.mxu1 }
 0x42f   : > { %v19405_v6 = vadd.f32 %v12787_v40, %v10191_v24 }
 0x430   : > { %v12789_v59 = vpop.f32.mrf.mxu0 }
 0x431   : > { %v12790_v1 = vadd.f32 %v12789_v59, %v12788_v50  ;;  %v19410_v25 = vpop.f32.mrf.mxu1 }
 0x433   : > { %v19412_v56 = vadd.f32 %v12790_v1, %v10194_v44  ;;  %v12826_v26 = vpop.f32.mrf.mxu1 }
 0x434   : > { %v12791_v52 = vpop.f32.mrf.mxu0 }
 0x435   : > { %21136 = vst [vmem:[#allocation16_spill] sm:$0xff] %v19412_v56  ;;  %v19414_v31 = vpop.f32.mrf.mxu1 }
 0x436   : > { %v12792_v13 = vpop.f32.mrf.mxu0 }
 0x437   : > { %v12793_v49 = vadd.f32 %v12792_v13, %v12791_v52  ;;  %v12829_v62 = vpop.f32.mrf.mxu1 }
 0x438   : > { %v12794_v7 = vpop.f32.mrf.mxu0 }
 0x439   : > { %v19417_v42 = vadd.f32 %v12793_v49, %v10199_v28 }
 0x43a   : > { %v12795_v20 = vpop.f32.mrf.mxu0 }
 0x43b   : > { %21137 = vst [vmem:[#allocation21_spill] sm:$0xff] %v19417_v42  ;;  %v12796_v57 = vadd.f32 %v12795_v20, %v12794_v7 }
 0x43c   : > { %v19420_v63 = vpop.f32.mrf.mxu1 }
 0x43d   : > { %v19422_v18 = vadd.f32 %v12796_v57, %v10202_v23 }
 0x43e   : > { %v19426_v39 = vpop.f32.mrf.mxu1 }
 0x43f   : > { %21138 = vst [vmem:[#allocation68_spill] sm:$0xff] %v19422_v18  ;;  %v19424_v54 = vpop.f32.mrf.mxu0 }
 0x440   : > { %v19430_v36 = vpop.f32.mrf.mxu1 }
 0x441   : > { %v19428_v61 = vpop.f32.mrf.mxu0 }
 0x442   : > { %v19434_v17 = vpop.f32.mrf.mxu1 }
 0x443   : > { %v19432_v35 = vpop.f32.mrf.mxu0 }
 0x444   : > { %21139 = vst [vmem:[#allocation69_spill] sm:$0xff] %v19432_v35 }
 0x445   : > { %v19436_v9 = vpop.f32.mrf.mxu0  ;;  %v19438_v32 = vpop.f32.mrf.mxu1 }
 0x446   : > { %21140 = vst [vmem:[#allocation36_spill] sm:$0xff] %v19436_v9 }
 0x447   : > { %v12883_v5 = vpop.f32.mrf.mxu0  ;;  %v19440_v15 = vpop.f32.mrf.mxu1 }
 0x449   : > { %v12884_v11 = vpop.f32.mrf.mxu0  ;;  %v19442_v21 = vpop.f32.mrf.mxu1 }
 0x44b   : > { %v12886_v27 = vpop.f32.mrf.mxu0  ;;  %v19444_v10 = vpop.f32.mrf.mxu1 }
 0x44d   : > { %v12887_v14 = vpop.f32.mrf.mxu0 }
 0x44f   : > { %v12889_v22 = vpop.f32.mrf.mxu0 }
 0x450   : > { %v19446_v55 = vpop.f32.mrf.mxu1 }
 0x451   : > { %v12890_v8 = vpop.f32.mrf.mxu0 }
 0x452   : > { %v19448_v30 = vpop.f32.mrf.mxu1  ;;  %v12891_v37 = vadd.f32 %v12890_v8, %v12889_v22  ;;  %v12888_v22 = vadd.f32 %v12887_v14, %v12886_v27  ;;  %v12833_v27 = vadd.f32 %v19426_v39, %v19420_v63 }
 0x453   : > { %v12892_v51 = vpop.f32.mrf.mxu0 }
 0x454   : > { %v19450_v41 = vpop.f32.mrf.mxu1 }
 0x455   : > { %21141 = vst [vmem:[#allocation70_spill] sm:$0xff] %v19450_v41  ;;  %v12893_v2 = vpop.f32.mrf.mxu0  ;;  %v12885_v41 = vadd.f32 %v12884_v11, %v12883_v5 }
 0x456   : > { %v19452_v34 = vpop.f32.mrf.mxu1 }
 0x457   : > { %21142 = vst [vmem:[#allocation71_spill] sm:$0xff] %v19452_v34  ;;  %v19454_v4 = vpop.f32.mrf.mxu0 }
 0x458   : > { %v19456_v24 = vpop.f32.mrf.mxu1 }
 0x459   : > { %v19458_v40 = vpop.f32.mrf.mxu0 }
 0x45a   : > { %v19460_v50 = vpop.f32.mrf.mxu1 }
 0x45b   : > { %v19462_v59 = vpop.f32.mrf.mxu0 }
 0x45c   : > { %v19464_v44 = vpop.f32.mrf.mxu1 }
 0x45d   : > { %v19466_v1 = vpop.f32.mrf.mxu0 }
 0x45e   : > { %v19468_v52 = vpop.f32.mrf.mxu1 }
 0x45f   : > { %v12901_v13 = vpop.f32.mrf.mxu0 }
 0x461   : > { %v12902_v49 = vpop.f32.mrf.mxu0 }
 0x462   : > { %v19470_v28 = vpop.f32.mrf.mxu1  ;;  %v12903_v14 = vadd.f32 %v12902_v49, %v12901_v13  ;;  %v12851_v13 = vadd.f32 %v19460_v50, %v19456_v24  ;;  %v12854_v50 = vadd.f32 %v19468_v52, %v19464_v44 }
 0x463   : > { %21143 = vst [vmem:[#allocation39_spill] sm:$0xff] %v19470_v28  ;;  %v12904_v20 = vpop.f32.mrf.mxu0 }
 0x464   : > { %v19472_v7 = vpop.f32.mrf.mxu1 }
 0x465   : > { %21144 = vst [vmem:[#allocation41_spill] sm:$0xff] %v19472_v7  ;;  %v12905_v57 = vpop.f32.mrf.mxu0 }
 0x466   : > { %v19474_v23 = vpop.f32.mrf.mxu1  ;;  %v12906_v63 = vadd.f32 %v12905_v57, %v12904_v20 }
 0x467   : > { %21145 = vst [vmem:[#allocation74_spill] sm:$0xff] %v19474_v23  ;;  %v12827_v23 = vadd.f32 %v12826_v26, %v19410_v25  ;;  %v12894_v25 = vadd.f32 %v12893_v2, %v12892_v51  ;;  %v12842_v2 = vadd.f32 %v19444_v10, %v19442_v21  ;;  %v12900_v21 = vadd.f32 %v19466_v1, %v19462_v59 }
 0x468   : > { %v19476_v18 = vpop.f32.mrf.mxu1 }
 0x469   : > { %21146 = vst [vmem:[#allocation29_spill] sm:$0xff] %v19476_v18  ;;  %v19478_v42 = vpop.f32.mrf.mxu0  ;;  %v12821_v18 = vadd.f32 %v19400_v58, %v19398_v16  ;;  %v10372_v49 = vadd.f32 %v12842_v2, %v19386_v60  ;;  %v10385_v60 = vadd.f32 %v12851_v13, %v19405_v6  ;;  %v21154_v6 = vld [vmem:[#allocation71_spill] sm:$0xff]  ;;  %v21164_v2 = vld [vmem:[#allocation14_spill] sm:$0xff] }
 0x46a   : > { %v19480_v12 = vpop.f32.mrf.mxu1 }
 0x46b   : > { %21147 = vst [vmem:[#allocation32_spill] sm:$0xff] %v19480_v12  ;;  %v19482_v29 = vpop.f32.mrf.mxu0  ;;  %v10469_v24 = vadd.f32 %v12906_v63, %v10372_v49 }
 0x46c   : > { %v19486_v35 = vpop.f32.mrf.mxu1 }
 0x46d   : > { %v19484_v9 = vpop.f32.mrf.mxu0  ;;  %21149 = vst [vmem:[#allocation25_spill] sm:$0xff] %v19486_v35  ;;  %v12830_v35 = vadd.f32 %v12829_v62, %v19414_v31 }
 0x46e   : > { %21148 = vst [vmem:[#allocation22_spill] sm:$0xff] %v19484_v9  ;;  %v19490_v56 = vpop.f32.mrf.mxu1  ;;  %v10353_v9 = vadd.f32 %v12827_v23, %v19371_v43 }
 0x46f   : > { %v19488_v28 = vpop.f32.mrf.mxu0  ;;  %21151 = vst [vmem:[#allocation72_spill] sm:$0xff] %v19490_v56  ;;  %v12824_v56 = vadd.f32 %v19407_v48, %v19403_v19  ;;  %v10356_v58 = vadd.f32 %v12830_v35, %v19374_v45 }
 0x470   : > { %21150 = vst [vmem:[#allocation58_spill] sm:$0xff] %v19488_v28  ;;  %v19495_v34 = vpop.f32.mrf.mxu1  ;;  %v10345_v28 = vadd.f32 %v12821_v18, %v19363_v53  ;;  %v10450_v26 = vadd.f32 %v12891_v37, %v10353_v9 }
 0x471   : > { %v10348_v31 = vadd.f32 %v12824_v56, %v19367_v33  ;;  %v10453_v18 = vadd.f32 %v12894_v25, %v10356_v58  ;;  %v10361_v25 = vadd.f32 %v12833_v27, %v19377_v0  ;;  %v12845_v0 = vadd.f32 %v19448_v30, %v19446_v55  ;;  %v21152_v30 = vld [vmem:[#allocation31_spill] sm:$0xff] }
 0x472   : > { %v10442_v43 = vadd.f32 %v12885_v41, %v10345_v28  ;;  %v12897_v28 = vadd.f32 %v19458_v40, %v19454_v4  ;;  %v12909_v58 = vadd.f32 %v19482_v29, %v19478_v42 }
 0x473   : > { %v12913_v7 = vpop.f32.mrf.mxu0  ;;  %v10445_v5 = vadd.f32 %v12888_v22, %v10348_v31  ;;  %v21155_v31 = vld [vmem:[#allocation17_spill] sm:$0xff] }
 0x474   : > { %v10458_v4 = vadd.f32 %v12897_v28, %v10361_v25  ;;  %v21166_v25 = vld [vmem:[#allocation41_spill] sm:$0xff] }
 0x475   : > { %v12914_v38 = vpop.f32.mrf.mxu0 }
 0x477   : > { %v19497_v12 = vpop.f32.mrf.mxu0 }
 0x479   : > { %v19504_v16 = vpop.f32.mrf.mxu0 }
 0x47a   : > { %v12918_v44 = vadd.f32 %v19504_v16, %v19497_v12 }
 0x47b   : > { %v13061_v3 = vpop.f32.mrf.mxu1 }
 0x47c   : > { %v10547_v8 = vadd.f32 %v13061_v3, %v10450_v26  ;;  %v12839_v3 = vadd.f32 %v19440_v15, %v19438_v32  ;;  %v12836_v15 = vadd.f32 %v19434_v17, %v19430_v36  ;;  %v12915_v17 = vadd.f32 %v12914_v38, %v12913_v7 }
 0x47d   : > { %v10538_v23 = vpop.f32.mrf.mxu1  ;;  %v12799_v38 = vadd.f32 %v19428_v61, %v19424_v54  ;;  %v10377_v7 = vadd.f32 %v12845_v0, %v21152_v30  ;;  %v21158_v54 = vld [vmem:[#allocation32_spill] sm:$0xff]  ;;  %v21159_v61 = vld [vmem:[#allocation25_spill] sm:$0xff] }
 0x47e   : > { %v10603_v62 = vmax.f32 %v10547_v8, 0.0  ;;  %v10539_v53 = vadd.f32 %v10538_v23, %v10442_v43  ;;  %v10369_v41 = vadd.f32 %v12839_v3, %v19383_v46  ;;  %v10364_v26 = vadd.f32 %v12836_v15, %v19380_v47  ;;  %v21153_v8 = vld [vmem:[#allocation70_spill] sm:$0xff]  ;;  %v21165_v15 = vld [vmem:[#allocation39_spill] sm:$0xff]  ;;  %v21168_v0 = vld [vmem:[#allocation72_spill] sm:$0xff] }
 0x47f   : > { %v13062_v19 = vpop.f32.mrf.mxu1  ;;  %v12848_v43 = vadd.f32 %v21154_v6, %v21153_v8  ;;  %v10482_v42 = vadd.f32 %v12915_v17, %v10385_v60  ;;  %v21161_v3 = vld [vmem:[#allocation58_spill] sm:$0xff]  ;;  %v12857_v63 = vadd.f32 %v21166_v25, %v21165_v15 }
 0x480   : > { %v19508_v48 = vpop.f32.mrf.mxu0  ;;  %10619 = vst [vmem:[%s19289_s11 + $0x90] sm:$0xff] %v10603_v62  ;;  %v10601_v37 = vmax.f32 %v10539_v53, 0.0  ;;  %v10550_v9 = vadd.f32 %v13062_v19, %v10453_v18  ;;  %v10466_v39 = vadd.f32 %v12903_v14, %v10369_v41  ;;  %v10461_v55 = vadd.f32 %v12900_v21, %v10364_v26  ;;  %v21156_v62 = vld [vmem:[#allocation66_spill] sm:$0xff]  ;;  %v21157_v18 = vld [vmem:[#allocation16_spill] sm:$0xff]  ;;  %v21162_v14 = vld [vmem:[#allocation69_spill] sm:$0xff] }
 0x481   : > { %v10541_v45 = vpop.f32.mrf.mxu1  ;;  %v10207_v53 = vadd.f32 %v21156_v62, %v21155_v31  ;;  %v10388_v19 = vadd.f32 %v12854_v50, %v21157_v18  ;;  %v10380_v28 = vadd.f32 %v12848_v43, %v21164_v2 }
 0x482   : > { %v19511_v35 = vpop.f32.mrf.mxu0  ;;  %10617 = vst [vmem:[%s19289_s11 + $0x80] sm:$0xff] %v10601_v37  ;;  %v10604_v33 = vmax.f32 %v10550_v9, 0.0  ;;  %v10542_v56 = vadd.f32 %v10541_v45, %v10445_v5  ;;  %v12863_v37 = vadd.f32 %v21159_v61, %v21158_v54  ;;  %v21160_v45 = vld [vmem:[#allocation22_spill] sm:$0xff] }
 0x483   : > { %v10304_v27 = vadd.f32 %v12799_v38, %v10207_v53  ;;  %v10485_v21 = vadd.f32 %v12918_v44, %v10388_v19 }
 0x484   : > { %v19516_v11 = vpop.f32.mrf.mxu0  ;;  %10620 = vst [vmem:[%s19289_s11 + $0x98] sm:$0xff] %v10604_v33  ;;  %v10602_v51 = vmax.f32 %v10542_v56, 0.0  ;;  %v12912_v33 = vadd.f32 %v21161_v3, %v21160_v45  ;;  %v10474_v56 = vadd.f32 %v12909_v58, %v10377_v7  ;;  %v21170_v58 = vld [vmem:[#allocation74_spill] sm:$0xff] }
 0x485   : > { %v10401_v26 = vadd.f32 %v12863_v37, %v10304_v27 }
 0x486   : > { %10618 = vst [vmem:[%s19289_s11 + $0x88] sm:$0xff] %v10602_v51  ;;  %v19527_v32 = vpop.f32.mrf.mxu0  ;;  %v21163_v51 = vld [vmem:[#allocation36_spill] sm:$0xff]  ;;  %v10477_v60 = vadd.f32 %v12912_v33, %v10380_v28 }
 0x487   : > { %v12802_v41 = vadd.f32 %v21163_v51, %v21162_v14  ;;  %v12924_v8 = vadd.f32 %v19527_v32, %v19516_v11 }
 0x48c   : > { %v13065_v46 = vpop.f32.mrf.mxu1  ;;  %v12925_v40 = vpop.f32.mrf.mxu0 }
 0x48d   : > { %v10563_v10 = vadd.f32 %v13065_v46, %v10466_v39 }
 0x48e   : > { %v10554_v36 = vpop.f32.mrf.mxu1  ;;  %v12926_v1 = vpop.f32.mrf.mxu0 }
 0x48f   : > { %v10607_v20 = vmax.f32 %v10563_v10, 0.0  ;;  %v10555_v57 = vadd.f32 %v10554_v36, %v10458_v4  ;;  %v12927_v13 = vadd.f32 %v12926_v1, %v12925_v40  ;;  %v21167_v10 = vld [vmem:[#allocation67_spill] sm:$0xff]  ;;  %v12866_v36 = vadd.f32 %v19495_v34, %v21168_v0 }
 0x490   : > { %v13066_v59 = vpop.f32.mrf.mxu1  ;;  %v12928_v5 = vpop.f32.mrf.mxu0  ;;  %v10210_v4 = vadd.f32 %v21167_v10, %v21155_v31 }
 0x491   : > { %10623 = vst [vmem:[%s19289_s11 + $0xb0] sm:$0xff] %v10607_v20  ;;  %v10605_v47 = vmax.f32 %v10555_v57, 0.0  ;;  %v10566_v22 = vadd.f32 %v13066_v59, %v10469_v24  ;;  %v12921_v57 = vadd.f32 %v19511_v35, %v19508_v48  ;;  %v21169_v59 = vld [vmem:[#allocation21_spill] sm:$0xff]  ;;  %v10498_v7 = vadd.f32 %v12927_v13, %v10401_v26 }
 0x492   : > { %v10557_v23 = vpop.f32.mrf.mxu1  ;;  %v12929_v17 = vpop.f32.mrf.mxu0  ;;  %v10307_v50 = vadd.f32 %v12802_v41, %v10210_v4  ;;  %v10393_v1 = vadd.f32 %v12857_v63, %v21169_v59 }
 0x493   : > { %10621 = vst [vmem:[%s19289_s11 + $0xa0] sm:$0xff] %v10605_v47  ;;  %v10608_v52 = vmax.f32 %v10566_v22, 0.0  ;;  %v10558_v29 = vadd.f32 %v10557_v23, %v10461_v55  ;;  %v21171_v47 = vld [vmem:[#allocation29_spill] sm:$0xff]  ;;  %v12930_v34 = vadd.f32 %v12929_v17, %v12928_v5 }
 0x494   : > { %v13069_v9 = vpop.f32.mrf.mxu1  ;;  %v12860_v22 = vadd.f32 %v21171_v47, %v21170_v58  ;;  %v10404_v48 = vadd.f32 %v12866_v36, %v10307_v50  ;;  %v10490_v23 = vadd.f32 %v12921_v57, %v10393_v1 }
 0x495   : > { %10624 = vst [vmem:[%s19289_s11 + $0xb8] sm:$0xff] %v10608_v52  ;;  %v10606_v12 = vmax.f32 %v10558_v29, 0.0  ;;  %v10579_v16 = vadd.f32 %v13069_v9, %v10482_v42  ;;  %v21172_v52 = vld [vmem:[#allocation68_spill] sm:$0xff] }
 0x496   : > { %v10570_v39 = vpop.f32.mrf.mxu1  ;;  %v10396_v29 = vadd.f32 %v12860_v22, %v21172_v52  ;;  %v10501_v62 = vadd.f32 %v12930_v34, %v10404_v48 }
 0x497   : > { %10622 = vst [vmem:[%s19289_s11 + $0xa8] sm:$0xff] %v10606_v12  ;;  %v10611_v46 = vmax.f32 %v10579_v16, 0.0  ;;  %v10571_v49 = vadd.f32 %v10570_v39, %v10474_v56 }
 0x498   : > { %v13070_v20 = vpop.f32.mrf.mxu1  ;;  %v10493_v54 = vadd.f32 %v12924_v8, %v10396_v29 }
 0x499   : > { %10627 = vst [vmem:[%s19289_s11 + $0xd0] sm:$0xff] %v10611_v46  ;;  %v10609_v24 = vmax.f32 %v10571_v49, 0.0  ;;  %v10582_v40 = vadd.f32 %v13070_v20, %v10485_v21 }
 0x49a   : > { %v10573_v55 = vpop.f32.mrf.mxu1 }
 0x49b   : > { %10625 = vst [vmem:[%s19289_s11 + $0xc0] sm:$0xff] %v10609_v24  ;;  %v10612_v38 = vmax.f32 %v10582_v40, 0.0  ;;  %v10574_v30 = vadd.f32 %v10573_v55, %v10477_v60 }
 0x49c   : > { %v13073_v35 = vpop.f32.mrf.mxu1 }
 0x49d   : > { %10628 = vst [vmem:[%s19289_s11 + $0xd8] sm:$0xff] %v10612_v38  ;;  %v10610_v6 = vmax.f32 %v10574_v30, 0.0  ;;  %v10595_v43 = vadd.f32 %v13073_v35, %v10498_v7 }
 0x49e   : > { %v10586_v44 = vpop.f32.mrf.mxu1 }
 0x49f   : > { %10626 = vst [vmem:[%s19289_s11 + $0xc8] sm:$0xff] %v10610_v6  ;;  %v10615_v42 = vmax.f32 %v10595_v43, 0.0  ;;  %v10587_v31 = vadd.f32 %v10586_v44, %v10490_v23 }
 0x4a0   : > { %v13074_v53 = vpop.f32.mrf.mxu1 }
 0x4a1   : > { %10631 = vst [vmem:[%s19289_s11 + $0xf0] sm:$0xff] %v10615_v42  ;;  %v10613_v18 = vmax.f32 %v10587_v31, 0.0  ;;  %v10598_v19 = vadd.f32 %v13074_v53, %v10501_v62 }
 0x4a2   : > { %v10589_v11 = vpop.f32.mrf.mxu1 }
 0x4a3   : > { %10629 = vst [vmem:[%s19289_s11 + $0xe0] sm:$0xff] %v10613_v18  ;;  %v10616_v32 = vmax.f32 %v10598_v19, 0.0  ;;  %v10590_v61 = vadd.f32 %v10589_v11, %v10493_v54 }
 0x4a5   : > { %10632 = vst [vmem:[%s19289_s11 + $0xf8] sm:$0xff] %v10616_v32  ;;  %v10614_v37 = vmax.f32 %v10590_v61, 0.0 }
 0x4a7   : > { %10630 = vst [vmem:[%s19289_s11 + $0xe8] sm:$0xff] %v10614_v37 }
 0x4a8 PF: > { %s13_s12 = sadd.s32 1, %s13485_s12  }
 0x4a9   : > { %p10_p4 = scmp.ge.s32.totalorder %s13_s12, 4  }
 0x4ab   :  { %12 = sbr.rel (!%p10_p4) target bundleno = 1 (0x1), region = 64 }

</bundles_post_ra>
